<compile_context>
chip_gen: v5e
topology: v5e:2x2
jax: 0.10.0
libtpu: 0.0.40
codegen_flags: <defaults>
</compile_context>

<pallas_src>
import functools

import jax
import jax.numpy as jnp
from jax.experimental import pallas as pl
from jax.experimental.pallas import tpu as pltpu

F32 = jnp.float32
BF16 = jnp.bfloat16


def _dot(a, b):
    return jnp.dot(a, b, preferred_element_type=jnp.float32)


def _round_up(x, m):
    return ((x + m - 1) // m) * m


def _softplus(x):
    # matches torch.nn.Softplus (beta=1, threshold=20)
    return jnp.where(x > 20.0, x, jnp.log1p(jnp.exp(jnp.minimum(x, 20.0))))


# ---------------------------------------------------------------------------
# Dense kernel 1: encoder fusion + LSTM input projection + hoisted V-projections
# (gridded over rows of the flattened (T*B, feat) slabs)
# ---------------------------------------------------------------------------
def encoder_kernel(x_ref, v_ref,
                   wxg, bxg, wev, bev, wmex, wmev, bme, wih, bih,
                   wdv, bdv, wpv, bpv,
                   xproj_ref, vpd_ref, vpp_ref):
    """mlp_x_gx + encoder_layerV + layer_mix_encoder + LSTM input projection,
    plus hoisted decoder_layerV / prior_layerV visual projections."""
    x = x_ref[...]                                              # bf16 (TM, x_dim)
    v = v_ref[...]                                              # bf16 (TM, 512)
    x_g = jnp.tanh(_dot(x, wxg[...]) + bxg[...])                # (TM, 256) f32
    v_g = _dot(v, wev[...]) + bev[...]                          # (TM, 256) f32 (no act.)
    # layer_mix_encoder(cat(x_g, v_g)) expressed as a split matmul (no concat)
    xv_g = jnp.tanh(_dot(x_g.astype(BF16), wmex[...]) +
                    _dot(v_g.astype(BF16), wmev[...]) + bme[...])
    # Pre-compute the LSTM input projection xv_g @ W_ih^T + b_ih
    xproj_ref[...] = (_dot(xv_g.astype(BF16), wih[...]) + bih[...]).astype(BF16)
    # Hoisted: decoder_layerV and prior_layerV (each used once downstream)
    vpd_ref[...] = jnp.tanh(_dot(v, wdv[...]) + bdv[...]).astype(BF16)
    vpp_ref[...] = jnp.tanh(_dot(v, wpv[...]) + bpv[...])


# ---------------------------------------------------------------------------
# Dense kernel 2 (fused): generation_z (gated prior) + generation_x (decoder)
# ---------------------------------------------------------------------------
def generate_kernel(z_ref, ztm1_ref, vpp_ref, vpd_ref, eps_ref,
                    # generation_z weights
                    wmpz, wmpv, bmp,
                    wgt1, bgt1, wgt2, bgt2,
                    wzp1, bzp1, wzp2, bzp2,
                    wpm, bpm, wpl, bpl,
                    # generation_x weights
                    w1, b1, w2, b2, w3, b3, w4, b4,
                    wmdz, wmdv, bmd, wgl, bgl,
                    y_ref, zp_ref, zmp_ref, zlvp_ref):
    # ---- generation_z: gated prior transition (time-parallel given z_{t-1})
    zv = jnp.tanh(_dot(ztm1_ref[...], wmpz[...]) +
                  _dot(vpp_ref[...], wmpv[...]) + bmp[...])
    gate = jax.nn.sigmoid(
        _dot(jnp.maximum(_dot(zv, wgt1[...]) + bgt1[...], 0.0), wgt2[...]) + bgt2[...])
    z_prop = _dot(jnp.maximum(_dot(zv, wzp1[...]) + bzp1[...], 0.0), wzp2[...]) + bzp2[...]
    z_mean_p = (1.0 - gate) * (_dot(zv, wpm[...]) + bpm[...]) + gate * z_prop
    # softplus can underflow -> log(-0) = -inf; clamp for numerical safety.
    z_var_p = jnp.maximum(
        _softplus(_dot(jnp.maximum(z_prop, 0.0), wpl[...]) + bpl[...]), 1e-20)
    z_logvar_p = jnp.log(z_var_p)
    zp_ref[...] = z_mean_p + eps_ref[...] * jnp.exp(0.5 * z_logvar_p)
    zmp_ref[...] = z_mean_p
    zlvp_ref[...] = z_logvar_p

    # ---- generation_x: decode sampled z (+ hoisted visual projection)
    h = jnp.tanh(_dot(z_ref[...].astype(BF16), w1[...]) + b1[...])
    h = jnp.tanh(_dot(h.astype(BF16), w2[...]) + b2[...])
    h = jnp.tanh(_dot(h.astype(BF16), w3[...]) + b3[...])
    h = jnp.tanh(_dot(h.astype(BF16), w4[...]) + b4[...])
    zvx = jnp.tanh(_dot(h.astype(BF16), wmdz[...]) +
                   _dot(vpd_ref[...], wmdv[...]) + bmd[...])
    y_ref[...] = jnp.exp(_dot(zvx.astype(BF16), wgl[...]) + bgl[...])


# ---------------------------------------------------------------------------
# Fused sequential kernel: backward LSTM + forward inference (z sampling) loop
# ---------------------------------------------------------------------------
def recurrence_kernel(xproj_ref, eps_ref, whh, bhh,
                      wz1, bz1, wz2, bz2, wz3, bz3,
                      wg1, bg1, wg2, bg2, wim, bim, wil, bil,
                      z_ref, ztm1_ref, zm_ref, zlv_ref, g_scr, *, unroll):
    """First loop: rnn_gx over the flipped sequence (t = T-1 .. 0), writing
    g[t] into VMEM scratch.  Second loop: the z_t sampling recurrence, which
    also emits the shifted z_{t-1} sequence used by generation_z."""
    T, B, _ = xproj_ref.shape
    H = whh.shape[0]
    Z = eps_ref.shape[-1]

    def lstm_step(s, carry):
        h, c = carry
        t = T - 1 - s                       # process the flipped sequence
        gates = xproj_ref[t].astype(F32) + _dot(h, whh[...]) + bhh[...]   # (B, 4H)
        i = jax.nn.sigmoid(gates[:, 0 * H:1 * H])
        f = jax.nn.sigmoid(gates[:, 1 * H:2 * H])
        g = jnp.tanh(gates[:, 2 * H:3 * H])
        o = jax.nn.sigmoid(gates[:, 3 * H:4 * H])
        c_new = f * c + i * g
        h_new = o * jnp.tanh(c_new)
        g_scr[t] = h_new                    # g = flip(rnn_gx(flip(xv_g)))
        return (h_new, c_new)

    zero_h = jnp.zeros((B, H), F32)
    jax.lax.fori_loop(0, T, lstm_step, (zero_h, zero_h), unroll=unroll)

    def inf_step(t, z_t):
        ztm1_ref[t] = z_t                   # z_{t-1} (zeros at t=0)
        # mlp_ztm1_g
        h1 = jnp.tanh(_dot(z_t, wz1[...]) + bz1[...])
        h1 = jnp.tanh(_dot(h1, wz2[...]) + bz2[...])
        h1 = jnp.tanh(_dot(h1, wz3[...]) + bz3[...])
        g_t = (h1 + g_scr[t]) * 0.5
        # mlp_g_z
        gz = jnp.tanh(_dot(g_t, wg1[...]) + bg1[...])
        gz = jnp.tanh(_dot(gz, wg2[...]) + bg2[...])
        z_mean = _dot(gz, wim[...]) + bim[...]
        z_logvar = _dot(gz, wil[...]) + bil[...]
        z_new = z_mean + eps_ref[t] * jnp.exp(0.5 * z_logvar)
        zm_ref[t] = z_mean
        zlv_ref[t] = z_logvar
        z_ref[t] = z_new
        return z_new

    jax.lax.fori_loop(0, T, inf_step, jnp.zeros((B, Z), F32), unroll=unroll)


# ---------------------------------------------------------------------------
# Parameters (deterministic synthetic init; transposed-Linear convention W:(in,out))
# ---------------------------------------------------------------------------
def init_params(key, x_dim=64, z_dim=16):
    keys = jax.random.split(key, 64)
    it = iter(keys)

    def lin(din, dout):
        k1, k2 = next(it), next(it)
        w = jax.random.normal(k1, (din, dout), F32) * (1.0 / jnp.sqrt(din))
        b = jax.random.normal(k2, (1, dout), F32) * 0.01
        return w, b

    p = {}
    # encoder side
    p['W_xg'], p['b_xg'] = lin(x_dim, 256)
    p['W_ev'], p['b_ev'] = lin(512, 256)
    Wme, p['b_me'] = lin(512, 256)
    p['W_me_x'], p['W_me_v'] = Wme[:256], Wme[256:]
    p['W_ih'], p['b_ih'] = lin(256, 512)              # LSTM input->4H
    p['W_hh'], p['b_hh'] = lin(128, 512)              # LSTM hidden->4H
    # inference loop
    p['W_z1'], p['b_z1'] = lin(16, 32)
    p['W_z2'], p['b_z2'] = lin(32, 64)
    p['W_z3'], p['b_z3'] = lin(64, 128)
    p['W_g1'], p['b_g1'] = lin(128, 64)
    p['W_g2'], p['b_g2'] = lin(64, 32)
    p['W_im'], p['b_im'] = lin(32, z_dim)
    p['W_il'], p['b_il'] = lin(32, z_dim)
    # generation_z
    p['W_pv'], p['b_pv'] = lin(512, z_dim)
    Wmp, p['b_mp'] = lin(2 * z_dim, z_dim)
    p['W_mp_z'], p['W_mp_v'] = Wmp[:z_dim], Wmp[z_dim:]
    p['W_gt1'], p['b_gt1'] = lin(z_dim, z_dim)
    p['W_gt2'], p['b_gt2'] = lin(z_dim, z_dim)
    p['W_zp1'], p['b_zp1'] = lin(z_dim, z_dim)
    p['W_zp2'], p['b_zp2'] = lin(z_dim, z_dim)
    p['W_pm'], p['b_pm'] = lin(z_dim, z_dim)
    p['W_pl'], p['b_pl'] = lin(z_dim, z_dim)
    # generation_x
    p['W_dv'], p['b_dv'] = lin(512, 256)
    p['W_zx1'], p['b_zx1'] = lin(z_dim, 32)
    p['W_zx2'], p['b_zx2'] = lin(32, 64)
    p['W_zx3'], p['b_zx3'] = lin(64, 128)
    p['W_zx4'], p['b_zx4'] = lin(128, 256)
    Wmd, p['b_md'] = lin(512, 256)
    p['W_md_z'], p['W_md_v'] = Wmd[:256], Wmd[256:]
    p['W_gl'], p['b_gl'] = lin(256, x_dim)
    return p


# ---------------------------------------------------------------------------
# Forward pass (jitted)
# ---------------------------------------------------------------------------
def _dkf_av_forward_impl(x, v, params, key):
    p = params
    B, x_dim, T = x.shape
    Z = p['W_im'].shape[1]
    H = p['W_hh'].shape[0]
    M = T * B

    # Row tiling of the flattened (T*B, feat) slabs.  TM is a multiple of 16
    # (bf16 sublane tile) and sized well under the scoped VMEM limit on all of
    # v5e / v6e / v7x with double buffering.
    TM = min(512, _round_up(M, 16))
    Mp = _round_up(M, TM)
    Ypad = _round_up(x_dim, 128)          # lane-dense decoder output

    # time-major, then flatten (T, B, F) -> (T*B, F); pad rows to Mp
    xt = jnp.transpose(x, (2, 0, 1)).astype(F32)        # (T, B, x_dim)
    vt = jnp.transpose(v, (2, 0, 1)).astype(F32)        # (T, B, 512)
    x2 = jnp.pad(xt.reshape(M, x_dim), ((0, Mp - M), (0, 0))).astype(BF16)
    v2 = jnp.pad(vt.reshape(M, 512), ((0, Mp - M), (0, 0))).astype(BF16)

    k1, k2 = jax.random.split(key)
    eps_inf = jax.random.normal(k1, (T, B, Z), F32)     # reparameterization noise
    eps_gen = jax.random.normal(k2, (Mp, Z), F32)

    bf = lambda w: w.astype(BF16)
    grid = (Mp // TM,)
    parallel = pltpu.CompilerParams(dimension_semantics=("parallel",))
    vmem = pl.BlockSpec(memory_space=pltpu.MemorySpace.VMEM)

    def rows(feat):
        return pl.BlockSpec((TM, feat), lambda i: (i, 0))

    def const(a):
        return pl.BlockSpec(a.shape, lambda i: (0, 0))

    # ---- 1) encoder fusion + LSTM input projection + hoisted visual projections
    enc_w = (bf(p['W_xg']), p['b_xg'], bf(p['W_ev']), p['b_ev'],
             bf(p['W_me_x']), bf(p['W_me_v']), p['b_me'], bf(p['W_ih']), p['b_ih'],
             bf(p['W_dv']), p['b_dv'], bf(p['W_pv']), p['b_pv'])
    xproj_p, vpd_p, vpp_p = pl.pallas_call(
        encoder_kernel,
        grid=grid,
        in_specs=[rows(x_dim), rows(512)] + [const(w) for w in enc_w],
        out_specs=[rows(4 * H), rows(256), rows(Z)],
        out_shape=[jax.ShapeDtypeStruct((Mp, 4 * H), BF16),
                   jax.ShapeDtypeStruct((Mp, 256), BF16),
                   jax.ShapeDtypeStruct((Mp, Z), F32)],
        compiler_params=parallel,
    )(x2, v2, *enc_w)

    xproj = xproj_p[:M].reshape(T, B, 4 * H)

    # ---- 2) fused backward LSTM + sequential inference loop (single kernel,
    #         in-kernel fori_loops, g resident in VMEM scratch, also emits the
    #         shifted z_{t-1} sequence needed by generation_z).
    # NOTE: xproj/eps/outputs are fully VMEM-resident; for very long sequences
    # this stage would need chunking (e.g. pltpu.emit_pipeline) — fine here.
    rec_w = (p['W_hh'], p['b_hh'],
             p['W_z1'], p['b_z1'], p['W_z2'], p['b_z2'], p['W_z3'], p['b_z3'],
             p['W_g1'], p['b_g1'], p['W_g2'], p['b_g2'],
             p['W_im'], p['b_im'], p['W_il'], p['b_il'])
    rec_kernel = functools.partial(recurrence_kernel, unroll=bool(T <= 16))
    z, z_tm1, z_mean, z_logvar = pl.pallas_call(
        rec_kernel,
        in_specs=[vmem] * (2 + len(rec_w)),
        out_specs=[vmem] * 4,
        out_shape=[jax.ShapeDtypeStruct((T, B, Z), F32)] * 4,
        scratch_shapes=[pltpu.VMEM((T, B, H), F32)],
    )(xproj, eps_inf, *rec_w)

    # ---- 3) fused generation_z (gated prior, time-parallel given z_{t-1}) +
    #         generation_x (decode the sampled z) in ONE gridded pass.
    # The reference also decodes z_p into y_zp, but y_zp only feeds the loss
    # (compute_loss=False here), so that dead decode is intentionally dropped.
    z_in = jnp.pad(z.reshape(M, Z), ((0, Mp - M), (0, 0)))
    z_tm1_in = jnp.pad(z_tm1.reshape(M, Z), ((0, Mp - M), (0, 0)))
    W_gl = jnp.pad(p['W_gl'], ((0, 0), (0, Ypad - x_dim)))
    b_gl = jnp.pad(p['b_gl'], ((0, 0), (0, Ypad - x_dim)))
    gen_w = (p['W_mp_z'], p['W_mp_v'], p['b_mp'],
             p['W_gt1'], p['b_gt1'], p['W_gt2'], p['b_gt2'],
             p['W_zp1'], p['b_zp1'], p['W_zp2'], p['b_zp2'],
             p['W_pm'], p['b_pm'], p['W_pl'], p['b_pl'],
             bf(p['W_zx1']), p['b_zx1'], bf(p['W_zx2']), p['b_zx2'],
             bf(p['W_zx3']), p['b_zx3'], bf(p['W_zx4']), p['b_zx4'],
             bf(p['W_md_z']), bf(p['W_md_v']), p['b_md'], bf(W_gl), b_gl)
    y_pad, z_p, z_mean_p, z_logvar_p = pl.pallas_call(
        generate_kernel,
        grid=grid,
        in_specs=[rows(Z), rows(Z), rows(Z), rows(256), rows(Z)]
                 + [const(w) for w in gen_w],
        out_specs=[rows(Ypad), rows(Z), rows(Z), rows(Z)],
        out_shape=[jax.ShapeDtypeStruct((Mp, Ypad), F32)]
                  + [jax.ShapeDtypeStruct((Mp, Z), F32)] * 3,
        compiler_params=parallel,
    )(z_in, z_tm1_in, vpp_p, vpd_p, eps_gen, *gen_w)

    y = y_pad[:M, :x_dim].reshape(T, B, x_dim)

    def to_btf(a):   # (T, B, F) -> (B, F, T), squeezed like the reference
        return jnp.squeeze(jnp.transpose(a, (1, 2, 0)))

    aux = {
        'z': to_btf(z),
        'z_mean': to_btf(z_mean),
        'z_logvar': to_btf(z_logvar),
        'z_p': to_btf(z_p[:M].reshape(T, B, Z)),
        'z_mean_p': to_btf(z_mean_p[:M].reshape(T, B, Z)),
        'z_logvar_p': to_btf(z_logvar_p[:M].reshape(T, B, Z)),
    }
    return to_btf(y), aux


dkf_av_forward = jax.jit(_dkf_av_forward_impl)


# ---------------------------------------------------------------------------
if __name__ == "__main__":
    key = jax.random.PRNGKey(0)
    kp, kx, kv, ke = jax.random.split(key, 4)

    B, X_DIM, T = 2, 64, 8
    params = init_params(kp, x_dim=X_DIM, z_dim=16)

    # x: (batch, x_dim, seq); v: (batch, 512, seq)  (PyTorch forward layout)
    x = jax.random.uniform(kx, (B, X_DIM, T), F32) + 0.1
    v = jax.random.normal(kv, (B, 512, T), F32) * 0.1

    y, aux = dkf_av_forward(x, v, params, ke)
    y = jax.block_until_ready(y)

    assert y.shape == (B, X_DIM, T), y.shape
    assert bool(jnp.all(jnp.isfinite(y)))
    for k_ in ('z', 'z_mean', 'z_logvar', 'z_p', 'z_mean_p', 'z_logvar_p'):
        assert bool(jnp.all(jnp.isfinite(aux[k_])))
    print("KERNEL_OK")
</pallas_src>

<mosaic_0001>
module attributes {stable_mosaic.version = 11 : i64} {
  func.func @encoder_kernel(%arg0: i32, %arg1: memref<16x64xbf16, #tpu.memory_space<vmem>>, %arg2: memref<16x512xbf16, #tpu.memory_space<vmem>>, %arg3: memref<64x256xbf16, #tpu.memory_space<vmem>>, %arg4: memref<1x256xf32, #tpu.memory_space<vmem>>, %arg5: memref<512x256xbf16, #tpu.memory_space<vmem>>, %arg6: memref<1x256xf32, #tpu.memory_space<vmem>>, %arg7: memref<256x256xbf16, #tpu.memory_space<vmem>>, %arg8: memref<256x256xbf16, #tpu.memory_space<vmem>>, %arg9: memref<1x256xf32, #tpu.memory_space<vmem>>, %arg10: memref<256x512xbf16, #tpu.memory_space<vmem>>, %arg11: memref<1x512xf32, #tpu.memory_space<vmem>>, %arg12: memref<512x256xbf16, #tpu.memory_space<vmem>>, %arg13: memref<1x256xf32, #tpu.memory_space<vmem>>, %arg14: memref<512x16xbf16, #tpu.memory_space<vmem>>, %arg15: memref<1x16xf32, #tpu.memory_space<vmem>>, %arg16: memref<16x512xbf16, #tpu.memory_space<vmem>>, %arg17: memref<16x256xbf16, #tpu.memory_space<vmem>>, %arg18: memref<16x16xf32, #tpu.memory_space<vmem>>) attributes {dimension_semantics = [#tpu.dimension_semantics<parallel>], iteration_bounds = array<i64: 1>, scalar_prefetch = 0 : i64, scratch_operands = 0 : i64, tpu.core_type = #tpu.core_type<tc>, window_params = [{transform_indices = @transform_0, window_bounds = array<i64: 16, 64>}, {transform_indices = @transform_1, window_bounds = array<i64: 16, 512>}, {pipeline_mode = #tpu.pipeline_mode<synchronous>, transform_indices = @transform_2, window_bounds = array<i64: 64, 256>}, {pipeline_mode = #tpu.pipeline_mode<synchronous>, transform_indices = @transform_3, window_bounds = array<i64: 1, 256>}, {pipeline_mode = #tpu.pipeline_mode<synchronous>, transform_indices = @transform_4, window_bounds = array<i64: 512, 256>}, {pipeline_mode = #tpu.pipeline_mode<synchronous>, transform_indices = @transform_5, window_bounds = array<i64: 1, 256>}, {pipeline_mode = #tpu.pipeline_mode<synchronous>, transform_indices = @transform_6, window_bounds = array<i64: 256, 256>}, {pipeline_mode = #tpu.pipeline_mode<synchronous>, transform_indices = @transform_7, window_bounds = array<i64: 256, 256>}, {pipeline_mode = #tpu.pipeline_mode<synchronous>, transform_indices = @transform_8, window_bounds = array<i64: 1, 256>}, {pipeline_mode = #tpu.pipeline_mode<synchronous>, transform_indices = @transform_9, window_bounds = array<i64: 256, 512>}, {pipeline_mode = #tpu.pipeline_mode<synchronous>, transform_indices = @transform_10, window_bounds = array<i64: 1, 512>}, {pipeline_mode = #tpu.pipeline_mode<synchronous>, transform_indices = @transform_11, window_bounds = array<i64: 512, 256>}, {pipeline_mode = #tpu.pipeline_mode<synchronous>, transform_indices = @transform_12, window_bounds = array<i64: 1, 256>}, {pipeline_mode = #tpu.pipeline_mode<synchronous>, transform_indices = @transform_13, window_bounds = array<i64: 512, 16>}, {pipeline_mode = #tpu.pipeline_mode<synchronous>, transform_indices = @transform_14, window_bounds = array<i64: 1, 16>}, {transform_indices = @transform_15, window_bounds = array<i64: 16, 512>}, {transform_indices = @transform_16, window_bounds = array<i64: 16, 256>}, {transform_indices = @transform_17, window_bounds = array<i64: 16, 16>}]} {
    %c0 = arith.constant 0 : index
    %c0_0 = arith.constant 0 : index
    %0 = vector.load %arg1[%c0, %c0_0] : memref<16x64xbf16, #tpu.memory_space<vmem>>, vector<16x64xbf16>
    %c0_1 = arith.constant 0 : index
    %c0_2 = arith.constant 0 : index
    %1 = vector.load %arg2[%c0_1, %c0_2] : memref<16x512xbf16, #tpu.memory_space<vmem>>, vector<16x512xbf16>
    %c0_3 = arith.constant 0 : index
    %c0_4 = arith.constant 0 : index
    %2 = vector.load %arg3[%c0_3, %c0_4] : memref<64x256xbf16, #tpu.memory_space<vmem>>, vector<64x256xbf16>
    %cst = arith.constant dense<0.000000e+00> : vector<16x256xf32>
    %3 = tpu.matmul %0, %2, %cst {dimension_numbers = #tpu.dot_dimension_numbers<[1], [0], [0], [1], [0, 0, 1, 1], [], []>} : vector<16x64xbf16>, vector<64x256xbf16>, vector<16x256xf32> -> vector<16x256xf32>
    %c0_5 = arith.constant 0 : index
    %c0_6 = arith.constant 0 : index
    %4 = vector.load %arg4[%c0_5, %c0_6] : memref<1x256xf32, #tpu.memory_space<vmem>>, vector<1x256xf32>
    %5 = vector.broadcast %4 : vector<1x256xf32> to vector<16x256xf32>
    %6 = arith.addf %3, %5 : vector<16x256xf32>
    %7 = math.tanh %6 : vector<16x256xf32>
    %c0_7 = arith.constant 0 : index
    %c0_8 = arith.constant 0 : index
    %8 = vector.load %arg5[%c0_7, %c0_8] : memref<512x256xbf16, #tpu.memory_space<vmem>>, vector<512x256xbf16>
    %cst_9 = arith.constant dense<0.000000e+00> : vector<16x256xf32>
    %9 = tpu.matmul %1, %8, %cst_9 {dimension_numbers = #tpu.dot_dimension_numbers<[1], [0], [0], [1], [0, 0, 1, 1], [], []>} : vector<16x512xbf16>, vector<512x256xbf16>, vector<16x256xf32> -> vector<16x256xf32>
    %c0_10 = arith.constant 0 : index
    %c0_11 = arith.constant 0 : index
    %10 = vector.load %arg6[%c0_10, %c0_11] : memref<1x256xf32, #tpu.memory_space<vmem>>, vector<1x256xf32>
    %11 = vector.broadcast %10 : vector<1x256xf32> to vector<16x256xf32>
    %12 = arith.addf %9, %11 : vector<16x256xf32>
    %13 = arith.truncf %7 : vector<16x256xf32> to vector<16x256xbf16>
    %c0_12 = arith.constant 0 : index
    %c0_13 = arith.constant 0 : index
    %14 = vector.load %arg7[%c0_12, %c0_13] : memref<256x256xbf16, #tpu.memory_space<vmem>>, vector<256x256xbf16>
    %cst_14 = arith.constant dense<0.000000e+00> : vector<16x256xf32>
    %15 = tpu.matmul %13, %14, %cst_14 {dimension_numbers = #tpu.dot_dimension_numbers<[1], [0], [0], [1], [0, 0, 1, 1], [], []>} : vector<16x256xbf16>, vector<256x256xbf16>, vector<16x256xf32> -> vector<16x256xf32>
    %16 = arith.truncf %12 : vector<16x256xf32> to vector<16x256xbf16>
    %c0_15 = arith.constant 0 : index
    %c0_16 = arith.constant 0 : index
    %17 = vector.load %arg8[%c0_15, %c0_16] : memref<256x256xbf16, #tpu.memory_space<vmem>>, vector<256x256xbf16>
    %cst_17 = arith.constant dense<0.000000e+00> : vector<16x256xf32>
    %18 = tpu.matmul %16, %17, %cst_17 {dimension_numbers = #tpu.dot_dimension_numbers<[1], [0], [0], [1], [0, 0, 1, 1], [], []>} : vector<16x256xbf16>, vector<256x256xbf16>, vector<16x256xf32> -> vector<16x256xf32>
    %19 = arith.addf %15, %18 : vector<16x256xf32>
    %c0_18 = arith.constant 0 : index
    %c0_19 = arith.constant 0 : index
    %20 = vector.load %arg9[%c0_18, %c0_19] : memref<1x256xf32, #tpu.memory_space<vmem>>, vector<1x256xf32>
    %21 = vector.broadcast %20 : vector<1x256xf32> to vector<16x256xf32>
    %22 = arith.addf %19, %21 : vector<16x256xf32>
    %23 = math.tanh %22 : vector<16x256xf32>
    %24 = arith.truncf %23 : vector<16x256xf32> to vector<16x256xbf16>
    %c0_20 = arith.constant 0 : index
    %c0_21 = arith.constant 0 : index
    %25 = vector.load %arg10[%c0_20, %c0_21] : memref<256x512xbf16, #tpu.memory_space<vmem>>, vector<256x512xbf16>
    %cst_22 = arith.constant dense<0.000000e+00> : vector<16x512xf32>
    %26 = tpu.matmul %24, %25, %cst_22 {dimension_numbers = #tpu.dot_dimension_numbers<[1], [0], [0], [1], [0, 0, 1, 1], [], []>} : vector<16x256xbf16>, vector<256x512xbf16>, vector<16x512xf32> -> vector<16x512xf32>
    %c0_23 = arith.constant 0 : index
    %c0_24 = arith.constant 0 : index
    %27 = vector.load %arg11[%c0_23, %c0_24] : memref<1x512xf32, #tpu.memory_space<vmem>>, vector<1x512xf32>
    %28 = vector.broadcast %27 : vector<1x512xf32> to vector<16x512xf32>
    %29 = arith.addf %26, %28 : vector<16x512xf32>
    %30 = arith.truncf %29 : vector<16x512xf32> to vector<16x512xbf16>
    %c0_25 = arith.constant 0 : index
    %c0_26 = arith.constant 0 : index
    %31 = vector.load %arg16[%c0_25, %c0_26] : memref<16x512xbf16, #tpu.memory_space<vmem>>, vector<16x512xbf16>
    tpu.vector_store %arg16[%c0_25, %c0_26], %30 {strides = array<i32>} : memref<16x512xbf16, #tpu.memory_space<vmem>>, vector<16x512xbf16>,
    %c0_27 = arith.constant 0 : index
    %c0_28 = arith.constant 0 : index
    %32 = vector.load %arg12[%c0_27, %c0_28] : memref<512x256xbf16, #tpu.memory_space<vmem>>, vector<512x256xbf16>
    %cst_29 = arith.constant dense<0.000000e+00> : vector<16x256xf32>
    %33 = tpu.matmul %1, %32, %cst_29 {dimension_numbers = #tpu.dot_dimension_numbers<[1], [0], [0], [1], [0, 0, 1, 1], [], []>} : vector<16x512xbf16>, vector<512x256xbf16>, vector<16x256xf32> -> vector<16x256xf32>
    %c0_30 = arith.constant 0 : index
    %c0_31 = arith.constant 0 : index
    %34 = vector.load %arg13[%c0_30, %c0_31] : memref<1x256xf32, #tpu.memory_space<vmem>>, vector<1x256xf32>
    %35 = vector.broadcast %34 : vector<1x256xf32> to vector<16x256xf32>
    %36 = arith.addf %33, %35 : vector<16x256xf32>
    %37 = math.tanh %36 : vector<16x256xf32>
    %38 = arith.truncf %37 : vector<16x256xf32> to vector<16x256xbf16>
    %c0_32 = arith.constant 0 : index
    %c0_33 = arith.constant 0 : index
    %39 = vector.load %arg17[%c0_32, %c0_33] : memref<16x256xbf16, #tpu.memory_space<vmem>>, vector<16x256xbf16>
    tpu.vector_store %arg17[%c0_32, %c0_33], %38 {strides = array<i32>} : memref<16x256xbf16, #tpu.memory_space<vmem>>, vector<16x256xbf16>,
    %c0_34 = arith.constant 0 : index
    %c0_35 = arith.constant 0 : index
    %40 = vector.load %arg14[%c0_34, %c0_35] : memref<512x16xbf16, #tpu.memory_space<vmem>>, vector<512x16xbf16>
    %cst_36 = arith.constant dense<0.000000e+00> : vector<16x16xf32>
    %41 = tpu.matmul %1, %40, %cst_36 {dimension_numbers = #tpu.dot_dimension_numbers<[1], [0], [0], [1], [0, 0, 1, 1], [], []>} : vector<16x512xbf16>, vector<512x16xbf16>, vector<16x16xf32> -> vector<16x16xf32>
    %c0_37 = arith.constant 0 : index
    %c0_38 = arith.constant 0 : index
    %42 = vector.load %arg15[%c0_37, %c0_38] : memref<1x16xf32, #tpu.memory_space<vmem>>, vector<1x16xf32>
    %43 = vector.broadcast %42 : vector<1x16xf32> to vector<16x16xf32>
    %44 = arith.addf %41, %43 : vector<16x16xf32>
    %45 = math.tanh %44 : vector<16x16xf32>
    %c0_39 = arith.constant 0 : index
    %c0_40 = arith.constant 0 : index
    %46 = vector.load %arg18[%c0_39, %c0_40] : memref<16x16xf32, #tpu.memory_space<vmem>>, vector<16x16xf32>
    tpu.vector_store %arg18[%c0_39, %c0_40], %45 {strides = array<i32>} : memref<16x16xf32, #tpu.memory_space<vmem>>, vector<16x16xf32>,
    return
  }
  func.func @transform_0(%arg0: i32) -> (i32, i32) {
    %c0_i32 = arith.constant 0 : i32
    %c0_i32_0 = arith.constant 0 : i32
    return %arg0, %c0_i32 : i32, i32
  }
  func.func @transform_1(%arg0: i32) -> (i32, i32) {
    %c0_i32 = arith.constant 0 : i32
    %c0_i32_0 = arith.constant 0 : i32
    return %arg0, %c0_i32 : i32, i32
  }
  func.func @transform_2(%arg0: i32) -> (i32, i32) {
    %c0_i32 = arith.constant 0 : i32
    %c0_i32_0 = arith.constant 0 : i32
    %c0_i32_1 = arith.constant 0 : i32
    return %c0_i32, %c0_i32_0 : i32, i32
  }
  func.func @transform_3(%arg0: i32) -> (i32, i32) {
    %c0_i32 = arith.constant 0 : i32
    %c0_i32_0 = arith.constant 0 : i32
    %c0_i32_1 = arith.constant 0 : i32
    return %c0_i32, %c0_i32_0 : i32, i32
  }
  func.func @transform_4(%arg0: i32) -> (i32, i32) {
    %c0_i32 = arith.constant 0 : i32
    %c0_i32_0 = arith.constant 0 : i32
    %c0_i32_1 = arith.constant 0 : i32
    return %c0_i32, %c0_i32_0 : i32, i32
  }
  func.func @transform_5(%arg0: i32) -> (i32, i32) {
    %c0_i32 = arith.constant 0 : i32
    %c0_i32_0 = arith.constant 0 : i32
    %c0_i32_1 = arith.constant 0 : i32
    return %c0_i32, %c0_i32_0 : i32, i32
  }
  func.func @transform_6(%arg0: i32) -> (i32, i32) {
    %c0_i32 = arith.constant 0 : i32
    %c0_i32_0 = arith.constant 0 : i32
    %c0_i32_1 = arith.constant 0 : i32
    return %c0_i32, %c0_i32_0 : i32, i32
  }
  func.func @transform_7(%arg0: i32) -> (i32, i32) {
    %c0_i32 = arith.constant 0 : i32
    %c0_i32_0 = arith.constant 0 : i32
    %c0_i32_1 = arith.constant 0 : i32
    return %c0_i32, %c0_i32_0 : i32, i32
  }
  func.func @transform_8(%arg0: i32) -> (i32, i32) {
    %c0_i32 = arith.constant 0 : i32
    %c0_i32_0 = arith.constant 0 : i32
    %c0_i32_1 = arith.constant 0 : i32
    return %c0_i32, %c0_i32_0 : i32, i32
  }
  func.func @transform_9(%arg0: i32) -> (i32, i32) {
    %c0_i32 = arith.constant 0 : i32
    %c0_i32_0 = arith.constant 0 : i32
    %c0_i32_1 = arith.constant 0 : i32
    return %c0_i32, %c0_i32_0 : i32, i32
  }
  func.func @transform_10(%arg0: i32) -> (i32, i32) {
    %c0_i32 = arith.constant 0 : i32
    %c0_i32_0 = arith.constant 0 : i32
    %c0_i32_1 = arith.constant 0 : i32
    return %c0_i32, %c0_i32_0 : i32, i32
  }
  func.func @transform_11(%arg0: i32) -> (i32, i32) {
    %c0_i32 = arith.constant 0 : i32
    %c0_i32_0 = arith.constant 0 : i32
    %c0_i32_1 = arith.constant 0 : i32
    return %c0_i32, %c0_i32_0 : i32, i32
  }
  func.func @transform_12(%arg0: i32) -> (i32, i32) {
    %c0_i32 = arith.constant 0 : i32
    %c0_i32_0 = arith.constant 0 : i32
    %c0_i32_1 = arith.constant 0 : i32
    return %c0_i32, %c0_i32_0 : i32, i32
  }
  func.func @transform_13(%arg0: i32) -> (i32, i32) {
    %c0_i32 = arith.constant 0 : i32
    %c0_i32_0 = arith.constant 0 : i32
    %c0_i32_1 = arith.constant 0 : i32
    return %c0_i32, %c0_i32_0 : i32, i32
  }
  func.func @transform_14(%arg0: i32) -> (i32, i32) {
    %c0_i32 = arith.constant 0 : i32
    %c0_i32_0 = arith.constant 0 : i32
    %c0_i32_1 = arith.constant 0 : i32
    return %c0_i32, %c0_i32_0 : i32, i32
  }
  func.func @transform_15(%arg0: i32) -> (i32, i32) {
    %c0_i32 = arith.constant 0 : i32
    %c0_i32_0 = arith.constant 0 : i32
    return %arg0, %c0_i32 : i32, i32
  }
  func.func @transform_16(%arg0: i32) -> (i32, i32) {
    %c0_i32 = arith.constant 0 : i32
    %c0_i32_0 = arith.constant 0 : i32
    return %arg0, %c0_i32 : i32, i32
  }
  func.func @transform_17(%arg0: i32) -> (i32, i32) {
    %c0_i32 = arith.constant 0 : i32
    %c0_i32_0 = arith.constant 0 : i32
    return %arg0, %c0_i32 : i32, i32
  }
}

module attributes {stable_mosaic.version = 11 : i64} {
  func.func @recurrence_kernel(%arg0: memref<8x2x512xbf16, #tpu.memory_space<vmem>>, %arg1: memref<8x2x16xf32, #tpu.memory_space<vmem>>, %arg2: memref<128x512xf32, #tpu.memory_space<vmem>>, %arg3: memref<1x512xf32, #tpu.memory_space<vmem>>, %arg4: memref<16x32xf32, #tpu.memory_space<vmem>>, %arg5: memref<1x32xf32, #tpu.memory_space<vmem>>, %arg6: memref<32x64xf32, #tpu.memory_space<vmem>>, %arg7: memref<1x64xf32, #tpu.memory_space<vmem>>, %arg8: memref<64x128xf32, #tpu.memory_space<vmem>>, %arg9: memref<1x128xf32, #tpu.memory_space<vmem>>, %arg10: memref<128x64xf32, #tpu.memory_space<vmem>>, %arg11: memref<1x64xf32, #tpu.memory_space<vmem>>, %arg12: memref<64x32xf32, #tpu.memory_space<vmem>>, %arg13: memref<1x32xf32, #tpu.memory_space<vmem>>, %arg14: memref<32x16xf32, #tpu.memory_space<vmem>>, %arg15: memref<1x16xf32, #tpu.memory_space<vmem>>, %arg16: memref<32x16xf32, #tpu.memory_space<vmem>>, %arg17: memref<1x16xf32, #tpu.memory_space<vmem>>, %arg18: memref<8x2x16xf32, #tpu.memory_space<vmem>>, %arg19: memref<8x2x16xf32, #tpu.memory_space<vmem>>, %arg20: memref<8x2x16xf32, #tpu.memory_space<vmem>>, %arg21: memref<8x2x16xf32, #tpu.memory_space<vmem>>, %arg22: memref<8x2x128xf32, #tpu.memory_space<vmem>>) attributes {dimension_semantics = [], scalar_prefetch = 0 : i64, scratch_operands = 1 : i64, tpu.core_type = #tpu.core_type<tc>} {
    %cst = arith.constant 0.000000e+00 : f32
    %0 = vector.broadcast %cst : f32 to vector<2x128xf32>
    %c0_i32 = arith.constant 0 : i32
    %c7_i32 = arith.constant 7 : i32
    %1 = arith.subi %c7_i32, %c0_i32 : i32
    %2 = arith.index_cast %1 : i32 to index
    %c0 = arith.constant 0 : index
    %c0_0 = arith.constant 0 : index
    %3 = vector.load %arg0[%2, %c0, %c0_0] : memref<8x2x512xbf16, #tpu.memory_space<vmem>>, vector<1x2x512xbf16>
    %4 = vector.shape_cast %3 : vector<1x2x512xbf16> to vector<2x512xbf16>
    %5 = arith.extf %4 : vector<2x512xbf16> to vector<2x512xf32>
    %c0_1 = arith.constant 0 : index
    %c0_2 = arith.constant 0 : index
    %6 = vector.load %arg2[%c0_1, %c0_2] : memref<128x512xf32, #tpu.memory_space<vmem>>, vector<128x512xf32>
    %cst_3 = arith.constant dense<0.000000e+00> : vector<2x512xf32>
    %7 = tpu.matmul %0, %6, %cst_3 {dimension_numbers = #tpu.dot_dimension_numbers<[1], [0], [0], [1], [0, 0, 1, 1], [], []>} : vector<2x128xf32>, vector<128x512xf32>, vector<2x512xf32> -> vector<2x512xf32>
    %8 = arith.addf %5, %7 : vector<2x512xf32>
    %c0_4 = arith.constant 0 : index
    %c0_5 = arith.constant 0 : index
    %9 = vector.load %arg3[%c0_4, %c0_5] : memref<1x512xf32, #tpu.memory_space<vmem>>, vector<1x512xf32>
    %10 = vector.broadcast %9 : vector<1x512xf32> to vector<2x512xf32>
    %11 = arith.addf %8, %10 : vector<2x512xf32>
    %12 = vector.extract_strided_slice %11 {offsets = [0, 0], sizes = [2, 128], strides = [1, 1]} : vector<2x512xf32> to vector<2x128xf32>
    %13 = arith.negf %12 : vector<2x128xf32>
    %14 = math.exp %13 : vector<2x128xf32>
    %cst_6 = arith.constant 1.000000e+00 : f32
    %15 = vector.broadcast %cst_6 : f32 to vector<2x128xf32>
    %16 = arith.addf %15, %14 : vector<2x128xf32>
    %17 = arith.divf %15, %16 : vector<2x128xf32>
    %18 = vector.extract_strided_slice %11 {offsets = [0, 128], sizes = [2, 128], strides = [1, 1]} : vector<2x512xf32> to vector<2x128xf32>
    %19 = arith.negf %18 : vector<2x128xf32>
    %20 = math.exp %19 : vector<2x128xf32>
    %cst_7 = arith.constant 1.000000e+00 : f32
    %21 = vector.broadcast %cst_7 : f32 to vector<2x128xf32>
    %22 = arith.addf %21, %20 : vector<2x128xf32>
    %23 = arith.divf %21, %22 : vector<2x128xf32>
    %24 = vector.extract_strided_slice %11 {offsets = [0, 256], sizes = [2, 128], strides = [1, 1]} : vector<2x512xf32> to vector<2x128xf32>
    %25 = math.tanh %24 : vector<2x128xf32>
    %26 = vector.extract_strided_slice %11 {offsets = [0, 384], sizes = [2, 128], strides = [1, 1]} : vector<2x512xf32> to vector<2x128xf32>
    %27 = arith.negf %26 : vector<2x128xf32>
    %28 = math.exp %27 : vector<2x128xf32>
    %cst_8 = arith.constant 1.000000e+00 : f32
    %29 = vector.broadcast %cst_8 : f32 to vector<2x128xf32>
    %30 = arith.addf %29, %28 : vector<2x128xf32>
    %31 = arith.divf %29, %30 : vector<2x128xf32>
    %32 = arith.mulf %23, %0 : vector<2x128xf32>
    %33 = arith.mulf %17, %25 : vector<2x128xf32>
    %34 = arith.addf %32, %33 : vector<2x128xf32>
    %35 = math.tanh %34 : vector<2x128xf32>
    %36 = arith.mulf %31, %35 : vector<2x128xf32>
    %37 = arith.index_cast %1 : i32 to index
    %c0_9 = arith.constant 0 : index
    %c0_10 = arith.constant 0 : index
    %38 = vector.load %arg22[%37, %c0_9, %c0_10] : memref<8x2x128xf32, #tpu.memory_space<vmem>>, vector<1x2x128xf32>
    %39 = vector.shape_cast %38 : vector<1x2x128xf32> to vector<2x128xf32>
    %40 = vector.shape_cast %36 : vector<2x128xf32> to vector<1x2x128xf32>
    tpu.vector_store %arg22[%37, %c0_9, %c0_10], %40 {strides = array<i32>} : memref<8x2x128xf32, #tpu.memory_space<vmem>>, vector<1x2x128xf32>,
    %c1_i32 = arith.constant 1 : i32
    %c7_i32_11 = arith.constant 7 : i32
    %41 = arith.subi %c7_i32_11, %c1_i32 : i32
    %42 = arith.index_cast %41 : i32 to index
    %c0_12 = arith.constant 0 : index
    %c0_13 = arith.constant 0 : index
    %43 = vector.load %arg0[%42, %c0_12, %c0_13] : memref<8x2x512xbf16, #tpu.memory_space<vmem>>, vector<1x2x512xbf16>
    %44 = vector.shape_cast %43 : vector<1x2x512xbf16> to vector<2x512xbf16>
    %45 = arith.extf %44 : vector<2x512xbf16> to vector<2x512xf32>
    %c0_14 = arith.constant 0 : index
    %c0_15 = arith.constant 0 : index
    %46 = vector.load %arg2[%c0_14, %c0_15] : memref<128x512xf32, #tpu.memory_space<vmem>>, vector<128x512xf32>
    %cst_16 = arith.constant dense<0.000000e+00> : vector<2x512xf32>
    %47 = tpu.matmul %36, %46, %cst_16 {dimension_numbers = #tpu.dot_dimension_numbers<[1], [0], [0], [1], [0, 0, 1, 1], [], []>} : vector<2x128xf32>, vector<128x512xf32>, vector<2x512xf32> -> vector<2x512xf32>
    %48 = arith.addf %45, %47 : vector<2x512xf32>
    %c0_17 = arith.constant 0 : index
    %c0_18 = arith.constant 0 : index
    %49 = vector.load %arg3[%c0_17, %c0_18] : memref<1x512xf32, #tpu.memory_space<vmem>>, vector<1x512xf32>
    %50 = vector.broadcast %49 : vector<1x512xf32> to vector<2x512xf32>
    %51 = arith.addf %48, %50 : vector<2x512xf32>
    %52 = vector.extract_strided_slice %51 {offsets = [0, 0], sizes = [2, 128], strides = [1, 1]} : vector<2x512xf32> to vector<2x128xf32>
    %53 = arith.negf %52 : vector<2x128xf32>
    %54 = math.exp %53 : vector<2x128xf32>
    %cst_19 = arith.constant 1.000000e+00 : f32
    %55 = vector.broadcast %cst_19 : f32 to vector<2x128xf32>
    %56 = arith.addf %55, %54 : vector<2x128xf32>
    %57 = arith.divf %55, %56 : vector<2x128xf32>
    %58 = vector.extract_strided_slice %51 {offsets = [0, 128], sizes = [2, 128], strides = [1, 1]} : vector<2x512xf32> to vector<2x128xf32>
    %59 = arith.negf %58 : vector<2x128xf32>
    %60 = math.exp %59 : vector<2x128xf32>
    %cst_20 = arith.constant 1.000000e+00 : f32
    %61 = vector.broadcast %cst_20 : f32 to vector<2x128xf32>
    %62 = arith.addf %61, %60 : vector<2x128xf32>
    %63 = arith.divf %61, %62 : vector<2x128xf32>
    %64 = vector.extract_strided_slice %51 {offsets = [0, 256], sizes = [2, 128], strides = [1, 1]} : vector<2x512xf32> to vector<2x128xf32>
    %65 = math.tanh %64 : vector<2x128xf32>
    %66 = vector.extract_strided_slice %51 {offsets = [0, 384], sizes = [2, 128], strides = [1, 1]} : vector<2x512xf32> to vector<2x128xf32>
    %67 = arith.negf %66 : vector<2x128xf32>
    %68 = math.exp %67 : vector<2x128xf32>
    %cst_21 = arith.constant 1.000000e+00 : f32
    %69 = vector.broadcast %cst_21 : f32 to vector<2x128xf32>
    %70 = arith.addf %69, %68 : vector<2x128xf32>
    %71 = arith.divf %69, %70 : vector<2x128xf32>
    %72 = arith.mulf %63, %34 : vector<2x128xf32>
    %73 = arith.mulf %57, %65 : vector<2x128xf32>
    %74 = arith.addf %72, %73 : vector<2x128xf32>
    %75 = math.tanh %74 : vector<2x128xf32>
    %76 = arith.mulf %71, %75 : vector<2x128xf32>
    %77 = arith.index_cast %41 : i32 to index
    %c0_22 = arith.constant 0 : index
    %c0_23 = arith.constant 0 : index
    %78 = vector.load %arg22[%77, %c0_22, %c0_23] : memref<8x2x128xf32, #tpu.memory_space<vmem>>, vector<1x2x128xf32>
    %79 = vector.shape_cast %78 : vector<1x2x128xf32> to vector<2x128xf32>
    %80 = vector.shape_cast %76 : vector<2x128xf32> to vector<1x2x128xf32>
    tpu.vector_store %arg22[%77, %c0_22, %c0_23], %80 {strides = array<i32>} : memref<8x2x128xf32, #tpu.memory_space<vmem>>, vector<1x2x128xf32>,
    %c2_i32 = arith.constant 2 : i32
    %c7_i32_24 = arith.constant 7 : i32
    %81 = arith.subi %c7_i32_24, %c2_i32 : i32
    %82 = arith.index_cast %81 : i32 to index
    %c0_25 = arith.constant 0 : index
    %c0_26 = arith.constant 0 : index
    %83 = vector.load %arg0[%82, %c0_25, %c0_26] : memref<8x2x512xbf16, #tpu.memory_space<vmem>>, vector<1x2x512xbf16>
    %84 = vector.shape_cast %83 : vector<1x2x512xbf16> to vector<2x512xbf16>
    %85 = arith.extf %84 : vector<2x512xbf16> to vector<2x512xf32>
    %c0_27 = arith.constant 0 : index
    %c0_28 = arith.constant 0 : index
    %86 = vector.load %arg2[%c0_27, %c0_28] : memref<128x512xf32, #tpu.memory_space<vmem>>, vector<128x512xf32>
    %cst_29 = arith.constant dense<0.000000e+00> : vector<2x512xf32>
    %87 = tpu.matmul %76, %86, %cst_29 {dimension_numbers = #tpu.dot_dimension_numbers<[1], [0], [0], [1], [0, 0, 1, 1], [], []>} : vector<2x128xf32>, vector<128x512xf32>, vector<2x512xf32> -> vector<2x512xf32>
    %88 = arith.addf %85, %87 : vector<2x512xf32>
    %c0_30 = arith.constant 0 : index
    %c0_31 = arith.constant 0 : index
    %89 = vector.load %arg3[%c0_30, %c0_31] : memref<1x512xf32, #tpu.memory_space<vmem>>, vector<1x512xf32>
    %90 = vector.broadcast %89 : vector<1x512xf32> to vector<2x512xf32>
    %91 = arith.addf %88, %90 : vector<2x512xf32>
    %92 = vector.extract_strided_slice %91 {offsets = [0, 0], sizes = [2, 128], strides = [1, 1]} : vector<2x512xf32> to vector<2x128xf32>
    %93 = arith.negf %92 : vector<2x128xf32>
    %94 = math.exp %93 : vector<2x128xf32>
    %cst_32 = arith.constant 1.000000e+00 : f32
    %95 = vector.broadcast %cst_32 : f32 to vector<2x128xf32>
    %96 = arith.addf %95, %94 : vector<2x128xf32>
    %97 = arith.divf %95, %96 : vector<2x128xf32>
    %98 = vector.extract_strided_slice %91 {offsets = [0, 128], sizes = [2, 128], strides = [1, 1]} : vector<2x512xf32> to vector<2x128xf32>
    %99 = arith.negf %98 : vector<2x128xf32>
    %100 = math.exp %99 : vector<2x128xf32>
    %cst_33 = arith.constant 1.000000e+00 : f32
    %101 = vector.broadcast %cst_33 : f32 to vector<2x128xf32>
    %102 = arith.addf %101, %100 : vector<2x128xf32>
    %103 = arith.divf %101, %102 : vector<2x128xf32>
    %104 = vector.extract_strided_slice %91 {offsets = [0, 256], sizes = [2, 128], strides = [1, 1]} : vector<2x512xf32> to vector<2x128xf32>
    %105 = math.tanh %104 : vector<2x128xf32>
    %106 = vector.extract_strided_slice %91 {offsets = [0, 384], sizes = [2, 128], strides = [1, 1]} : vector<2x512xf32> to vector<2x128xf32>
    %107 = arith.negf %106 : vector<2x128xf32>
    %108 = math.exp %107 : vector<2x128xf32>
    %cst_34 = arith.constant 1.000000e+00 : f32
    %109 = vector.broadcast %cst_34 : f32 to vector<2x128xf32>
    %110 = arith.addf %109, %108 : vector<2x128xf32>
    %111 = arith.divf %109, %110 : vector<2x128xf32>
    %112 = arith.mulf %103, %74 : vector<2x128xf32>
    %113 = arith.mulf %97, %105 : vector<2x128xf32>
    %114 = arith.addf %112, %113 : vector<2x128xf32>
    %115 = math.tanh %114 : vector<2x128xf32>
    %116 = arith.mulf %111, %115 : vector<2x128xf32>
    %117 = arith.index_cast %81 : i32 to index
    %c0_35 = arith.constant 0 : index
    %c0_36 = arith.constant 0 : index
    %118 = vector.load %arg22[%117, %c0_35, %c0_36] : memref<8x2x128xf32, #tpu.memory_space<vmem>>, vector<1x2x128xf32>
    %119 = vector.shape_cast %118 : vector<1x2x128xf32> to vector<2x128xf32>
    %120 = vector.shape_cast %116 : vector<2x128xf32> to vector<1x2x128xf32>
    tpu.vector_store %arg22[%117, %c0_35, %c0_36], %120 {strides = array<i32>} : memref<8x2x128xf32, #tpu.memory_space<vmem>>, vector<1x2x128xf32>,
    %c3_i32 = arith.constant 3 : i32
    %c7_i32_37 = arith.constant 7 : i32
    %121 = arith.subi %c7_i32_37, %c3_i32 : i32
    %122 = arith.index_cast %121 : i32 to index
    %c0_38 = arith.constant 0 : index
    %c0_39 = arith.constant 0 : index
    %123 = vector.load %arg0[%122, %c0_38, %c0_39] : memref<8x2x512xbf16, #tpu.memory_space<vmem>>, vector<1x2x512xbf16>
    %124 = vector.shape_cast %123 : vector<1x2x512xbf16> to vector<2x512xbf16>
    %125 = arith.extf %124 : vector<2x512xbf16> to vector<2x512xf32>
    %c0_40 = arith.constant 0 : index
    %c0_41 = arith.constant 0 : index
    %126 = vector.load %arg2[%c0_40, %c0_41] : memref<128x512xf32, #tpu.memory_space<vmem>>, vector<128x512xf32>
    %cst_42 = arith.constant dense<0.000000e+00> : vector<2x512xf32>
    %127 = tpu.matmul %116, %126, %cst_42 {dimension_numbers = #tpu.dot_dimension_numbers<[1], [0], [0], [1], [0, 0, 1, 1], [], []>} : vector<2x128xf32>, vector<128x512xf32>, vector<2x512xf32> -> vector<2x512xf32>
    %128 = arith.addf %125, %127 : vector<2x512xf32>
    %c0_43 = arith.constant 0 : index
    %c0_44 = arith.constant 0 : index
    %129 = vector.load %arg3[%c0_43, %c0_44] : memref<1x512xf32, #tpu.memory_space<vmem>>, vector<1x512xf32>
    %130 = vector.broadcast %129 : vector<1x512xf32> to vector<2x512xf32>
    %131 = arith.addf %128, %130 : vector<2x512xf32>
    %132 = vector.extract_strided_slice %131 {offsets = [0, 0], sizes = [2, 128], strides = [1, 1]} : vector<2x512xf32> to vector<2x128xf32>
    %133 = arith.negf %132 : vector<2x128xf32>
    %134 = math.exp %133 : vector<2x128xf32>
    %cst_45 = arith.constant 1.000000e+00 : f32
    %135 = vector.broadcast %cst_45 : f32 to vector<2x128xf32>
    %136 = arith.addf %135, %134 : vector<2x128xf32>
    %137 = arith.divf %135, %136 : vector<2x128xf32>
    %138 = vector.extract_strided_slice %131 {offsets = [0, 128], sizes = [2, 128], strides = [1, 1]} : vector<2x512xf32> to vector<2x128xf32>
    %139 = arith.negf %138 : vector<2x128xf32>
    %140 = math.exp %139 : vector<2x128xf32>
    %cst_46 = arith.constant 1.000000e+00 : f32
    %141 = vector.broadcast %cst_46 : f32 to vector<2x128xf32>
    %142 = arith.addf %141, %140 : vector<2x128xf32>
    %143 = arith.divf %141, %142 : vector<2x128xf32>
    %144 = vector.extract_strided_slice %131 {offsets = [0, 256], sizes = [2, 128], strides = [1, 1]} : vector<2x512xf32> to vector<2x128xf32>
    %145 = math.tanh %144 : vector<2x128xf32>
    %146 = vector.extract_strided_slice %131 {offsets = [0, 384], sizes = [2, 128], strides = [1, 1]} : vector<2x512xf32> to vector<2x128xf32>
    %147 = arith.negf %146 : vector<2x128xf32>
    %148 = math.exp %147 : vector<2x128xf32>
    %cst_47 = arith.constant 1.000000e+00 : f32
    %149 = vector.broadcast %cst_47 : f32 to vector<2x128xf32>
    %150 = arith.addf %149, %148 : vector<2x128xf32>
    %151 = arith.divf %149, %150 : vector<2x128xf32>
    %152 = arith.mulf %143, %114 : vector<2x128xf32>
    %153 = arith.mulf %137, %145 : vector<2x128xf32>
    %154 = arith.addf %152, %153 : vector<2x128xf32>
    %155 = math.tanh %154 : vector<2x128xf32>
    %156 = arith.mulf %151, %155 : vector<2x128xf32>
    %157 = arith.index_cast %121 : i32 to index
    %c0_48 = arith.constant 0 : index
    %c0_49 = arith.constant 0 : index
    %158 = vector.load %arg22[%157, %c0_48, %c0_49] : memref<8x2x128xf32, #tpu.memory_space<vmem>>, vector<1x2x128xf32>
    %159 = vector.shape_cast %158 : vector<1x2x128xf32> to vector<2x128xf32>
    %160 = vector.shape_cast %156 : vector<2x128xf32> to vector<1x2x128xf32>
    tpu.vector_store %arg22[%157, %c0_48, %c0_49], %160 {strides = array<i32>} : memref<8x2x128xf32, #tpu.memory_space<vmem>>, vector<1x2x128xf32>,
    %c4_i32 = arith.constant 4 : i32
    %c7_i32_50 = arith.constant 7 : i32
    %161 = arith.subi %c7_i32_50, %c4_i32 : i32
    %162 = arith.index_cast %161 : i32 to index
    %c0_51 = arith.constant 0 : index
    %c0_52 = arith.constant 0 : index
    %163 = vector.load %arg0[%162, %c0_51, %c0_52] : memref<8x2x512xbf16, #tpu.memory_space<vmem>>, vector<1x2x512xbf16>
    %164 = vector.shape_cast %163 : vector<1x2x512xbf16> to vector<2x512xbf16>
    %165 = arith.extf %164 : vector<2x512xbf16> to vector<2x512xf32>
    %c0_53 = arith.constant 0 : index
    %c0_54 = arith.constant 0 : index
    %166 = vector.load %arg2[%c0_53, %c0_54] : memref<128x512xf32, #tpu.memory_space<vmem>>, vector<128x512xf32>
    %cst_55 = arith.constant dense<0.000000e+00> : vector<2x512xf32>
    %167 = tpu.matmul %156, %166, %cst_55 {dimension_numbers = #tpu.dot_dimension_numbers<[1], [0], [0], [1], [0, 0, 1, 1], [], []>} : vector<2x128xf32>, vector<128x512xf32>, vector<2x512xf32> -> vector<2x512xf32>
    %168 = arith.addf %165, %167 : vector<2x512xf32>
    %c0_56 = arith.constant 0 : index
    %c0_57 = arith.constant 0 : index
    %169 = vector.load %arg3[%c0_56, %c0_57] : memref<1x512xf32, #tpu.memory_space<vmem>>, vector<1x512xf32>
    %170 = vector.broadcast %169 : vector<1x512xf32> to vector<2x512xf32>
    %171 = arith.addf %168, %170 : vector<2x512xf32>
    %172 = vector.extract_strided_slice %171 {offsets = [0, 0], sizes = [2, 128], strides = [1, 1]} : vector<2x512xf32> to vector<2x128xf32>
    %173 = arith.negf %172 : vector<2x128xf32>
    %174 = math.exp %173 : vector<2x128xf32>
    %cst_58 = arith.constant 1.000000e+00 : f32
    %175 = vector.broadcast %cst_58 : f32 to vector<2x128xf32>
    %176 = arith.addf %175, %174 : vector<2x128xf32>
    %177 = arith.divf %175, %176 : vector<2x128xf32>
    %178 = vector.extract_strided_slice %171 {offsets = [0, 128], sizes = [2, 128], strides = [1, 1]} : vector<2x512xf32> to vector<2x128xf32>
    %179 = arith.negf %178 : vector<2x128xf32>
    %180 = math.exp %179 : vector<2x128xf32>
    %cst_59 = arith.constant 1.000000e+00 : f32
    %181 = vector.broadcast %cst_59 : f32 to vector<2x128xf32>
    %182 = arith.addf %181, %180 : vector<2x128xf32>
    %183 = arith.divf %181, %182 : vector<2x128xf32>
    %184 = vector.extract_strided_slice %171 {offsets = [0, 256], sizes = [2, 128], strides = [1, 1]} : vector<2x512xf32> to vector<2x128xf32>
    %185 = math.tanh %184 : vector<2x128xf32>
    %186 = vector.extract_strided_slice %171 {offsets = [0, 384], sizes = [2, 128], strides = [1, 1]} : vector<2x512xf32> to vector<2x128xf32>
    %187 = arith.negf %186 : vector<2x128xf32>
    %188 = math.exp %187 : vector<2x128xf32>
    %cst_60 = arith.constant 1.000000e+00 : f32
    %189 = vector.broadcast %cst_60 : f32 to vector<2x128xf32>
    %190 = arith.addf %189, %188 : vector<2x128xf32>
    %191 = arith.divf %189, %190 : vector<2x128xf32>
    %192 = arith.mulf %183, %154 : vector<2x128xf32>
    %193 = arith.mulf %177, %185 : vector<2x128xf32>
    %194 = arith.addf %192, %193 : vector<2x128xf32>
    %195 = math.tanh %194 : vector<2x128xf32>
    %196 = arith.mulf %191, %195 : vector<2x128xf32>
    %197 = arith.index_cast %161 : i32 to index
    %c0_61 = arith.constant 0 : index
    %c0_62 = arith.constant 0 : index
    %198 = vector.load %arg22[%197, %c0_61, %c0_62] : memref<8x2x128xf32, #tpu.memory_space<vmem>>, vector<1x2x128xf32>
    %199 = vector.shape_cast %198 : vector<1x2x128xf32> to vector<2x128xf32>
    %200 = vector.shape_cast %196 : vector<2x128xf32> to vector<1x2x128xf32>
    tpu.vector_store %arg22[%197, %c0_61, %c0_62], %200 {strides = array<i32>} : memref<8x2x128xf32, #tpu.memory_space<vmem>>, vector<1x2x128xf32>,
    %c5_i32 = arith.constant 5 : i32
    %c7_i32_63 = arith.constant 7 : i32
    %201 = arith.subi %c7_i32_63, %c5_i32 : i32
    %202 = arith.index_cast %201 : i32 to index
    %c0_64 = arith.constant 0 : index
    %c0_65 = arith.constant 0 : index
    %203 = vector.load %arg0[%202, %c0_64, %c0_65] : memref<8x2x512xbf16, #tpu.memory_space<vmem>>, vector<1x2x512xbf16>
    %204 = vector.shape_cast %203 : vector<1x2x512xbf16> to vector<2x512xbf16>
    %205 = arith.extf %204 : vector<2x512xbf16> to vector<2x512xf32>
    %c0_66 = arith.constant 0 : index
    %c0_67 = arith.constant 0 : index
    %206 = vector.load %arg2[%c0_66, %c0_67] : memref<128x512xf32, #tpu.memory_space<vmem>>, vector<128x512xf32>
    %cst_68 = arith.constant dense<0.000000e+00> : vector<2x512xf32>
    %207 = tpu.matmul %196, %206, %cst_68 {dimension_numbers = #tpu.dot_dimension_numbers<[1], [0], [0], [1], [0, 0, 1, 1], [], []>} : vector<2x128xf32>, vector<128x512xf32>, vector<2x512xf32> -> vector<2x512xf32>
    %208 = arith.addf %205, %207 : vector<2x512xf32>
    %c0_69 = arith.constant 0 : index
    %c0_70 = arith.constant 0 : index
    %209 = vector.load %arg3[%c0_69, %c0_70] : memref<1x512xf32, #tpu.memory_space<vmem>>, vector<1x512xf32>
    %210 = vector.broadcast %209 : vector<1x512xf32> to vector<2x512xf32>
    %211 = arith.addf %208, %210 : vector<2x512xf32>
    %212 = vector.extract_strided_slice %211 {offsets = [0, 0], sizes = [2, 128], strides = [1, 1]} : vector<2x512xf32> to vector<2x128xf32>
    %213 = arith.negf %212 : vector<2x128xf32>
    %214 = math.exp %213 : vector<2x128xf32>
    %cst_71 = arith.constant 1.000000e+00 : f32
    %215 = vector.broadcast %cst_71 : f32 to vector<2x128xf32>
    %216 = arith.addf %215, %214 : vector<2x128xf32>
    %217 = arith.divf %215, %216 : vector<2x128xf32>
    %218 = vector.extract_strided_slice %211 {offsets = [0, 128], sizes = [2, 128], strides = [1, 1]} : vector<2x512xf32> to vector<2x128xf32>
    %219 = arith.negf %218 : vector<2x128xf32>
    %220 = math.exp %219 : vector<2x128xf32>
    %cst_72 = arith.constant 1.000000e+00 : f32
    %221 = vector.broadcast %cst_72 : f32 to vector<2x128xf32>
    %222 = arith.addf %221, %220 : vector<2x128xf32>
    %223 = arith.divf %221, %222 : vector<2x128xf32>
    %224 = vector.extract_strided_slice %211 {offsets = [0, 256], sizes = [2, 128], strides = [1, 1]} : vector<2x512xf32> to vector<2x128xf32>
    %225 = math.tanh %224 : vector<2x128xf32>
    %226 = vector.extract_strided_slice %211 {offsets = [0, 384], sizes = [2, 128], strides = [1, 1]} : vector<2x512xf32> to vector<2x128xf32>
    %227 = arith.negf %226 : vector<2x128xf32>
    %228 = math.exp %227 : vector<2x128xf32>
    %cst_73 = arith.constant 1.000000e+00 : f32
    %229 = vector.broadcast %cst_73 : f32 to vector<2x128xf32>
    %230 = arith.addf %229, %228 : vector<2x128xf32>
    %231 = arith.divf %229, %230 : vector<2x128xf32>
    %232 = arith.mulf %223, %194 : vector<2x128xf32>
    %233 = arith.mulf %217, %225 : vector<2x128xf32>
    %234 = arith.addf %232, %233 : vector<2x128xf32>
    %235 = math.tanh %234 : vector<2x128xf32>
    %236 = arith.mulf %231, %235 : vector<2x128xf32>
    %237 = arith.index_cast %201 : i32 to index
    %c0_74 = arith.constant 0 : index
    %c0_75 = arith.constant 0 : index
    %238 = vector.load %arg22[%237, %c0_74, %c0_75] : memref<8x2x128xf32, #tpu.memory_space<vmem>>, vector<1x2x128xf32>
    %239 = vector.shape_cast %238 : vector<1x2x128xf32> to vector<2x128xf32>
    %240 = vector.shape_cast %236 : vector<2x128xf32> to vector<1x2x128xf32>
    tpu.vector_store %arg22[%237, %c0_74, %c0_75], %240 {strides = array<i32>} : memref<8x2x128xf32, #tpu.memory_space<vmem>>, vector<1x2x128xf32>,
    %c6_i32 = arith.constant 6 : i32
    %c7_i32_76 = arith.constant 7 : i32
    %241 = arith.subi %c7_i32_76, %c6_i32 : i32
    %242 = arith.index_cast %241 : i32 to index
    %c0_77 = arith.constant 0 : index
    %c0_78 = arith.constant 0 : index
    %243 = vector.load %arg0[%242, %c0_77, %c0_78] : memref<8x2x512xbf16, #tpu.memory_space<vmem>>, vector<1x2x512xbf16>
    %244 = vector.shape_cast %243 : vector<1x2x512xbf16> to vector<2x512xbf16>
    %245 = arith.extf %244 : vector<2x512xbf16> to vector<2x512xf32>
    %c0_79 = arith.constant 0 : index
    %c0_80 = arith.constant 0 : index
    %246 = vector.load %arg2[%c0_79, %c0_80] : memref<128x512xf32, #tpu.memory_space<vmem>>, vector<128x512xf32>
    %cst_81 = arith.constant dense<0.000000e+00> : vector<2x512xf32>
    %247 = tpu.matmul %236, %246, %cst_81 {dimension_numbers = #tpu.dot_dimension_numbers<[1], [0], [0], [1], [0, 0, 1, 1], [], []>} : vector<2x128xf32>, vector<128x512xf32>, vector<2x512xf32> -> vector<2x512xf32>
    %248 = arith.addf %245, %247 : vector<2x512xf32>
    %c0_82 = arith.constant 0 : index
    %c0_83 = arith.constant 0 : index
    %249 = vector.load %arg3[%c0_82, %c0_83] : memref<1x512xf32, #tpu.memory_space<vmem>>, vector<1x512xf32>
    %250 = vector.broadcast %249 : vector<1x512xf32> to vector<2x512xf32>
    %251 = arith.addf %248, %250 : vector<2x512xf32>
    %252 = vector.extract_strided_slice %251 {offsets = [0, 0], sizes = [2, 128], strides = [1, 1]} : vector<2x512xf32> to vector<2x128xf32>
    %253 = arith.negf %252 : vector<2x128xf32>
    %254 = math.exp %253 : vector<2x128xf32>
    %cst_84 = arith.constant 1.000000e+00 : f32
    %255 = vector.broadcast %cst_84 : f32 to vector<2x128xf32>
    %256 = arith.addf %255, %254 : vector<2x128xf32>
    %257 = arith.divf %255, %256 : vector<2x128xf32>
    %258 = vector.extract_strided_slice %251 {offsets = [0, 128], sizes = [2, 128], strides = [1, 1]} : vector<2x512xf32> to vector<2x128xf32>
    %259 = arith.negf %258 : vector<2x128xf32>
    %260 = math.exp %259 : vector<2x128xf32>
    %cst_85 = arith.constant 1.000000e+00 : f32
    %261 = vector.broadcast %cst_85 : f32 to vector<2x128xf32>
    %262 = arith.addf %261, %260 : vector<2x128xf32>
    %263 = arith.divf %261, %262 : vector<2x128xf32>
    %264 = vector.extract_strided_slice %251 {offsets = [0, 256], sizes = [2, 128], strides = [1, 1]} : vector<2x512xf32> to vector<2x128xf32>
    %265 = math.tanh %264 : vector<2x128xf32>
    %266 = vector.extract_strided_slice %251 {offsets = [0, 384], sizes = [2, 128], strides = [1, 1]} : vector<2x512xf32> to vector<2x128xf32>
    %267 = arith.negf %266 : vector<2x128xf32>
    %268 = math.exp %267 : vector<2x128xf32>
    %cst_86 = arith.constant 1.000000e+00 : f32
    %269 = vector.broadcast %cst_86 : f32 to vector<2x128xf32>
    %270 = arith.addf %269, %268 : vector<2x128xf32>
    %271 = arith.divf %269, %270 : vector<2x128xf32>
    %272 = arith.mulf %263, %234 : vector<2x128xf32>
    %273 = arith.mulf %257, %265 : vector<2x128xf32>
    %274 = arith.addf %272, %273 : vector<2x128xf32>
    %275 = math.tanh %274 : vector<2x128xf32>
    %276 = arith.mulf %271, %275 : vector<2x128xf32>
    %277 = arith.index_cast %241 : i32 to index
    %c0_87 = arith.constant 0 : index
    %c0_88 = arith.constant 0 : index
    %278 = vector.load %arg22[%277, %c0_87, %c0_88] : memref<8x2x128xf32, #tpu.memory_space<vmem>>, vector<1x2x128xf32>
    %279 = vector.shape_cast %278 : vector<1x2x128xf32> to vector<2x128xf32>
    %280 = vector.shape_cast %276 : vector<2x128xf32> to vector<1x2x128xf32>
    tpu.vector_store %arg22[%277, %c0_87, %c0_88], %280 {strides = array<i32>} : memref<8x2x128xf32, #tpu.memory_space<vmem>>, vector<1x2x128xf32>,
    %c7_i32_89 = arith.constant 7 : i32
    %c7_i32_90 = arith.constant 7 : i32
    %281 = arith.subi %c7_i32_90, %c7_i32_89 : i32
    %282 = arith.index_cast %281 : i32 to index
    %c0_91 = arith.constant 0 : index
    %c0_92 = arith.constant 0 : index
    %283 = vector.load %arg0[%282, %c0_91, %c0_92] : memref<8x2x512xbf16, #tpu.memory_space<vmem>>, vector<1x2x512xbf16>
    %284 = vector.shape_cast %283 : vector<1x2x512xbf16> to vector<2x512xbf16>
    %285 = arith.extf %284 : vector<2x512xbf16> to vector<2x512xf32>
    %c0_93 = arith.constant 0 : index
    %c0_94 = arith.constant 0 : index
    %286 = vector.load %arg2[%c0_93, %c0_94] : memref<128x512xf32, #tpu.memory_space<vmem>>, vector<128x512xf32>
    %cst_95 = arith.constant dense<0.000000e+00> : vector<2x512xf32>
    %287 = tpu.matmul %276, %286, %cst_95 {dimension_numbers = #tpu.dot_dimension_numbers<[1], [0], [0], [1], [0, 0, 1, 1], [], []>} : vector<2x128xf32>, vector<128x512xf32>, vector<2x512xf32> -> vector<2x512xf32>
    %288 = arith.addf %285, %287 : vector<2x512xf32>
    %c0_96 = arith.constant 0 : index
    %c0_97 = arith.constant 0 : index
    %289 = vector.load %arg3[%c0_96, %c0_97] : memref<1x512xf32, #tpu.memory_space<vmem>>, vector<1x512xf32>
    %290 = vector.broadcast %289 : vector<1x512xf32> to vector<2x512xf32>
    %291 = arith.addf %288, %290 : vector<2x512xf32>
    %292 = vector.extract_strided_slice %291 {offsets = [0, 0], sizes = [2, 128], strides = [1, 1]} : vector<2x512xf32> to vector<2x128xf32>
    %293 = arith.negf %292 : vector<2x128xf32>
    %294 = math.exp %293 : vector<2x128xf32>
    %cst_98 = arith.constant 1.000000e+00 : f32
    %295 = vector.broadcast %cst_98 : f32 to vector<2x128xf32>
    %296 = arith.addf %295, %294 : vector<2x128xf32>
    %297 = arith.divf %295, %296 : vector<2x128xf32>
    %298 = vector.extract_strided_slice %291 {offsets = [0, 128], sizes = [2, 128], strides = [1, 1]} : vector<2x512xf32> to vector<2x128xf32>
    %299 = arith.negf %298 : vector<2x128xf32>
    %300 = math.exp %299 : vector<2x128xf32>
    %cst_99 = arith.constant 1.000000e+00 : f32
    %301 = vector.broadcast %cst_99 : f32 to vector<2x128xf32>
    %302 = arith.addf %301, %300 : vector<2x128xf32>
    %303 = arith.divf %301, %302 : vector<2x128xf32>
    %304 = vector.extract_strided_slice %291 {offsets = [0, 256], sizes = [2, 128], strides = [1, 1]} : vector<2x512xf32> to vector<2x128xf32>
    %305 = math.tanh %304 : vector<2x128xf32>
    %306 = vector.extract_strided_slice %291 {offsets = [0, 384], sizes = [2, 128], strides = [1, 1]} : vector<2x512xf32> to vector<2x128xf32>
    %307 = arith.negf %306 : vector<2x128xf32>
    %308 = math.exp %307 : vector<2x128xf32>
    %cst_100 = arith.constant 1.000000e+00 : f32
    %309 = vector.broadcast %cst_100 : f32 to vector<2x128xf32>
    %310 = arith.addf %309, %308 : vector<2x128xf32>
    %311 = arith.divf %309, %310 : vector<2x128xf32>
    %312 = arith.mulf %303, %274 : vector<2x128xf32>
    %313 = arith.mulf %297, %305 : vector<2x128xf32>
    %314 = arith.addf %312, %313 : vector<2x128xf32>
    %315 = math.tanh %314 : vector<2x128xf32>
    %316 = arith.mulf %311, %315 : vector<2x128xf32>
    %317 = arith.index_cast %281 : i32 to index
    %c0_101 = arith.constant 0 : index
    %c0_102 = arith.constant 0 : index
    %318 = vector.load %arg22[%317, %c0_101, %c0_102] : memref<8x2x128xf32, #tpu.memory_space<vmem>>, vector<1x2x128xf32>
    %319 = vector.shape_cast %318 : vector<1x2x128xf32> to vector<2x128xf32>
    %320 = vector.shape_cast %316 : vector<2x128xf32> to vector<1x2x128xf32>
    tpu.vector_store %arg22[%317, %c0_101, %c0_102], %320 {strides = array<i32>} : memref<8x2x128xf32, #tpu.memory_space<vmem>>, vector<1x2x128xf32>,
    %c8_i32 = arith.constant 8 : i32
    %cst_103 = arith.constant 0.000000e+00 : f32
    %321 = vector.broadcast %cst_103 : f32 to vector<2x16xf32>
    %c0_i32_104 = arith.constant 0 : i32
    %322 = arith.index_cast %c0_i32_104 : i32 to index
    %c0_105 = arith.constant 0 : index
    %c0_106 = arith.constant 0 : index
    %323 = vector.load %arg19[%322, %c0_105, %c0_106] : memref<8x2x16xf32, #tpu.memory_space<vmem>>, vector<1x2x16xf32>
    %324 = vector.shape_cast %323 : vector<1x2x16xf32> to vector<2x16xf32>
    %325 = vector.shape_cast %321 : vector<2x16xf32> to vector<1x2x16xf32>
    tpu.vector_store %arg19[%322, %c0_105, %c0_106], %325 {strides = array<i32>} : memref<8x2x16xf32, #tpu.memory_space<vmem>>, vector<1x2x16xf32>,
    %c0_107 = arith.constant 0 : index
    %c0_108 = arith.constant 0 : index
    %326 = vector.load %arg4[%c0_107, %c0_108] : memref<16x32xf32, #tpu.memory_space<vmem>>, vector<16x32xf32>
    %cst_109 = arith.constant dense<0.000000e+00> : vector<2x32xf32>
    %327 = tpu.matmul %321, %326, %cst_109 {dimension_numbers = #tpu.dot_dimension_numbers<[1], [0], [0], [1], [0, 0, 1, 1], [], []>} : vector<2x16xf32>, vector<16x32xf32>, vector<2x32xf32> -> vector<2x32xf32>
    %c0_110 = arith.constant 0 : index
    %c0_111 = arith.constant 0 : index
    %328 = vector.load %arg5[%c0_110, %c0_111] : memref<1x32xf32, #tpu.memory_space<vmem>>, vector<1x32xf32>
    %329 = vector.broadcast %328 : vector<1x32xf32> to vector<2x32xf32>
    %330 = arith.addf %327, %329 : vector<2x32xf32>
    %331 = math.tanh %330 : vector<2x32xf32>
    %c0_112 = arith.constant 0 : index
    %c0_113 = arith.constant 0 : index
    %332 = vector.load %arg6[%c0_112, %c0_113] : memref<32x64xf32, #tpu.memory_space<vmem>>, vector<32x64xf32>
    %cst_114 = arith.constant dense<0.000000e+00> : vector<2x64xf32>
    %333 = tpu.matmul %331, %332, %cst_114 {dimension_numbers = #tpu.dot_dimension_numbers<[1], [0], [0], [1], [0, 0, 1, 1], [], []>} : vector<2x32xf32>, vector<32x64xf32>, vector<2x64xf32> -> vector<2x64xf32>
    %c0_115 = arith.constant 0 : index
    %c0_116 = arith.constant 0 : index
    %334 = vector.load %arg7[%c0_115, %c0_116] : memref<1x64xf32, #tpu.memory_space<vmem>>, vector<1x64xf32>
    %335 = vector.broadcast %334 : vector<1x64xf32> to vector<2x64xf32>
    %336 = arith.addf %333, %335 : vector<2x64xf32>
    %337 = math.tanh %336 : vector<2x64xf32>
    %c0_117 = arith.constant 0 : index
    %c0_118 = arith.constant 0 : index
    %338 = vector.load %arg8[%c0_117, %c0_118] : memref<64x128xf32, #tpu.memory_space<vmem>>, vector<64x128xf32>
    %cst_119 = arith.constant dense<0.000000e+00> : vector<2x128xf32>
    %339 = tpu.matmul %337, %338, %cst_119 {dimension_numbers = #tpu.dot_dimension_numbers<[1], [0], [0], [1], [0, 0, 1, 1], [], []>} : vector<2x64xf32>, vector<64x128xf32>, vector<2x128xf32> -> vector<2x128xf32>
    %c0_120 = arith.constant 0 : index
    %c0_121 = arith.constant 0 : index
    %340 = vector.load %arg9[%c0_120, %c0_121] : memref<1x128xf32, #tpu.memory_space<vmem>>, vector<1x128xf32>
    %341 = vector.broadcast %340 : vector<1x128xf32> to vector<2x128xf32>
    %342 = arith.addf %339, %341 : vector<2x128xf32>
    %343 = math.tanh %342 : vector<2x128xf32>
    %344 = arith.index_cast %c0_i32_104 : i32 to index
    %c0_122 = arith.constant 0 : index
    %c0_123 = arith.constant 0 : index
    %345 = vector.load %arg22[%344, %c0_122, %c0_123] : memref<8x2x128xf32, #tpu.memory_space<vmem>>, vector<1x2x128xf32>
    %346 = vector.shape_cast %345 : vector<1x2x128xf32> to vector<2x128xf32>
    %347 = arith.addf %343, %346 : vector<2x128xf32>
    %cst_124 = arith.constant 5.000000e-01 : f32
    %348 = vector.broadcast %cst_124 : f32 to vector<2x128xf32>
    %349 = arith.mulf %347, %348 : vector<2x128xf32>
    %c0_125 = arith.constant 0 : index
    %c0_126 = arith.constant 0 : index
    %350 = vector.load %arg10[%c0_125, %c0_126] : memref<128x64xf32, #tpu.memory_space<vmem>>, vector<128x64xf32>
    %cst_127 = arith.constant dense<0.000000e+00> : vector<2x64xf32>
    %351 = tpu.matmul %349, %350, %cst_127 {dimension_numbers = #tpu.dot_dimension_numbers<[1], [0], [0], [1], [0, 0, 1, 1], [], []>} : vector<2x128xf32>, vector<128x64xf32>, vector<2x64xf32> -> vector<2x64xf32>
    %c0_128 = arith.constant 0 : index
    %c0_129 = arith.constant 0 : index
    %352 = vector.load %arg11[%c0_128, %c0_129] : memref<1x64xf32, #tpu.memory_space<vmem>>, vector<1x64xf32>
    %353 = vector.broadcast %352 : vector<1x64xf32> to vector<2x64xf32>
    %354 = arith.addf %351, %353 : vector<2x64xf32>
    %355 = math.tanh %354 : vector<2x64xf32>
    %c0_130 = arith.constant 0 : index
    %c0_131 = arith.constant 0 : index
    %356 = vector.load %arg12[%c0_130, %c0_131] : memref<64x32xf32, #tpu.memory_space<vmem>>, vector<64x32xf32>
    %cst_132 = arith.constant dense<0.000000e+00> : vector<2x32xf32>
    %357 = tpu.matmul %355, %356, %cst_132 {dimension_numbers = #tpu.dot_dimension_numbers<[1], [0], [0], [1], [0, 0, 1, 1], [], []>} : vector<2x64xf32>, vector<64x32xf32>, vector<2x32xf32> -> vector<2x32xf32>
    %c0_133 = arith.constant 0 : index
    %c0_134 = arith.constant 0 : index
    %358 = vector.load %arg13[%c0_133, %c0_134] : memref<1x32xf32, #tpu.memory_space<vmem>>, vector<1x32xf32>
    %359 = vector.broadcast %358 : vector<1x32xf32> to vector<2x32xf32>
    %360 = arith.addf %357, %359 : vector<2x32xf32>
    %361 = math.tanh %360 : vector<2x32xf32>
    %c0_135 = arith.constant 0 : index
    %c0_136 = arith.constant 0 : index
    %362 = vector.load %arg14[%c0_135, %c0_136] : memref<32x16xf32, #tpu.memory_space<vmem>>, vector<32x16xf32>
    %cst_137 = arith.constant dense<0.000000e+00> : vector<2x16xf32>
    %363 = tpu.matmul %361, %362, %cst_137 {dimension_numbers = #tpu.dot_dimension_numbers<[1], [0], [0], [1], [0, 0, 1, 1], [], []>} : vector<2x32xf32>, vector<32x16xf32>, vector<2x16xf32> -> vector<2x16xf32>
    %c0_138 = arith.constant 0 : index
    %c0_139 = arith.constant 0 : index
    %364 = vector.load %arg15[%c0_138, %c0_139] : memref<1x16xf32, #tpu.memory_space<vmem>>, vector<1x16xf32>
    %365 = vector.broadcast %364 : vector<1x16xf32> to vector<2x16xf32>
    %366 = arith.addf %363, %365 : vector<2x16xf32>
    %c0_140 = arith.constant 0 : index
    %c0_141 = arith.constant 0 : index
    %367 = vector.load %arg16[%c0_140, %c0_141] : memref<32x16xf32, #tpu.memory_space<vmem>>, vector<32x16xf32>
    %cst_142 = arith.constant dense<0.000000e+00> : vector<2x16xf32>
    %368 = tpu.matmul %361, %367, %cst_142 {dimension_numbers = #tpu.dot_dimension_numbers<[1], [0], [0], [1], [0, 0, 1, 1], [], []>} : vector<2x32xf32>, vector<32x16xf32>, vector<2x16xf32> -> vector<2x16xf32>
    %c0_143 = arith.constant 0 : index
    %c0_144 = arith.constant 0 : index
    %369 = vector.load %arg17[%c0_143, %c0_144] : memref<1x16xf32, #tpu.memory_space<vmem>>, vector<1x16xf32>
    %370 = vector.broadcast %369 : vector<1x16xf32> to vector<2x16xf32>
    %371 = arith.addf %368, %370 : vector<2x16xf32>
    %372 = arith.index_cast %c0_i32_104 : i32 to index
    %c0_145 = arith.constant 0 : index
    %c0_146 = arith.constant 0 : index
    %373 = vector.load %arg1[%372, %c0_145, %c0_146] : memref<8x2x16xf32, #tpu.memory_space<vmem>>, vector<1x2x16xf32>
    %374 = vector.shape_cast %373 : vector<1x2x16xf32> to vector<2x16xf32>
    %cst_147 = arith.constant 5.000000e-01 : f32
    %375 = vector.broadcast %cst_147 : f32 to vector<2x16xf32>
    %376 = arith.mulf %375, %371 : vector<2x16xf32>
    %377 = math.exp %376 : vector<2x16xf32>
    %378 = arith.mulf %374, %377 : vector<2x16xf32>
    %379 = arith.addf %366, %378 : vector<2x16xf32>
    %380 = arith.index_cast %c0_i32_104 : i32 to index
    %c0_148 = arith.constant 0 : index
    %c0_149 = arith.constant 0 : index
    %381 = vector.load %arg20[%380, %c0_148, %c0_149] : memref<8x2x16xf32, #tpu.memory_space<vmem>>, vector<1x2x16xf32>
    %382 = vector.shape_cast %381 : vector<1x2x16xf32> to vector<2x16xf32>
    %383 = vector.shape_cast %366 : vector<2x16xf32> to vector<1x2x16xf32>
    tpu.vector_store %arg20[%380, %c0_148, %c0_149], %383 {strides = array<i32>} : memref<8x2x16xf32, #tpu.memory_space<vmem>>, vector<1x2x16xf32>,
    %384 = arith.index_cast %c0_i32_104 : i32 to index
    %c0_150 = arith.constant 0 : index
    %c0_151 = arith.constant 0 : index
    %385 = vector.load %arg21[%384, %c0_150, %c0_151] : memref<8x2x16xf32, #tpu.memory_space<vmem>>, vector<1x2x16xf32>
    %386 = vector.shape_cast %385 : vector<1x2x16xf32> to vector<2x16xf32>
    %387 = vector.shape_cast %371 : vector<2x16xf32> to vector<1x2x16xf32>
    tpu.vector_store %arg21[%384, %c0_150, %c0_151], %387 {strides = array<i32>} : memref<8x2x16xf32, #tpu.memory_space<vmem>>, vector<1x2x16xf32>,
    %388 = arith.index_cast %c0_i32_104 : i32 to index
    %c0_152 = arith.constant 0 : index
    %c0_153 = arith.constant 0 : index
    %389 = vector.load %arg18[%388, %c0_152, %c0_153] : memref<8x2x16xf32, #tpu.memory_space<vmem>>, vector<1x2x16xf32>
    %390 = vector.shape_cast %389 : vector<1x2x16xf32> to vector<2x16xf32>
    %391 = vector.shape_cast %379 : vector<2x16xf32> to vector<1x2x16xf32>
    tpu.vector_store %arg18[%388, %c0_152, %c0_153], %391 {strides = array<i32>} : memref<8x2x16xf32, #tpu.memory_space<vmem>>, vector<1x2x16xf32>,
    %c1_i32_154 = arith.constant 1 : i32
    %392 = arith.index_cast %c1_i32_154 : i32 to index
    %c0_155 = arith.constant 0 : index
    %c0_156 = arith.constant 0 : index
    %393 = vector.load %arg19[%392, %c0_155, %c0_156] : memref<8x2x16xf32, #tpu.memory_space<vmem>>, vector<1x2x16xf32>
    %394 = vector.shape_cast %393 : vector<1x2x16xf32> to vector<2x16xf32>
    %395 = vector.shape_cast %379 : vector<2x16xf32> to vector<1x2x16xf32>
    tpu.vector_store %arg19[%392, %c0_155, %c0_156], %395 {strides = array<i32>} : memref<8x2x16xf32, #tpu.memory_space<vmem>>, vector<1x2x16xf32>,
    %c0_157 = arith.constant 0 : index
    %c0_158 = arith.constant 0 : index
    %396 = vector.load %arg4[%c0_157, %c0_158] : memref<16x32xf32, #tpu.memory_space<vmem>>, vector<16x32xf32>
    %cst_159 = arith.constant dense<0.000000e+00> : vector<2x32xf32>
    %397 = tpu.matmul %379, %396, %cst_159 {dimension_numbers = #tpu.dot_dimension_numbers<[1], [0], [0], [1], [0, 0, 1, 1], [], []>} : vector<2x16xf32>, vector<16x32xf32>, vector<2x32xf32> -> vector<2x32xf32>
    %c0_160 = arith.constant 0 : index
    %c0_161 = arith.constant 0 : index
    %398 = vector.load %arg5[%c0_160, %c0_161] : memref<1x32xf32, #tpu.memory_space<vmem>>, vector<1x32xf32>
    %399 = vector.broadcast %398 : vector<1x32xf32> to vector<2x32xf32>
    %400 = arith.addf %397, %399 : vector<2x32xf32>
    %401 = math.tanh %400 : vector<2x32xf32>
    %c0_162 = arith.constant 0 : index
    %c0_163 = arith.constant 0 : index
    %402 = vector.load %arg6[%c0_162, %c0_163] : memref<32x64xf32, #tpu.memory_space<vmem>>, vector<32x64xf32>
    %cst_164 = arith.constant dense<0.000000e+00> : vector<2x64xf32>
    %403 = tpu.matmul %401, %402, %cst_164 {dimension_numbers = #tpu.dot_dimension_numbers<[1], [0], [0], [1], [0, 0, 1, 1], [], []>} : vector<2x32xf32>, vector<32x64xf32>, vector<2x64xf32> -> vector<2x64xf32>
    %c0_165 = arith.constant 0 : index
    %c0_166 = arith.constant 0 : index
    %404 = vector.load %arg7[%c0_165, %c0_166] : memref<1x64xf32, #tpu.memory_space<vmem>>, vector<1x64xf32>
    %405 = vector.broadcast %404 : vector<1x64xf32> to vector<2x64xf32>
    %406 = arith.addf %403, %405 : vector<2x64xf32>
    %407 = math.tanh %406 : vector<2x64xf32>
    %c0_167 = arith.constant 0 : index
    %c0_168 = arith.constant 0 : index
    %408 = vector.load %arg8[%c0_167, %c0_168] : memref<64x128xf32, #tpu.memory_space<vmem>>, vector<64x128xf32>
    %cst_169 = arith.constant dense<0.000000e+00> : vector<2x128xf32>
    %409 = tpu.matmul %407, %408, %cst_169 {dimension_numbers = #tpu.dot_dimension_numbers<[1], [0], [0], [1], [0, 0, 1, 1], [], []>} : vector<2x64xf32>, vector<64x128xf32>, vector<2x128xf32> -> vector<2x128xf32>
    %c0_170 = arith.constant 0 : index
    %c0_171 = arith.constant 0 : index
    %410 = vector.load %arg9[%c0_170, %c0_171] : memref<1x128xf32, #tpu.memory_space<vmem>>, vector<1x128xf32>
    %411 = vector.broadcast %410 : vector<1x128xf32> to vector<2x128xf32>
    %412 = arith.addf %409, %411 : vector<2x128xf32>
    %413 = math.tanh %412 : vector<2x128xf32>
    %414 = arith.index_cast %c1_i32_154 : i32 to index
    %c0_172 = arith.constant 0 : index
    %c0_173 = arith.constant 0 : index
    %415 = vector.load %arg22[%414, %c0_172, %c0_173] : memref<8x2x128xf32, #tpu.memory_space<vmem>>, vector<1x2x128xf32>
    %416 = vector.shape_cast %415 : vector<1x2x128xf32> to vector<2x128xf32>
    %417 = arith.addf %413, %416 : vector<2x128xf32>
    %cst_174 = arith.constant 5.000000e-01 : f32
    %418 = vector.broadcast %cst_174 : f32 to vector<2x128xf32>
    %419 = arith.mulf %417, %418 : vector<2x128xf32>
    %c0_175 = arith.constant 0 : index
    %c0_176 = arith.constant 0 : index
    %420 = vector.load %arg10[%c0_175, %c0_176] : memref<128x64xf32, #tpu.memory_space<vmem>>, vector<128x64xf32>
    %cst_177 = arith.constant dense<0.000000e+00> : vector<2x64xf32>
    %421 = tpu.matmul %419, %420, %cst_177 {dimension_numbers = #tpu.dot_dimension_numbers<[1], [0], [0], [1], [0, 0, 1, 1], [], []>} : vector<2x128xf32>, vector<128x64xf32>, vector<2x64xf32> -> vector<2x64xf32>
    %c0_178 = arith.constant 0 : index
    %c0_179 = arith.constant 0 : index
    %422 = vector.load %arg11[%c0_178, %c0_179] : memref<1x64xf32, #tpu.memory_space<vmem>>, vector<1x64xf32>
    %423 = vector.broadcast %422 : vector<1x64xf32> to vector<2x64xf32>
    %424 = arith.addf %421, %423 : vector<2x64xf32>
    %425 = math.tanh %424 : vector<2x64xf32>
    %c0_180 = arith.constant 0 : index
    %c0_181 = arith.constant 0 : index
    %426 = vector.load %arg12[%c0_180, %c0_181] : memref<64x32xf32, #tpu.memory_space<vmem>>, vector<64x32xf32>
    %cst_182 = arith.constant dense<0.000000e+00> : vector<2x32xf32>
    %427 = tpu.matmul %425, %426, %cst_182 {dimension_numbers = #tpu.dot_dimension_numbers<[1], [0], [0], [1], [0, 0, 1, 1], [], []>} : vector<2x64xf32>, vector<64x32xf32>, vector<2x32xf32> -> vector<2x32xf32>
    %c0_183 = arith.constant 0 : index
    %c0_184 = arith.constant 0 : index
    %428 = vector.load %arg13[%c0_183, %c0_184] : memref<1x32xf32, #tpu.memory_space<vmem>>, vector<1x32xf32>
    %429 = vector.broadcast %428 : vector<1x32xf32> to vector<2x32xf32>
    %430 = arith.addf %427, %429 : vector<2x32xf32>
    %431 = math.tanh %430 : vector<2x32xf32>
    %c0_185 = arith.constant 0 : index
    %c0_186 = arith.constant 0 : index
    %432 = vector.load %arg14[%c0_185, %c0_186] : memref<32x16xf32, #tpu.memory_space<vmem>>, vector<32x16xf32>
    %cst_187 = arith.constant dense<0.000000e+00> : vector<2x16xf32>
    %433 = tpu.matmul %431, %432, %cst_187 {dimension_numbers = #tpu.dot_dimension_numbers<[1], [0], [0], [1], [0, 0, 1, 1], [], []>} : vector<2x32xf32>, vector<32x16xf32>, vector<2x16xf32> -> vector<2x16xf32>
    %c0_188 = arith.constant 0 : index
    %c0_189 = arith.constant 0 : index
    %434 = vector.load %arg15[%c0_188, %c0_189] : memref<1x16xf32, #tpu.memory_space<vmem>>, vector<1x16xf32>
    %435 = vector.broadcast %434 : vector<1x16xf32> to vector<2x16xf32>
    %436 = arith.addf %433, %435 : vector<2x16xf32>
    %c0_190 = arith.constant 0 : index
    %c0_191 = arith.constant 0 : index
    %437 = vector.load %arg16[%c0_190, %c0_191] : memref<32x16xf32, #tpu.memory_space<vmem>>, vector<32x16xf32>
    %cst_192 = arith.constant dense<0.000000e+00> : vector<2x16xf32>
    %438 = tpu.matmul %431, %437, %cst_192 {dimension_numbers = #tpu.dot_dimension_numbers<[1], [0], [0], [1], [0, 0, 1, 1], [], []>} : vector<2x32xf32>, vector<32x16xf32>, vector<2x16xf32> -> vector<2x16xf32>
    %c0_193 = arith.constant 0 : index
    %c0_194 = arith.constant 0 : index
    %439 = vector.load %arg17[%c0_193, %c0_194] : memref<1x16xf32, #tpu.memory_space<vmem>>, vector<1x16xf32>
    %440 = vector.broadcast %439 : vector<1x16xf32> to vector<2x16xf32>
    %441 = arith.addf %438, %440 : vector<2x16xf32>
    %442 = arith.index_cast %c1_i32_154 : i32 to index
    %c0_195 = arith.constant 0 : index
    %c0_196 = arith.constant 0 : index
    %443 = vector.load %arg1[%442, %c0_195, %c0_196] : memref<8x2x16xf32, #tpu.memory_space<vmem>>, vector<1x2x16xf32>
    %444 = vector.shape_cast %443 : vector<1x2x16xf32> to vector<2x16xf32>
    %cst_197 = arith.constant 5.000000e-01 : f32
    %445 = vector.broadcast %cst_197 : f32 to vector<2x16xf32>
    %446 = arith.mulf %445, %441 : vector<2x16xf32>
    %447 = math.exp %446 : vector<2x16xf32>
    %448 = arith.mulf %444, %447 : vector<2x16xf32>
    %449 = arith.addf %436, %448 : vector<2x16xf32>
    %450 = arith.index_cast %c1_i32_154 : i32 to index
    %c0_198 = arith.constant 0 : index
    %c0_199 = arith.constant 0 : index
    %451 = vector.load %arg20[%450, %c0_198, %c0_199] : memref<8x2x16xf32, #tpu.memory_space<vmem>>, vector<1x2x16xf32>
    %452 = vector.shape_cast %451 : vector<1x2x16xf32> to vector<2x16xf32>
    %453 = vector.shape_cast %436 : vector<2x16xf32> to vector<1x2x16xf32>
    tpu.vector_store %arg20[%450, %c0_198, %c0_199], %453 {strides = array<i32>} : memref<8x2x16xf32, #tpu.memory_space<vmem>>, vector<1x2x16xf32>,
    %454 = arith.index_cast %c1_i32_154 : i32 to index
    %c0_200 = arith.constant 0 : index
    %c0_201 = arith.constant 0 : index
    %455 = vector.load %arg21[%454, %c0_200, %c0_201] : memref<8x2x16xf32, #tpu.memory_space<vmem>>, vector<1x2x16xf32>
    %456 = vector.shape_cast %455 : vector<1x2x16xf32> to vector<2x16xf32>
    %457 = vector.shape_cast %441 : vector<2x16xf32> to vector<1x2x16xf32>
    tpu.vector_store %arg21[%454, %c0_200, %c0_201], %457 {strides = array<i32>} : memref<8x2x16xf32, #tpu.memory_space<vmem>>, vector<1x2x16xf32>,
    %458 = arith.index_cast %c1_i32_154 : i32 to index
    %c0_202 = arith.constant 0 : index
    %c0_203 = arith.constant 0 : index
    %459 = vector.load %arg18[%458, %c0_202, %c0_203] : memref<8x2x16xf32, #tpu.memory_space<vmem>>, vector<1x2x16xf32>
    %460 = vector.shape_cast %459 : vector<1x2x16xf32> to vector<2x16xf32>
    %461 = vector.shape_cast %449 : vector<2x16xf32> to vector<1x2x16xf32>
    tpu.vector_store %arg18[%458, %c0_202, %c0_203], %461 {strides = array<i32>} : memref<8x2x16xf32, #tpu.memory_space<vmem>>, vector<1x2x16xf32>,
    %c2_i32_204 = arith.constant 2 : i32
    %462 = arith.index_cast %c2_i32_204 : i32 to index
    %c0_205 = arith.constant 0 : index
    %c0_206 = arith.constant 0 : index
    %463 = vector.load %arg19[%462, %c0_205, %c0_206] : memref<8x2x16xf32, #tpu.memory_space<vmem>>, vector<1x2x16xf32>
    %464 = vector.shape_cast %463 : vector<1x2x16xf32> to vector<2x16xf32>
    %465 = vector.shape_cast %449 : vector<2x16xf32> to vector<1x2x16xf32>
    tpu.vector_store %arg19[%462, %c0_205, %c0_206], %465 {strides = array<i32>} : memref<8x2x16xf32, #tpu.memory_space<vmem>>, vector<1x2x16xf32>,
    %c0_207 = arith.constant 0 : index
    %c0_208 = arith.constant 0 : index
    %466 = vector.load %arg4[%c0_207, %c0_208] : memref<16x32xf32, #tpu.memory_space<vmem>>, vector<16x32xf32>
    %cst_209 = arith.constant dense<0.000000e+00> : vector<2x32xf32>
    %467 = tpu.matmul %449, %466, %cst_209 {dimension_numbers = #tpu.dot_dimension_numbers<[1], [0], [0], [1], [0, 0, 1, 1], [], []>} : vector<2x16xf32>, vector<16x32xf32>, vector<2x32xf32> -> vector<2x32xf32>
    %c0_210 = arith.constant 0 : index
    %c0_211 = arith.constant 0 : index
    %468 = vector.load %arg5[%c0_210, %c0_211] : memref<1x32xf32, #tpu.memory_space<vmem>>, vector<1x32xf32>
    %469 = vector.broadcast %468 : vector<1x32xf32> to vector<2x32xf32>
    %470 = arith.addf %467, %469 : vector<2x32xf32>
    %471 = math.tanh %470 : vector<2x32xf32>
    %c0_212 = arith.constant 0 : index
    %c0_213 = arith.constant 0 : index
    %472 = vector.load %arg6[%c0_212, %c0_213] : memref<32x64xf32, #tpu.memory_space<vmem>>, vector<32x64xf32>
    %cst_214 = arith.constant dense<0.000000e+00> : vector<2x64xf32>
    %473 = tpu.matmul %471, %472, %cst_214 {dimension_numbers = #tpu.dot_dimension_numbers<[1], [0], [0], [1], [0, 0, 1, 1], [], []>} : vector<2x32xf32>, vector<32x64xf32>, vector<2x64xf32> -> vector<2x64xf32>
    %c0_215 = arith.constant 0 : index
    %c0_216 = arith.constant 0 : index
    %474 = vector.load %arg7[%c0_215, %c0_216] : memref<1x64xf32, #tpu.memory_space<vmem>>, vector<1x64xf32>
    %475 = vector.broadcast %474 : vector<1x64xf32> to vector<2x64xf32>
    %476 = arith.addf %473, %475 : vector<2x64xf32>
    %477 = math.tanh %476 : vector<2x64xf32>
    %c0_217 = arith.constant 0 : index
    %c0_218 = arith.constant 0 : index
    %478 = vector.load %arg8[%c0_217, %c0_218] : memref<64x128xf32, #tpu.memory_space<vmem>>, vector<64x128xf32>
    %cst_219 = arith.constant dense<0.000000e+00> : vector<2x128xf32>
    %479 = tpu.matmul %477, %478, %cst_219 {dimension_numbers = #tpu.dot_dimension_numbers<[1], [0], [0], [1], [0, 0, 1, 1], [], []>} : vector<2x64xf32>, vector<64x128xf32>, vector<2x128xf32> -> vector<2x128xf32>
    %c0_220 = arith.constant 0 : index
    %c0_221 = arith.constant 0 : index
    %480 = vector.load %arg9[%c0_220, %c0_221] : memref<1x128xf32, #tpu.memory_space<vmem>>, vector<1x128xf32>
    %481 = vector.broadcast %480 : vector<1x128xf32> to vector<2x128xf32>
    %482 = arith.addf %479, %481 : vector<2x128xf32>
    %483 = math.tanh %482 : vector<2x128xf32>
    %484 = arith.index_cast %c2_i32_204 : i32 to index
    %c0_222 = arith.constant 0 : index
    %c0_223 = arith.constant 0 : index
    %485 = vector.load %arg22[%484, %c0_222, %c0_223] : memref<8x2x128xf32, #tpu.memory_space<vmem>>, vector<1x2x128xf32>
    %486 = vector.shape_cast %485 : vector<1x2x128xf32> to vector<2x128xf32>
    %487 = arith.addf %483, %486 : vector<2x128xf32>
    %cst_224 = arith.constant 5.000000e-01 : f32
    %488 = vector.broadcast %cst_224 : f32 to vector<2x128xf32>
    %489 = arith.mulf %487, %488 : vector<2x128xf32>
    %c0_225 = arith.constant 0 : index
    %c0_226 = arith.constant 0 : index
    %490 = vector.load %arg10[%c0_225, %c0_226] : memref<128x64xf32, #tpu.memory_space<vmem>>, vector<128x64xf32>
    %cst_227 = arith.constant dense<0.000000e+00> : vector<2x64xf32>
    %491 = tpu.matmul %489, %490, %cst_227 {dimension_numbers = #tpu.dot_dimension_numbers<[1], [0], [0], [1], [0, 0, 1, 1], [], []>} : vector<2x128xf32>, vector<128x64xf32>, vector<2x64xf32> -> vector<2x64xf32>
    %c0_228 = arith.constant 0 : index
    %c0_229 = arith.constant 0 : index
    %492 = vector.load %arg11[%c0_228, %c0_229] : memref<1x64xf32, #tpu.memory_space<vmem>>, vector<1x64xf32>
    %493 = vector.broadcast %492 : vector<1x64xf32> to vector<2x64xf32>
    %494 = arith.addf %491, %493 : vector<2x64xf32>
    %495 = math.tanh %494 : vector<2x64xf32>
    %c0_230 = arith.constant 0 : index
    %c0_231 = arith.constant 0 : index
    %496 = vector.load %arg12[%c0_230, %c0_231] : memref<64x32xf32, #tpu.memory_space<vmem>>, vector<64x32xf32>
    %cst_232 = arith.constant dense<0.000000e+00> : vector<2x32xf32>
    %497 = tpu.matmul %495, %496, %cst_232 {dimension_numbers = #tpu.dot_dimension_numbers<[1], [0], [0], [1], [0, 0, 1, 1], [], []>} : vector<2x64xf32>, vector<64x32xf32>, vector<2x32xf32> -> vector<2x32xf32>
    %c0_233 = arith.constant 0 : index
    %c0_234 = arith.constant 0 : index
    %498 = vector.load %arg13[%c0_233, %c0_234] : memref<1x32xf32, #tpu.memory_space<vmem>>, vector<1x32xf32>
    %499 = vector.broadcast %498 : vector<1x32xf32> to vector<2x32xf32>
    %500 = arith.addf %497, %499 : vector<2x32xf32>
    %501 = math.tanh %500 : vector<2x32xf32>
    %c0_235 = arith.constant 0 : index
    %c0_236 = arith.constant 0 : index
    %502 = vector.load %arg14[%c0_235, %c0_236] : memref<32x16xf32, #tpu.memory_space<vmem>>, vector<32x16xf32>
    %cst_237 = arith.constant dense<0.000000e+00> : vector<2x16xf32>
    %503 = tpu.matmul %501, %502, %cst_237 {dimension_numbers = #tpu.dot_dimension_numbers<[1], [0], [0], [1], [0, 0, 1, 1], [], []>} : vector<2x32xf32>, vector<32x16xf32>, vector<2x16xf32> -> vector<2x16xf32>
    %c0_238 = arith.constant 0 : index
    %c0_239 = arith.constant 0 : index
    %504 = vector.load %arg15[%c0_238, %c0_239] : memref<1x16xf32, #tpu.memory_space<vmem>>, vector<1x16xf32>
    %505 = vector.broadcast %504 : vector<1x16xf32> to vector<2x16xf32>
    %506 = arith.addf %503, %505 : vector<2x16xf32>
    %c0_240 = arith.constant 0 : index
    %c0_241 = arith.constant 0 : index
    %507 = vector.load %arg16[%c0_240, %c0_241] : memref<32x16xf32, #tpu.memory_space<vmem>>, vector<32x16xf32>
    %cst_242 = arith.constant dense<0.000000e+00> : vector<2x16xf32>
    %508 = tpu.matmul %501, %507, %cst_242 {dimension_numbers = #tpu.dot_dimension_numbers<[1], [0], [0], [1], [0, 0, 1, 1], [], []>} : vector<2x32xf32>, vector<32x16xf32>, vector<2x16xf32> -> vector<2x16xf32>
    %c0_243 = arith.constant 0 : index
    %c0_244 = arith.constant 0 : index
    %509 = vector.load %arg17[%c0_243, %c0_244] : memref<1x16xf32, #tpu.memory_space<vmem>>, vector<1x16xf32>
    %510 = vector.broadcast %509 : vector<1x16xf32> to vector<2x16xf32>
    %511 = arith.addf %508, %510 : vector<2x16xf32>
    %512 = arith.index_cast %c2_i32_204 : i32 to index
    %c0_245 = arith.constant 0 : index
    %c0_246 = arith.constant 0 : index
    %513 = vector.load %arg1[%512, %c0_245, %c0_246] : memref<8x2x16xf32, #tpu.memory_space<vmem>>, vector<1x2x16xf32>
    %514 = vector.shape_cast %513 : vector<1x2x16xf32> to vector<2x16xf32>
    %cst_247 = arith.constant 5.000000e-01 : f32
    %515 = vector.broadcast %cst_247 : f32 to vector<2x16xf32>
    %516 = arith.mulf %515, %511 : vector<2x16xf32>
    %517 = math.exp %516 : vector<2x16xf32>
    %518 = arith.mulf %514, %517 : vector<2x16xf32>
    %519 = arith.addf %506, %518 : vector<2x16xf32>
    %520 = arith.index_cast %c2_i32_204 : i32 to index
    %c0_248 = arith.constant 0 : index
    %c0_249 = arith.constant 0 : index
    %521 = vector.load %arg20[%520, %c0_248, %c0_249] : memref<8x2x16xf32, #tpu.memory_space<vmem>>, vector<1x2x16xf32>
    %522 = vector.shape_cast %521 : vector<1x2x16xf32> to vector<2x16xf32>
    %523 = vector.shape_cast %506 : vector<2x16xf32> to vector<1x2x16xf32>
    tpu.vector_store %arg20[%520, %c0_248, %c0_249], %523 {strides = array<i32>} : memref<8x2x16xf32, #tpu.memory_space<vmem>>, vector<1x2x16xf32>,
    %524 = arith.index_cast %c2_i32_204 : i32 to index
    %c0_250 = arith.constant 0 : index
    %c0_251 = arith.constant 0 : index
    %525 = vector.load %arg21[%524, %c0_250, %c0_251] : memref<8x2x16xf32, #tpu.memory_space<vmem>>, vector<1x2x16xf32>
    %526 = vector.shape_cast %525 : vector<1x2x16xf32> to vector<2x16xf32>
    %527 = vector.shape_cast %511 : vector<2x16xf32> to vector<1x2x16xf32>
    tpu.vector_store %arg21[%524, %c0_250, %c0_251], %527 {strides = array<i32>} : memref<8x2x16xf32, #tpu.memory_space<vmem>>, vector<1x2x16xf32>,
    %528 = arith.index_cast %c2_i32_204 : i32 to index
    %c0_252 = arith.constant 0 : index
    %c0_253 = arith.constant 0 : index
    %529 = vector.load %arg18[%528, %c0_252, %c0_253] : memref<8x2x16xf32, #tpu.memory_space<vmem>>, vector<1x2x16xf32>
    %530 = vector.shape_cast %529 : vector<1x2x16xf32> to vector<2x16xf32>
    %531 = vector.shape_cast %519 : vector<2x16xf32> to vector<1x2x16xf32>
    tpu.vector_store %arg18[%528, %c0_252, %c0_253], %531 {strides = array<i32>} : memref<8x2x16xf32, #tpu.memory_space<vmem>>, vector<1x2x16xf32>,
    %c3_i32_254 = arith.constant 3 : i32
    %532 = arith.index_cast %c3_i32_254 : i32 to index
    %c0_255 = arith.constant 0 : index
    %c0_256 = arith.constant 0 : index
    %533 = vector.load %arg19[%532, %c0_255, %c0_256] : memref<8x2x16xf32, #tpu.memory_space<vmem>>, vector<1x2x16xf32>
    %534 = vector.shape_cast %533 : vector<1x2x16xf32> to vector<2x16xf32>
    %535 = vector.shape_cast %519 : vector<2x16xf32> to vector<1x2x16xf32>
    tpu.vector_store %arg19[%532, %c0_255, %c0_256], %535 {strides = array<i32>} : memref<8x2x16xf32, #tpu.memory_space<vmem>>, vector<1x2x16xf32>,
    %c0_257 = arith.constant 0 : index
    %c0_258 = arith.constant 0 : index
    %536 = vector.load %arg4[%c0_257, %c0_258] : memref<16x32xf32, #tpu.memory_space<vmem>>, vector<16x32xf32>
    %cst_259 = arith.constant dense<0.000000e+00> : vector<2x32xf32>
    %537 = tpu.matmul %519, %536, %cst_259 {dimension_numbers = #tpu.dot_dimension_numbers<[1], [0], [0], [1], [0, 0, 1, 1], [], []>} : vector<2x16xf32>, vector<16x32xf32>, vector<2x32xf32> -> vector<2x32xf32>
    %c0_260 = arith.constant 0 : index
    %c0_261 = arith.constant 0 : index
    %538 = vector.load %arg5[%c0_260, %c0_261] : memref<1x32xf32, #tpu.memory_space<vmem>>, vector<1x32xf32>
    %539 = vector.broadcast %538 : vector<1x32xf32> to vector<2x32xf32>
    %540 = arith.addf %537, %539 : vector<2x32xf32>
    %541 = math.tanh %540 : vector<2x32xf32>
    %c0_262 = arith.constant 0 : index
    %c0_263 = arith.constant 0 : index
    %542 = vector.load %arg6[%c0_262, %c0_263] : memref<32x64xf32, #tpu.memory_space<vmem>>, vector<32x64xf32>
    %cst_264 = arith.constant dense<0.000000e+00> : vector<2x64xf32>
    %543 = tpu.matmul %541, %542, %cst_264 {dimension_numbers = #tpu.dot_dimension_numbers<[1], [0], [0], [1], [0, 0, 1, 1], [], []>} : vector<2x32xf32>, vector<32x64xf32>, vector<2x64xf32> -> vector<2x64xf32>
    %c0_265 = arith.constant 0 : index
    %c0_266 = arith.constant 0 : index
    %544 = vector.load %arg7[%c0_265, %c0_266] : memref<1x64xf32, #tpu.memory_space<vmem>>, vector<1x64xf32>
    %545 = vector.broadcast %544 : vector<1x64xf32> to vector<2x64xf32>
    %546 = arith.addf %543, %545 : vector<2x64xf32>
    %547 = math.tanh %546 : vector<2x64xf32>
    %c0_267 = arith.constant 0 : index
    %c0_268 = arith.constant 0 : index
    %548 = vector.load %arg8[%c0_267, %c0_268] : memref<64x128xf32, #tpu.memory_space<vmem>>, vector<64x128xf32>
    %cst_269 = arith.constant dense<0.000000e+00> : vector<2x128xf32>
    %549 = tpu.matmul %547, %548, %cst_269 {dimension_numbers = #tpu.dot_dimension_numbers<[1], [0], [0], [1], [0, 0, 1, 1], [], []>} : vector<2x64xf32>, vector<64x128xf32>, vector<2x128xf32> -> vector<2x128xf32>
    %c0_270 = arith.constant 0 : index
    %c0_271 = arith.constant 0 : index
    %550 = vector.load %arg9[%c0_270, %c0_271] : memref<1x128xf32, #tpu.memory_space<vmem>>, vector<1x128xf32>
    %551 = vector.broadcast %550 : vector<1x128xf32> to vector<2x128xf32>
    %552 = arith.addf %549, %551 : vector<2x128xf32>
    %553 = math.tanh %552 : vector<2x128xf32>
    %554 = arith.index_cast %c3_i32_254 : i32 to index
    %c0_272 = arith.constant 0 : index
    %c0_273 = arith.constant 0 : index
    %555 = vector.load %arg22[%554, %c0_272, %c0_273] : memref<8x2x128xf32, #tpu.memory_space<vmem>>, vector<1x2x128xf32>
    %556 = vector.shape_cast %555 : vector<1x2x128xf32> to vector<2x128xf32>
    %557 = arith.addf %553, %556 : vector<2x128xf32>
    %cst_274 = arith.constant 5.000000e-01 : f32
    %558 = vector.broadcast %cst_274 : f32 to vector<2x128xf32>
    %559 = arith.mulf %557, %558 : vector<2x128xf32>
    %c0_275 = arith.constant 0 : index
    %c0_276 = arith.constant 0 : index
    %560 = vector.load %arg10[%c0_275, %c0_276] : memref<128x64xf32, #tpu.memory_space<vmem>>, vector<128x64xf32>
    %cst_277 = arith.constant dense<0.000000e+00> : vector<2x64xf32>
    %561 = tpu.matmul %559, %560, %cst_277 {dimension_numbers = #tpu.dot_dimension_numbers<[1], [0], [0], [1], [0, 0, 1, 1], [], []>} : vector<2x128xf32>, vector<128x64xf32>, vector<2x64xf32> -> vector<2x64xf32>
    %c0_278 = arith.constant 0 : index
    %c0_279 = arith.constant 0 : index
    %562 = vector.load %arg11[%c0_278, %c0_279] : memref<1x64xf32, #tpu.memory_space<vmem>>, vector<1x64xf32>
    %563 = vector.broadcast %562 : vector<1x64xf32> to vector<2x64xf32>
    %564 = arith.addf %561, %563 : vector<2x64xf32>
    %565 = math.tanh %564 : vector<2x64xf32>
    %c0_280 = arith.constant 0 : index
    %c0_281 = arith.constant 0 : index
    %566 = vector.load %arg12[%c0_280, %c0_281] : memref<64x32xf32, #tpu.memory_space<vmem>>, vector<64x32xf32>
    %cst_282 = arith.constant dense<0.000000e+00> : vector<2x32xf32>
    %567 = tpu.matmul %565, %566, %cst_282 {dimension_numbers = #tpu.dot_dimension_numbers<[1], [0], [0], [1], [0, 0, 1, 1], [], []>} : vector<2x64xf32>, vector<64x32xf32>, vector<2x32xf32> -> vector<2x32xf32>
    %c0_283 = arith.constant 0 : index
    %c0_284 = arith.constant 0 : index
    %568 = vector.load %arg13[%c0_283, %c0_284] : memref<1x32xf32, #tpu.memory_space<vmem>>, vector<1x32xf32>
    %569 = vector.broadcast %568 : vector<1x32xf32> to vector<2x32xf32>
    %570 = arith.addf %567, %569 : vector<2x32xf32>
    %571 = math.tanh %570 : vector<2x32xf32>
    %c0_285 = arith.constant 0 : index
    %c0_286 = arith.constant 0 : index
    %572 = vector.load %arg14[%c0_285, %c0_286] : memref<32x16xf32, #tpu.memory_space<vmem>>, vector<32x16xf32>
    %cst_287 = arith.constant dense<0.000000e+00> : vector<2x16xf32>
    %573 = tpu.matmul %571, %572, %cst_287 {dimension_numbers = #tpu.dot_dimension_numbers<[1], [0], [0], [1], [0, 0, 1, 1], [], []>} : vector<2x32xf32>, vector<32x16xf32>, vector<2x16xf32> -> vector<2x16xf32>
    %c0_288 = arith.constant 0 : index
    %c0_289 = arith.constant 0 : index
    %574 = vector.load %arg15[%c0_288, %c0_289] : memref<1x16xf32, #tpu.memory_space<vmem>>, vector<1x16xf32>
    %575 = vector.broadcast %574 : vector<1x16xf32> to vector<2x16xf32>
    %576 = arith.addf %573, %575 : vector<2x16xf32>
    %c0_290 = arith.constant 0 : index
    %c0_291 = arith.constant 0 : index
    %577 = vector.load %arg16[%c0_290, %c0_291] : memref<32x16xf32, #tpu.memory_space<vmem>>, vector<32x16xf32>
    %cst_292 = arith.constant dense<0.000000e+00> : vector<2x16xf32>
    %578 = tpu.matmul %571, %577, %cst_292 {dimension_numbers = #tpu.dot_dimension_numbers<[1], [0], [0], [1], [0, 0, 1, 1], [], []>} : vector<2x32xf32>, vector<32x16xf32>, vector<2x16xf32> -> vector<2x16xf32>
    %c0_293 = arith.constant 0 : index
    %c0_294 = arith.constant 0 : index
    %579 = vector.load %arg17[%c0_293, %c0_294] : memref<1x16xf32, #tpu.memory_space<vmem>>, vector<1x16xf32>
    %580 = vector.broadcast %579 : vector<1x16xf32> to vector<2x16xf32>
    %581 = arith.addf %578, %580 : vector<2x16xf32>
    %582 = arith.index_cast %c3_i32_254 : i32 to index
    %c0_295 = arith.constant 0 : index
    %c0_296 = arith.constant 0 : index
    %583 = vector.load %arg1[%582, %c0_295, %c0_296] : memref<8x2x16xf32, #tpu.memory_space<vmem>>, vector<1x2x16xf32>
    %584 = vector.shape_cast %583 : vector<1x2x16xf32> to vector<2x16xf32>
    %cst_297 = arith.constant 5.000000e-01 : f32
    %585 = vector.broadcast %cst_297 : f32 to vector<2x16xf32>
    %586 = arith.mulf %585, %581 : vector<2x16xf32>
    %587 = math.exp %586 : vector<2x16xf32>
    %588 = arith.mulf %584, %587 : vector<2x16xf32>
    %589 = arith.addf %576, %588 : vector<2x16xf32>
    %590 = arith.index_cast %c3_i32_254 : i32 to index
    %c0_298 = arith.constant 0 : index
    %c0_299 = arith.constant 0 : index
    %591 = vector.load %arg20[%590, %c0_298, %c0_299] : memref<8x2x16xf32, #tpu.memory_space<vmem>>, vector<1x2x16xf32>
    %592 = vector.shape_cast %591 : vector<1x2x16xf32> to vector<2x16xf32>
    %593 = vector.shape_cast %576 : vector<2x16xf32> to vector<1x2x16xf32>
    tpu.vector_store %arg20[%590, %c0_298, %c0_299], %593 {strides = array<i32>} : memref<8x2x16xf32, #tpu.memory_space<vmem>>, vector<1x2x16xf32>,
    %594 = arith.index_cast %c3_i32_254 : i32 to index
    %c0_300 = arith.constant 0 : index
    %c0_301 = arith.constant 0 : index
    %595 = vector.load %arg21[%594, %c0_300, %c0_301] : memref<8x2x16xf32, #tpu.memory_space<vmem>>, vector<1x2x16xf32>
    %596 = vector.shape_cast %595 : vector<1x2x16xf32> to vector<2x16xf32>
    %597 = vector.shape_cast %581 : vector<2x16xf32> to vector<1x2x16xf32>
    tpu.vector_store %arg21[%594, %c0_300, %c0_301], %597 {strides = array<i32>} : memref<8x2x16xf32, #tpu.memory_space<vmem>>, vector<1x2x16xf32>,
    %598 = arith.index_cast %c3_i32_254 : i32 to index
    %c0_302 = arith.constant 0 : index
    %c0_303 = arith.constant 0 : index
    %599 = vector.load %arg18[%598, %c0_302, %c0_303] : memref<8x2x16xf32, #tpu.memory_space<vmem>>, vector<1x2x16xf32>
    %600 = vector.shape_cast %599 : vector<1x2x16xf32> to vector<2x16xf32>
    %601 = vector.shape_cast %589 : vector<2x16xf32> to vector<1x2x16xf32>
    tpu.vector_store %arg18[%598, %c0_302, %c0_303], %601 {strides = array<i32>} : memref<8x2x16xf32, #tpu.memory_space<vmem>>, vector<1x2x16xf32>,
    %c4_i32_304 = arith.constant 4 : i32
    %602 = arith.index_cast %c4_i32_304 : i32 to index
    %c0_305 = arith.constant 0 : index
    %c0_306 = arith.constant 0 : index
    %603 = vector.load %arg19[%602, %c0_305, %c0_306] : memref<8x2x16xf32, #tpu.memory_space<vmem>>, vector<1x2x16xf32>
    %604 = vector.shape_cast %603 : vector<1x2x16xf32> to vector<2x16xf32>
    %605 = vector.shape_cast %589 : vector<2x16xf32> to vector<1x2x16xf32>
    tpu.vector_store %arg19[%602, %c0_305, %c0_306], %605 {strides = array<i32>} : memref<8x2x16xf32, #tpu.memory_space<vmem>>, vector<1x2x16xf32>,
    %c0_307 = arith.constant 0 : index
    %c0_308 = arith.constant 0 : index
    %606 = vector.load %arg4[%c0_307, %c0_308] : memref<16x32xf32, #tpu.memory_space<vmem>>, vector<16x32xf32>
    %cst_309 = arith.constant dense<0.000000e+00> : vector<2x32xf32>
    %607 = tpu.matmul %589, %606, %cst_309 {dimension_numbers = #tpu.dot_dimension_numbers<[1], [0], [0], [1], [0, 0, 1, 1], [], []>} : vector<2x16xf32>, vector<16x32xf32>, vector<2x32xf32> -> vector<2x32xf32>
    %c0_310 = arith.constant 0 : index
    %c0_311 = arith.constant 0 : index
    %608 = vector.load %arg5[%c0_310, %c0_311] : memref<1x32xf32, #tpu.memory_space<vmem>>, vector<1x32xf32>
    %609 = vector.broadcast %608 : vector<1x32xf32> to vector<2x32xf32>
    %610 = arith.addf %607, %609 : vector<2x32xf32>
    %611 = math.tanh %610 : vector<2x32xf32>
    %c0_312 = arith.constant 0 : index
    %c0_313 = arith.constant 0 : index
    %612 = vector.load %arg6[%c0_312, %c0_313] : memref<32x64xf32, #tpu.memory_space<vmem>>, vector<32x64xf32>
    %cst_314 = arith.constant dense<0.000000e+00> : vector<2x64xf32>
    %613 = tpu.matmul %611, %612, %cst_314 {dimension_numbers = #tpu.dot_dimension_numbers<[1], [0], [0], [1], [0, 0, 1, 1], [], []>} : vector<2x32xf32>, vector<32x64xf32>, vector<2x64xf32> -> vector<2x64xf32>
    %c0_315 = arith.constant 0 : index
    %c0_316 = arith.constant 0 : index
    %614 = vector.load %arg7[%c0_315, %c0_316] : memref<1x64xf32, #tpu.memory_space<vmem>>, vector<1x64xf32>
    %615 = vector.broadcast %614 : vector<1x64xf32> to vector<2x64xf32>
    %616 = arith.addf %613, %615 : vector<2x64xf32>
    %617 = math.tanh %616 : vector<2x64xf32>
    %c0_317 = arith.constant 0 : index
    %c0_318 = arith.constant 0 : index
    %618 = vector.load %arg8[%c0_317, %c0_318] : memref<64x128xf32, #tpu.memory_space<vmem>>, vector<64x128xf32>
    %cst_319 = arith.constant dense<0.000000e+00> : vector<2x128xf32>
    %619 = tpu.matmul %617, %618, %cst_319 {dimension_numbers = #tpu.dot_dimension_numbers<[1], [0], [0], [1], [0, 0, 1, 1], [], []>} : vector<2x64xf32>, vector<64x128xf32>, vector<2x128xf32> -> vector<2x128xf32>
    %c0_320 = arith.constant 0 : index
    %c0_321 = arith.constant 0 : index
    %620 = vector.load %arg9[%c0_320, %c0_321] : memref<1x128xf32, #tpu.memory_space<vmem>>, vector<1x128xf32>
    %621 = vector.broadcast %620 : vector<1x128xf32> to vector<2x128xf32>
    %622 = arith.addf %619, %621 : vector<2x128xf32>
    %623 = math.tanh %622 : vector<2x128xf32>
    %624 = arith.index_cast %c4_i32_304 : i32 to index
    %c0_322 = arith.constant 0 : index
    %c0_323 = arith.constant 0 : index
    %625 = vector.load %arg22[%624, %c0_322, %c0_323] : memref<8x2x128xf32, #tpu.memory_space<vmem>>, vector<1x2x128xf32>
    %626 = vector.shape_cast %625 : vector<1x2x128xf32> to vector<2x128xf32>
    %627 = arith.addf %623, %626 : vector<2x128xf32>
    %cst_324 = arith.constant 5.000000e-01 : f32
    %628 = vector.broadcast %cst_324 : f32 to vector<2x128xf32>
    %629 = arith.mulf %627, %628 : vector<2x128xf32>
    %c0_325 = arith.constant 0 : index
    %c0_326 = arith.constant 0 : index
    %630 = vector.load %arg10[%c0_325, %c0_326] : memref<128x64xf32, #tpu.memory_space<vmem>>, vector<128x64xf32>
    %cst_327 = arith.constant dense<0.000000e+00> : vector<2x64xf32>
    %631 = tpu.matmul %629, %630, %cst_327 {dimension_numbers = #tpu.dot_dimension_numbers<[1], [0], [0], [1], [0, 0, 1, 1], [], []>} : vector<2x128xf32>, vector<128x64xf32>, vector<2x64xf32> -> vector<2x64xf32>
    %c0_328 = arith.constant 0 : index
    %c0_329 = arith.constant 0 : index
    %632 = vector.load %arg11[%c0_328, %c0_329] : memref<1x64xf32, #tpu.memory_space<vmem>>, vector<1x64xf32>
    %633 = vector.broadcast %632 : vector<1x64xf32> to vector<2x64xf32>
    %634 = arith.addf %631, %633 : vector<2x64xf32>
    %635 = math.tanh %634 : vector<2x64xf32>
    %c0_330 = arith.constant 0 : index
    %c0_331 = arith.constant 0 : index
    %636 = vector.load %arg12[%c0_330, %c0_331] : memref<64x32xf32, #tpu.memory_space<vmem>>, vector<64x32xf32>
    %cst_332 = arith.constant dense<0.000000e+00> : vector<2x32xf32>
    %637 = tpu.matmul %635, %636, %cst_332 {dimension_numbers = #tpu.dot_dimension_numbers<[1], [0], [0], [1], [0, 0, 1, 1], [], []>} : vector<2x64xf32>, vector<64x32xf32>, vector<2x32xf32> -> vector<2x32xf32>
    %c0_333 = arith.constant 0 : index
    %c0_334 = arith.constant 0 : index
    %638 = vector.load %arg13[%c0_333, %c0_334] : memref<1x32xf32, #tpu.memory_space<vmem>>, vector<1x32xf32>
    %639 = vector.broadcast %638 : vector<1x32xf32> to vector<2x32xf32>
    %640 = arith.addf %637, %639 : vector<2x32xf32>
    %641 = math.tanh %640 : vector<2x32xf32>
    %c0_335 = arith.constant 0 : index
    %c0_336 = arith.constant 0 : index
    %642 = vector.load %arg14[%c0_335, %c0_336] : memref<32x16xf32, #tpu.memory_space<vmem>>, vector<32x16xf32>
    %cst_337 = arith.constant dense<0.000000e+00> : vector<2x16xf32>
    %643 = tpu.matmul %641, %642, %cst_337 {dimension_numbers = #tpu.dot_dimension_numbers<[1], [0], [0], [1], [0, 0, 1, 1], [], []>} : vector<2x32xf32>, vector<32x16xf32>, vector<2x16xf32> -> vector<2x16xf32>
    %c0_338 = arith.constant 0 : index
    %c0_339 = arith.constant 0 : index
    %644 = vector.load %arg15[%c0_338, %c0_339] : memref<1x16xf32, #tpu.memory_space<vmem>>, vector<1x16xf32>
    %645 = vector.broadcast %644 : vector<1x16xf32> to vector<2x16xf32>
    %646 = arith.addf %643, %645 : vector<2x16xf32>
    %c0_340 = arith.constant 0 : index
    %c0_341 = arith.constant 0 : index
    %647 = vector.load %arg16[%c0_340, %c0_341] : memref<32x16xf32, #tpu.memory_space<vmem>>, vector<32x16xf32>
    %cst_342 = arith.constant dense<0.000000e+00> : vector<2x16xf32>
    %648 = tpu.matmul %641, %647, %cst_342 {dimension_numbers = #tpu.dot_dimension_numbers<[1], [0], [0], [1], [0, 0, 1, 1], [], []>} : vector<2x32xf32>, vector<32x16xf32>, vector<2x16xf32> -> vector<2x16xf32>
    %c0_343 = arith.constant 0 : index
    %c0_344 = arith.constant 0 : index
    %649 = vector.load %arg17[%c0_343, %c0_344] : memref<1x16xf32, #tpu.memory_space<vmem>>, vector<1x16xf32>
    %650 = vector.broadcast %649 : vector<1x16xf32> to vector<2x16xf32>
    %651 = arith.addf %648, %650 : vector<2x16xf32>
    %652 = arith.index_cast %c4_i32_304 : i32 to index
    %c0_345 = arith.constant 0 : index
    %c0_346 = arith.constant 0 : index
    %653 = vector.load %arg1[%652, %c0_345, %c0_346] : memref<8x2x16xf32, #tpu.memory_space<vmem>>, vector<1x2x16xf32>
    %654 = vector.shape_cast %653 : vector<1x2x16xf32> to vector<2x16xf32>
    %cst_347 = arith.constant 5.000000e-01 : f32
    %655 = vector.broadcast %cst_347 : f32 to vector<2x16xf32>
    %656 = arith.mulf %655, %651 : vector<2x16xf32>
    %657 = math.exp %656 : vector<2x16xf32>
    %658 = arith.mulf %654, %657 : vector<2x16xf32>
    %659 = arith.addf %646, %658 : vector<2x16xf32>
    %660 = arith.index_cast %c4_i32_304 : i32 to index
    %c0_348 = arith.constant 0 : index
    %c0_349 = arith.constant 0 : index
    %661 = vector.load %arg20[%660, %c0_348, %c0_349] : memref<8x2x16xf32, #tpu.memory_space<vmem>>, vector<1x2x16xf32>
    %662 = vector.shape_cast %661 : vector<1x2x16xf32> to vector<2x16xf32>
    %663 = vector.shape_cast %646 : vector<2x16xf32> to vector<1x2x16xf32>
    tpu.vector_store %arg20[%660, %c0_348, %c0_349], %663 {strides = array<i32>} : memref<8x2x16xf32, #tpu.memory_space<vmem>>, vector<1x2x16xf32>,
    %664 = arith.index_cast %c4_i32_304 : i32 to index
    %c0_350 = arith.constant 0 : index
    %c0_351 = arith.constant 0 : index
    %665 = vector.load %arg21[%664, %c0_350, %c0_351] : memref<8x2x16xf32, #tpu.memory_space<vmem>>, vector<1x2x16xf32>
    %666 = vector.shape_cast %665 : vector<1x2x16xf32> to vector<2x16xf32>
    %667 = vector.shape_cast %651 : vector<2x16xf32> to vector<1x2x16xf32>
    tpu.vector_store %arg21[%664, %c0_350, %c0_351], %667 {strides = array<i32>} : memref<8x2x16xf32, #tpu.memory_space<vmem>>, vector<1x2x16xf32>,
    %668 = arith.index_cast %c4_i32_304 : i32 to index
    %c0_352 = arith.constant 0 : index
    %c0_353 = arith.constant 0 : index
    %669 = vector.load %arg18[%668, %c0_352, %c0_353] : memref<8x2x16xf32, #tpu.memory_space<vmem>>, vector<1x2x16xf32>
    %670 = vector.shape_cast %669 : vector<1x2x16xf32> to vector<2x16xf32>
    %671 = vector.shape_cast %659 : vector<2x16xf32> to vector<1x2x16xf32>
    tpu.vector_store %arg18[%668, %c0_352, %c0_353], %671 {strides = array<i32>} : memref<8x2x16xf32, #tpu.memory_space<vmem>>, vector<1x2x16xf32>,
    %c5_i32_354 = arith.constant 5 : i32
    %672 = arith.index_cast %c5_i32_354 : i32 to index
    %c0_355 = arith.constant 0 : index
    %c0_356 = arith.constant 0 : index
    %673 = vector.load %arg19[%672, %c0_355, %c0_356] : memref<8x2x16xf32, #tpu.memory_space<vmem>>, vector<1x2x16xf32>
    %674 = vector.shape_cast %673 : vector<1x2x16xf32> to vector<2x16xf32>
    %675 = vector.shape_cast %659 : vector<2x16xf32> to vector<1x2x16xf32>
    tpu.vector_store %arg19[%672, %c0_355, %c0_356], %675 {strides = array<i32>} : memref<8x2x16xf32, #tpu.memory_space<vmem>>, vector<1x2x16xf32>,
    %c0_357 = arith.constant 0 : index
    %c0_358 = arith.constant 0 : index
    %676 = vector.load %arg4[%c0_357, %c0_358] : memref<16x32xf32, #tpu.memory_space<vmem>>, vector<16x32xf32>
    %cst_359 = arith.constant dense<0.000000e+00> : vector<2x32xf32>
    %677 = tpu.matmul %659, %676, %cst_359 {dimension_numbers = #tpu.dot_dimension_numbers<[1], [0], [0], [1], [0, 0, 1, 1], [], []>} : vector<2x16xf32>, vector<16x32xf32>, vector<2x32xf32> -> vector<2x32xf32>
    %c0_360 = arith.constant 0 : index
    %c0_361 = arith.constant 0 : index
    %678 = vector.load %arg5[%c0_360, %c0_361] : memref<1x32xf32, #tpu.memory_space<vmem>>, vector<1x32xf32>
    %679 = vector.broadcast %678 : vector<1x32xf32> to vector<2x32xf32>
    %680 = arith.addf %677, %679 : vector<2x32xf32>
    %681 = math.tanh %680 : vector<2x32xf32>
    %c0_362 = arith.constant 0 : index
    %c0_363 = arith.constant 0 : index
    %682 = vector.load %arg6[%c0_362, %c0_363] : memref<32x64xf32, #tpu.memory_space<vmem>>, vector<32x64xf32>
    %cst_364 = arith.constant dense<0.000000e+00> : vector<2x64xf32>
    %683 = tpu.matmul %681, %682, %cst_364 {dimension_numbers = #tpu.dot_dimension_numbers<[1], [0], [0], [1], [0, 0, 1, 1], [], []>} : vector<2x32xf32>, vector<32x64xf32>, vector<2x64xf32> -> vector<2x64xf32>
    %c0_365 = arith.constant 0 : index
    %c0_366 = arith.constant 0 : index
    %684 = vector.load %arg7[%c0_365, %c0_366] : memref<1x64xf32, #tpu.memory_space<vmem>>, vector<1x64xf32>
    %685 = vector.broadcast %684 : vector<1x64xf32> to vector<2x64xf32>
    %686 = arith.addf %683, %685 : vector<2x64xf32>
    %687 = math.tanh %686 : vector<2x64xf32>
    %c0_367 = arith.constant 0 : index
    %c0_368 = arith.constant 0 : index
    %688 = vector.load %arg8[%c0_367, %c0_368] : memref<64x128xf32, #tpu.memory_space<vmem>>, vector<64x128xf32>
    %cst_369 = arith.constant dense<0.000000e+00> : vector<2x128xf32>
    %689 = tpu.matmul %687, %688, %cst_369 {dimension_numbers = #tpu.dot_dimension_numbers<[1], [0], [0], [1], [0, 0, 1, 1], [], []>} : vector<2x64xf32>, vector<64x128xf32>, vector<2x128xf32> -> vector<2x128xf32>
    %c0_370 = arith.constant 0 : index
    %c0_371 = arith.constant 0 : index
    %690 = vector.load %arg9[%c0_370, %c0_371] : memref<1x128xf32, #tpu.memory_space<vmem>>, vector<1x128xf32>
    %691 = vector.broadcast %690 : vector<1x128xf32> to vector<2x128xf32>
    %692 = arith.addf %689, %691 : vector<2x128xf32>
    %693 = math.tanh %692 : vector<2x128xf32>
    %694 = arith.index_cast %c5_i32_354 : i32 to index
    %c0_372 = arith.constant 0 : index
    %c0_373 = arith.constant 0 : index
    %695 = vector.load %arg22[%694, %c0_372, %c0_373] : memref<8x2x128xf32, #tpu.memory_space<vmem>>, vector<1x2x128xf32>
    %696 = vector.shape_cast %695 : vector<1x2x128xf32> to vector<2x128xf32>
    %697 = arith.addf %693, %696 : vector<2x128xf32>
    %cst_374 = arith.constant 5.000000e-01 : f32
    %698 = vector.broadcast %cst_374 : f32 to vector<2x128xf32>
    %699 = arith.mulf %697, %698 : vector<2x128xf32>
    %c0_375 = arith.constant 0 : index
    %c0_376 = arith.constant 0 : index
    %700 = vector.load %arg10[%c0_375, %c0_376] : memref<128x64xf32, #tpu.memory_space<vmem>>, vector<128x64xf32>
    %cst_377 = arith.constant dense<0.000000e+00> : vector<2x64xf32>
    %701 = tpu.matmul %699, %700, %cst_377 {dimension_numbers = #tpu.dot_dimension_numbers<[1], [0], [0], [1], [0, 0, 1, 1], [], []>} : vector<2x128xf32>, vector<128x64xf32>, vector<2x64xf32> -> vector<2x64xf32>
    %c0_378 = arith.constant 0 : index
    %c0_379 = arith.constant 0 : index
    %702 = vector.load %arg11[%c0_378, %c0_379] : memref<1x64xf32, #tpu.memory_space<vmem>>, vector<1x64xf32>
    %703 = vector.broadcast %702 : vector<1x64xf32> to vector<2x64xf32>
    %704 = arith.addf %701, %703 : vector<2x64xf32>
    %705 = math.tanh %704 : vector<2x64xf32>
    %c0_380 = arith.constant 0 : index
    %c0_381 = arith.constant 0 : index
    %706 = vector.load %arg12[%c0_380, %c0_381] : memref<64x32xf32, #tpu.memory_space<vmem>>, vector<64x32xf32>
    %cst_382 = arith.constant dense<0.000000e+00> : vector<2x32xf32>
    %707 = tpu.matmul %705, %706, %cst_382 {dimension_numbers = #tpu.dot_dimension_numbers<[1], [0], [0], [1], [0, 0, 1, 1], [], []>} : vector<2x64xf32>, vector<64x32xf32>, vector<2x32xf32> -> vector<2x32xf32>
    %c0_383 = arith.constant 0 : index
    %c0_384 = arith.constant 0 : index
    %708 = vector.load %arg13[%c0_383, %c0_384] : memref<1x32xf32, #tpu.memory_space<vmem>>, vector<1x32xf32>
    %709 = vector.broadcast %708 : vector<1x32xf32> to vector<2x32xf32>
    %710 = arith.addf %707, %709 : vector<2x32xf32>
    %711 = math.tanh %710 : vector<2x32xf32>
    %c0_385 = arith.constant 0 : index
    %c0_386 = arith.constant 0 : index
    %712 = vector.load %arg14[%c0_385, %c0_386] : memref<32x16xf32, #tpu.memory_space<vmem>>, vector<32x16xf32>
    %cst_387 = arith.constant dense<0.000000e+00> : vector<2x16xf32>
    %713 = tpu.matmul %711, %712, %cst_387 {dimension_numbers = #tpu.dot_dimension_numbers<[1], [0], [0], [1], [0, 0, 1, 1], [], []>} : vector<2x32xf32>, vector<32x16xf32>, vector<2x16xf32> -> vector<2x16xf32>
    %c0_388 = arith.constant 0 : index
    %c0_389 = arith.constant 0 : index
    %714 = vector.load %arg15[%c0_388, %c0_389] : memref<1x16xf32, #tpu.memory_space<vmem>>, vector<1x16xf32>
    %715 = vector.broadcast %714 : vector<1x16xf32> to vector<2x16xf32>
    %716 = arith.addf %713, %715 : vector<2x16xf32>
    %c0_390 = arith.constant 0 : index
    %c0_391 = arith.constant 0 : index
    %717 = vector.load %arg16[%c0_390, %c0_391] : memref<32x16xf32, #tpu.memory_space<vmem>>, vector<32x16xf32>
    %cst_392 = arith.constant dense<0.000000e+00> : vector<2x16xf32>
    %718 = tpu.matmul %711, %717, %cst_392 {dimension_numbers = #tpu.dot_dimension_numbers<[1], [0], [0], [1], [0, 0, 1, 1], [], []>} : vector<2x32xf32>, vector<32x16xf32>, vector<2x16xf32> -> vector<2x16xf32>
    %c0_393 = arith.constant 0 : index
    %c0_394 = arith.constant 0 : index
    %719 = vector.load %arg17[%c0_393, %c0_394] : memref<1x16xf32, #tpu.memory_space<vmem>>, vector<1x16xf32>
    %720 = vector.broadcast %719 : vector<1x16xf32> to vector<2x16xf32>
    %721 = arith.addf %718, %720 : vector<2x16xf32>
    %722 = arith.index_cast %c5_i32_354 : i32 to index
    %c0_395 = arith.constant 0 : index
    %c0_396 = arith.constant 0 : index
    %723 = vector.load %arg1[%722, %c0_395, %c0_396] : memref<8x2x16xf32, #tpu.memory_space<vmem>>, vector<1x2x16xf32>
    %724 = vector.shape_cast %723 : vector<1x2x16xf32> to vector<2x16xf32>
    %cst_397 = arith.constant 5.000000e-01 : f32
    %725 = vector.broadcast %cst_397 : f32 to vector<2x16xf32>
    %726 = arith.mulf %725, %721 : vector<2x16xf32>
    %727 = math.exp %726 : vector<2x16xf32>
    %728 = arith.mulf %724, %727 : vector<2x16xf32>
    %729 = arith.addf %716, %728 : vector<2x16xf32>
    %730 = arith.index_cast %c5_i32_354 : i32 to index
    %c0_398 = arith.constant 0 : index
    %c0_399 = arith.constant 0 : index
    %731 = vector.load %arg20[%730, %c0_398, %c0_399] : memref<8x2x16xf32, #tpu.memory_space<vmem>>, vector<1x2x16xf32>
    %732 = vector.shape_cast %731 : vector<1x2x16xf32> to vector<2x16xf32>
    %733 = vector.shape_cast %716 : vector<2x16xf32> to vector<1x2x16xf32>
    tpu.vector_store %arg20[%730, %c0_398, %c0_399], %733 {strides = array<i32>} : memref<8x2x16xf32, #tpu.memory_space<vmem>>, vector<1x2x16xf32>,
    %734 = arith.index_cast %c5_i32_354 : i32 to index
    %c0_400 = arith.constant 0 : index
    %c0_401 = arith.constant 0 : index
    %735 = vector.load %arg21[%734, %c0_400, %c0_401] : memref<8x2x16xf32, #tpu.memory_space<vmem>>, vector<1x2x16xf32>
    %736 = vector.shape_cast %735 : vector<1x2x16xf32> to vector<2x16xf32>
    %737 = vector.shape_cast %721 : vector<2x16xf32> to vector<1x2x16xf32>
    tpu.vector_store %arg21[%734, %c0_400, %c0_401], %737 {strides = array<i32>} : memref<8x2x16xf32, #tpu.memory_space<vmem>>, vector<1x2x16xf32>,
    %738 = arith.index_cast %c5_i32_354 : i32 to index
    %c0_402 = arith.constant 0 : index
    %c0_403 = arith.constant 0 : index
    %739 = vector.load %arg18[%738, %c0_402, %c0_403] : memref<8x2x16xf32, #tpu.memory_space<vmem>>, vector<1x2x16xf32>
    %740 = vector.shape_cast %739 : vector<1x2x16xf32> to vector<2x16xf32>
    %741 = vector.shape_cast %729 : vector<2x16xf32> to vector<1x2x16xf32>
    tpu.vector_store %arg18[%738, %c0_402, %c0_403], %741 {strides = array<i32>} : memref<8x2x16xf32, #tpu.memory_space<vmem>>, vector<1x2x16xf32>,
    %c6_i32_404 = arith.constant 6 : i32
    %742 = arith.index_cast %c6_i32_404 : i32 to index
    %c0_405 = arith.constant 0 : index
    %c0_406 = arith.constant 0 : index
    %743 = vector.load %arg19[%742, %c0_405, %c0_406] : memref<8x2x16xf32, #tpu.memory_space<vmem>>, vector<1x2x16xf32>
    %744 = vector.shape_cast %743 : vector<1x2x16xf32> to vector<2x16xf32>
    %745 = vector.shape_cast %729 : vector<2x16xf32> to vector<1x2x16xf32>
    tpu.vector_store %arg19[%742, %c0_405, %c0_406], %745 {strides = array<i32>} : memref<8x2x16xf32, #tpu.memory_space<vmem>>, vector<1x2x16xf32>,
    %c0_407 = arith.constant 0 : index
    %c0_408 = arith.constant 0 : index
    %746 = vector.load %arg4[%c0_407, %c0_408] : memref<16x32xf32, #tpu.memory_space<vmem>>, vector<16x32xf32>
    %cst_409 = arith.constant dense<0.000000e+00> : vector<2x32xf32>
    %747 = tpu.matmul %729, %746, %cst_409 {dimension_numbers = #tpu.dot_dimension_numbers<[1], [0], [0], [1], [0, 0, 1, 1], [], []>} : vector<2x16xf32>, vector<16x32xf32>, vector<2x32xf32> -> vector<2x32xf32>
    %c0_410 = arith.constant 0 : index
    %c0_411 = arith.constant 0 : index
    %748 = vector.load %arg5[%c0_410, %c0_411] : memref<1x32xf32, #tpu.memory_space<vmem>>, vector<1x32xf32>
    %749 = vector.broadcast %748 : vector<1x32xf32> to vector<2x32xf32>
    %750 = arith.addf %747, %749 : vector<2x32xf32>
    %751 = math.tanh %750 : vector<2x32xf32>
    %c0_412 = arith.constant 0 : index
    %c0_413 = arith.constant 0 : index
    %752 = vector.load %arg6[%c0_412, %c0_413] : memref<32x64xf32, #tpu.memory_space<vmem>>, vector<32x64xf32>
    %cst_414 = arith.constant dense<0.000000e+00> : vector<2x64xf32>
    %753 = tpu.matmul %751, %752, %cst_414 {dimension_numbers = #tpu.dot_dimension_numbers<[1], [0], [0], [1], [0, 0, 1, 1], [], []>} : vector<2x32xf32>, vector<32x64xf32>, vector<2x64xf32> -> vector<2x64xf32>
    %c0_415 = arith.constant 0 : index
    %c0_416 = arith.constant 0 : index
    %754 = vector.load %arg7[%c0_415, %c0_416] : memref<1x64xf32, #tpu.memory_space<vmem>>, vector<1x64xf32>
    %755 = vector.broadcast %754 : vector<1x64xf32> to vector<2x64xf32>
    %756 = arith.addf %753, %755 : vector<2x64xf32>
    %757 = math.tanh %756 : vector<2x64xf32>
    %c0_417 = arith.constant 0 : index
    %c0_418 = arith.constant 0 : index
    %758 = vector.load %arg8[%c0_417, %c0_418] : memref<64x128xf32, #tpu.memory_space<vmem>>, vector<64x128xf32>
    %cst_419 = arith.constant dense<0.000000e+00> : vector<2x128xf32>
    %759 = tpu.matmul %757, %758, %cst_419 {dimension_numbers = #tpu.dot_dimension_numbers<[1], [0], [0], [1], [0, 0, 1, 1], [], []>} : vector<2x64xf32>, vector<64x128xf32>, vector<2x128xf32> -> vector<2x128xf32>
    %c0_420 = arith.constant 0 : index
    %c0_421 = arith.constant 0 : index
    %760 = vector.load %arg9[%c0_420, %c0_421] : memref<1x128xf32, #tpu.memory_space<vmem>>, vector<1x128xf32>
    %761 = vector.broadcast %760 : vector<1x128xf32> to vector<2x128xf32>
    %762 = arith.addf %759, %761 : vector<2x128xf32>
    %763 = math.tanh %762 : vector<2x128xf32>
    %764 = arith.index_cast %c6_i32_404 : i32 to index
    %c0_422 = arith.constant 0 : index
    %c0_423 = arith.constant 0 : index
    %765 = vector.load %arg22[%764, %c0_422, %c0_423] : memref<8x2x128xf32, #tpu.memory_space<vmem>>, vector<1x2x128xf32>
    %766 = vector.shape_cast %765 : vector<1x2x128xf32> to vector<2x128xf32>
    %767 = arith.addf %763, %766 : vector<2x128xf32>
    %cst_424 = arith.constant 5.000000e-01 : f32
    %768 = vector.broadcast %cst_424 : f32 to vector<2x128xf32>
    %769 = arith.mulf %767, %768 : vector<2x128xf32>
    %c0_425 = arith.constant 0 : index
    %c0_426 = arith.constant 0 : index
    %770 = vector.load %arg10[%c0_425, %c0_426] : memref<128x64xf32, #tpu.memory_space<vmem>>, vector<128x64xf32>
    %cst_427 = arith.constant dense<0.000000e+00> : vector<2x64xf32>
    %771 = tpu.matmul %769, %770, %cst_427 {dimension_numbers = #tpu.dot_dimension_numbers<[1], [0], [0], [1], [0, 0, 1, 1], [], []>} : vector<2x128xf32>, vector<128x64xf32>, vector<2x64xf32> -> vector<2x64xf32>
    %c0_428 = arith.constant 0 : index
    %c0_429 = arith.constant 0 : index
    %772 = vector.load %arg11[%c0_428, %c0_429] : memref<1x64xf32, #tpu.memory_space<vmem>>, vector<1x64xf32>
    %773 = vector.broadcast %772 : vector<1x64xf32> to vector<2x64xf32>
    %774 = arith.addf %771, %773 : vector<2x64xf32>
    %775 = math.tanh %774 : vector<2x64xf32>
    %c0_430 = arith.constant 0 : index
    %c0_431 = arith.constant 0 : index
    %776 = vector.load %arg12[%c0_430, %c0_431] : memref<64x32xf32, #tpu.memory_space<vmem>>, vector<64x32xf32>
    %cst_432 = arith.constant dense<0.000000e+00> : vector<2x32xf32>
    %777 = tpu.matmul %775, %776, %cst_432 {dimension_numbers = #tpu.dot_dimension_numbers<[1], [0], [0], [1], [0, 0, 1, 1], [], []>} : vector<2x64xf32>, vector<64x32xf32>, vector<2x32xf32> -> vector<2x32xf32>
    %c0_433 = arith.constant 0 : index
    %c0_434 = arith.constant 0 : index
    %778 = vector.load %arg13[%c0_433, %c0_434] : memref<1x32xf32, #tpu.memory_space<vmem>>, vector<1x32xf32>
    %779 = vector.broadcast %778 : vector<1x32xf32> to vector<2x32xf32>
    %780 = arith.addf %777, %779 : vector<2x32xf32>
    %781 = math.tanh %780 : vector<2x32xf32>
    %c0_435 = arith.constant 0 : index
    %c0_436 = arith.constant 0 : index
    %782 = vector.load %arg14[%c0_435, %c0_436] : memref<32x16xf32, #tpu.memory_space<vmem>>, vector<32x16xf32>
    %cst_437 = arith.constant dense<0.000000e+00> : vector<2x16xf32>
    %783 = tpu.matmul %781, %782, %cst_437 {dimension_numbers = #tpu.dot_dimension_numbers<[1], [0], [0], [1], [0, 0, 1, 1], [], []>} : vector<2x32xf32>, vector<32x16xf32>, vector<2x16xf32> -> vector<2x16xf32>
    %c0_438 = arith.constant 0 : index
    %c0_439 = arith.constant 0 : index
    %784 = vector.load %arg15[%c0_438, %c0_439] : memref<1x16xf32, #tpu.memory_space<vmem>>, vector<1x16xf32>
    %785 = vector.broadcast %784 : vector<1x16xf32> to vector<2x16xf32>
    %786 = arith.addf %783, %785 : vector<2x16xf32>
    %c0_440 = arith.constant 0 : index
    %c0_441 = arith.constant 0 : index
    %787 = vector.load %arg16[%c0_440, %c0_441] : memref<32x16xf32, #tpu.memory_space<vmem>>, vector<32x16xf32>
    %cst_442 = arith.constant dense<0.000000e+00> : vector<2x16xf32>
    %788 = tpu.matmul %781, %787, %cst_442 {dimension_numbers = #tpu.dot_dimension_numbers<[1], [0], [0], [1], [0, 0, 1, 1], [], []>} : vector<2x32xf32>, vector<32x16xf32>, vector<2x16xf32> -> vector<2x16xf32>
    %c0_443 = arith.constant 0 : index
    %c0_444 = arith.constant 0 : index
    %789 = vector.load %arg17[%c0_443, %c0_444] : memref<1x16xf32, #tpu.memory_space<vmem>>, vector<1x16xf32>
    %790 = vector.broadcast %789 : vector<1x16xf32> to vector<2x16xf32>
    %791 = arith.addf %788, %790 : vector<2x16xf32>
    %792 = arith.index_cast %c6_i32_404 : i32 to index
    %c0_445 = arith.constant 0 : index
    %c0_446 = arith.constant 0 : index
    %793 = vector.load %arg1[%792, %c0_445, %c0_446] : memref<8x2x16xf32, #tpu.memory_space<vmem>>, vector<1x2x16xf32>
    %794 = vector.shape_cast %793 : vector<1x2x16xf32> to vector<2x16xf32>
    %cst_447 = arith.constant 5.000000e-01 : f32
    %795 = vector.broadcast %cst_447 : f32 to vector<2x16xf32>
    %796 = arith.mulf %795, %791 : vector<2x16xf32>
    %797 = math.exp %796 : vector<2x16xf32>
    %798 = arith.mulf %794, %797 : vector<2x16xf32>
    %799 = arith.addf %786, %798 : vector<2x16xf32>
    %800 = arith.index_cast %c6_i32_404 : i32 to index
    %c0_448 = arith.constant 0 : index
    %c0_449 = arith.constant 0 : index
    %801 = vector.load %arg20[%800, %c0_448, %c0_449] : memref<8x2x16xf32, #tpu.memory_space<vmem>>, vector<1x2x16xf32>
    %802 = vector.shape_cast %801 : vector<1x2x16xf32> to vector<2x16xf32>
    %803 = vector.shape_cast %786 : vector<2x16xf32> to vector<1x2x16xf32>
    tpu.vector_store %arg20[%800, %c0_448, %c0_449], %803 {strides = array<i32>} : memref<8x2x16xf32, #tpu.memory_space<vmem>>, vector<1x2x16xf32>,
    %804 = arith.index_cast %c6_i32_404 : i32 to index
    %c0_450 = arith.constant 0 : index
    %c0_451 = arith.constant 0 : index
    %805 = vector.load %arg21[%804, %c0_450, %c0_451] : memref<8x2x16xf32, #tpu.memory_space<vmem>>, vector<1x2x16xf32>
    %806 = vector.shape_cast %805 : vector<1x2x16xf32> to vector<2x16xf32>
    %807 = vector.shape_cast %791 : vector<2x16xf32> to vector<1x2x16xf32>
    tpu.vector_store %arg21[%804, %c0_450, %c0_451], %807 {strides = array<i32>} : memref<8x2x16xf32, #tpu.memory_space<vmem>>, vector<1x2x16xf32>,
    %808 = arith.index_cast %c6_i32_404 : i32 to index
    %c0_452 = arith.constant 0 : index
    %c0_453 = arith.constant 0 : index
    %809 = vector.load %arg18[%808, %c0_452, %c0_453] : memref<8x2x16xf32, #tpu.memory_space<vmem>>, vector<1x2x16xf32>
    %810 = vector.shape_cast %809 : vector<1x2x16xf32> to vector<2x16xf32>
    %811 = vector.shape_cast %799 : vector<2x16xf32> to vector<1x2x16xf32>
    tpu.vector_store %arg18[%808, %c0_452, %c0_453], %811 {strides = array<i32>} : memref<8x2x16xf32, #tpu.memory_space<vmem>>, vector<1x2x16xf32>,
    %c7_i32_454 = arith.constant 7 : i32
    %812 = arith.index_cast %c7_i32_454 : i32 to index
    %c0_455 = arith.constant 0 : index
    %c0_456 = arith.constant 0 : index
    %813 = vector.load %arg19[%812, %c0_455, %c0_456] : memref<8x2x16xf32, #tpu.memory_space<vmem>>, vector<1x2x16xf32>
    %814 = vector.shape_cast %813 : vector<1x2x16xf32> to vector<2x16xf32>
    %815 = vector.shape_cast %799 : vector<2x16xf32> to vector<1x2x16xf32>
    tpu.vector_store %arg19[%812, %c0_455, %c0_456], %815 {strides = array<i32>} : memref<8x2x16xf32, #tpu.memory_space<vmem>>, vector<1x2x16xf32>,
    %c0_457 = arith.constant 0 : index
    %c0_458 = arith.constant 0 : index
    %816 = vector.load %arg4[%c0_457, %c0_458] : memref<16x32xf32, #tpu.memory_space<vmem>>, vector<16x32xf32>
    %cst_459 = arith.constant dense<0.000000e+00> : vector<2x32xf32>
    %817 = tpu.matmul %799, %816, %cst_459 {dimension_numbers = #tpu.dot_dimension_numbers<[1], [0], [0], [1], [0, 0, 1, 1], [], []>} : vector<2x16xf32>, vector<16x32xf32>, vector<2x32xf32> -> vector<2x32xf32>
    %c0_460 = arith.constant 0 : index
    %c0_461 = arith.constant 0 : index
    %818 = vector.load %arg5[%c0_460, %c0_461] : memref<1x32xf32, #tpu.memory_space<vmem>>, vector<1x32xf32>
    %819 = vector.broadcast %818 : vector<1x32xf32> to vector<2x32xf32>
    %820 = arith.addf %817, %819 : vector<2x32xf32>
    %821 = math.tanh %820 : vector<2x32xf32>
    %c0_462 = arith.constant 0 : index
    %c0_463 = arith.constant 0 : index
    %822 = vector.load %arg6[%c0_462, %c0_463] : memref<32x64xf32, #tpu.memory_space<vmem>>, vector<32x64xf32>
    %cst_464 = arith.constant dense<0.000000e+00> : vector<2x64xf32>
    %823 = tpu.matmul %821, %822, %cst_464 {dimension_numbers = #tpu.dot_dimension_numbers<[1], [0], [0], [1], [0, 0, 1, 1], [], []>} : vector<2x32xf32>, vector<32x64xf32>, vector<2x64xf32> -> vector<2x64xf32>
    %c0_465 = arith.constant 0 : index
    %c0_466 = arith.constant 0 : index
    %824 = vector.load %arg7[%c0_465, %c0_466] : memref<1x64xf32, #tpu.memory_space<vmem>>, vector<1x64xf32>
    %825 = vector.broadcast %824 : vector<1x64xf32> to vector<2x64xf32>
    %826 = arith.addf %823, %825 : vector<2x64xf32>
    %827 = math.tanh %826 : vector<2x64xf32>
    %c0_467 = arith.constant 0 : index
    %c0_468 = arith.constant 0 : index
    %828 = vector.load %arg8[%c0_467, %c0_468] : memref<64x128xf32, #tpu.memory_space<vmem>>, vector<64x128xf32>
    %cst_469 = arith.constant dense<0.000000e+00> : vector<2x128xf32>
    %829 = tpu.matmul %827, %828, %cst_469 {dimension_numbers = #tpu.dot_dimension_numbers<[1], [0], [0], [1], [0, 0, 1, 1], [], []>} : vector<2x64xf32>, vector<64x128xf32>, vector<2x128xf32> -> vector<2x128xf32>
    %c0_470 = arith.constant 0 : index
    %c0_471 = arith.constant 0 : index
    %830 = vector.load %arg9[%c0_470, %c0_471] : memref<1x128xf32, #tpu.memory_space<vmem>>, vector<1x128xf32>
    %831 = vector.broadcast %830 : vector<1x128xf32> to vector<2x128xf32>
    %832 = arith.addf %829, %831 : vector<2x128xf32>
    %833 = math.tanh %832 : vector<2x128xf32>
    %834 = arith.index_cast %c7_i32_454 : i32 to index
    %c0_472 = arith.constant 0 : index
    %c0_473 = arith.constant 0 : index
    %835 = vector.load %arg22[%834, %c0_472, %c0_473] : memref<8x2x128xf32, #tpu.memory_space<vmem>>, vector<1x2x128xf32>
    %836 = vector.shape_cast %835 : vector<1x2x128xf32> to vector<2x128xf32>
    %837 = arith.addf %833, %836 : vector<2x128xf32>
    %cst_474 = arith.constant 5.000000e-01 : f32
    %838 = vector.broadcast %cst_474 : f32 to vector<2x128xf32>
    %839 = arith.mulf %837, %838 : vector<2x128xf32>
    %c0_475 = arith.constant 0 : index
    %c0_476 = arith.constant 0 : index
    %840 = vector.load %arg10[%c0_475, %c0_476] : memref<128x64xf32, #tpu.memory_space<vmem>>, vector<128x64xf32>
    %cst_477 = arith.constant dense<0.000000e+00> : vector<2x64xf32>
    %841 = tpu.matmul %839, %840, %cst_477 {dimension_numbers = #tpu.dot_dimension_numbers<[1], [0], [0], [1], [0, 0, 1, 1], [], []>} : vector<2x128xf32>, vector<128x64xf32>, vector<2x64xf32> -> vector<2x64xf32>
    %c0_478 = arith.constant 0 : index
    %c0_479 = arith.constant 0 : index
    %842 = vector.load %arg11[%c0_478, %c0_479] : memref<1x64xf32, #tpu.memory_space<vmem>>, vector<1x64xf32>
    %843 = vector.broadcast %842 : vector<1x64xf32> to vector<2x64xf32>
    %844 = arith.addf %841, %843 : vector<2x64xf32>
    %845 = math.tanh %844 : vector<2x64xf32>
    %c0_480 = arith.constant 0 : index
    %c0_481 = arith.constant 0 : index
    %846 = vector.load %arg12[%c0_480, %c0_481] : memref<64x32xf32, #tpu.memory_space<vmem>>, vector<64x32xf32>
    %cst_482 = arith.constant dense<0.000000e+00> : vector<2x32xf32>
    %847 = tpu.matmul %845, %846, %cst_482 {dimension_numbers = #tpu.dot_dimension_numbers<[1], [0], [0], [1], [0, 0, 1, 1], [], []>} : vector<2x64xf32>, vector<64x32xf32>, vector<2x32xf32> -> vector<2x32xf32>
    %c0_483 = arith.constant 0 : index
    %c0_484 = arith.constant 0 : index
    %848 = vector.load %arg13[%c0_483, %c0_484] : memref<1x32xf32, #tpu.memory_space<vmem>>, vector<1x32xf32>
    %849 = vector.broadcast %848 : vector<1x32xf32> to vector<2x32xf32>
    %850 = arith.addf %847, %849 : vector<2x32xf32>
    %851 = math.tanh %850 : vector<2x32xf32>
    %c0_485 = arith.constant 0 : index
    %c0_486 = arith.constant 0 : index
    %852 = vector.load %arg14[%c0_485, %c0_486] : memref<32x16xf32, #tpu.memory_space<vmem>>, vector<32x16xf32>
    %cst_487 = arith.constant dense<0.000000e+00> : vector<2x16xf32>
    %853 = tpu.matmul %851, %852, %cst_487 {dimension_numbers = #tpu.dot_dimension_numbers<[1], [0], [0], [1], [0, 0, 1, 1], [], []>} : vector<2x32xf32>, vector<32x16xf32>, vector<2x16xf32> -> vector<2x16xf32>
    %c0_488 = arith.constant 0 : index
    %c0_489 = arith.constant 0 : index
    %854 = vector.load %arg15[%c0_488, %c0_489] : memref<1x16xf32, #tpu.memory_space<vmem>>, vector<1x16xf32>
    %855 = vector.broadcast %854 : vector<1x16xf32> to vector<2x16xf32>
    %856 = arith.addf %853, %855 : vector<2x16xf32>
    %c0_490 = arith.constant 0 : index
    %c0_491 = arith.constant 0 : index
    %857 = vector.load %arg16[%c0_490, %c0_491] : memref<32x16xf32, #tpu.memory_space<vmem>>, vector<32x16xf32>
    %cst_492 = arith.constant dense<0.000000e+00> : vector<2x16xf32>
    %858 = tpu.matmul %851, %857, %cst_492 {dimension_numbers = #tpu.dot_dimension_numbers<[1], [0], [0], [1], [0, 0, 1, 1], [], []>} : vector<2x32xf32>, vector<32x16xf32>, vector<2x16xf32> -> vector<2x16xf32>
    %c0_493 = arith.constant 0 : index
    %c0_494 = arith.constant 0 : index
    %859 = vector.load %arg17[%c0_493, %c0_494] : memref<1x16xf32, #tpu.memory_space<vmem>>, vector<1x16xf32>
    %860 = vector.broadcast %859 : vector<1x16xf32> to vector<2x16xf32>
    %861 = arith.addf %858, %860 : vector<2x16xf32>
    %862 = arith.index_cast %c7_i32_454 : i32 to index
    %c0_495 = arith.constant 0 : index
    %c0_496 = arith.constant 0 : index
    %863 = vector.load %arg1[%862, %c0_495, %c0_496] : memref<8x2x16xf32, #tpu.memory_space<vmem>>, vector<1x2x16xf32>
    %864 = vector.shape_cast %863 : vector<1x2x16xf32> to vector<2x16xf32>
    %cst_497 = arith.constant 5.000000e-01 : f32
    %865 = vector.broadcast %cst_497 : f32 to vector<2x16xf32>
    %866 = arith.mulf %865, %861 : vector<2x16xf32>
    %867 = math.exp %866 : vector<2x16xf32>
    %868 = arith.mulf %864, %867 : vector<2x16xf32>
    %869 = arith.addf %856, %868 : vector<2x16xf32>
    %870 = arith.index_cast %c7_i32_454 : i32 to index
    %c0_498 = arith.constant 0 : index
    %c0_499 = arith.constant 0 : index
    %871 = vector.load %arg20[%870, %c0_498, %c0_499] : memref<8x2x16xf32, #tpu.memory_space<vmem>>, vector<1x2x16xf32>
    %872 = vector.shape_cast %871 : vector<1x2x16xf32> to vector<2x16xf32>
    %873 = vector.shape_cast %856 : vector<2x16xf32> to vector<1x2x16xf32>
    tpu.vector_store %arg20[%870, %c0_498, %c0_499], %873 {strides = array<i32>} : memref<8x2x16xf32, #tpu.memory_space<vmem>>, vector<1x2x16xf32>,
    %874 = arith.index_cast %c7_i32_454 : i32 to index
    %c0_500 = arith.constant 0 : index
    %c0_501 = arith.constant 0 : index
    %875 = vector.load %arg21[%874, %c0_500, %c0_501] : memref<8x2x16xf32, #tpu.memory_space<vmem>>, vector<1x2x16xf32>
    %876 = vector.shape_cast %875 : vector<1x2x16xf32> to vector<2x16xf32>
    %877 = vector.shape_cast %861 : vector<2x16xf32> to vector<1x2x16xf32>
    tpu.vector_store %arg21[%874, %c0_500, %c0_501], %877 {strides = array<i32>} : memref<8x2x16xf32, #tpu.memory_space<vmem>>, vector<1x2x16xf32>,
    %878 = arith.index_cast %c7_i32_454 : i32 to index
    %c0_502 = arith.constant 0 : index
    %c0_503 = arith.constant 0 : index
    %879 = vector.load %arg18[%878, %c0_502, %c0_503] : memref<8x2x16xf32, #tpu.memory_space<vmem>>, vector<1x2x16xf32>
    %880 = vector.shape_cast %879 : vector<1x2x16xf32> to vector<2x16xf32>
    %881 = vector.shape_cast %869 : vector<2x16xf32> to vector<1x2x16xf32>
    tpu.vector_store %arg18[%878, %c0_502, %c0_503], %881 {strides = array<i32>} : memref<8x2x16xf32, #tpu.memory_space<vmem>>, vector<1x2x16xf32>,
    %c8_i32_504 = arith.constant 8 : i32
    return
  }
}

module attributes {stable_mosaic.version = 11 : i64} {
  func.func @generate_kernel(%arg0: i32, %arg1: memref<16x16xf32, #tpu.memory_space<vmem>>, %arg2: memref<16x16xf32, #tpu.memory_space<vmem>>, %arg3: memref<16x16xf32, #tpu.memory_space<vmem>>, %arg4: memref<16x256xbf16, #tpu.memory_space<vmem>>, %arg5: memref<16x16xf32, #tpu.memory_space<vmem>>, %arg6: memref<16x16xf32, #tpu.memory_space<vmem>>, %arg7: memref<16x16xf32, #tpu.memory_space<vmem>>, %arg8: memref<1x16xf32, #tpu.memory_space<vmem>>, %arg9: memref<16x16xf32, #tpu.memory_space<vmem>>, %arg10: memref<1x16xf32, #tpu.memory_space<vmem>>, %arg11: memref<16x16xf32, #tpu.memory_space<vmem>>, %arg12: memref<1x16xf32, #tpu.memory_space<vmem>>, %arg13: memref<16x16xf32, #tpu.memory_space<vmem>>, %arg14: memref<1x16xf32, #tpu.memory_space<vmem>>, %arg15: memref<16x16xf32, #tpu.memory_space<vmem>>, %arg16: memref<1x16xf32, #tpu.memory_space<vmem>>, %arg17: memref<16x16xf32, #tpu.memory_space<vmem>>, %arg18: memref<1x16xf32, #tpu.memory_space<vmem>>, %arg19: memref<16x16xf32, #tpu.memory_space<vmem>>, %arg20: memref<1x16xf32, #tpu.memory_space<vmem>>, %arg21: memref<16x32xbf16, #tpu.memory_space<vmem>>, %arg22: memref<1x32xf32, #tpu.memory_space<vmem>>, %arg23: memref<32x64xbf16, #tpu.memory_space<vmem>>, %arg24: memref<1x64xf32, #tpu.memory_space<vmem>>, %arg25: memref<64x128xbf16, #tpu.memory_space<vmem>>, %arg26: memref<1x128xf32, #tpu.memory_space<vmem>>, %arg27: memref<128x256xbf16, #tpu.memory_space<vmem>>, %arg28: memref<1x256xf32, #tpu.memory_space<vmem>>, %arg29: memref<256x256xbf16, #tpu.memory_space<vmem>>, %arg30: memref<256x256xbf16, #tpu.memory_space<vmem>>, %arg31: memref<1x256xf32, #tpu.memory_space<vmem>>, %arg32: memref<256x128xbf16, #tpu.memory_space<vmem>>, %arg33: memref<1x128xf32, #tpu.memory_space<vmem>>, %arg34: memref<16x128xf32, #tpu.memory_space<vmem>>, %arg35: memref<16x16xf32, #tpu.memory_space<vmem>>, %arg36: memref<16x16xf32, #tpu.memory_space<vmem>>, %arg37: memref<16x16xf32, #tpu.memory_space<vmem>>) attributes {dimension_semantics = [#tpu.dimension_semantics<parallel>], iteration_bounds = array<i64: 1>, scalar_prefetch = 0 : i64, scratch_operands = 0 : i64, tpu.core_type = #tpu.core_type<tc>, window_params = [{transform_indices = @transform_0, window_bounds = array<i64: 16, 16>}, {transform_indices = @transform_1, window_bounds = array<i64: 16, 16>}, {transform_indices = @transform_2, window_bounds = array<i64: 16, 16>}, {transform_indices = @transform_3, window_bounds = array<i64: 16, 256>}, {transform_indices = @transform_4, window_bounds = array<i64: 16, 16>}, {pipeline_mode = #tpu.pipeline_mode<synchronous>, transform_indices = @transform_5, window_bounds = array<i64: 16, 16>}, {pipeline_mode = #tpu.pipeline_mode<synchronous>, transform_indices = @transform_6, window_bounds = array<i64: 16, 16>}, {pipeline_mode = #tpu.pipeline_mode<synchronous>, transform_indices = @transform_7, window_bounds = array<i64: 1, 16>}, {pipeline_mode = #tpu.pipeline_mode<synchronous>, transform_indices = @transform_8, window_bounds = array<i64: 16, 16>}, {pipeline_mode = #tpu.pipeline_mode<synchronous>, transform_indices = @transform_9, window_bounds = array<i64: 1, 16>}, {pipeline_mode = #tpu.pipeline_mode<synchronous>, transform_indices = @transform_10, window_bounds = array<i64: 16, 16>}, {pipeline_mode = #tpu.pipeline_mode<synchronous>, transform_indices = @transform_11, window_bounds = array<i64: 1, 16>}, {pipeline_mode = #tpu.pipeline_mode<synchronous>, transform_indices = @transform_12, window_bounds = array<i64: 16, 16>}, {pipeline_mode = #tpu.pipeline_mode<synchronous>, transform_indices = @transform_13, window_bounds = array<i64: 1, 16>}, {pipeline_mode = #tpu.pipeline_mode<synchronous>, transform_indices = @transform_14, window_bounds = array<i64: 16, 16>}, {pipeline_mode = #tpu.pipeline_mode<synchronous>, transform_indices = @transform_15, window_bounds = array<i64: 1, 16>}, {pipeline_mode = #tpu.pipeline_mode<synchronous>, transform_indices = @transform_16, window_bounds = array<i64: 16, 16>}, {pipeline_mode = #tpu.pipeline_mode<synchronous>, transform_indices = @transform_17, window_bounds = array<i64: 1, 16>}, {pipeline_mode = #tpu.pipeline_mode<synchronous>, transform_indices = @transform_18, window_bounds = array<i64: 16, 16>}, {pipeline_mode = #tpu.pipeline_mode<synchronous>, transform_indices = @transform_19, window_bounds = array<i64: 1, 16>}, {pipeline_mode = #tpu.pipeline_mode<synchronous>, transform_indices = @transform_20, window_bounds = array<i64: 16, 32>}, {pipeline_mode = #tpu.pipeline_mode<synchronous>, transform_indices = @transform_21, window_bounds = array<i64: 1, 32>}, {pipeline_mode = #tpu.pipeline_mode<synchronous>, transform_indices = @transform_22, window_bounds = array<i64: 32, 64>}, {pipeline_mode = #tpu.pipeline_mode<synchronous>, transform_indices = @transform_23, window_bounds = array<i64: 1, 64>}, {pipeline_mode = #tpu.pipeline_mode<synchronous>, transform_indices = @transform_24, window_bounds = array<i64: 64, 128>}, {pipeline_mode = #tpu.pipeline_mode<synchronous>, transform_indices = @transform_25, window_bounds = array<i64: 1, 128>}, {pipeline_mode = #tpu.pipeline_mode<synchronous>, transform_indices = @transform_26, window_bounds = array<i64: 128, 256>}, {pipeline_mode = #tpu.pipeline_mode<synchronous>, transform_indices = @transform_27, window_bounds = array<i64: 1, 256>}, {pipeline_mode = #tpu.pipeline_mode<synchronous>, transform_indices = @transform_28, window_bounds = array<i64: 256, 256>}, {pipeline_mode = #tpu.pipeline_mode<synchronous>, transform_indices = @transform_29, window_bounds = array<i64: 256, 256>}, {pipeline_mode = #tpu.pipeline_mode<synchronous>, transform_indices = @transform_30, window_bounds = array<i64: 1, 256>}, {pipeline_mode = #tpu.pipeline_mode<synchronous>, transform_indices = @transform_31, window_bounds = array<i64: 256, 128>}, {pipeline_mode = #tpu.pipeline_mode<synchronous>, transform_indices = @transform_32, window_bounds = array<i64: 1, 128>}, {transform_indices = @transform_33, window_bounds = array<i64: 16, 128>}, {transform_indices = @transform_34, window_bounds = array<i64: 16, 16>}, {transform_indices = @transform_35, window_bounds = array<i64: 16, 16>}, {transform_indices = @transform_36, window_bounds = array<i64: 16, 16>}]} {
    %c0 = arith.constant 0 : index
    %c0_0 = arith.constant 0 : index
    %0 = vector.load %arg2[%c0, %c0_0] : memref<16x16xf32, #tpu.memory_space<vmem>>, vector<16x16xf32>
    %c0_1 = arith.constant 0 : index
    %c0_2 = arith.constant 0 : index
    %1 = vector.load %arg6[%c0_1, %c0_2] : memref<16x16xf32, #tpu.memory_space<vmem>>, vector<16x16xf32>
    %cst = arith.constant dense<0.000000e+00> : vector<16x16xf32>
    %2 = tpu.matmul %0, %1, %cst {dimension_numbers = #tpu.dot_dimension_numbers<[1], [0], [0], [1], [0, 0, 1, 1], [], []>} : vector<16x16xf32>, vector<16x16xf32>, vector<16x16xf32> -> vector<16x16xf32>
    %c0_3 = arith.constant 0 : index
    %c0_4 = arith.constant 0 : index
    %3 = vector.load %arg3[%c0_3, %c0_4] : memref<16x16xf32, #tpu.memory_space<vmem>>, vector<16x16xf32>
    %c0_5 = arith.constant 0 : index
    %c0_6 = arith.constant 0 : index
    %4 = vector.load %arg7[%c0_5, %c0_6] : memref<16x16xf32, #tpu.memory_space<vmem>>, vector<16x16xf32>
    %cst_7 = arith.constant dense<0.000000e+00> : vector<16x16xf32>
    %5 = tpu.matmul %3, %4, %cst_7 {dimension_numbers = #tpu.dot_dimension_numbers<[1], [0], [0], [1], [0, 0, 1, 1], [], []>} : vector<16x16xf32>, vector<16x16xf32>, vector<16x16xf32> -> vector<16x16xf32>
    %6 = arith.addf %2, %5 : vector<16x16xf32>
    %c0_8 = arith.constant 0 : index
    %c0_9 = arith.constant 0 : index
    %7 = vector.load %arg8[%c0_8, %c0_9] : memref<1x16xf32, #tpu.memory_space<vmem>>, vector<1x16xf32>
    %8 = vector.broadcast %7 : vector<1x16xf32> to vector<16x16xf32>
    %9 = arith.addf %6, %8 : vector<16x16xf32>
    %10 = math.tanh %9 : vector<16x16xf32>
    %c0_10 = arith.constant 0 : index
    %c0_11 = arith.constant 0 : index
    %11 = vector.load %arg9[%c0_10, %c0_11] : memref<16x16xf32, #tpu.memory_space<vmem>>, vector<16x16xf32>
    %cst_12 = arith.constant dense<0.000000e+00> : vector<16x16xf32>
    %12 = tpu.matmul %10, %11, %cst_12 {dimension_numbers = #tpu.dot_dimension_numbers<[1], [0], [0], [1], [0, 0, 1, 1], [], []>} : vector<16x16xf32>, vector<16x16xf32>, vector<16x16xf32> -> vector<16x16xf32>
    %c0_13 = arith.constant 0 : index
    %c0_14 = arith.constant 0 : index
    %13 = vector.load %arg10[%c0_13, %c0_14] : memref<1x16xf32, #tpu.memory_space<vmem>>, vector<1x16xf32>
    %14 = vector.broadcast %13 : vector<1x16xf32> to vector<16x16xf32>
    %15 = arith.addf %12, %14 : vector<16x16xf32>
    %cst_15 = arith.constant 0.000000e+00 : f32
    %16 = vector.broadcast %cst_15 : f32 to vector<16x16xf32>
    %17 = arith.maximumf %15, %16 : vector<16x16xf32>
    %c0_16 = arith.constant 0 : index
    %c0_17 = arith.constant 0 : index
    %18 = vector.load %arg11[%c0_16, %c0_17] : memref<16x16xf32, #tpu.memory_space<vmem>>, vector<16x16xf32>
    %cst_18 = arith.constant dense<0.000000e+00> : vector<16x16xf32>
    %19 = tpu.matmul %17, %18, %cst_18 {dimension_numbers = #tpu.dot_dimension_numbers<[1], [0], [0], [1], [0, 0, 1, 1], [], []>} : vector<16x16xf32>, vector<16x16xf32>, vector<16x16xf32> -> vector<16x16xf32>
    %c0_19 = arith.constant 0 : index
    %c0_20 = arith.constant 0 : index
    %20 = vector.load %arg12[%c0_19, %c0_20] : memref<1x16xf32, #tpu.memory_space<vmem>>, vector<1x16xf32>
    %21 = vector.broadcast %20 : vector<1x16xf32> to vector<16x16xf32>
    %22 = arith.addf %19, %21 : vector<16x16xf32>
    %23 = arith.negf %22 : vector<16x16xf32>
    %24 = math.exp %23 : vector<16x16xf32>
    %cst_21 = arith.constant 1.000000e+00 : f32
    %25 = vector.broadcast %cst_21 : f32 to vector<16x16xf32>
    %26 = arith.addf %25, %24 : vector<16x16xf32>
    %27 = arith.divf %25, %26 : vector<16x16xf32>
    %c0_22 = arith.constant 0 : index
    %c0_23 = arith.constant 0 : index
    %28 = vector.load %arg13[%c0_22, %c0_23] : memref<16x16xf32, #tpu.memory_space<vmem>>, vector<16x16xf32>
    %cst_24 = arith.constant dense<0.000000e+00> : vector<16x16xf32>
    %29 = tpu.matmul %10, %28, %cst_24 {dimension_numbers = #tpu.dot_dimension_numbers<[1], [0], [0], [1], [0, 0, 1, 1], [], []>} : vector<16x16xf32>, vector<16x16xf32>, vector<16x16xf32> -> vector<16x16xf32>
    %c0_25 = arith.constant 0 : index
    %c0_26 = arith.constant 0 : index
    %30 = vector.load %arg14[%c0_25, %c0_26] : memref<1x16xf32, #tpu.memory_space<vmem>>, vector<1x16xf32>
    %31 = vector.broadcast %30 : vector<1x16xf32> to vector<16x16xf32>
    %32 = arith.addf %29, %31 : vector<16x16xf32>
    %cst_27 = arith.constant 0.000000e+00 : f32
    %33 = vector.broadcast %cst_27 : f32 to vector<16x16xf32>
    %34 = arith.maximumf %32, %33 : vector<16x16xf32>
    %c0_28 = arith.constant 0 : index
    %c0_29 = arith.constant 0 : index
    %35 = vector.load %arg15[%c0_28, %c0_29] : memref<16x16xf32, #tpu.memory_space<vmem>>, vector<16x16xf32>
    %cst_30 = arith.constant dense<0.000000e+00> : vector<16x16xf32>
    %36 = tpu.matmul %34, %35, %cst_30 {dimension_numbers = #tpu.dot_dimension_numbers<[1], [0], [0], [1], [0, 0, 1, 1], [], []>} : vector<16x16xf32>, vector<16x16xf32>, vector<16x16xf32> -> vector<16x16xf32>
    %c0_31 = arith.constant 0 : index
    %c0_32 = arith.constant 0 : index
    %37 = vector.load %arg16[%c0_31, %c0_32] : memref<1x16xf32, #tpu.memory_space<vmem>>, vector<1x16xf32>
    %38 = vector.broadcast %37 : vector<1x16xf32> to vector<16x16xf32>
    %39 = arith.addf %36, %38 : vector<16x16xf32>
    %cst_33 = arith.constant 1.000000e+00 : f32
    %40 = vector.broadcast %cst_33 : f32 to vector<16x16xf32>
    %41 = arith.subf %40, %27 : vector<16x16xf32>
    %c0_34 = arith.constant 0 : index
    %c0_35 = arith.constant 0 : index
    %42 = vector.load %arg17[%c0_34, %c0_35] : memref<16x16xf32, #tpu.memory_space<vmem>>, vector<16x16xf32>
    %cst_36 = arith.constant dense<0.000000e+00> : vector<16x16xf32>
    %43 = tpu.matmul %10, %42, %cst_36 {dimension_numbers = #tpu.dot_dimension_numbers<[1], [0], [0], [1], [0, 0, 1, 1], [], []>} : vector<16x16xf32>, vector<16x16xf32>, vector<16x16xf32> -> vector<16x16xf32>
    %c0_37 = arith.constant 0 : index
    %c0_38 = arith.constant 0 : index
    %44 = vector.load %arg18[%c0_37, %c0_38] : memref<1x16xf32, #tpu.memory_space<vmem>>, vector<1x16xf32>
    %45 = vector.broadcast %44 : vector<1x16xf32> to vector<16x16xf32>
    %46 = arith.addf %43, %45 : vector<16x16xf32>
    %47 = arith.mulf %41, %46 : vector<16x16xf32>
    %48 = arith.mulf %27, %39 : vector<16x16xf32>
    %49 = arith.addf %47, %48 : vector<16x16xf32>
    %cst_39 = arith.constant 0.000000e+00 : f32
    %50 = vector.broadcast %cst_39 : f32 to vector<16x16xf32>
    %51 = arith.maximumf %39, %50 : vector<16x16xf32>
    %c0_40 = arith.constant 0 : index
    %c0_41 = arith.constant 0 : index
    %52 = vector.load %arg19[%c0_40, %c0_41] : memref<16x16xf32, #tpu.memory_space<vmem>>, vector<16x16xf32>
    %cst_42 = arith.constant dense<0.000000e+00> : vector<16x16xf32>
    %53 = tpu.matmul %51, %52, %cst_42 {dimension_numbers = #tpu.dot_dimension_numbers<[1], [0], [0], [1], [0, 0, 1, 1], [], []>} : vector<16x16xf32>, vector<16x16xf32>, vector<16x16xf32> -> vector<16x16xf32>
    %c0_43 = arith.constant 0 : index
    %c0_44 = arith.constant 0 : index
    %54 = vector.load %arg20[%c0_43, %c0_44] : memref<1x16xf32, #tpu.memory_space<vmem>>, vector<1x16xf32>
    %55 = vector.broadcast %54 : vector<1x16xf32> to vector<16x16xf32>
    %56 = arith.addf %53, %55 : vector<16x16xf32>
    %cst_45 = arith.constant 2.000000e+01 : f32
    %57 = vector.broadcast %cst_45 : f32 to vector<16x16xf32>
    %58 = arith.cmpf ogt, %56, %57 : vector<16x16xf32>
    %cst_46 = arith.constant 2.000000e+01 : f32
    %59 = vector.broadcast %cst_46 : f32 to vector<16x16xf32>
    %60 = arith.minimumf %56, %59 : vector<16x16xf32>
    %61 = math.exp %60 : vector<16x16xf32>
    %62 = math.log1p %61 : vector<16x16xf32>
    %63 = arith.select %58, %56, %62 : vector<16x16xi1>, vector<16x16xf32>
    %cst_47 = arith.constant 9.99999968E-21 : f32
    %64 = vector.broadcast %cst_47 : f32 to vector<16x16xf32>
    %65 = arith.maximumf %63, %64 : vector<16x16xf32>
    %66 = math.log %65 : vector<16x16xf32>
    %c0_48 = arith.constant 0 : index
    %c0_49 = arith.constant 0 : index
    %67 = vector.load %arg5[%c0_48, %c0_49] : memref<16x16xf32, #tpu.memory_space<vmem>>, vector<16x16xf32>
    %cst_50 = arith.constant 5.000000e-01 : f32
    %68 = vector.broadcast %cst_50 : f32 to vector<16x16xf32>
    %69 = arith.mulf %68, %66 : vector<16x16xf32>
    %70 = math.exp %69 : vector<16x16xf32>
    %71 = arith.mulf %67, %70 : vector<16x16xf32>
    %72 = arith.addf %49, %71 : vector<16x16xf32>
    %c0_51 = arith.constant 0 : index
    %c0_52 = arith.constant 0 : index
    %73 = vector.load %arg35[%c0_51, %c0_52] : memref<16x16xf32, #tpu.memory_space<vmem>>, vector<16x16xf32>
    tpu.vector_store %arg35[%c0_51, %c0_52], %72 {strides = array<i32>} : memref<16x16xf32, #tpu.memory_space<vmem>>, vector<16x16xf32>,
    %c0_53 = arith.constant 0 : index
    %c0_54 = arith.constant 0 : index
    %74 = vector.load %arg36[%c0_53, %c0_54] : memref<16x16xf32, #tpu.memory_space<vmem>>, vector<16x16xf32>
    tpu.vector_store %arg36[%c0_53, %c0_54], %49 {strides = array<i32>} : memref<16x16xf32, #tpu.memory_space<vmem>>, vector<16x16xf32>,
    %c0_55 = arith.constant 0 : index
    %c0_56 = arith.constant 0 : index
    %75 = vector.load %arg37[%c0_55, %c0_56] : memref<16x16xf32, #tpu.memory_space<vmem>>, vector<16x16xf32>
    tpu.vector_store %arg37[%c0_55, %c0_56], %66 {strides = array<i32>} : memref<16x16xf32, #tpu.memory_space<vmem>>, vector<16x16xf32>,
    %c0_57 = arith.constant 0 : index
    %c0_58 = arith.constant 0 : index
    %76 = vector.load %arg1[%c0_57, %c0_58] : memref<16x16xf32, #tpu.memory_space<vmem>>, vector<16x16xf32>
    %77 = arith.truncf %76 : vector<16x16xf32> to vector<16x16xbf16>
    %c0_59 = arith.constant 0 : index
    %c0_60 = arith.constant 0 : index
    %78 = vector.load %arg21[%c0_59, %c0_60] : memref<16x32xbf16, #tpu.memory_space<vmem>>, vector<16x32xbf16>
    %cst_61 = arith.constant dense<0.000000e+00> : vector<16x32xf32>
    %79 = tpu.matmul %77, %78, %cst_61 {dimension_numbers = #tpu.dot_dimension_numbers<[1], [0], [0], [1], [0, 0, 1, 1], [], []>} : vector<16x16xbf16>, vector<16x32xbf16>, vector<16x32xf32> -> vector<16x32xf32>
    %c0_62 = arith.constant 0 : index
    %c0_63 = arith.constant 0 : index
    %80 = vector.load %arg22[%c0_62, %c0_63] : memref<1x32xf32, #tpu.memory_space<vmem>>, vector<1x32xf32>
    %81 = vector.broadcast %80 : vector<1x32xf32> to vector<16x32xf32>
    %82 = arith.addf %79, %81 : vector<16x32xf32>
    %83 = math.tanh %82 : vector<16x32xf32>
    %84 = arith.truncf %83 : vector<16x32xf32> to vector<16x32xbf16>
    %c0_64 = arith.constant 0 : index
    %c0_65 = arith.constant 0 : index
    %85 = vector.load %arg23[%c0_64, %c0_65] : memref<32x64xbf16, #tpu.memory_space<vmem>>, vector<32x64xbf16>
    %cst_66 = arith.constant dense<0.000000e+00> : vector<16x64xf32>
    %86 = tpu.matmul %84, %85, %cst_66 {dimension_numbers = #tpu.dot_dimension_numbers<[1], [0], [0], [1], [0, 0, 1, 1], [], []>} : vector<16x32xbf16>, vector<32x64xbf16>, vector<16x64xf32> -> vector<16x64xf32>
    %c0_67 = arith.constant 0 : index
    %c0_68 = arith.constant 0 : index
    %87 = vector.load %arg24[%c0_67, %c0_68] : memref<1x64xf32, #tpu.memory_space<vmem>>, vector<1x64xf32>
    %88 = vector.broadcast %87 : vector<1x64xf32> to vector<16x64xf32>
    %89 = arith.addf %86, %88 : vector<16x64xf32>
    %90 = math.tanh %89 : vector<16x64xf32>
    %91 = arith.truncf %90 : vector<16x64xf32> to vector<16x64xbf16>
    %c0_69 = arith.constant 0 : index
    %c0_70 = arith.constant 0 : index
    %92 = vector.load %arg25[%c0_69, %c0_70] : memref<64x128xbf16, #tpu.memory_space<vmem>>, vector<64x128xbf16>
    %cst_71 = arith.constant dense<0.000000e+00> : vector<16x128xf32>
    %93 = tpu.matmul %91, %92, %cst_71 {dimension_numbers = #tpu.dot_dimension_numbers<[1], [0], [0], [1], [0, 0, 1, 1], [], []>} : vector<16x64xbf16>, vector<64x128xbf16>, vector<16x128xf32> -> vector<16x128xf32>
    %c0_72 = arith.constant 0 : index
    %c0_73 = arith.constant 0 : index
    %94 = vector.load %arg26[%c0_72, %c0_73] : memref<1x128xf32, #tpu.memory_space<vmem>>, vector<1x128xf32>
    %95 = vector.broadcast %94 : vector<1x128xf32> to vector<16x128xf32>
    %96 = arith.addf %93, %95 : vector<16x128xf32>
    %97 = math.tanh %96 : vector<16x128xf32>
    %98 = arith.truncf %97 : vector<16x128xf32> to vector<16x128xbf16>
    %c0_74 = arith.constant 0 : index
    %c0_75 = arith.constant 0 : index
    %99 = vector.load %arg27[%c0_74, %c0_75] : memref<128x256xbf16, #tpu.memory_space<vmem>>, vector<128x256xbf16>
    %cst_76 = arith.constant dense<0.000000e+00> : vector<16x256xf32>
    %100 = tpu.matmul %98, %99, %cst_76 {dimension_numbers = #tpu.dot_dimension_numbers<[1], [0], [0], [1], [0, 0, 1, 1], [], []>} : vector<16x128xbf16>, vector<128x256xbf16>, vector<16x256xf32> -> vector<16x256xf32>
    %c0_77 = arith.constant 0 : index
    %c0_78 = arith.constant 0 : index
    %101 = vector.load %arg28[%c0_77, %c0_78] : memref<1x256xf32, #tpu.memory_space<vmem>>, vector<1x256xf32>
    %102 = vector.broadcast %101 : vector<1x256xf32> to vector<16x256xf32>
    %103 = arith.addf %100, %102 : vector<16x256xf32>
    %104 = math.tanh %103 : vector<16x256xf32>
    %105 = arith.truncf %104 : vector<16x256xf32> to vector<16x256xbf16>
    %c0_79 = arith.constant 0 : index
    %c0_80 = arith.constant 0 : index
    %106 = vector.load %arg29[%c0_79, %c0_80] : memref<256x256xbf16, #tpu.memory_space<vmem>>, vector<256x256xbf16>
    %cst_81 = arith.constant dense<0.000000e+00> : vector<16x256xf32>
    %107 = tpu.matmul %105, %106, %cst_81 {dimension_numbers = #tpu.dot_dimension_numbers<[1], [0], [0], [1], [0, 0, 1, 1], [], []>} : vector<16x256xbf16>, vector<256x256xbf16>, vector<16x256xf32> -> vector<16x256xf32>
    %c0_82 = arith.constant 0 : index
    %c0_83 = arith.constant 0 : index
    %108 = vector.load %arg4[%c0_82, %c0_83] : memref<16x256xbf16, #tpu.memory_space<vmem>>, vector<16x256xbf16>
    %c0_84 = arith.constant 0 : index
    %c0_85 = arith.constant 0 : index
    %109 = vector.load %arg30[%c0_84, %c0_85] : memref<256x256xbf16, #tpu.memory_space<vmem>>, vector<256x256xbf16>
    %cst_86 = arith.constant dense<0.000000e+00> : vector<16x256xf32>
    %110 = tpu.matmul %108, %109, %cst_86 {dimension_numbers = #tpu.dot_dimension_numbers<[1], [0], [0], [1], [0, 0, 1, 1], [], []>} : vector<16x256xbf16>, vector<256x256xbf16>, vector<16x256xf32> -> vector<16x256xf32>
    %111 = arith.addf %107, %110 : vector<16x256xf32>
    %c0_87 = arith.constant 0 : index
    %c0_88 = arith.constant 0 : index
    %112 = vector.load %arg31[%c0_87, %c0_88] : memref<1x256xf32, #tpu.memory_space<vmem>>, vector<1x256xf32>
    %113 = vector.broadcast %112 : vector<1x256xf32> to vector<16x256xf32>
    %114 = arith.addf %111, %113 : vector<16x256xf32>
    %115 = math.tanh %114 : vector<16x256xf32>
    %116 = arith.truncf %115 : vector<16x256xf32> to vector<16x256xbf16>
    %c0_89 = arith.constant 0 : index
    %c0_90 = arith.constant 0 : index
    %117 = vector.load %arg32[%c0_89, %c0_90] : memref<256x128xbf16, #tpu.memory_space<vmem>>, vector<256x128xbf16>
    %cst_91 = arith.constant dense<0.000000e+00> : vector<16x128xf32>
    %118 = tpu.matmul %116, %117, %cst_91 {dimension_numbers = #tpu.dot_dimension_numbers<[1], [0], [0], [1], [0, 0, 1, 1], [], []>} : vector<16x256xbf16>, vector<256x128xbf16>, vector<16x128xf32> -> vector<16x128xf32>
    %c0_92 = arith.constant 0 : index
    %c0_93 = arith.constant 0 : index
    %119 = vector.load %arg33[%c0_92, %c0_93] : memref<1x128xf32, #tpu.memory_space<vmem>>, vector<1x128xf32>
    %120 = vector.broadcast %119 : vector<1x128xf32> to vector<16x128xf32>
    %121 = arith.addf %118, %120 : vector<16x128xf32>
    %122 = math.exp %121 : vector<16x128xf32>
    %c0_94 = arith.constant 0 : index
    %c0_95 = arith.constant 0 : index
    %123 = vector.load %arg34[%c0_94, %c0_95] : memref<16x128xf32, #tpu.memory_space<vmem>>, vector<16x128xf32>
    tpu.vector_store %arg34[%c0_94, %c0_95], %122 {strides = array<i32>} : memref<16x128xf32, #tpu.memory_space<vmem>>, vector<16x128xf32>,
    return
  }
  func.func @transform_0(%arg0: i32) -> (i32, i32) {
    %c0_i32 = arith.constant 0 : i32
    %c0_i32_0 = arith.constant 0 : i32
    return %arg0, %c0_i32 : i32, i32
  }
  func.func @transform_1(%arg0: i32) -> (i32, i32) {
    %c0_i32 = arith.constant 0 : i32
    %c0_i32_0 = arith.constant 0 : i32
    return %arg0, %c0_i32 : i32, i32
  }
  func.func @transform_2(%arg0: i32) -> (i32, i32) {
    %c0_i32 = arith.constant 0 : i32
    %c0_i32_0 = arith.constant 0 : i32
    return %arg0, %c0_i32 : i32, i32
  }
  func.func @transform_3(%arg0: i32) -> (i32, i32) {
    %c0_i32 = arith.constant 0 : i32
    %c0_i32_0 = arith.constant 0 : i32
    return %arg0, %c0_i32 : i32, i32
  }
  func.func @transform_4(%arg0: i32) -> (i32, i32) {
    %c0_i32 = arith.constant 0 : i32
    %c0_i32_0 = arith.constant 0 : i32
    return %arg0, %c0_i32 : i32, i32
  }
  func.func @transform_5(%arg0: i32) -> (i32, i32) {
    %c0_i32 = arith.constant 0 : i32
    %c0_i32_0 = arith.constant 0 : i32
    %c0_i32_1 = arith.constant 0 : i32
    return %c0_i32, %c0_i32_0 : i32, i32
  }
  func.func @transform_6(%arg0: i32) -> (i32, i32) {
    %c0_i32 = arith.constant 0 : i32
    %c0_i32_0 = arith.constant 0 : i32
    %c0_i32_1 = arith.constant 0 : i32
    return %c0_i32, %c0_i32_0 : i32, i32
  }
  func.func @transform_7(%arg0: i32) -> (i32, i32) {
    %c0_i32 = arith.constant 0 : i32
    %c0_i32_0 = arith.constant 0 : i32
    %c0_i32_1 = arith.constant 0 : i32
    return %c0_i32, %c0_i32_0 : i32, i32
  }
  func.func @transform_8(%arg0: i32) -> (i32, i32) {
    %c0_i32 = arith.constant 0 : i32
    %c0_i32_0 = arith.constant 0 : i32
    %c0_i32_1 = arith.constant 0 : i32
    return %c0_i32, %c0_i32_0 : i32, i32
  }
  func.func @transform_9(%arg0: i32) -> (i32, i32) {
    %c0_i32 = arith.constant 0 : i32
    %c0_i32_0 = arith.constant 0 : i32
    %c0_i32_1 = arith.constant 0 : i32
    return %c0_i32, %c0_i32_0 : i32, i32
  }
  func.func @transform_10(%arg0: i32) -> (i32, i32) {
    %c0_i32 = arith.constant 0 : i32
    %c0_i32_0 = arith.constant 0 : i32
    %c0_i32_1 = arith.constant 0 : i32
    return %c0_i32, %c0_i32_0 : i32, i32
  }
  func.func @transform_11(%arg0: i32) -> (i32, i32) {
    %c0_i32 = arith.constant 0 : i32
    %c0_i32_0 = arith.constant 0 : i32
    %c0_i32_1 = arith.constant 0 : i32
    return %c0_i32, %c0_i32_0 : i32, i32
  }
  func.func @transform_12(%arg0: i32) -> (i32, i32) {
    %c0_i32 = arith.constant 0 : i32
    %c0_i32_0 = arith.constant 0 : i32
    %c0_i32_1 = arith.constant 0 : i32
    return %c0_i32, %c0_i32_0 : i32, i32
  }
  func.func @transform_13(%arg0: i32) -> (i32, i32) {
    %c0_i32 = arith.constant 0 : i32
    %c0_i32_0 = arith.constant 0 : i32
    %c0_i32_1 = arith.constant 0 : i32
    return %c0_i32, %c0_i32_0 : i32, i32
  }
  func.func @transform_14(%arg0: i32) -> (i32, i32) {
    %c0_i32 = arith.constant 0 : i32
    %c0_i32_0 = arith.constant 0 : i32
    %c0_i32_1 = arith.constant 0 : i32
    return %c0_i32, %c0_i32_0 : i32, i32
  }
  func.func @transform_15(%arg0: i32) -> (i32, i32) {
    %c0_i32 = arith.constant 0 : i32
    %c0_i32_0 = arith.constant 0 : i32
    %c0_i32_1 = arith.constant 0 : i32
    return %c0_i32, %c0_i32_0 : i32, i32
  }
  func.func @transform_16(%arg0: i32) -> (i32, i32) {
    %c0_i32 = arith.constant 0 : i32
    %c0_i32_0 = arith.constant 0 : i32
    %c0_i32_1 = arith.constant 0 : i32
    return %c0_i32, %c0_i32_0 : i32, i32
  }
  func.func @transform_17(%arg0: i32) -> (i32, i32) {
    %c0_i32 = arith.constant 0 : i32
    %c0_i32_0 = arith.constant 0 : i32
    %c0_i32_1 = arith.constant 0 : i32
    return %c0_i32, %c0_i32_0 : i32, i32
  }
  func.func @transform_18(%arg0: i32) -> (i32, i32) {
    %c0_i32 = arith.constant 0 : i32
    %c0_i32_0 = arith.constant 0 : i32
    %c0_i32_1 = arith.constant 0 : i32
    return %c0_i32, %c0_i32_0 : i32, i32
  }
  func.func @transform_19(%arg0: i32) -> (i32, i32) {
    %c0_i32 = arith.constant 0 : i32
    %c0_i32_0 = arith.constant 0 : i32
    %c0_i32_1 = arith.constant 0 : i32
    return %c0_i32, %c0_i32_0 : i32, i32
  }
  func.func @transform_20(%arg0: i32) -> (i32, i32) {
    %c0_i32 = arith.constant 0 : i32
    %c0_i32_0 = arith.constant 0 : i32
    %c0_i32_1 = arith.constant 0 : i32
    return %c0_i32, %c0_i32_0 : i32, i32
  }
  func.func @transform_21(%arg0: i32) -> (i32, i32) {
    %c0_i32 = arith.constant 0 : i32
    %c0_i32_0 = arith.constant 0 : i32
    %c0_i32_1 = arith.constant 0 : i32
    return %c0_i32, %c0_i32_0 : i32, i32
  }
  func.func @transform_22(%arg0: i32) -> (i32, i32) {
    %c0_i32 = arith.constant 0 : i32
    %c0_i32_0 = arith.constant 0 : i32
    %c0_i32_1 = arith.constant 0 : i32
    return %c0_i32, %c0_i32_0 : i32, i32
  }
  func.func @transform_23(%arg0: i32) -> (i32, i32) {
    %c0_i32 = arith.constant 0 : i32
    %c0_i32_0 = arith.constant 0 : i32
    %c0_i32_1 = arith.constant 0 : i32
    return %c0_i32, %c0_i32_0 : i32, i32
  }
  func.func @transform_24(%arg0: i32) -> (i32, i32) {
    %c0_i32 = arith.constant 0 : i32
    %c0_i32_0 = arith.constant 0 : i32
    %c0_i32_1 = arith.constant 0 : i32
    return %c0_i32, %c0_i32_0 : i32, i32
  }
  func.func @transform_25(%arg0: i32) -> (i32, i32) {
    %c0_i32 = arith.constant 0 : i32
    %c0_i32_0 = arith.constant 0 : i32
    %c0_i32_1 = arith.constant 0 : i32
    return %c0_i32, %c0_i32_0 : i32, i32
  }
  func.func @transform_26(%arg0: i32) -> (i32, i32) {
    %c0_i32 = arith.constant 0 : i32
    %c0_i32_0 = arith.constant 0 : i32
    %c0_i32_1 = arith.constant 0 : i32
    return %c0_i32, %c0_i32_0 : i32, i32
  }
  func.func @transform_27(%arg0: i32) -> (i32, i32) {
    %c0_i32 = arith.constant 0 : i32
    %c0_i32_0 = arith.constant 0 : i32
    %c0_i32_1 = arith.constant 0 : i32
    return %c0_i32, %c0_i32_0 : i32, i32
  }
  func.func @transform_28(%arg0: i32) -> (i32, i32) {
    %c0_i32 = arith.constant 0 : i32
    %c0_i32_0 = arith.constant 0 : i32
    %c0_i32_1 = arith.constant 0 : i32
    return %c0_i32, %c0_i32_0 : i32, i32
  }
  func.func @transform_29(%arg0: i32) -> (i32, i32) {
    %c0_i32 = arith.constant 0 : i32
    %c0_i32_0 = arith.constant 0 : i32
    %c0_i32_1 = arith.constant 0 : i32
    return %c0_i32, %c0_i32_0 : i32, i32
  }
  func.func @transform_30(%arg0: i32) -> (i32, i32) {
    %c0_i32 = arith.constant 0 : i32
    %c0_i32_0 = arith.constant 0 : i32
    %c0_i32_1 = arith.constant 0 : i32
    return %c0_i32, %c0_i32_0 : i32, i32
  }
  func.func @transform_31(%arg0: i32) -> (i32, i32) {
    %c0_i32 = arith.constant 0 : i32
    %c0_i32_0 = arith.constant 0 : i32
    %c0_i32_1 = arith.constant 0 : i32
    return %c0_i32, %c0_i32_0 : i32, i32
  }
  func.func @transform_32(%arg0: i32) -> (i32, i32) {
    %c0_i32 = arith.constant 0 : i32
    %c0_i32_0 = arith.constant 0 : i32
    %c0_i32_1 = arith.constant 0 : i32
    return %c0_i32, %c0_i32_0 : i32, i32
  }
  func.func @transform_33(%arg0: i32) -> (i32, i32) {
    %c0_i32 = arith.constant 0 : i32
    %c0_i32_0 = arith.constant 0 : i32
    return %arg0, %c0_i32 : i32, i32
  }
  func.func @transform_34(%arg0: i32) -> (i32, i32) {
    %c0_i32 = arith.constant 0 : i32
    %c0_i32_0 = arith.constant 0 : i32
    return %arg0, %c0_i32 : i32, i32
  }
  func.func @transform_35(%arg0: i32) -> (i32, i32) {
    %c0_i32 = arith.constant 0 : i32
    %c0_i32_0 = arith.constant 0 : i32
    return %arg0, %c0_i32 : i32, i32
  }
  func.func @transform_36(%arg0: i32) -> (i32, i32) {
    %c0_i32 = arith.constant 0 : i32
    %c0_i32_0 = arith.constant 0 : i32
    return %arg0, %c0_i32 : i32, i32
  }
}

</mosaic_0001>

<bundles_post_ra>
// kernel: _dkf_av_forward_impl.5
= control target key start
LH: loop header
LB: loop body
LE: loop exit
PB: predicated region body
PF: predicated region fallthrough
CT: control target
= control target key end

     0   :  { %vm119_vm0 = vcmask 523264   ;;  %vm2535_vm1 = vcmask 130048   ;;  %s5993_s2 = inlined_call_operand.vmem [shape: bf16[64,256], index: 2, kind: input, shape index: {}]   ;;  %s5994_s4 = inlined_call_operand.vmem [shape: bf16[512,256], index: 4, kind: input, shape index: {}]   ;;  %s5995_s0 = inlined_call_operand.vmem [shape: bf16[16,64], index: 0, kind: input, shape index: {}]   ;;  %s5996_s1 = inlined_call_operand.vmem [shape: bf16[16,512], index: 1, kind: input, shape index: {}]   ;;  %s5997_s7 = inlined_call_operand.vmem [shape: bf16[256,256], index: 7, kind: input, shape index: {}]   ;;  %s5998_s6 = inlined_call_operand.vmem [shape: bf16[256,256], index: 6, kind: input, shape index: {}]   ;;  %s5999_s5 = inlined_call_operand.vmem [shape: f32[1,256], index: 5, kind: input, shape index: {}]   ;;  %s6000_s3 = inlined_call_operand.vmem [shape: f32[1,256], index: 3, kind: input, shape index: {}]   ;;  %s6001_s9 = inlined_call_operand.vmem [shape: bf16[256,512], index: 9, kind: input, shape index: {}]   ;;  %s6002_s8 = inlined_call_operand.vmem [shape: f32[1,256], index: 8, kind: input, shape index: {}]   ;;  %s6003_s11 = inlined_call_operand.vmem [shape: bf16[512,256], index: 11, kind: input, shape index: {}]   ;;  %s6004_s13 = inlined_call_operand.vmem [shape: bf16[512,16], index: 13, kind: input, shape index: {}]   ;;  %s6005_s14 = inlined_call_operand.vmem [shape: f32[1,16], index: 14, kind: input, shape index: {}]   ;;  %s6006_s10 = inlined_call_operand.vmem [shape: f32[1,512], index: 10, kind: input, shape index: {}]   ;;  %s6007_s15 = inlined_call_operand.vmem [shape: bf16[16,512], index: 15, kind: output, shape index: {0}]   ;;  %s6008_s12 = inlined_call_operand.vmem [shape: f32[1,256], index: 12, kind: input, shape index: {}]   ;;  %s6009_s16 = inlined_call_operand.vmem [shape: bf16[16,256], index: 16, kind: output, shape index: {1}]   ;;  %s6010_s17 = inlined_call_operand.vmem [shape: f32[16,16], index: 17, kind: output, shape index: {2}]  }
   0x1   :  { %6013 = sst [smem:[#allocation2_spill]] %s5993_s2 }
   0x2   :  { %6014 = sst [smem:[#allocation3_spill]] %s5994_s4 }
   0x3   :  { %s6015_s26 = sld [smem:[#allocation2_spill]] }
   0x4   :  { %s6016_s20 = sld [smem:[#allocation3_spill]] }
   0x9   :  { %v2580_v0 = vld [vmem:[%s6015_s26 + $0x30] sm:$0xf]  ;;  %v3768_v1 = vld [vmem:[%s6015_s26 + $0x34] sm:$0xf0]  ;;  %v3767_v2 = vld [vmem:[%s6015_s26 + $0x34] sm:$0xf] }
   0xa   :  { %v2581_v3 = vor.u32 %v3768_v1, %v2580_v0  ;;  %v2582_v4 = vld [vmem:[%s6015_s26 + $0x38] sm:$0xf0]  ;;  %v2662_v5 = vld [vmem:[%s6016_s20 + $0x70] sm:$0xf]  ;;  %v3784_v6 = vld [vmem:[%s6016_s20 + $0x74] sm:$0xf0] }
   0xb   :  { %v2585_v7 = vor.u32 %v3767_v2, %v2582_v4  ;;  %v2663_v8 = vor.u32 %v3784_v6, %v2662_v5  ;;  %v2726_v9 = vld [vmem:[%s6016_s20 + $0xf0] sm:$0xf]  ;;  %v3800_v10 = vld [vmem:[%s6016_s20 + $0xf4] sm:$0xf0]  ;;  %v2572_v11 = vld [vmem:[%s6015_s26 + $0x20] sm:$0xf] }
   0xc   :  { %127 = vmatpush.bf16.msra.mxu0 %v2581_v3  ;;  %v2727_v12 = vor.u32 %v3800_v10, %v2726_v9  ;;  %v3766_v13 = vld [vmem:[%s6015_s26 + $0x24] sm:$0xf0]  ;;  %v3765_v14 = vld [vmem:[%s6015_s26 + $0x24] sm:$0xf]  ;;  %v2574_v15 = vld [vmem:[%s6015_s26 + $0x28] sm:$0xf0] }
   0xd   :  { %141 = vmatpush.bf16.msra.mxu1 %v2585_v7  ;;  %565 = vmatpush.bf16.msra.mxu2 %v2663_v8  ;;  %v2573_v16 = vor.u32 %v3766_v13, %v2572_v11  ;;  %v2577_v17 = vor.u32 %v3765_v14, %v2574_v15  ;;  %v2654_v18 = vld [vmem:[%s6016_s20 + $0x60] sm:$0xf]  ;;  %v3782_v19 = vld [vmem:[%s6016_s20 + $0x64] sm:$0xf0]  ;;  %v2564_v23 = vld [vmem:[%s6015_s26 + $0x10] sm:$0xf] }
   0xe   :  { %v2718_v20 = vld [vmem:[%s6016_s20 + $0xe0] sm:$0xf]  ;;  %579 = vmatpush.bf16.msra.mxu3 %v2727_v12  ;;  %v2655_v21 = vor.u32 %v3782_v19, %v2654_v18  ;;  %v3798_v22 = vld [vmem:[%s6016_s20 + $0xe4] sm:$0xf0]  ;;  %v3764_v24 = vld [vmem:[%s6015_s26 + $0x14] sm:$0xf0] }
   0xf   :  { %v2719_v25 = vor.u32 %v3798_v22, %v2718_v20  ;;  %v3763_v26 = vld [vmem:[%s6015_s26 + $0x14] sm:$0xf]  ;;  %v2566_v27 = vld [vmem:[%s6015_s26 + $0x18] sm:$0xf0]  ;;  %v2646_v28 = vld [vmem:[%s6016_s20 + $0x50] sm:$0xf]  ;;  %v2565_v29 = vor.u32 %v3764_v24, %v2564_v23 }
  0x10   :  { %128 = vmatpush.bf16.msra.mxu0 %v2573_v16  ;;  %v3780_v30 = vld [vmem:[%s6016_s20 + $0x54] sm:$0xf0]  ;;  %v2710_v31 = vld [vmem:[%s6016_s20 + $0xd0] sm:$0xf]  ;;  %v2569_v33 = vor.u32 %v3763_v26, %v2566_v27  ;;  %v2556_v35 = vld [vmem:[%s6015_s26] sm:$0xf] }
  0x11   :  { %v3796_v32 = vld [vmem:[%s6016_s20 + $0xd4] sm:$0xf0]  ;;  %142 = vmatpush.bf16.msra.mxu1 %v2577_v17  ;;  %566 = vmatpush.bf16.msra.mxu2 %v2655_v21  ;;  %v2647_v34 = vor.u32 %v3780_v30, %v2646_v28  ;;  %v3762_v36 = vld [vmem:[%s6015_s26 + $0x4] sm:$0xf0]  ;;  %v3761_v37 = vld [vmem:[%s6015_s26 + $0x4] sm:$0xf] }
  0x12   :  { %580 = vmatpush.bf16.msra.mxu3 %v2719_v25  ;;  %v2711_v38 = vor.u32 %v3796_v32, %v2710_v31  ;;  %v2558_v39 = vld [vmem:[%s6015_s26 + $0x8] sm:$0xf0]  ;;  %v2638_v40 = vld [vmem:[%s6016_s20 + $0x40] sm:$0xf]  ;;  %v3778_v41 = vld [vmem:[%s6016_s20 + $0x44] sm:$0xf0]  ;;  %v2557_v45 = vor.u32 %v3762_v36, %v2556_v35 }
  0x13   :  { %v2702_v42 = vld [vmem:[%s6016_s20 + $0xc0] sm:$0xf]  ;;  %v3794_v43 = vld [vmem:[%s6016_s20 + $0xc4] sm:$0xf0]  ;;  %v2790_v44 = vld [vmem:[%s6016_s20 + $0x170] sm:$0xf]  ;;  %v2561_v49 = vor.u32 %v3761_v37, %v2558_v39  ;;  %v2639_v50 = vor.u32 %v3778_v41, %v2638_v40 }
  0x14   :  { %129 = vmatpush.bf16.msra.mxu0 %v2565_v29  ;;  %v3816_v46 = vld [vmem:[%s6016_s20 + $0x174] sm:$0xf0]  ;;  %v2854_v47 = vld [vmem:[%s6016_s20 + $0x1f0] sm:$0xf]  ;;  %v2703_v51 = vor.u32 %v3794_v43, %v2702_v42  ;;  %v2782_v58 = vld [vmem:[%s6016_s20 + $0x160] sm:$0xf] }
  0x15   :  { %v3832_v48 = vld [vmem:[%s6016_s20 + $0x1f4] sm:$0xf0]  ;;  %143 = vmatpush.bf16.msra.mxu1 %v2569_v33  ;;  %567 = vmatpush.bf16.msra.mxu2 %v2647_v34  ;;  %v2791_v52 = vor.u32 %v3816_v46, %v2790_v44  ;;  %v2630_v53 = vld [vmem:[%s6016_s20 + $0x30] sm:$0xf]  ;;  %v3814_v59 = vld [vmem:[%s6016_s20 + $0x164] sm:$0xf0] }
  0x16   :  { %581 = vmatpush.bf16.msra.mxu3 %v2711_v38  ;;  %v3776_v54 = vld [vmem:[%s6016_s20 + $0x34] sm:$0xf0]  ;;  %v2694_v55 = vld [vmem:[%s6016_s20 + $0xb0] sm:$0xf]  ;;  %v2855_v56 = vor.u32 %v3832_v48, %v2854_v47  ;;  %v2846_v60 = vld [vmem:[%s6016_s20 + $0x1e0] sm:$0xf]  ;;  %v2783_v0 = vor.u32 %v3814_v59, %v2782_v58 }
  0x17   :  { %v3792_v57 = vld [vmem:[%s6016_s20 + $0xb4] sm:$0xf0]  ;;  %v3830_v61 = vld [vmem:[%s6016_s20 + $0x1e4] sm:$0xf0]  ;;  %v2631_v62 = vor.u32 %v3776_v54, %v2630_v53  ;;  %v2622_v1 = vld [vmem:[%s6016_s20 + $0x20] sm:$0xf] }
  0x18   :  { %130 = vmatpush.bf16.msra.mxu0 %v2557_v45  ;;  %v2695_v63 = vor.u32 %v3792_v57, %v2694_v55  ;;  %v3774_v2 = vld [vmem:[%s6016_s20 + $0x24] sm:$0xf0]  ;;  %v2686_v3 = vld [vmem:[%s6016_s20 + $0xa0] sm:$0xf]  ;;  %v2847_v4 = vor.u32 %v3830_v61, %v2846_v60  ;;  %v2774_v6 = vld [vmem:[%s6016_s20 + $0x150] sm:$0xf] }
  0x19   :  { %144 = vmatpush.bf16.msra.mxu1 %v2561_v49  ;;  %568 = vmatpush.bf16.msra.mxu2 %v2639_v50  ;;  %v3790_v5 = vld [vmem:[%s6016_s20 + $0xa4] sm:$0xf0]  ;;  %v3812_v7 = vld [vmem:[%s6016_s20 + $0x154] sm:$0xf0]  ;;  %v2838_v8 = vld [vmem:[%s6016_s20 + $0x1d0] sm:$0xf]  ;;  %v2623_v10 = vor.u32 %v3774_v2, %v2622_v1 }
  0x1a   :  { %582 = vmatpush.bf16.msra.mxu3 %v2703_v51  ;;  %v3828_v9 = vld [vmem:[%s6016_s20 + $0x1d4] sm:$0xf0]  ;;  %v3756_v11 = vld [vmem:[%s5995_s0] sm:$0xff]  ;;  %v2687_v12 = vor.u32 %v3790_v5, %v2686_v3  ;;  %v2775_v13 = vor.u32 %v3812_v7, %v2774_v6  ;;  %v2614_v14 = vld [vmem:[%s6016_s20 + $0x10] sm:$0xf] }
  0x1b   :  { %v3772_v15 = vld [vmem:[%s6016_s20 + $0x14] sm:$0xf0]  ;;  %v2678_v16 = vld [vmem:[%s6016_s20 + $0x90] sm:$0xf]  ;;  %v2839_v17 = vor.u32 %v3828_v9, %v2838_v8  ;;  %v2766_v19 = vld [vmem:[%s6016_s20 + $0x140] sm:$0xf]  ;;  %2586 = vmatmul.msk.bf16.vlgmr.msra.gmra.mxu0 %vm119_vm0, %v3756_v11 }
  0x1c   :  { %593 = vmatpush.bf16.msrb.mxu0 %v2791_v52  ;;  %v3788_v18 = vld [vmem:[%s6016_s20 + $0x94] sm:$0xf0]  ;;  %v3810_v20 = vld [vmem:[%s6016_s20 + $0x144] sm:$0xf0]  ;;  %v2830_v21 = vld [vmem:[%s6016_s20 + $0x1c0] sm:$0xf]  ;;  %2587 = vmatmul.msk.bf16.vlgmr.msra.gmra.mxu1 %vm119_vm0, %v3756_v11  ;;  %v2615_v23 = vor.u32 %v3772_v15, %v2614_v14 }
  0x1d   :  { %607 = vmatpush.bf16.msrb.mxu1 %v2855_v56  ;;  %569 = vmatpush.bf16.msra.mxu2 %v2631_v62  ;;  %v3826_v22 = vld [vmem:[%s6016_s20 + $0x1c4] sm:$0xf0]  ;;  %v2606_v24 = vld [vmem:[%s6016_s20] sm:$0xf]  ;;  %v2679_v26 = vor.u32 %v3788_v18, %v2678_v16  ;;  %v2767_v27 = vor.u32 %v3810_v20, %v2766_v19  ;;  %v2758_v30 = vld [vmem:[%s6016_s20 + $0x130] sm:$0xf] }
  0x1e   :  { %583 = vmatpush.bf16.msra.mxu3 %v2695_v63  ;;  %v3770_v25 = vld [vmem:[%s6016_s20 + $0x4] sm:$0xf0]  ;;  %v2670_v28 = vld [vmem:[%s6016_s20 + $0x80] sm:$0xf]  ;;  %v2831_v31 = vor.u32 %v3826_v22, %v2830_v21  ;;  %v3808_v32 = vld [vmem:[%s6016_s20 + $0x134] sm:$0xf0] }
  0x1f   :  { %v3786_v29 = vld [vmem:[%s6016_s20 + $0x84] sm:$0xf0]  ;;  %v2822_v33 = vld [vmem:[%s6016_s20 + $0x1b0] sm:$0xf]  ;;  %v3824_v34 = vld [vmem:[%s6016_s20 + $0x1b4] sm:$0xf0]  ;;  %v2607_v38 = vor.u32 %v3770_v25, %v2606_v24  ;;  %v2759_v43 = vor.u32 %v3808_v32, %v2758_v30 }
  0x20   :  { %594 = vmatpush.bf16.msrb.mxu0 %v2783_v0  ;;  %v3783_v35 = vld [vmem:[%s6016_s20 + $0x74] sm:$0xf]  ;;  %v2664_v36 = vld [vmem:[%s6016_s20 + $0x78] sm:$0xf0]  ;;  %v2590_v40 = vld [vmem:[%s5996_s1] sm:$0xf]  ;;  %v2671_v42 = vor.u32 %v3786_v29, %v2670_v28  ;;  %v2823_v46 = vor.u32 %v3824_v34, %v2822_v33 }
  0x21   :  { %608 = vmatpush.bf16.msrb.mxu1 %v2847_v4  ;;  %570 = vmatpush.bf16.msra.mxu2 %v2623_v10  ;;  %v3799_v37 = vld [vmem:[%s6016_s20 + $0xf4] sm:$0xf]  ;;  %v2728_v39 = vld [vmem:[%s6016_s20 + $0xf8] sm:$0xf0]  ;;  %v3759_v41 = vld [vmem:[%s5996_s1 + $0xc] sm:$0xf0]  ;;  %v2667_v47 = vor.u32 %v3783_v35, %v2664_v36 }
  0x22   :  { %584 = vmatpush.bf16.msra.mxu3 %v2687_v12  ;;  %v3757_v44 = vld [vmem:[%s5996_s1 + $0x4] sm:$0xf]  ;;  %v2592_v45 = vld [vmem:[%s5996_s1 + $0x10] sm:$0xf0]  ;;  %v2750_v48 = vld [vmem:[%s6016_s20 + $0x120] sm:$0xf]  ;;  %v2731_v51 = vor.u32 %v3799_v37, %v2728_v39  ;;  %v4427_v55 = vor.u32 %v3759_v41, %v2590_v40 }
  0x23   :  { %v3806_v49 = vld [vmem:[%s6016_s20 + $0x124] sm:$0xf0]  ;;  %v2814_v50 = vld [vmem:[%s6016_s20 + $0x1a0] sm:$0xf]  ;;  %v3781_v53 = vld [vmem:[%s6016_s20 + $0x64] sm:$0xf]  ;;  %v4435_v58 = vor.u32 %v3757_v44, %v2592_v45 }
  0x24   :  { %595 = vmatpush.bf16.msrb.mxu0 %v2775_v13  ;;  %v3822_v52 = vld [vmem:[%s6016_s20 + $0x1a4] sm:$0xf0]  ;;  %v2656_v54 = vld [vmem:[%s6016_s20 + $0x68] sm:$0xf0]  ;;  %v3797_v56 = vld [vmem:[%s6016_s20 + $0xe4] sm:$0xf]  ;;  %v2751_v59 = vor.u32 %v3806_v49, %v2750_v48 }
  0x25   :  { %609 = vmatpush.bf16.msrb.mxu1 %v2839_v17  ;;  %571 = vmatpush.bf16.msra.mxu2 %v2615_v23  ;;  %v2720_v57 = vld [vmem:[%s6016_s20 + $0xe8] sm:$0xf0]  ;;  %v2815_v60 = vor.u32 %v3822_v52, %v2814_v50  ;;  %v2659_v61 = vor.u32 %v3781_v53, %v2656_v54  ;;  %v2742_v62 = vld [vmem:[%s6016_s20 + $0x110] sm:$0xf]  ;;  %v3804_v63 = vld [vmem:[%s6016_s20 + $0x114] sm:$0xf0] }
  0x26   :  { %585 = vmatpush.bf16.msra.mxu3 %v2679_v26  ;;  %v2806_v0 = vld [vmem:[%s6016_s20 + $0x190] sm:$0xf]  ;;  %v2723_v1 = vor.u32 %v3797_v56, %v2720_v57  ;;  %v3820_v2 = vld [vmem:[%s6016_s20 + $0x194] sm:$0xf0]  ;;  %v3779_v3 = vld [vmem:[%s6016_s20 + $0x54] sm:$0xf]  ;;  %v2743_v7 = vor.u32 %v3804_v63, %v2742_v62 }
  0x27   :  { %v2648_v4 = vld [vmem:[%s6016_s20 + $0x58] sm:$0xf0]  ;;  %v3795_v5 = vld [vmem:[%s6016_s20 + $0xd4] sm:$0xf]  ;;  %v2734_v8 = vld [vmem:[%s6016_s20 + $0x100] sm:$0xf]  ;;  %v2807_v10 = vor.u32 %v3820_v2, %v2806_v0 }
  0x28   :  { %596 = vmatpush.bf16.msrb.mxu0 %v2767_v27  ;;  %v2712_v6 = vld [vmem:[%s6016_s20 + $0xd8] sm:$0xf0]  ;;  %v3802_v9 = vld [vmem:[%s6016_s20 + $0x104] sm:$0xf0]  ;;  %v2651_v11 = vor.u32 %v3779_v3, %v2648_v4  ;;  %v2798_v12 = vld [vmem:[%s6016_s20 + $0x180] sm:$0xf] }
  0x29   :  { %610 = vmatpush.bf16.msrb.mxu1 %v2831_v31  ;;  %572 = vmatpush.bf16.msra.mxu2 %v2607_v38  ;;  %v3818_v13 = vld [vmem:[%s6016_s20 + $0x184] sm:$0xf0]  ;;  %v3777_v14 = vld [vmem:[%s6016_s20 + $0x44] sm:$0xf]  ;;  %v2715_v15 = vor.u32 %v3795_v5, %v2712_v6  ;;  %v2640_v16 = vld [vmem:[%s6016_s20 + $0x48] sm:$0xf0]  ;;  %v2735_v22 = vor.u32 %v3802_v9, %v2734_v8 }
  0x2a   :  { %586 = vmatpush.bf16.msra.mxu3 %v2671_v42  ;;  %v3793_v17 = vld [vmem:[%s6016_s20 + $0xc4] sm:$0xf]  ;;  %v2704_v18 = vld [vmem:[%s6016_s20 + $0xc8] sm:$0xf0]  ;;  %v3815_v19 = vld [vmem:[%s6016_s20 + $0x174] sm:$0xf]  ;;  %v2799_v26 = vor.u32 %v3818_v13, %v2798_v12  ;;  %v2643_v27 = vor.u32 %v3777_v14, %v2640_v16 }
  0x2b   :  { %v2792_v20 = vld [vmem:[%s6016_s20 + $0x178] sm:$0xf0]  ;;  %v3831_v21 = vld [vmem:[%s6016_s20 + $0x1f4] sm:$0xf]  ;;  %v2598_v24 = vld [vmem:[%s5996_s1 + $0x8] sm:$0xf]  ;;  %v2707_v30 = vor.u32 %v3793_v17, %v2704_v18 }
  0x2c   :  { %597 = vmatpush.bf16.msrb.mxu0 %v2759_v43  ;;  %573 = vmatmul.bf16.vlgmr.msra.gmra.mxu2 %v4427_v55  ;;  %v2856_v23 = vld [vmem:[%s6016_s20 + $0x1f8] sm:$0xf0]  ;;  %v3760_v25 = vld [vmem:[%s5996_s1 + $0x14] sm:$0xf0]  ;;  %v3758_v28 = vld [vmem:[%s5996_s1 + $0xc] sm:$0xf]  ;;  %v2795_v31 = vor.u32 %v3815_v19, %v2792_v20 }
  0x2d   :  { %611 = vmatpush.bf16.msrb.mxu1 %v2823_v46  ;;  %621 = vmatpush.bf16.msrb.mxu2 %v2667_v47  ;;  %v2600_v29 = vld [vmem:[%s5996_s1 + $0x18] sm:$0xf0]  ;;  %v3775_v32 = vld [vmem:[%s6016_s20 + $0x34] sm:$0xf]  ;;  %v2859_v35 = vor.u32 %v3831_v21, %v2856_v23  ;;  %v4520_v36 = vor.u32 %v3760_v25, %v2598_v24  ;;  %v3813_v38 = vld [vmem:[%s6016_s20 + $0x164] sm:$0xf] }
  0x2e   :  { %635 = vmatpush.bf16.msrb.mxu3 %v2731_v51  ;;  %v2632_v33 = vld [vmem:[%s6016_s20 + $0x38] sm:$0xf0]  ;;  %v3791_v34 = vld [vmem:[%s6016_s20 + $0xb4] sm:$0xf]  ;;  %v2784_v39 = vld [vmem:[%s6016_s20 + $0x168] sm:$0xf0]  ;;  %v4531_v40 = vor.u32 %v3758_v28, %v2600_v29 }
  0x2f   :  { %587 = vmatmul.bf16.vlgmr.msra.gmra.mxu3 %v4435_v58  ;;  %v2696_v37 = vld [vmem:[%s6016_s20 + $0xb8] sm:$0xf0]  ;;  %v3829_v41 = vld [vmem:[%s6016_s20 + $0x1e4] sm:$0xf]  ;;  %v2848_v42 = vld [vmem:[%s6016_s20 + $0x1e8] sm:$0xf0]  ;;  %v2635_v43 = vor.u32 %v3775_v32, %v2632_v33  ;;  %v2787_v45 = vor.u32 %v3813_v38, %v2784_v39 }
  0x30   :  { %598 = vmatpush.bf16.msrb.mxu0 %v2751_v59  ;;  %v2699_v44 = vor.u32 %v3791_v34, %v2696_v37  ;;  %v3773_v46 = vld [vmem:[%s6016_s20 + $0x24] sm:$0xf]  ;;  %v2624_v47 = vld [vmem:[%s6016_s20 + $0x28] sm:$0xf0]  ;;  %v2851_v49 = vor.u32 %v3829_v41, %v2848_v42  ;;  %v3811_v51 = vld [vmem:[%s6016_s20 + $0x154] sm:$0xf] }
  0x31   :  { %612 = vmatpush.bf16.msrb.mxu1 %v2815_v60  ;;  %622 = vmatpush.bf16.msrb.mxu2 %v2659_v61  ;;  %v3789_v48 = vld [vmem:[%s6016_s20 + $0xa4] sm:$0xf]  ;;  %v2688_v50 = vld [vmem:[%s6016_s20 + $0xa8] sm:$0xf0]  ;;  %v2776_v52 = vld [vmem:[%s6016_s20 + $0x158] sm:$0xf0]  ;;  %v2627_v56 = vor.u32 %v3773_v46, %v2624_v47 }
  0x32   :  { %636 = vmatpush.bf16.msrb.mxu3 %v2723_v1  ;;  %v3827_v53 = vld [vmem:[%s6016_s20 + $0x1d4] sm:$0xf]  ;;  %v2840_v54 = vld [vmem:[%s6016_s20 + $0x1d8] sm:$0xf0]  ;;  %v2691_v57 = vor.u32 %v3789_v48, %v2688_v50  ;;  %v2779_v59 = vor.u32 %v3811_v51, %v2776_v52  ;;  %v3809_v1 = vld [vmem:[%s6016_s20 + $0x144] sm:$0xf] }
  0x33   :  { %v3771_v60 = vld [vmem:[%s6016_s20 + $0x14] sm:$0xf]  ;;  %v2616_v61 = vld [vmem:[%s6016_s20 + $0x18] sm:$0xf0]  ;;  %v2843_v63 = vor.u32 %v3827_v53, %v2840_v54  ;;  %v2768_v2 = vld [vmem:[%s6016_s20 + $0x148] sm:$0xf0] }
  0x34   :  { %599 = vmatpush.bf16.msrb.mxu0 %v2743_v7  ;;  %v3787_v62 = vld [vmem:[%s6016_s20 + $0x94] sm:$0xf]  ;;  %v2680_v0 = vld [vmem:[%s6016_s20 + $0x98] sm:$0xf0]  ;;  %v3825_v3 = vld [vmem:[%s6016_s20 + $0x1c4] sm:$0xf]  ;;  %v2619_v5 = vor.u32 %v3771_v60, %v2616_v61  ;;  %v2771_v8 = vor.u32 %v3809_v1, %v2768_v2 }
  0x35   :  { %613 = vmatpush.bf16.msrb.mxu1 %v2807_v10  ;;  %623 = vmatpush.bf16.msrb.mxu2 %v2651_v11  ;;  %v2832_v4 = vld [vmem:[%s6016_s20 + $0x1c8] sm:$0xf0]  ;;  %v3769_v6 = vld [vmem:[%s6016_s20 + $0x4] sm:$0xf]  ;;  %v2683_v7 = vor.u32 %v3787_v62, %v2680_v0  ;;  %v3807_v13 = vld [vmem:[%s6016_s20 + $0x134] sm:$0xf] }
  0x36   :  { %637 = vmatpush.bf16.msrb.mxu3 %v2715_v15  ;;  %v2608_v9 = vld [vmem:[%s6016_s20 + $0x8] sm:$0xf0]  ;;  %v3785_v10 = vld [vmem:[%s6016_s20 + $0x84] sm:$0xf]  ;;  %v2835_v12 = vor.u32 %v3825_v3, %v2832_v4  ;;  %v2760_v14 = vld [vmem:[%s6016_s20 + $0x138] sm:$0xf0] }
  0x37   :  { %v2672_v11 = vld [vmem:[%s6016_s20 + $0x88] sm:$0xf0]  ;;  %v3823_v15 = vld [vmem:[%s6016_s20 + $0x1b4] sm:$0xf]  ;;  %v2824_v16 = vld [vmem:[%s6016_s20 + $0x1b8] sm:$0xf0]  ;;  %v2611_v19 = vor.u32 %v3769_v6, %v2608_v9  ;;  %v2763_v21 = vor.u32 %v3807_v13, %v2760_v14 }
  0x38   :  { %600 = vmatpush.bf16.msrb.mxu0 %v2735_v22  ;;  %v2918_v17 = vld [vmem:[%s5997_s7 + $0x70] sm:$0xf]  ;;  %v3880_v18 = vld [vmem:[%s5997_s7 + $0x74] sm:$0xf0]  ;;  %v2675_v20 = vor.u32 %v3785_v10, %v2672_v11  ;;  %v2827_v22 = vor.u32 %v3823_v15, %v2824_v16  ;;  %v3805_v23 = vld [vmem:[%s6016_s20 + $0x124] sm:$0xf] }
  0x39   :  { %614 = vmatpush.bf16.msrb.mxu1 %v2799_v26  ;;  %624 = vmatpush.bf16.msrb.mxu2 %v2643_v27  ;;  %v2752_v24 = vld [vmem:[%s6016_s20 + $0x128] sm:$0xf0]  ;;  %v3821_v25 = vld [vmem:[%s6016_s20 + $0x1a4] sm:$0xf]  ;;  %v2919_v26 = vor.u32 %v3880_v18, %v2918_v17  ;;  %v2910_v28 = vld [vmem:[%s5997_s7 + $0x60] sm:$0xf] }
  0x3a   :  { %638 = vmatpush.bf16.msrb.mxu3 %v2707_v30  ;;  %v2816_v27 = vld [vmem:[%s6016_s20 + $0x1a8] sm:$0xf0]  ;;  %v3878_v29 = vld [vmem:[%s5997_s7 + $0x64] sm:$0xf0]  ;;  %v2755_v30 = vor.u32 %v3805_v23, %v2752_v24  ;;  %v3803_v32 = vld [vmem:[%s6016_s20 + $0x114] sm:$0xf] }
  0x3b   :  { %601 = vmatmul.bf16.vlgmr.msrb.gmra.mxu0 %v4520_v36  ;;  %v2744_v33 = vld [vmem:[%s6016_s20 + $0x118] sm:$0xf0]  ;;  %v3819_v34 = vld [vmem:[%s6016_s20 + $0x194] sm:$0xf]  ;;  %v2902_v38 = vld [vmem:[%s5997_s7 + $0x50] sm:$0xf] }
  0x3c   :  { %649 = vmatpush.bf16.msra.mxu0 %v2795_v31  ;;  %615 = vmatmul.bf16.vlgmr.msrb.gmra.mxu1 %v4531_v40  ;;  %v2819_v31 = vor.u32 %v3821_v25, %v2816_v27  ;;  %v2808_v37 = vld [vmem:[%s6016_s20 + $0x198] sm:$0xf0]  ;;  %v3876_v39 = vld [vmem:[%s5997_s7 + $0x54] sm:$0xf0]  ;;  %v2747_v41 = vor.u32 %v3803_v32, %v2744_v33  ;;  %v2800_v47 = vld [vmem:[%s6016_s20 + $0x188] sm:$0xf0] }
  0x3d   :  { %663 = vmatpush.bf16.msra.mxu1 %v2859_v35  ;;  %625 = vmatpush.bf16.msrb.mxu2 %v2635_v43  ;;  %v2911_v35 = vor.u32 %v3878_v29, %v2910_v28  ;;  %v2811_v42 = vor.u32 %v3819_v34, %v2808_v37  ;;  %v3801_v43 = vld [vmem:[%s6016_s20 + $0x104] sm:$0xf]  ;;  %v2903_v46 = vor.u32 %v3876_v39, %v2902_v38  ;;  %v3879_v48 = vld [vmem:[%s5997_s7 + $0x74] sm:$0xf]  ;;  %v2894_v50 = vld [vmem:[%s5997_s7 + $0x40] sm:$0xf] }
  0x3e   :  { %639 = vmatpush.bf16.msrb.mxu3 %v2699_v44  ;;  %v2736_v44 = vld [vmem:[%s6016_s20 + $0x108] sm:$0xf0]  ;;  %v3874_v51 = vld [vmem:[%s5997_s7 + $0x44] sm:$0xf0]  ;;  %v3875_v61 = vld [vmem:[%s5997_s7 + $0x54] sm:$0xf] }
  0x3f   :  { %v2739_v52 = vor.u32 %v3801_v43, %v2736_v44  ;;  %v2904_v62 = vld [vmem:[%s5997_s7 + $0x58] sm:$0xf0]  ;;  %v3873_v0 = vld [vmem:[%s5997_s7 + $0x44] sm:$0xf]  ;;  %v2896_v1 = vld [vmem:[%s5997_s7 + $0x48] sm:$0xf0] }
  0x40   :  { %650 = vmatpush.bf16.msra.mxu0 %v2787_v45  ;;  %v3817_v45 = vld [vmem:[%s6016_s20 + $0x184] sm:$0xf]  ;;  %v2899_v2 = vor.u32 %v3873_v0, %v2896_v1  ;;  %v2886_v3 = vld [vmem:[%s5997_s7 + $0x30] sm:$0xf]  ;;  %v3872_v4 = vld [vmem:[%s5997_s7 + $0x34] sm:$0xf0] }
  0x41   :  { %664 = vmatpush.bf16.msra.mxu1 %v2851_v49  ;;  %626 = vmatpush.bf16.msrb.mxu2 %v2627_v56  ;;  %v2920_v49 = vld [vmem:[%s5997_s7 + $0x78] sm:$0xf0]  ;;  %v2803_v53 = vor.u32 %v3817_v45, %v2800_v47  ;;  %v3877_v56 = vld [vmem:[%s5997_s7 + $0x64] sm:$0xf]  ;;  %v2887_v6 = vor.u32 %v3872_v4, %v2886_v3  ;;  %v3870_v9 = vld [vmem:[%s5997_s7 + $0x24] sm:$0xf0] }
  0x42   :  { %640 = vmatpush.bf16.msrb.mxu3 %v2691_v57  ;;  %v2923_v54 = vor.u32 %v3879_v48, %v2920_v49  ;;  %v2912_v57 = vld [vmem:[%s5997_s7 + $0x68] sm:$0xf0]  ;;  %v3869_v11 = vld [vmem:[%s5997_s7 + $0x24] sm:$0xf]  ;;  %v2870_v15 = vld [vmem:[%s5997_s7 + $0x10] sm:$0xf] }
  0x43   :  { %v2915_v60 = vor.u32 %v3877_v56, %v2912_v57  ;;  %v3868_v16 = vld [vmem:[%s5997_s7 + $0x14] sm:$0xf0]  ;;  %v3867_v17 = vld [vmem:[%s5997_s7 + $0x14] sm:$0xf]  ;;  %v3865_v23 = vld [vmem:[%s5997_s7 + $0x4] sm:$0xf] }
  0x44   :  { %651 = vmatpush.bf16.msra.mxu0 %v2779_v59  ;;  %v2895_v59 = vor.u32 %v3874_v51, %v2894_v50  ;;  %v2871_v18 = vor.u32 %v3868_v16, %v2870_v15  ;;  %v2864_v25 = vld [vmem:[%s5997_s7 + $0x8] sm:$0xf0]  ;;  %v2982_v27 = vld [vmem:[%s5997_s7 + $0xf0] sm:$0xf]  ;;  %v3896_v28 = vld [vmem:[%s5997_s7 + $0xf4] sm:$0xf0] }
  0x45   :  { %665 = vmatpush.bf16.msra.mxu1 %v2843_v63  ;;  %627 = vmatpush.bf16.msrb.mxu2 %v2619_v5  ;;  %v2907_v63 = vor.u32 %v3875_v61, %v2904_v62  ;;  %v3871_v5 = vld [vmem:[%s5997_s7 + $0x34] sm:$0xf]  ;;  %v3046_v32 = vld [vmem:[%s5998_s6 + $0x70] sm:$0xf]  ;;  %v3848_v33 = vld [vmem:[%s5998_s6 + $0x74] sm:$0xf0] }
  0x46   :  { %641 = vmatpush.bf16.msrb.mxu3 %v2683_v7  ;;  %v2888_v7 = vld [vmem:[%s5997_s7 + $0x38] sm:$0xf0]  ;;  %v3895_v29 = vld [vmem:[%s5997_s7 + $0xf4] sm:$0xf]  ;;  %v3893_v43 = vld [vmem:[%s5997_s7 + $0xe4] sm:$0xf] }
  0x47   :  { %v2891_v10 = vor.u32 %v3871_v5, %v2888_v7  ;;  %v3847_v37 = vld [vmem:[%s5998_s6 + $0x74] sm:$0xf]  ;;  %v3048_v38 = vld [vmem:[%s5998_s6 + $0x78] sm:$0xf0]  ;;  %v2976_v45 = vld [vmem:[%s5997_s7 + $0xe8] sm:$0xf0] }
  0x48   :  { %652 = vmatpush.bf16.msra.mxu0 %v2771_v8  ;;  %v2878_v8 = vld [vmem:[%s5997_s7 + $0x20] sm:$0xf]  ;;  %v3051_v39 = vor.u32 %v3847_v37, %v3048_v38  ;;  %v3846_v47 = vld [vmem:[%s5998_s6 + $0x64] sm:$0xf0]  ;;  %v2979_v48 = vor.u32 %v3893_v43, %v2976_v45  ;;  %v3845_v50 = vld [vmem:[%s5998_s6 + $0x64] sm:$0xf] }
  0x49   :  { %666 = vmatpush.bf16.msra.mxu1 %v2835_v12  ;;  %628 = vmatpush.bf16.msrb.mxu2 %v2611_v19  ;;  %v2880_v12 = vld [vmem:[%s5997_s7 + $0x28] sm:$0xf0]  ;;  %v2879_v13 = vor.u32 %v3870_v9, %v2878_v8  ;;  %v2872_v19 = vld [vmem:[%s5997_s7 + $0x18] sm:$0xf0]  ;;  %v3891_v56 = vld [vmem:[%s5997_s7 + $0xd4] sm:$0xf] }
  0x4a   :  { %642 = vmatpush.bf16.msrb.mxu3 %v2675_v20  ;;  %v2883_v14 = vor.u32 %v3869_v11, %v2880_v12  ;;  %v2875_v20 = vor.u32 %v3867_v17, %v2872_v19  ;;  %v3040_v51 = vld [vmem:[%s5998_s6 + $0x68] sm:$0xf0]  ;;  %v3844_v61 = vld [vmem:[%s5998_s6 + $0x54] sm:$0xf0]  ;;  %v3843_v0 = vld [vmem:[%s5998_s6 + $0x54] sm:$0xf] }
  0x4b   :  { %v3032_v1 = vld [vmem:[%s5998_s6 + $0x58] sm:$0xf0]  ;;  %v2958_v3 = vld [vmem:[%s5997_s7 + $0xc0] sm:$0xf]  ;;  %v3890_v4 = vld [vmem:[%s5997_s7 + $0xc4] sm:$0xf0] }
  0x4c   :  { %653 = vmatpush.bf16.msra.mxu0 %v2763_v21  ;;  %629 = vmatmul.bf16.vlgmr.msrb.gmra.mxu2 %v4427_v55  ;;  %v2862_v21 = vld [vmem:[%s5997_s7] sm:$0xf]  ;;  %v3889_v5 = vld [vmem:[%s5997_s7 + $0xc4] sm:$0xf]  ;;  %v2959_v7 = vor.u32 %v3890_v4, %v2958_v3  ;;  %v2960_v8 = vld [vmem:[%s5997_s7 + $0xc8] sm:$0xf0] }
  0x4d   :  { %667 = vmatpush.bf16.msra.mxu1 %v2827_v22  ;;  %905 = vmatpush.bf16.msra.mxu2 %v2919_v26  ;;  %v3866_v22 = vld [vmem:[%s5997_s7 + $0x4] sm:$0xf0]  ;;  %v2867_v26 = vor.u32 %v3865_v23, %v2864_v25  ;;  %v3022_v9 = vld [vmem:[%s5998_s6 + $0x40] sm:$0xf]  ;;  %v2963_v12 = vor.u32 %v3889_v5, %v2960_v8  ;;  %v3024_v15 = vld [vmem:[%s5998_s6 + $0x48] sm:$0xf0] }
  0x4e   :  { %643 = vmatmul.bf16.vlgmr.msrb.gmra.mxu3 %v4435_v58  ;;  %v2863_v24 = vor.u32 %v3866_v22, %v2862_v21  ;;  %v2950_v17 = vld [vmem:[%s5997_s7 + $0xb0] sm:$0xf]  ;;  %v3887_v19 = vld [vmem:[%s5997_s7 + $0xb4] sm:$0xf]  ;;  %v2952_v21 = vld [vmem:[%s5997_s7 + $0xb8] sm:$0xf0] }
  0x4f   :  { %v3014_v22 = vld [vmem:[%s5998_s6 + $0x30] sm:$0xf]  ;;  %v3840_v23 = vld [vmem:[%s5998_s6 + $0x34] sm:$0xf0]  ;;  %v3838_v37 = vld [vmem:[%s5998_s6 + $0x24] sm:$0xf0] }
  0x50   :  { %654 = vmatpush.bf16.msra.mxu0 %v2755_v30  ;;  %v2983_v30 = vor.u32 %v3896_v28, %v2982_v27  ;;  %v3015_v25 = vor.u32 %v3840_v23, %v3014_v22  ;;  %v3016_v27 = vld [vmem:[%s5998_s6 + $0x38] sm:$0xf0]  ;;  %v2942_v28 = vld [vmem:[%s5997_s7 + $0xa0] sm:$0xf]  ;;  %v3837_v38 = vld [vmem:[%s5998_s6 + $0x24] sm:$0xf] }
  0x51   :  { %668 = vmatpush.bf16.msra.mxu1 %v2819_v31  ;;  %906 = vmatpush.bf16.msra.mxu2 %v2911_v35  ;;  %v2984_v31 = vld [vmem:[%s5997_s7 + $0xf8] sm:$0xf0]  ;;  %v3047_v35 = vor.u32 %v3848_v33, %v3046_v32  ;;  %v2944_v32 = vld [vmem:[%s5997_s7 + $0xa8] sm:$0xf0]  ;;  %v2990_v4 = vld [vmem:[%s5998_s6] sm:$0xf] }
  0x52   :  { %v2987_v34 = vor.u32 %v3895_v29, %v2984_v31  ;;  %919 = vmatpush.bf16.msra.mxu3 %v2983_v30  ;;  %v3886_v30 = vld [vmem:[%s5997_s7 + $0xa4] sm:$0xf0]  ;;  %v3885_v31 = vld [vmem:[%s5997_s7 + $0xa4] sm:$0xf]  ;;  %v2928_v3 = vld [vmem:[%s5997_s7 + $0x88] sm:$0xf0] }
  0x53   :  { %v2943_v33 = vor.u32 %v3886_v30, %v2942_v28  ;;  %v3834_v5 = vld [vmem:[%s5998_s6 + $0x4] sm:$0xf0]  ;;  %v3861_v23 = vld [vmem:[%s5998_s6 + $0xe4] sm:$0xf]  ;;  %v3104_v28 = vld [vmem:[%s5998_s6 + $0xe8] sm:$0xf0] }
  0x54   :  { %655 = vmatpush.bf16.msra.mxu0 %v2747_v41  ;;  %v2974_v41 = vld [vmem:[%s5997_s7 + $0xe0] sm:$0xf]  ;;  %v2991_v8 = vor.u32 %v3834_v5, %v2990_v4  ;;  %v3862_v22 = vld [vmem:[%s5998_s6 + $0xe4] sm:$0xf0]  ;;  %v3853_v5 = vld [vmem:[%s5998_s6 + $0xa4] sm:$0xf] }
  0x55   :  { %669 = vmatpush.bf16.msra.mxu1 %v2811_v42  ;;  %907 = vmatpush.bf16.msra.mxu2 %v2903_v46  ;;  %v3894_v42 = vld [vmem:[%s5997_s7 + $0xe4] sm:$0xf0]  ;;  %v3038_v46 = vld [vmem:[%s5998_s6 + $0x60] sm:$0xf] }
  0x56   :  { %v2975_v44 = vor.u32 %v3894_v42, %v2974_v41  ;;  %v3039_v49 = vor.u32 %v3846_v47, %v3038_v46  ;;  %v3008_v41 = vld [vmem:[%s5998_s6 + $0x28] sm:$0xf0]  ;;  %v2934_v46 = vld [vmem:[%s5997_s7 + $0x90] sm:$0xf]  ;;  %v3884_v47 = vld [vmem:[%s5997_s7 + $0x94] sm:$0xf0] }
  0x57   :  { %v3011_v42 = vor.u32 %v3837_v38, %v3008_v41 }
  0x58   :  { %656 = vmatpush.bf16.msra.mxu0 %v2739_v52  ;;  %920 = vmatpush.bf16.msra.mxu3 %v2975_v44  ;;  %v3043_v52 = vor.u32 %v3845_v50, %v3040_v51  ;;  %v4902_v44 = vld [vmem:[%s5999_s5] sm:$0x3]  ;;  %v2936_v50 = vld [vmem:[%s5997_s7 + $0x98] sm:$0xf0]  ;;  %v2998_v51 = vld [vmem:[%s5998_s6 + $0x10] sm:$0xf] }
  0x59   :  { %670 = vmatpush.bf16.msra.mxu1 %v2803_v53  ;;  %908 = vmatpush.bf16.msra.mxu2 %v2895_v59  ;;  %v2966_v53 = vld [vmem:[%s5997_s7 + $0xd0] sm:$0xf]  ;;  %v2968_v59 = vld [vmem:[%s5997_s7 + $0xd8] sm:$0xf0] }
  0x5a   :  { %v2971_v62 = vor.u32 %v3891_v56, %v2968_v59  ;;  %v3835_v59 = vld [vmem:[%s5998_s6 + $0x14] sm:$0xf] }
  0x5b   :  { %657 = vmatmul.bf16.vlgmr.msra.gmra.mxu0 %v4520_v36 }
  0x5c   :  { %933 = vmatpush.bf16.msrb.mxu0 %v2923_v54  ;;  %671 = vmatmul.bf16.vlgmr.msra.gmra.mxu1 %v4531_v40  ;;  %v3892_v54 = vld [vmem:[%s5997_s7 + $0xd4] sm:$0xf0] }
  0x5d   :  { %909 = vmatpush.bf16.msra.mxu2 %v2887_v6  ;;  %947 = vmatpush.bf16.msrb.mxu1 %v2987_v34  ;;  %v2967_v57 = vor.u32 %v3892_v54, %v2966_v53  ;;  %v2947_v34 = vor.u32 %v3885_v31, %v2944_v32  ;;  %v221_v53 = vperm.slane %v4902_v44, 0  ;;  %v3107_v31 = vor.u32 %v3861_v23, %v3104_v28  ;;  %v3094_v32 = vld [vmem:[%s5998_s6 + $0xd0] sm:$0xf] }
  0x5f   :  { %921 = vmatpush.bf16.msra.mxu3 %v2967_v57 }
  0x60   :  { %934 = vmatpush.bf16.msrb.mxu0 %v2915_v60  ;;  %v3030_v60 = vld [vmem:[%s5998_s6 + $0x50] sm:$0xf] }
  0x61   :  { %910 = vmatpush.bf16.msra.mxu2 %v2879_v13  ;;  %948 = vmatpush.bf16.msrb.mxu1 %v2979_v48  ;;  %v3883_v48 = vld [vmem:[%s5997_s7 + $0x94] sm:$0xf] }
  0x62   :  { %v2939_v56 = vor.u32 %v3883_v48, %v2936_v50  ;;  %v3858_v48 = vld [vmem:[%s5998_s6 + $0xc4] sm:$0xf0] }
  0x63   :  { %922 = vmatpush.bf16.msra.mxu3 %v2959_v7 }
  0x64   :  { %935 = vmatpush.bf16.msrb.mxu0 %v2907_v63  ;;  %v3031_v63 = vor.u32 %v3844_v61, %v3030_v60  ;;  %v3000_v60 = vld [vmem:[%s5998_s6 + $0x18] sm:$0xf0] }
  0x65   :  { %911 = vmatpush.bf16.msra.mxu2 %v2871_v18  ;;  %949 = vmatpush.bf16.msrb.mxu1 %v2971_v62  ;;  %v3888_v18 = vld [vmem:[%s5997_s7 + $0xb4] sm:$0xf0]  ;;  %v3003_v62 = vor.u32 %v3835_v59, %v3000_v60  ;;  %v3078_v60 = vld [vmem:[%s5998_s6 + $0xb0] sm:$0xf] }
  0x68   :  { %936 = vmatpush.bf16.msrb.mxu0 %v2899_v2  ;;  %v3035_v2 = vor.u32 %v3843_v0, %v3032_v1  ;;  %v3882_v0 = vld [vmem:[%s5997_s7 + $0x84] sm:$0xf0]  ;;  %v3881_v1 = vld [vmem:[%s5997_s7 + $0x84] sm:$0xf] }
  0x69   :  { %912 = vmatpush.bf16.msra.mxu2 %v2863_v24  ;;  %950 = vmatpush.bf16.msrb.mxu1 %v2963_v12  ;;  %v2955_v24 = vor.u32 %v3887_v19, %v2952_v21  ;;  %v2931_v7 = vor.u32 %v3881_v1, %v2928_v3  ;;  %v3110_v12 = vld [vmem:[%s5998_s6 + $0xf0] sm:$0xf]  ;;  %v3102_v21 = vld [vmem:[%s5998_s6 + $0xe0] sm:$0xf]  ;;  %v3080_v1 = vld [vmem:[%s5998_s6 + $0xb8] sm:$0xf0] }
  0x6a   :  { %v3854_v3 = vld [vmem:[%s5998_s6 + $0xa4] sm:$0xf0] }
  0x6c   :  { %937 = vmatpush.bf16.msrb.mxu0 %v2891_v10  ;;  %v3842_v10 = vld [vmem:[%s5998_s6 + $0x44] sm:$0xf0] }
  0x6d   :  { %1121 = vmatpush.bf16.msrb.mxu2 %v3047_v35  ;;  %v3023_v13 = vor.u32 %v3842_v10, %v3022_v9  ;;  %951 = vmatpush.bf16.msrb.mxu1 %v2955_v24  ;;  %v3006_v35 = vld [vmem:[%s5998_s6 + $0x20] sm:$0xf]  ;;  %v3833_v9 = vld [vmem:[%s5998_s6 + $0x4] sm:$0xf]  ;;  %v2992_v10 = vld [vmem:[%s5998_s6 + $0x8] sm:$0xf0] }
  0x70   :  { %938 = vmatpush.bf16.msrb.mxu0 %v2883_v14  ;;  %v3841_v14 = vld [vmem:[%s5998_s6 + $0x44] sm:$0xf] }
  0x71   :  { %1122 = vmatpush.bf16.msrb.mxu2 %v3039_v49  ;;  %v3027_v16 = vor.u32 %v3841_v14, %v3024_v15  ;;  %952 = vmatpush.bf16.msrb.mxu1 %v2947_v34  ;;  %v2935_v49 = vor.u32 %v3884_v47, %v2934_v46  ;;  %v2995_v14 = vor.u32 %v3833_v9, %v2992_v10  ;;  %v3864_v15 = vld [vmem:[%s5998_s6 + $0xf4] sm:$0xf0]  ;;  %v3859_v34 = vld [vmem:[%s5998_s6 + $0xd4] sm:$0xf]  ;;  %v3086_v47 = vld [vmem:[%s5998_s6 + $0xc0] sm:$0xf] }
  0x74   :  { %939 = vmatpush.bf16.msrb.mxu0 %v2875_v20  ;;  %v2951_v20 = vor.u32 %v3888_v18, %v2950_v17  ;;  %v3112_v17 = vld [vmem:[%s5998_s6 + $0xf8] sm:$0xf0]  ;;  %v3111_v18 = vor.u32 %v3864_v15, %v3110_v12 }
  0x75   :  { %1123 = vmatpush.bf16.msrb.mxu2 %v3031_v63  ;;  %v2926_v63 = vld [vmem:[%s5997_s7 + $0x80] sm:$0xf]  ;;  %953 = vmatpush.bf16.msrb.mxu1 %v2939_v56 }
  0x76   :  { %923 = vmatpush.bf16.msra.mxu3 %v2951_v20 }
  0x78   :  { %940 = vmatpush.bf16.msrb.mxu0 %v2867_v26  ;;  %v3839_v26 = vld [vmem:[%s5998_s6 + $0x34] sm:$0xf] }
  0x79   :  { %1124 = vmatpush.bf16.msrb.mxu2 %v3023_v13  ;;  %v3019_v29 = vor.u32 %v3839_v26, %v3016_v27  ;;  %954 = vmatpush.bf16.msrb.mxu1 %v2931_v7  ;;  %v3103_v27 = vor.u32 %v3862_v22, %v3102_v21  ;;  %v3072_v7 = vld [vmem:[%s5998_s6 + $0xa8] sm:$0xf0] }
  0x7a   :  { %924 = vmatpush.bf16.msra.mxu3 %v2943_v33  ;;  %v3860_v33 = vld [vmem:[%s5998_s6 + $0xd4] sm:$0xf0]  ;;  %v3075_v12 = vor.u32 %v3853_v5, %v3072_v7  ;;  %v3923_v5 = vld [vmem:[%s6001_s9 + $0xcc] sm:$0xf0] }
  0x7b   :  { %v3095_v38 = vor.u32 %v3860_v33, %v3094_v32 }
  0x7c   :  { %1149 = vmatpush.bf16.msra.mxu0 %v3051_v39  ;;  %v3007_v39 = vor.u32 %v3838_v37, %v3006_v35 }
  0x7d   :  { %1125 = vmatpush.bf16.msrb.mxu2 %v3015_v25 }
  0x7e   :  { %925 = vmatpush.bf16.msra.mxu3 %v2935_v49  ;;  %v3857_v49 = vld [vmem:[%s5998_s6 + $0xc4] sm:$0xf] }
  0x80   :  { %1150 = vmatpush.bf16.msra.mxu0 %v3043_v52  ;;  %v3836_v52 = vld [vmem:[%s5998_s6 + $0x14] sm:$0xf0] }
  0x81   :  { %1126 = vmatpush.bf16.msrb.mxu2 %v3007_v39  ;;  %v2999_v57 = vor.u32 %v3836_v52, %v2998_v51  ;;  %v3096_v39 = vld [vmem:[%s5998_s6 + $0xd8] sm:$0xf0] }
  0x82   :  { %v3099_v41 = vor.u32 %v3859_v34, %v3096_v39 }
  0x84   :  { %1151 = vmatpush.bf16.msra.mxu0 %v3035_v2  ;;  %v2927_v2 = vor.u32 %v3882_v0, %v2926_v63 }
  0x85   :  { %1127 = vmatpush.bf16.msrb.mxu2 %v2999_v57 }
  0x86   :  { %926 = vmatpush.bf16.msra.mxu3 %v2927_v2  ;;  %v3070_v2 = vld [vmem:[%s5998_s6 + $0xa0] sm:$0xf] }
  0x87   :  { %v3071_v10 = vor.u32 %v3854_v3, %v3070_v2  ;;  %v3232_v3 = vld [vmem:[%s6001_s9 + $0xf0] sm:$0xf0] }
  0x88   :  { %1152 = vmatpush.bf16.msra.mxu0 %v3027_v16  ;;  %v3863_v16 = vld [vmem:[%s5998_s6 + $0xf4] sm:$0xf] }
  0x89   :  { %v3115_v19 = vor.u32 %v3863_v16, %v3112_v17  ;;  %1128 = vmatpush.bf16.msrb.mxu2 %v2991_v8  ;;  %v3054_v17 = vld [vmem:[%s5998_s6 + $0x80] sm:$0xf] }
  0x8a   :  { %1135 = vmatpush.bf16.msrb.mxu3 %v3111_v18  ;;  %v3850_v18 = vld [vmem:[%s5998_s6 + $0x84] sm:$0xf0] }
  0x8b   :  { %1163 = vmatpush.bf16.msra.mxu1 %v3115_v19  ;;  %v3849_v19 = vld [vmem:[%s5998_s6 + $0x84] sm:$0xf]  ;;  %v3055_v22 = vor.u32 %v3850_v18, %v3054_v17  ;;  %v3198_v17 = vld [vmem:[%s6001_s9 + $0xa0] sm:$0xf]  ;;  %v3919_v18 = vld [vmem:[%s6001_s9 + $0xac] sm:$0xf0] }
  0x8c   :  { %1153 = vmatpush.bf16.msra.mxu0 %v3019_v29 }
  0x8e   :  { %1136 = vmatpush.bf16.msrb.mxu3 %v3103_v27 }
  0x8f   :  { %1164 = vmatpush.bf16.msra.mxu1 %v3107_v31 }
  0x90   :  { %1154 = vmatpush.bf16.msra.mxu0 %v3011_v42  ;;  %v4994_v42 = vld [vmem:[%s6000_s3] sm:$0x3] }
  0x91   :  { %v70_v57 = vperm.slane %v4994_v42, 0 }
  0x92   :  { %1137 = vmatpush.bf16.msrb.mxu3 %v3095_v38 }
  0x93   :  { %1165 = vmatpush.bf16.msra.mxu1 %v3099_v41 }
  0x94   :  { %1155 = vmatpush.bf16.msra.mxu0 %v3003_v62  ;;  %v3855_v62 = vld [vmem:[%s5998_s6 + $0xb4] sm:$0xf] }
  0x95   :  { %v3083_v4 = vor.u32 %v3855_v62, %v3080_v1  ;;  %v3925_v1 = vld [vmem:[%s6001_s9 + $0xe4] sm:$0xf] }
  0x96   :  { %v3235_v7 = vor.u32 %v3925_v1, %v3232_v3  ;;  %v3905_v1 = vld [vmem:[%s6001_s9 + $0x44] sm:$0xf]  ;;  %v3152_v3 = vld [vmem:[%s6001_s9 + $0x50] sm:$0xf0] }
  0x98   :  { %v4830_v6 = vpop.f32.mrf.mxu0  ;;  %1156 = vmatpush.bf16.msra.mxu0 %v2995_v14  ;;  %v3852_v14 = vld [vmem:[%s5998_s6 + $0x94] sm:$0xf0] }
  0x99   :  { %v4841_v11 = vpop.f32.mrf.mxu1  ;;  %v133_v8 = vadd.f32 %v4830_v6, %v70_v57  ;;  %v3851_v6 = vld [vmem:[%s5998_s6 + $0x94] sm:$0xf] }
  0x9b   :  { %4058 = vtanh.f32 %v133_v8 }
  0xa0   :  { %v4897_v43 = vpop.f32.mrf.mxu0 }
  0xa1   :  { %v4904_v45 = vpop.f32.mrf.mxu1  ;;  %v135_v9 = vadd.f32 %v4897_v43, %v70_v57  ;;  %v3064_v43 = vld [vmem:[%s5998_s6 + $0x98] sm:$0xf0]  ;;  %v4059_v23 = vpop.eup %4058  ;;  %v3955_v57 = vld [vmem:[%s6001_s9 + $0x1cc] sm:$0xf0] }
  0xa2   :  { %v3067_v16 = vor.u32 %v3851_v6, %v3064_v43  ;;  %v3921_v6 = vld [vmem:[%s6001_s9 + $0xc4] sm:$0xf]  ;;  %v3216_v43 = vld [vmem:[%s6001_s9 + $0xd0] sm:$0xf0] }
  0xa3   :  { %4060 = vtanh.f32 %v135_v9  ;;  %v3957_v9 = vld [vmem:[%s6001_s9 + $0x1e4] sm:$0xf] }
  0xaf   :  { %v574_v54 = vpop.f32.mrf.mxu2 }
  0xb0   :  { %v575_v13 = vadd.f32 %v574_v54, %v221_v53  ;;  %v3088_v54 = vld [vmem:[%s5998_s6 + $0xc8] sm:$0xf0] }
  0xb1   :  { %v3091_v56 = vor.u32 %v3857_v49, %v3088_v54 }
  0xb2   :  { %v588_v61 = vpop.f32.mrf.mxu3 }
  0xb3   :  { %v589_v24 = vadd.f32 %v588_v61, %v575_v13  ;;  %v3856_v61 = vld [vmem:[%s5998_s6 + $0xb4] sm:$0xf0]  ;;  %1166 = vmatpush.bf16.msra.mxu1 %v3091_v56  ;;  %v3062_v13 = vld [vmem:[%s5998_s6 + $0x90] sm:$0xf] }
  0xb4   :  { %v3079_v0 = vor.u32 %v3856_v61, %v3078_v60  ;;  %v3063_v15 = vor.u32 %v3852_v14, %v3062_v13  ;;  %v3959_v56 = vld [vmem:[%s6001_s9 + $0x1ec] sm:$0xf0]  ;;  %v3230_v60 = vld [vmem:[%s6001_s9 + $0xe0] sm:$0xf] }
  0xb5   :  { %v3927_v61 = vld [vmem:[%s6001_s9 + $0xec] sm:$0xf0] }
  0xb6   :  { %v3231_v62 = vor.u32 %v3927_v61, %v3230_v60  ;;  %v3947_v14 = vld [vmem:[%s6001_s9 + $0x18c] sm:$0xf0]  ;;  %v3296_v61 = vld [vmem:[%s6001_s9 + $0x170] sm:$0xf0] }
  0xb7   :  { %v576_v26 = vpop.f32.mrf.mxu2  ;;  %1167 = vmatpush.bf16.msra.mxu1 %v3083_v4  ;;  %v3214_v4 = vld [vmem:[%s6001_s9 + $0xc0] sm:$0xf] }
  0xb8   :  { %v602_v20 = vpop.f32.mrf.mxu0  ;;  %v577_v29 = vadd.f32 %v576_v26, %v221_v53  ;;  %v3087_v53 = vor.u32 %v3858_v48, %v3086_v47  ;;  %v4061_v26 = vpop.eup %4060  ;;  %v3215_v8 = vor.u32 %v3923_v5, %v3214_v4  ;;  %v3366_v4 = vld [vmem:[%s6001_s9 + $0x1e8] sm:$0xf]  ;;  %v3960_v5 = vld [vmem:[%s6001_s9 + $0x1f4] sm:$0xf0] }
  0xb9   :  { %v616_v25 = vpop.f32.mrf.mxu1  ;;  %v603_v35 = vadd.f32 %v602_v20, %v589_v24  ;;  %v3056_v20 = vld [vmem:[%s5998_s6 + $0x88] sm:$0xf0]  ;;  %v222_v24 = vperm.slane %v4902_v44, 1 }
  0xba   :  { %v590_v30 = vpop.f32.mrf.mxu3  ;;  %1138 = vmatpush.bf16.msrb.mxu3 %v3087_v53 }
  0xbb   :  { %v591_v37 = vadd.f32 %v590_v30, %v577_v29  ;;  %v617_v50 = vadd.f32 %v616_v25, %v603_v35  ;;  %1168 = vmatpush.bf16.msra.mxu1 %v3075_v12  ;;  %v3059_v25 = vor.u32 %v3849_v19, %v3056_v20  ;;  %v677_v29 = vpack.c.bf16 %v4061_v26, %v4059_v23  ;;  %v3310_v12 = vld [vmem:[%s6001_s9 + $0x180] sm:$0xf]  ;;  %v3953_v19 = vld [vmem:[%s6001_s9 + $0x1c4] sm:$0xf] }
  0xbc   :  { %v3199_v20 = vor.u32 %v3919_v18, %v3198_v17  ;;  %v3294_v23 = vld [vmem:[%s6001_s9 + $0x160] sm:$0xf]  ;;  %v3350_v17 = vld [vmem:[%s6001_s9 + $0x1c8] sm:$0xf]  ;;  %v3956_v18 = vld [vmem:[%s6001_s9 + $0x1d4] sm:$0xf0] }
  0xbe   :  { %1139 = vmatpush.bf16.msrb.mxu3 %v3079_v0  ;;  %v3951_v0 = vld [vmem:[%s6001_s9 + $0x1ac] sm:$0xf0] }
  0xbf   :  { %1169 = vmatpush.bf16.msra.mxu1 %v3067_v16  ;;  %v3219_v16 = vor.u32 %v3921_v6, %v3216_v43  ;;  %v3901_v6 = vld [vmem:[%s6001_s9 + $0x24] sm:$0xf]  ;;  %v3136_v43 = vld [vmem:[%s6001_s9 + $0x30] sm:$0xf0] }
  0xc0   :  { %v604_v46 = vpop.f32.mrf.mxu0 }
  0xc1   :  { %v605_v51 = vadd.f32 %v604_v46, %v591_v37  ;;  %v618_v52 = vpop.f32.mrf.mxu1  ;;  %v71_v46 = vperm.slane %v4994_v42, 1  ;;  %v3358_v42 = vld [vmem:[%s6001_s9 + $0x1e0] sm:$0xf] }
  0xc2   :  { %1140 = vmatpush.bf16.msrb.mxu3 %v3071_v10  ;;  %v3360_v10 = vld [vmem:[%s6001_s9 + $0x1f0] sm:$0xf0] }
  0xc3   :  { %v619_v59 = vadd.f32 %v618_v52, %v605_v51  ;;  %1170 = vmatpush.bf16.msra.mxu1 %v3059_v25  ;;  %v149_v51 = vadd.f32 %v4904_v45, %v71_v46  ;;  %v3359_v45 = vor.u32 %v3959_v56, %v3358_v42  ;;  %v3363_v13 = vor.u32 %v3957_v9, %v3360_v10  ;;  %v3917_v25 = vld [vmem:[%s6001_s9 + $0xa4] sm:$0xf]  ;;  %v3168_v56 = vld [vmem:[%s6001_s9 + $0x70] sm:$0xf0]  ;;  %v3134_v9 = vld [vmem:[%s6001_s9 + $0x20] sm:$0xf] }
  0xc4   :  { %v3909_v42 = vld [vmem:[%s6001_s9 + $0x64] sm:$0xf]  ;;  %v3903_v10 = vld [vmem:[%s6001_s9 + $0x2c] sm:$0xf0] }
  0xc5   :  { %v711_v63 = vpack.c.bf16 %v619_v59, %v617_v50  ;;  %v147_v50 = vadd.f32 %v4841_v11, %v71_v46  ;;  %v3342_v11 = vld [vmem:[%s6001_s9 + $0x1c0] sm:$0xf] }
  0xc6   :  { %1141 = vmatpush.bf16.msrb.mxu3 %v3063_v15  ;;  %v3343_v59 = vor.u32 %v3955_v57, %v3342_v11  ;;  %v3311_v15 = vor.u32 %v3947_v14, %v3310_v12  ;;  %v3166_v46 = vld [vmem:[%s6001_s9 + $0x60] sm:$0xf]  ;;  %v3171_v11 = vor.u32 %v3909_v42, %v3168_v56  ;;  %v3907_v57 = vld [vmem:[%s6001_s9 + $0x4c] sm:$0xf0]  ;;  %v3937_v12 = vld [vmem:[%s6001_s9 + $0x144] sm:$0xf] }
  0xc7   :  { %913 = vmatmul.bf16.vlgmr.msra.gmra.mxu2 %v711_v63  ;;  %941 = vmatmul.bf16.vlgmr.msrb.gmra.mxu0 %v711_v63  ;;  %4062 = vtanh.f32 %v147_v50  ;;  %v3326_v63 = vld [vmem:[%s6001_s9 + $0x1a0] sm:$0xf]  ;;  %v3312_v50 = vld [vmem:[%s6001_s9 + $0x190] sm:$0xf0]  ;;  %v3224_v56 = vld [vmem:[%s6001_s9 + $0xd8] sm:$0xf0] }
  0xc8   :  { %4064 = vtanh.f32 %v149_v51  ;;  %1587 = vmatpush.bf16.msra.mxu2 %v3231_v62  ;;  %v3327_v2 = vor.u32 %v3951_v0, %v3326_v63  ;;  %1615 = vmatpush.bf16.msrb.mxu0 %v3235_v7  ;;  %v3262_v51 = vld [vmem:[%s6001_s9 + $0x120] sm:$0xf]  ;;  %v3931_v0 = vld [vmem:[%s6001_s9 + $0x10c] sm:$0xf0]  ;;  %v3155_v7 = vor.u32 %v3905_v1, %v3152_v3  ;;  %v3280_v14 = vld [vmem:[%s6001_s9 + $0x150] sm:$0xf0] }
  0xc9   :  { %v3246_v63 = vld [vmem:[%s6001_s9 + $0x100] sm:$0xf]  ;;  %v3918_v3 = vld [vmem:[%s6001_s9 + $0xac] sm:$0xf] }
  0xca   :  { %1142 = vmatpush.bf16.msrb.mxu3 %v3055_v22 }
  0xcc   :  { %1588 = vmatpush.bf16.msra.mxu2 %v3215_v8  ;;  %1616 = vmatpush.bf16.msrb.mxu0 %v3219_v16  ;;  %v3367_v8 = vor.u32 %v3960_v5, %v3366_v4  ;;  %v3139_v16 = vor.u32 %v3901_v6, %v3136_v43  ;;  %v3208_v4 = vld [vmem:[%s6001_s9 + $0xb8] sm:$0xf0]  ;;  %v3940_v6 = vld [vmem:[%s6001_s9 + $0x154] sm:$0xf0]  ;;  %v3914_v43 = vld [vmem:[%s6001_s9 + $0x8c] sm:$0xf] }
  0xcd   :  { %v4063_v52 = vpop.eup %4062  ;;  %v3211_v5 = vor.u32 %v3918_v3, %v3208_v4  ;;  %v3898_v4 = vld [vmem:[%s6001_s9 + $0xc] sm:$0xf] }
  0xce   :  { %v4065_v53 = vpop.eup %4064 }
  0xcf   :  { %v630_v21 = vpop.f32.mrf.mxu2  ;;  %v678_v54 = vpack.c.bf16 %v4065_v53, %v4063_v52  ;;  %v3935_v52 = vld [vmem:[%s6001_s9 + $0x12c] sm:$0xf0] }
  0xd0   :  { %v631_v28 = vadd.f32 %v630_v21, %v222_v24  ;;  %v3344_v21 = vld [vmem:[%s6001_s9 + $0x1d0] sm:$0xf0]  ;;  %1589 = vmatpush.bf16.msra.mxu2 %v3199_v20  ;;  %v3118_v20 = vld [vmem:[%s6001_s9] sm:$0xf] }
  0xd1   :  { %v644_v27 = vpop.f32.mrf.mxu3  ;;  %v3347_v22 = vor.u32 %v3953_v19, %v3344_v21  ;;  %v3351_v19 = vor.u32 %v3956_v18, %v3350_v17  ;;  %v3899_v21 = vld [vmem:[%s6001_s9 + $0xc] sm:$0xf0]  ;;  %v3174_v18 = vld [vmem:[%s6001_s9 + $0x68] sm:$0xf] }
  0xd2   :  { %v645_v33 = vadd.f32 %v644_v27, %v631_v28  ;;  %v3200_v27 = vld [vmem:[%s6001_s9 + $0xb0] sm:$0xf0]  ;;  %v3182_v28 = vld [vmem:[%s6001_s9 + $0x80] sm:$0xf] }
  0xd7   :  { %v632_v32 = vpop.f32.mrf.mxu2  ;;  %1129 = vmatmul.bf16.vlgmr.msrb.gmra.mxu2 %v677_v29  ;;  %1157 = vmatmul.bf16.vlgmr.msra.gmra.mxu0 %v677_v29  ;;  %v3915_v29 = vld [vmem:[%s6001_s9 + $0x8c] sm:$0xf0] }
  0xd8   :  { %v658_v30 = vpop.f32.mrf.mxu0  ;;  %v633_v34 = vadd.f32 %v632_v32, %v222_v24  ;;  %v3943_v24 = vld [vmem:[%s6001_s9 + $0x16c] sm:$0xf0]  ;;  %v3949_v32 = vld [vmem:[%s6001_s9 + $0x1a4] sm:$0xf] }
  0xd9   :  { %v672_v31 = vpop.f32.mrf.mxu1  ;;  %v646_v35 = vpop.f32.mrf.mxu3  ;;  %v659_v37 = vadd.f32 %v658_v30, %v645_v33  ;;  %v3295_v26 = vor.u32 %v3943_v24, %v3294_v23  ;;  %v3203_v30 = vor.u32 %v3917_v25, %v3200_v27  ;;  %v3328_v33 = vld [vmem:[%s6001_s9 + $0x1b0] sm:$0xf0]  ;;  %v3119_v23 = vor.u32 %v3899_v21, %v3118_v20  ;;  %v3238_v25 = vld [vmem:[%s6001_s9 + $0xe8] sm:$0xf]  ;;  %v3946_v20 = vld [vmem:[%s6001_s9 + $0x18c] sm:$0xf] }
  0xda   :  { %v647_v38 = vadd.f32 %v646_v35, %v633_v34  ;;  %v3331_v34 = vor.u32 %v3949_v32, %v3328_v33  ;;  %v3278_v35 = vld [vmem:[%s6001_s9 + $0x140] sm:$0xf]  ;;  %v3264_v24 = vld [vmem:[%s6001_s9 + $0x130] sm:$0xf0]  ;;  %v3334_v32 = vld [vmem:[%s6001_s9 + $0x1a8] sm:$0xf] }
  0xdb   :  { %v673_v47 = vadd.f32 %v672_v31, %v659_v37  ;;  %v3183_v31 = vor.u32 %v3915_v29, %v3182_v28  ;;  %1617 = vmatpush.bf16.msrb.mxu0 %v3203_v30  ;;  %v3939_v37 = vld [vmem:[%s6001_s9 + $0x14c] sm:$0xf0]  ;;  %v3897_v29 = vld [vmem:[%s6001_s9 + $0x4] sm:$0xf]  ;;  %v3120_v30 = vld [vmem:[%s6001_s9 + $0x10] sm:$0xf0] }
  0xdc   :  { %v3952_v33 = vld [vmem:[%s6001_s9 + $0x1b4] sm:$0xf0] }
  0xdd   :  { %1590 = vmatpush.bf16.msra.mxu2 %v3183_v31  ;;  %v3123_v31 = vor.u32 %v3897_v29, %v3120_v30  ;;  %v3176_v30 = vld [vmem:[%s6001_s9 + $0x78] sm:$0xf0] }
  0xe0   :  { %v660_v39 = vpop.f32.mrf.mxu0 }
  0xe1   :  { %v661_v44 = vadd.f32 %v660_v39, %v647_v38  ;;  %v674_v41 = vpop.f32.mrf.mxu1  ;;  %v3913_v38 = vld [vmem:[%s6001_s9 + $0x84] sm:$0xf]  ;;  %v3279_v39 = vor.u32 %v3939_v37, %v3278_v35  ;;  %v3335_v35 = vor.u32 %v3952_v33, %v3334_v32  ;;  %v3240_v37 = vld [vmem:[%s6001_s9 + $0xf8] sm:$0xf0]  ;;  %v3158_v32 = vld [vmem:[%s6001_s9 + $0x48] sm:$0xf] }
  0xe2   :  { %v3908_v33 = vld [vmem:[%s6001_s9 + $0x54] sm:$0xf0] }
  0xe3   :  { %v675_v48 = vadd.f32 %v674_v41, %v661_v44  ;;  %v3184_v44 = vld [vmem:[%s6001_s9 + $0x90] sm:$0xf0] }
  0xe4   :  { %v3187_v41 = vor.u32 %v3913_v38, %v3184_v44  ;;  %v3929_v38 = vld [vmem:[%s6001_s9 + $0x104] sm:$0xf] }
  0xe5   :  { %v712_v49 = vpack.c.bf16 %v675_v48, %v673_v47  ;;  %v3911_v47 = vld [vmem:[%s6001_s9 + $0x6c] sm:$0xf0]  ;;  %v3945_v48 = vld [vmem:[%s6001_s9 + $0x184] sm:$0xf] }
  0xe6   :  { %1618 = vmatpush.bf16.msrb.mxu0 %v3187_v41  ;;  %v3315_v53 = vor.u32 %v3945_v48, %v3312_v50  ;;  %v3368_v50 = vld [vmem:[%s6001_s9 + $0x1f8] sm:$0xf0] }
  0xe7   :  { %927 = vmatmul.bf16.vlgmr.msra.gmra.mxu3 %v712_v49  ;;  %955 = vmatmul.bf16.vlgmr.msrb.gmra.mxu1 %v712_v49  ;;  %v3167_v49 = vor.u32 %v3911_v47, %v3166_v46  ;;  %v3222_v46 = vld [vmem:[%s6001_s9 + $0xc8] sm:$0xf]  ;;  %v3924_v47 = vld [vmem:[%s6001_s9 + $0xd4] sm:$0xf0] }
  0xe8   :  { %1601 = vmatpush.bf16.msra.mxu3 %v3359_v45  ;;  %1629 = vmatpush.bf16.msrb.mxu1 %v3363_v13  ;;  %v3150_v45 = vld [vmem:[%s6001_s9 + $0x40] sm:$0xf]  ;;  %v3135_v13 = vor.u32 %v3903_v10, %v3134_v9  ;;  %v3223_v48 = vor.u32 %v3924_v47, %v3222_v46  ;;  %v3950_v9 = vld [vmem:[%s6001_s9 + $0x1ac] sm:$0xf] }
  0xe9   :  { %1591 = vmatpush.bf16.msra.mxu2 %v3167_v49  ;;  %v3151_v60 = vor.u32 %v3907_v57, %v3150_v45  ;;  %v3958_v49 = vld [vmem:[%s6001_s9 + $0x1ec] sm:$0xf]  ;;  %v3206_v45 = vld [vmem:[%s6001_s9 + $0xa8] sm:$0xf]  ;;  %v3920_v57 = vld [vmem:[%s6001_s9 + $0xb4] sm:$0xf0] }
  0xea   :  { %1619 = vmatpush.bf16.msrb.mxu0 %v3171_v11  ;;  %v3906_v46 = vld [vmem:[%s6001_s9 + $0x4c] sm:$0xf] }
  0xec   :  { %1602 = vmatpush.bf16.msra.mxu3 %v3343_v59  ;;  %1630 = vmatpush.bf16.msrb.mxu1 %v3347_v22  ;;  %v3941_v59 = vld [vmem:[%s6001_s9 + $0x164] sm:$0xf] }
  0xed   :  { %v3299_v62 = vor.u32 %v3941_v59, %v3296_v61  ;;  %1592 = vmatpush.bf16.msra.mxu2 %v3151_v60  ;;  %v3933_v22 = vld [vmem:[%s6001_s9 + $0x124] sm:$0xf]  ;;  %v3954_v59 = vld [vmem:[%s6001_s9 + $0x1cc] sm:$0xf]  ;;  %v3207_v60 = vor.u32 %v3920_v57, %v3206_v45  ;;  %v3352_v61 = vld [vmem:[%s6001_s9 + $0x1d8] sm:$0xf0] }
  0xee   :  { %1620 = vmatpush.bf16.msrb.mxu0 %v3155_v7  ;;  %v3267_v27 = vor.u32 %v3933_v22, %v3264_v24  ;;  %v3190_v7 = vld [vmem:[%s6001_s9 + $0x88] sm:$0xf]  ;;  %v3144_v45 = vld [vmem:[%s6001_s9 + $0x38] sm:$0xf0] }
  0xf0   :  { %1603 = vmatpush.bf16.msra.mxu3 %v3327_v2  ;;  %1631 = vmatpush.bf16.msrb.mxu1 %v3331_v34  ;;  %v3247_v2 = vor.u32 %v3931_v0, %v3246_v63  ;;  %v3926_v34 = vld [vmem:[%s6001_s9 + $0xec] sm:$0xf]  ;;  %v3302_v63 = vld [vmem:[%s6001_s9 + $0x168] sm:$0xf]  ;;  %v3944_v0 = vld [vmem:[%s6001_s9 + $0x174] sm:$0xf0] }
  0xf1   :  { %1593 = vmatpush.bf16.msra.mxu2 %v3135_v13  ;;  %v3243_v44 = vor.u32 %v3926_v34, %v3240_v37  ;;  %v3942_v34 = vld [vmem:[%s6001_s9 + $0x16c] sm:$0xf]  ;;  %v3159_v37 = vor.u32 %v3908_v33, %v3158_v32 }
  0xf2   :  { %1621 = vmatpush.bf16.msrb.mxu0 %v3139_v16  ;;  %v3192_v16 = vld [vmem:[%s6001_s9 + $0x98] sm:$0xf0] }
  0xf3   :  { %v3195_v17 = vor.u32 %v3914_v43, %v3192_v16  ;;  %v1177_v43 = vld [vmem:[%s6002_s8] sm:$0x3] }
  0xf4   :  { %1604 = vmatpush.bf16.msra.mxu3 %v3311_v15  ;;  %1632 = vmatpush.bf16.msrb.mxu1 %v3315_v53  ;;  %v3283_v15 = vor.u32 %v3937_v12, %v3280_v14  ;;  %v3948_v53 = vld [vmem:[%s6001_s9 + $0x194] sm:$0xf0]  ;;  %v3336_v12 = vld [vmem:[%s6001_s9 + $0x1b8] sm:$0xf0]  ;;  %v3286_v14 = vld [vmem:[%s6001_s9 + $0x148] sm:$0xf] }
  0xf5   :  { %1594 = vmatpush.bf16.msra.mxu2 %v3119_v23  ;;  %v3339_v13 = vor.u32 %v3950_v9, %v3336_v12  ;;  %v3320_v23 = vld [vmem:[%s6001_s9 + $0x198] sm:$0xf0]  ;;  %v3930_v9 = vld [vmem:[%s6001_s9 + $0x10c] sm:$0xf] }
  0xf6   :  { %1622 = vmatpush.bf16.msrb.mxu0 %v3123_v31  ;;  %v3323_v24 = vor.u32 %v3946_v20, %v3320_v23  ;;  %v1180_v20 = vperm.slane %v1177_v43, 1 }
  0xf7   :  { %1143 = vmatmul.bf16.vlgmr.msrb.gmra.mxu3 %v678_v54  ;;  %1171 = vmatmul.bf16.vlgmr.msra.gmra.mxu1 %v678_v54  ;;  %v3263_v54 = vor.u32 %v3935_v52, %v3262_v51  ;;  %v3371_v51 = vor.u32 %v3958_v49, %v3368_v50  ;;  %v3318_v52 = vld [vmem:[%s6001_s9 + $0x188] sm:$0xf] }
  0xf8   :  { %1605 = vmatpush.bf16.msra.mxu3 %v3295_v26  ;;  %1633 = vmatpush.bf16.msrb.mxu1 %v3299_v62  ;;  %v3928_v26 = vld [vmem:[%s6001_s9 + $0xf4] sm:$0xf0]  ;;  %v3319_v42 = vor.u32 %v3948_v53, %v3318_v52  ;;  %v3355_v62 = vor.u32 %v3954_v59, %v3352_v61  ;;  %v3142_v50 = vld [vmem:[%s6001_s9 + $0x28] sm:$0xf]  ;;  %v3938_v52 = vld [vmem:[%s6001_s9 + $0x14c] sm:$0xf] }
  0xf9   :  { %v3239_v28 = vor.u32 %v3928_v26, %v3238_v25  ;;  %v3270_v25 = vld [vmem:[%s6001_s9 + $0x128] sm:$0xf]  ;;  %v3936_v26 = vld [vmem:[%s6001_s9 + $0x134] sm:$0xf0] }
  0xfa   :  { %1671 = vmatpush.bf16.msra.mxu0 %v3243_v44  ;;  %v3271_v29 = vor.u32 %v3936_v26, %v3270_v25  ;;  %v3254_v44 = vld [vmem:[%s6001_s9 + $0x108] sm:$0xf] }
  0xfb   :  { %1643 = vmatpush.bf16.msrb.mxu2 %v3239_v28  ;;  %v3126_v61 = vld [vmem:[%s6001_s9 + $0x8] sm:$0xf] }
  0xfc   :  { %1606 = vmatpush.bf16.msra.mxu3 %v3279_v39  ;;  %1634 = vmatpush.bf16.msrb.mxu1 %v3283_v15  ;;  %v3248_v39 = vld [vmem:[%s6001_s9 + $0x110] sm:$0xf0]  ;;  %v3287_v15 = vor.u32 %v3940_v6, %v3286_v14 }
  0xfd   :  { %v3251_v41 = vor.u32 %v3929_v38, %v3248_v39  ;;  %v3304_v38 = vld [vmem:[%s6001_s9 + $0x178] sm:$0xf0] }
  0xfe   :  { %v3307_v39 = vor.u32 %v3942_v34, %v3304_v38  ;;  %v3992_v38 = vld [vmem:[%s6003_s11 + $0xf4] sm:$0xf0] }
  0xff   :  { %1644 = vmatpush.bf16.msrb.mxu2 %v3223_v48  ;;  %v3160_v48 = vld [vmem:[%s6001_s9 + $0x58] sm:$0xf0] }
 0x100   :  { %1607 = vmatpush.bf16.msra.mxu3 %v3263_v54  ;;  %1635 = vmatpush.bf16.msrb.mxu1 %v3267_v27  ;;  %v3922_v54 = vld [vmem:[%s6001_s9 + $0xcc] sm:$0xf]  ;;  %v3163_v49 = vor.u32 %v3906_v46, %v3160_v48 }
 0x101   :  { %v3227_v11 = vor.u32 %v3922_v54, %v3224_v56  ;;  %v3910_v27 = vld [vmem:[%s6001_s9 + $0x6c] sm:$0xf] }
 0x102   :  { %v3179_v31 = vor.u32 %v3910_v27, %v3176_v30  ;;  %v1179_v30 = vperm.slane %v1177_v43, 0  ;;  %v3598_v43 = vld [vmem:[%s6003_s11 + $0x1c0] sm:$0xf] }
 0x103   :  { %1672 = vmatpush.bf16.msra.mxu0 %v3227_v11  ;;  %1645 = vmatpush.bf16.msrb.mxu2 %v3207_v60  ;;  %v3902_v11 = vld [vmem:[%s6001_s9 + $0x2c] sm:$0xf] }
 0x104   :  { %1608 = vmatpush.bf16.msra.mxu3 %v3247_v2  ;;  %1636 = vmatpush.bf16.msrb.mxu1 %v3251_v41  ;;  %v3303_v2 = vor.u32 %v3944_v0, %v3302_v63  ;;  %v3932_v41 = vld [vmem:[%s6001_s9 + $0x114] sm:$0xf0]  ;;  %v3147_v60 = vor.u32 %v3902_v11, %v3144_v45  ;;  %v3934_v63 = vld [vmem:[%s6001_s9 + $0x12c] sm:$0xf]  ;;  %v3558_v11 = vld [vmem:[%s6003_s11 + $0x170] sm:$0xf] }
 0x105   :  { %v3255_v47 = vor.u32 %v3932_v41, %v3254_v44  ;;  %v4024_v44 = vld [vmem:[%s6003_s11 + $0x1f4] sm:$0xf0] }
 0x106   :  { %v4008_v45 = vld [vmem:[%s6003_s11 + $0x174] sm:$0xf0] }
 0x107   :  { %1673 = vmatpush.bf16.msra.mxu0 %v3211_v5  ;;  %v3128_v5 = vld [vmem:[%s6001_s9 + $0x18] sm:$0xf0] }
 0x108   :  { %1657 = vmatpush.bf16.msrb.mxu3 %v3367_v8  ;;  %1685 = vmatpush.bf16.msra.mxu1 %v3371_v51  ;;  %v3916_v8 = vld [vmem:[%s6001_s9 + $0x94] sm:$0xf0] }
 0x109   :  { %v3191_v10 = vor.u32 %v3916_v8, %v3190_v7  ;;  %v3904_v51 = vld [vmem:[%s6001_s9 + $0x34] sm:$0xf0]  ;;  %v3131_v8 = vor.u32 %v3898_v4, %v3128_v5  ;;  %v3559_v4 = vor.u32 %v4008_v45, %v3558_v11  ;;  %v3422_v5 = vld [vmem:[%s6003_s11 + $0x60] sm:$0xf] }
 0x10a   :  { %v3143_v54 = vor.u32 %v3904_v51, %v3142_v50  ;;  %v3390_v45 = vld [vmem:[%s6003_s11 + $0x20] sm:$0xf] }
 0x10b   :  { %1646 = vmatpush.bf16.msrb.mxu2 %v3191_v10  ;;  %1674 = vmatpush.bf16.msra.mxu0 %v3195_v17  ;;  %v3256_v10 = vld [vmem:[%s6001_s9 + $0x118] sm:$0xf0] }
 0x10c   :  { %1658 = vmatpush.bf16.msrb.mxu3 %v3351_v19  ;;  %1686 = vmatpush.bf16.msra.mxu1 %v3355_v62  ;;  %v3912_v19 = vld [vmem:[%s6001_s9 + $0x74] sm:$0xf0]  ;;  %v3259_v14 = vor.u32 %v3930_v9, %v3256_v10  ;;  %v3550_v9 = vld [vmem:[%s6003_s11 + $0x160] sm:$0xf]  ;;  %v4006_v10 = vld [vmem:[%s6003_s11 + $0x164] sm:$0xf0] }
 0x10d   :  { %v3175_v22 = vor.u32 %v3912_v19, %v3174_v18  ;;  %v3900_v62 = vld [vmem:[%s6001_s9 + $0x14] sm:$0xf0] }
 0x10e   :  { %v3127_v0 = vor.u32 %v3900_v62, %v3126_v61  ;;  %v3988_v62 = vld [vmem:[%s6003_s11 + $0xd4] sm:$0xf0] }
 0x10f   :  { %1647 = vmatpush.bf16.msrb.mxu2 %v3175_v22  ;;  %1675 = vmatpush.bf16.msra.mxu0 %v3179_v31 }
 0x110   :  { %1659 = vmatpush.bf16.msrb.mxu3 %v3335_v35  ;;  %1687 = vmatpush.bf16.msra.mxu1 %v3339_v13 }
 0x113   :  { %1648 = vmatpush.bf16.msrb.mxu2 %v3159_v37  ;;  %1676 = vmatpush.bf16.msra.mxu0 %v3163_v49  ;;  %v3494_v37 = vld [vmem:[%s6003_s11 + $0xf0] sm:$0xf]  ;;  %v3486_v49 = vld [vmem:[%s6003_s11 + $0xe0] sm:$0xf] }
 0x114   :  { %1660 = vmatpush.bf16.msrb.mxu3 %v3319_v42  ;;  %1688 = vmatpush.bf16.msra.mxu1 %v3323_v24  ;;  %v3288_v42 = vld [vmem:[%s6001_s9 + $0x158] sm:$0xf0]  ;;  %v3495_v48 = vor.u32 %v3992_v38, %v3494_v37  ;;  %v3982_v37 = vld [vmem:[%s6003_s11 + $0xa4] sm:$0xf0]  ;;  %v3582_v38 = vld [vmem:[%s6003_s11 + $0x1a0] sm:$0xf] }
 0x115   :  { %v3291_v56 = vor.u32 %v3938_v52, %v3288_v42  ;;  %v3990_v52 = vld [vmem:[%s6003_s11 + $0xe4] sm:$0xf0]  ;;  %v3430_v42 = vld [vmem:[%s6003_s11 + $0x70] sm:$0xf] }
 0x117   :  { %1649 = vmatpush.bf16.msrb.mxu2 %v3143_v54  ;;  %1677 = vmatpush.bf16.msra.mxu0 %v3147_v60  ;;  %v4022_v54 = vld [vmem:[%s6003_s11 + $0x1e4] sm:$0xf0] }
 0x118   :  { %1661 = vmatpush.bf16.msrb.mxu3 %v3303_v2  ;;  %1689 = vmatpush.bf16.msra.mxu1 %v3307_v39  ;;  %v3272_v2 = vld [vmem:[%s6001_s9 + $0x138] sm:$0xf0]  ;;  %v3622_v39 = vld [vmem:[%s6003_s11 + $0x1f0] sm:$0xf] }
 0x119   :  { %v3275_v3 = vor.u32 %v3934_v63, %v3272_v2  ;;  %v3623_v50 = vor.u32 %v4024_v44, %v3622_v39  ;;  %v3606_v63 = vld [vmem:[%s6003_s11 + $0x1d0] sm:$0xf]  ;;  %v4014_v39 = vld [vmem:[%s6003_s11 + $0x1a4] sm:$0xf0] }
 0x11b   :  { %1650 = vmatpush.bf16.msrb.mxu2 %v3127_v0  ;;  %1678 = vmatpush.bf16.msra.mxu0 %v3131_v8  ;;  %v4020_v0 = vld [vmem:[%s6003_s11 + $0x1d4] sm:$0xf0]  ;;  %v3974_v8 = vld [vmem:[%s6003_s11 + $0x64] sm:$0xf0] }
 0x11c   :  { %1662 = vmatpush.bf16.msrb.mxu3 %v3287_v15  ;;  %1690 = vmatpush.bf16.msra.mxu1 %v3291_v56  ;;  %v3976_v56 = vld [vmem:[%s6003_s11 + $0x74] sm:$0xf0] }
 0x120   :  { %1663 = vmatpush.bf16.msrb.mxu3 %v3271_v29  ;;  %1691 = vmatpush.bf16.msra.mxu1 %v3275_v3  ;;  %v3431_v3 = vor.u32 %v3976_v56, %v3430_v42  ;;  %v4012_v42 = vld [vmem:[%s6003_s11 + $0x194] sm:$0xf0] }
 0x124   :  { %1664 = vmatpush.bf16.msrb.mxu3 %v3255_v47  ;;  %1692 = vmatpush.bf16.msra.mxu1 %v3259_v14  ;;  %v3607_v14 = vor.u32 %v4020_v0, %v3606_v63  ;;  %v3978_v63 = vld [vmem:[%s6003_s11 + $0x84] sm:$0xf0]  ;;  %v3991_v0 = vld [vmem:[%s6003_s11 + $0xf4] sm:$0xf] }
 0x144   :  { %v5327_v1 = vpop.f32.mrf.mxu0 }
 0x14a   :  { %v5368_v21 = vpop.f32.mrf.mxu2 }
 0x14c   :  { %v944_v35 = vpop.f32.mrf.mxu0 }
 0x152   :  { %v916_v57 = vpop.f32.mrf.mxu2 }
 0x154   :  { %v1158_v7 = vpop.f32.mrf.mxu0 }
 0x15a   :  { %v1130_v15 = vpop.f32.mrf.mxu2 }
 0x15c   :  { %v1160_v22 = vpop.f32.mrf.mxu0 }
 0x162   :  { %v1132_v32 = vpop.f32.mrf.mxu2 }
 0x164   :  { %v956_v28 = vpop.f32.mrf.mxu1 }
 0x165   :  { %v957_v12 = vadd.f32 %v956_v28, %v5327_v1 }
 0x167   :  { %v1159_v16 = vadd.f32 %v1158_v7, %v957_v12 }
 0x16a   :  { %v928_v53 = vpop.f32.mrf.mxu3 }
 0x16b   :  { %v929_v18 = vadd.f32 %v928_v53, %v5368_v21  ;;  %v3614_v53 = vld [vmem:[%s6003_s11 + $0x1e0] sm:$0xf] }
 0x16c   :  { %v958_v59 = vpop.f32.mrf.mxu1  ;;  %v3615_v60 = vor.u32 %v4022_v54, %v3614_v53  ;;  %v3980_v53 = vld [vmem:[%s6003_s11 + $0x94] sm:$0xf0]  ;;  %v3574_v54 = vld [vmem:[%s6003_s11 + $0x190] sm:$0xf] }
 0x16d   :  { %v959_v17 = vadd.f32 %v958_v59, %v944_v35  ;;  %v1131_v25 = vadd.f32 %v1130_v15, %v929_v18  ;;  %v3478_v59 = vld [vmem:[%s6003_s11 + $0xd0] sm:$0xf]  ;;  %v4018_v15 = vld [vmem:[%s6003_s11 + $0x1c4] sm:$0xf0] }
 0x16e   :  { %v3479_v12 = vor.u32 %v3988_v62, %v3478_v59  ;;  %v3414_v18 = vld [vmem:[%s6003_s11 + $0x50] sm:$0xf]  ;;  %v3518_v59 = vld [vmem:[%s6003_s11 + $0x120] sm:$0xf] }
 0x16f   :  { %v1161_v24 = vadd.f32 %v1160_v22, %v959_v17  ;;  %v3551_v17 = vor.u32 %v4006_v10, %v3550_v9  ;;  %v4004_v22 = vld [vmem:[%s6003_s11 + $0x154] sm:$0xf0]  ;;  %v3438_v62 = vld [vmem:[%s6003_s11 + $0x80] sm:$0xf]  ;;  %v4023_v10 = vld [vmem:[%s6003_s11 + $0x1f4] sm:$0xf] }
 0x172   :  { %v930_v13 = vpop.f32.mrf.mxu3 }
 0x173   :  { %v931_v27 = vadd.f32 %v930_v13, %v916_v57  ;;  %v3487_v57 = vor.u32 %v3990_v52, %v3486_v49  ;;  %v3470_v13 = vld [vmem:[%s6003_s11 + $0xc0] sm:$0xf]  ;;  %v4000_v49 = vld [vmem:[%s6003_s11 + $0x134] sm:$0xf0]  ;;  %v3446_v52 = vld [vmem:[%s6003_s11 + $0x90] sm:$0xf] }
 0x174   :  { %v1172_v6 = vpop.f32.mrf.mxu1 }
 0x175   :  { %v1173_v19 = vadd.f32 %v1172_v6, %v1159_v16  ;;  %v1133_v33 = vadd.f32 %v1132_v32, %v931_v27  ;;  %v3986_v6 = vld [vmem:[%s6003_s11 + $0xc4] sm:$0xf0]  ;;  %v3423_v16 = vor.u32 %v3974_v8, %v3422_v5  ;;  %v4016_v27 = vld [vmem:[%s6003_s11 + $0x1b4] sm:$0xf0]  ;;  %v3534_v32 = vld [vmem:[%s6003_s11 + $0x140] sm:$0xf] }
 0x176   :  { %v4010_v5 = vld [vmem:[%s6003_s11 + $0x184] sm:$0xf0] }
 0x177   :  { %v1184_v1 = vadd.f32 %v1180_v20, %v1173_v19  ;;  %v3972_v19 = vld [vmem:[%s6003_s11 + $0x54] sm:$0xf0] }
 0x179   :  { %4066 = vtanh.f32 %v1184_v1  ;;  %v3599_v1 = vor.u32 %v4018_v15, %v3598_v43  ;;  %v3439_v43 = vor.u32 %v3978_v63, %v3438_v62  ;;  %v3983_v62 = vld [vmem:[%s6003_s11 + $0xb4] sm:$0xf] }
 0x17a   :  { %v1144_v23 = vpop.f32.mrf.mxu3 }
 0x17b   :  { %v1145_v29 = vadd.f32 %v1144_v23, %v1131_v25  ;;  %v3471_v23 = vor.u32 %v3986_v6, %v3470_v13  ;;  %v3984_v25 = vld [vmem:[%s6003_s11 + $0xb4] sm:$0xf0] }
 0x17c   :  { %v1174_v26 = vpop.f32.mrf.mxu1  ;;  %v3964_v13 = vld [vmem:[%s6003_s11 + $0x14] sm:$0xf0] }
 0x17d   :  { %v1175_v28 = vadd.f32 %v1174_v26, %v1161_v24  ;;  %v1183_v34 = vadd.f32 %v1179_v30, %v1145_v29  ;;  %v3462_v24 = vld [vmem:[%s6003_s11 + $0xb0] sm:$0xf]  ;;  %v3996_v6 = vld [vmem:[%s6003_s11 + $0x114] sm:$0xf0] }
 0x17e   :  { %v3590_v26 = vld [vmem:[%s6003_s11 + $0x1b0] sm:$0xf] }
 0x17f   :  { %v1186_v31 = vadd.f32 %v1180_v20, %v1175_v28  ;;  %v4067_v46 = vpop.eup %4066  ;;  %v3542_v20 = vld [vmem:[%s6003_s11 + $0x150] sm:$0xf]  ;;  %v3415_v28 = vor.u32 %v3972_v19, %v3414_v18  ;;  %v3488_v18 = vld [vmem:[%s6003_s11 + $0xe8] sm:$0xf0]  ;;  %v3374_v19 = vld [vmem:[%s6003_s11] sm:$0xf] }
 0x180   :  { %v3543_v29 = vor.u32 %v4004_v22, %v3542_v20 }
 0x181   :  { %4068 = vtanh.f32 %v1186_v31  ;;  %v3970_v31 = vld [vmem:[%s6003_s11 + $0x44] sm:$0xf0] }
 0x182   :  { %v1146_v35 = vpop.f32.mrf.mxu3  ;;  %4070 = vtanh.f32 %v1183_v34  ;;  %v3463_v34 = vor.u32 %v3984_v25, %v3462_v24  ;;  %v3962_v24 = vld [vmem:[%s6003_s11 + $0x4] sm:$0xf0]  ;;  %v3616_v25 = vld [vmem:[%s6003_s11 + $0x1e8] sm:$0xf0] }
 0x183   :  { %v1147_v21 = vadd.f32 %v1146_v35, %v1133_v33  ;;  %v4002_v33 = vld [vmem:[%s6003_s11 + $0x144] sm:$0xf0]  ;;  %v3454_v35 = vld [vmem:[%s6003_s11 + $0xa0] sm:$0xf] }
 0x185   :  { %v1185_v41 = vadd.f32 %v1179_v30, %v1147_v21  ;;  %v3406_v30 = vld [vmem:[%s6003_s11 + $0x40] sm:$0xf]  ;;  %v3591_v21 = vor.u32 %v4016_v27, %v3590_v26  ;;  %v3975_v26 = vld [vmem:[%s6003_s11 + $0x74] sm:$0xf] }
 0x186   :  { %v3407_v44 = vor.u32 %v3970_v31, %v3406_v30  ;;  %v3502_v27 = vld [vmem:[%s6003_s11 + $0x100] sm:$0xf]  ;;  %v4007_v30 = vld [vmem:[%s6003_s11 + $0x174] sm:$0xf]  ;;  %v3560_v31 = vld [vmem:[%s6003_s11 + $0x178] sm:$0xf0] }
 0x187   :  { %v4069_v47 = vpop.eup %4068  ;;  %4072 = vtanh.f32 %v1185_v41  ;;  %v3535_v41 = vor.u32 %v4002_v33, %v3534_v32  ;;  %v3987_v33 = vld [vmem:[%s6003_s11 + $0xd4] sm:$0xf] }
 0x188   :  { %v5471_v51 = vpack.c.bf16 %v4069_v47, %v4067_v46  ;;  %v4071_v61 = vpop.eup %4070  ;;  %v3398_v46 = vld [vmem:[%s6003_s11 + $0x30] sm:$0xf]  ;;  %v3968_v47 = vld [vmem:[%s6003_s11 + $0x34] sm:$0xf0] }
 0x189   :  { %v3399_v56 = vor.u32 %v3968_v47, %v3398_v46  ;;  %v3973_v46 = vld [vmem:[%s6003_s11 + $0x64] sm:$0xf]  ;;  %v3424_v47 = vld [vmem:[%s6003_s11 + $0x68] sm:$0xf0] }
 0x18a   :  { %1609 = vmatmul.bf16.vlgmr.msra.gmra.mxu3 %v5471_v51  ;;  %1637 = vmatmul.bf16.vlgmr.msrb.gmra.mxu1 %v5471_v51 }
 0x18b   :  { %2111 = vmatpush.bf16.msra.mxu3 %v3495_v48  ;;  %2139 = vmatpush.bf16.msrb.mxu1 %v3623_v50  ;;  %v3526_v48 = vld [vmem:[%s6003_s11 + $0x130] sm:$0xf]  ;;  %v3455_v50 = vor.u32 %v3982_v37, %v3454_v35  ;;  %v3375_v35 = vor.u32 %v3962_v24, %v3374_v19  ;;  %v3480_v37 = vld [vmem:[%s6003_s11 + $0xd8] sm:$0xf0]  ;;  %v3979_v24 = vld [vmem:[%s6003_s11 + $0x94] sm:$0xf] }
 0x18c   :  { %v3527_v11 = vor.u32 %v4000_v49, %v3526_v48  ;;  %v4005_v48 = vld [vmem:[%s6003_s11 + $0x164] sm:$0xf]  ;;  %v3552_v49 = vld [vmem:[%s6003_s11 + $0x168] sm:$0xf0]  ;;  %v3400_v19 = vld [vmem:[%s6003_s11 + $0x38] sm:$0xf0] }
 0x18d   :  { %v4073_v2 = vpop.eup %4072 }
 0x18e   :  { %v5511_v7 = vpack.c.bf16 %v4073_v2, %v4071_v61  ;;  %v3447_v61 = vor.u32 %v3980_v53, %v3446_v52  ;;  %v3575_v2 = vor.u32 %v4012_v42, %v3574_v54  ;;  %v3985_v52 = vld [vmem:[%s6003_s11 + $0xc4] sm:$0xf]  ;;  %v3472_v53 = vld [vmem:[%s6003_s11 + $0xc8] sm:$0xf0] }
 0x18f   :  { %2112 = vmatpush.bf16.msra.mxu3 %v3487_v57  ;;  %2140 = vmatpush.bf16.msrb.mxu1 %v3615_v60  ;;  %v3966_v57 = vld [vmem:[%s6003_s11 + $0x24] sm:$0xf0]  ;;  %v4017_v54 = vld [vmem:[%s6003_s11 + $0x1c4] sm:$0xf]  ;;  %v3600_v42 = vld [vmem:[%s6003_s11 + $0x1c8] sm:$0xf0] }
 0x190   :  { %1595 = vmatmul.bf16.vlgmr.msra.gmra.mxu2 %v5511_v7  ;;  %1623 = vmatmul.bf16.vlgmr.msrb.gmra.mxu0 %v5511_v7  ;;  %v3998_v60 = vld [vmem:[%s6003_s11 + $0x124] sm:$0xf0]  ;;  %v3391_v8 = vor.u32 %v3966_v57, %v3390_v45  ;;  %v3971_v45 = vld [vmem:[%s6003_s11 + $0x54] sm:$0xf]  ;;  %v3416_v57 = vld [vmem:[%s6003_s11 + $0x58] sm:$0xf0]  ;;  %v3603_v63 = vor.u32 %v4017_v54, %v3600_v42 }
 0x191   :  { %2097 = vmatpush.bf16.msra.mxu2 %v3431_v3  ;;  %2125 = vmatpush.bf16.msrb.mxu0 %v3559_v4  ;;  %v3496_v3 = vld [vmem:[%s6003_s11 + $0xf8] sm:$0xf0]  ;;  %v3566_v4 = vld [vmem:[%s6003_s11 + $0x180] sm:$0xf]  ;;  %v3519_v9 = vor.u32 %v3998_v60, %v3518_v59  ;;  %v4003_v59 = vld [vmem:[%s6003_s11 + $0x154] sm:$0xf] }
 0x192   :  { %v3567_v15 = vor.u32 %v4010_v5, %v3566_v4  ;;  %v3544_v60 = vld [vmem:[%s6003_s11 + $0x158] sm:$0xf0]  ;;  %v3419_v4 = vor.u32 %v3971_v45, %v3416_v57  ;;  %v3993_v45 = vld [vmem:[%s6003_s11 + $0x104] sm:$0xf]  ;;  %v3504_v57 = vld [vmem:[%s6003_s11 + $0x108] sm:$0xf0] }
 0x193   :  { %2113 = vmatpush.bf16.msra.mxu3 %v3479_v12  ;;  %2141 = vmatpush.bf16.msrb.mxu1 %v3607_v14  ;;  %v3624_v12 = vld [vmem:[%s6003_s11 + $0x1f8] sm:$0xf0]  ;;  %v3510_v14 = vld [vmem:[%s6003_s11 + $0x110] sm:$0xf]  ;;  %v3547_v5 = vor.u32 %v4003_v59, %v3544_v60 }
 0x194   :  { %v3627_v20 = vor.u32 %v4023_v10, %v3624_v12  ;;  %v3536_v10 = vld [vmem:[%s6003_s11 + $0x148] sm:$0xf0]  ;;  %v4039_v59 = vld [vmem:[%s6004_s13 + $0x70] sm:$0xff] }
 0x195   :  { %2098 = vmatpush.bf16.msra.mxu2 %v3423_v16  ;;  %2126 = vmatpush.bf16.msrb.mxu0 %v3551_v17  ;;  %v3499_v16 = vor.u32 %v3991_v0, %v3496_v3  ;;  %v3989_v17 = vld [vmem:[%s6003_s11 + $0xe4] sm:$0xf]  ;;  %v3464_v0 = vld [vmem:[%s6003_s11 + $0xb8] sm:$0xf0]  ;;  %v4055_v60 = vld [vmem:[%s6004_s13 + $0xf0] sm:$0xff] }
 0x196   :  { %v3491_v32 = vor.u32 %v3989_v17, %v3488_v18  ;;  %v3592_v3 = vld [vmem:[%s6003_s11 + $0x1b8] sm:$0xf0]  ;;  %v3467_v12 = vor.u32 %v3983_v62, %v3464_v0  ;;  %v3967_v18 = vld [vmem:[%s6003_s11 + $0x34] sm:$0xf]  ;;  %v3507_v62 = vor.u32 %v3993_v45, %v3504_v57 }
 0x197   :  { %2114 = vmatpush.bf16.msra.mxu3 %v3471_v23  ;;  %2142 = vmatpush.bf16.msrb.mxu1 %v3599_v1  ;;  %v3511_v23 = vor.u32 %v3996_v6, %v3510_v14  ;;  %v4021_v1 = vld [vmem:[%s6003_s11 + $0x1e4] sm:$0xf]  ;;  %v3456_v6 = vld [vmem:[%s6003_s11 + $0xa8] sm:$0xf0]  ;;  %v4048_v0 = vld [vmem:[%s6004_s13 + $0xb8] sm:$0xff] }
 0x199   :  { %2099 = vmatpush.bf16.msra.mxu2 %v3415_v28  ;;  %2127 = vmatpush.bf16.msrb.mxu0 %v3543_v29  ;;  %v3994_v28 = vld [vmem:[%s6003_s11 + $0x104] sm:$0xf0]  ;;  %v3432_v29 = vld [vmem:[%s6003_s11 + $0x78] sm:$0xf0] }
 0x19a   :  { %1665 = vmatmul.bf16.vlgmr.msrb.gmra.mxu3 %v5471_v51  ;;  %1693 = vmatmul.bf16.vlgmr.msra.gmra.mxu1 %v5471_v51  ;;  %v3583_v51 = vor.u32 %v4014_v39, %v3582_v38  ;;  %v4019_v38 = vld [vmem:[%s6003_s11 + $0x1d4] sm:$0xf]  ;;  %v3608_v39 = vld [vmem:[%s6003_s11 + $0x1d8] sm:$0xf0] }
 0x19b   :  { %2115 = vmatpush.bf16.msra.mxu3 %v3463_v34  ;;  %2143 = vmatpush.bf16.msrb.mxu1 %v3591_v21  ;;  %v3619_v34 = vor.u32 %v4021_v1, %v3616_v25  ;;  %v3503_v21 = vor.u32 %v3994_v28, %v3502_v27  ;;  %v3448_v25 = vld [vmem:[%s6003_s11 + $0x98] sm:$0xf0]  ;;  %v3403_v28 = vor.u32 %v3967_v18, %v3400_v19  ;;  %v4034_v18 = vld [vmem:[%s6004_s13 + $0x48] sm:$0xff] }
 0x19c   :  { %v3576_v27 = vld [vmem:[%s6003_s11 + $0x198] sm:$0xf0]  ;;  %v4050_v19 = vld [vmem:[%s6004_s13 + $0xc8] sm:$0xff] }
 0x19d   :  { %2100 = vmatpush.bf16.msra.mxu2 %v3407_v44  ;;  %2128 = vmatpush.bf16.msrb.mxu0 %v3535_v41  ;;  %v3435_v44 = vor.u32 %v3975_v26, %v3432_v29  ;;  %v3563_v41 = vor.u32 %v4007_v30, %v3560_v31  ;;  %v4011_v26 = vld [vmem:[%s6003_s11 + $0x194] sm:$0xf]  ;;  %v3965_v30 = vld [vmem:[%s6003_s11 + $0x24] sm:$0xf]  ;;  %v3392_v31 = vld [vmem:[%s6003_s11 + $0x28] sm:$0xf0] }
 0x19f   :  { %2116 = vmatpush.bf16.msra.mxu3 %v3455_v50  ;;  %2144 = vmatpush.bf16.msrb.mxu1 %v3583_v51  ;;  %v3483_v50 = vor.u32 %v3987_v33, %v3480_v37  ;;  %v3611_v51 = vor.u32 %v4019_v38, %v3608_v39  ;;  %v3520_v33 = vld [vmem:[%s6003_s11 + $0x128] sm:$0xf0]  ;;  %v4009_v38 = vld [vmem:[%s6003_s11 + $0x184] sm:$0xf] }
 0x1a0   :  { %1651 = vmatmul.bf16.vlgmr.msrb.gmra.mxu2 %v5511_v7  ;;  %1679 = vmatmul.bf16.vlgmr.msra.gmra.mxu0 %v5511_v7  ;;  %v3382_v7 = vld [vmem:[%s6003_s11 + $0x10] sm:$0xf]  ;;  %v3440_v37 = vld [vmem:[%s6003_s11 + $0x88] sm:$0xf0] }
 0x1a1   :  { %2101 = vmatpush.bf16.msra.mxu2 %v3399_v56  ;;  %2129 = vmatpush.bf16.msrb.mxu0 %v3527_v11  ;;  %v3383_v22 = vor.u32 %v3964_v13, %v3382_v7  ;;  %v3427_v56 = vor.u32 %v3973_v46, %v3424_v47  ;;  %v3555_v11 = vor.u32 %v4005_v48, %v3552_v49  ;;  %v4001_v7 = vld [vmem:[%s6003_s11 + $0x144] sm:$0xf]  ;;  %v3568_v39 = vld [vmem:[%s6003_s11 + $0x188] sm:$0xf0]  ;;  %v3963_v46 = vld [vmem:[%s6003_s11 + $0x14] sm:$0xf] }
 0x1a2   :  { %v3981_v13 = vld [vmem:[%s6003_s11 + $0xa4] sm:$0xf]  ;;  %v3539_v17 = vor.u32 %v4001_v7, %v3536_v10  ;;  %v3384_v47 = vld [vmem:[%s6003_s11 + $0x18] sm:$0xf0]  ;;  %v3995_v48 = vld [vmem:[%s6003_s11 + $0x114] sm:$0xf] }
 0x1a3   :  { %2117 = vmatpush.bf16.msra.mxu3 %v3447_v61  ;;  %2145 = vmatpush.bf16.msrb.mxu1 %v3575_v2  ;;  %v3475_v61 = vor.u32 %v3985_v52, %v3472_v53  ;;  %v4015_v2 = vld [vmem:[%s6003_s11 + $0x1b4] sm:$0xf]  ;;  %v3512_v49 = vld [vmem:[%s6003_s11 + $0x118] sm:$0xf0]  ;;  %v3571_v52 = vor.u32 %v4009_v38, %v3568_v39  ;;  %v3387_v54 = vor.u32 %v3963_v46, %v3384_v47  ;;  %v4030_v7 = vld [vmem:[%s6004_s13 + $0x28] sm:$0xff] }
 0x1a4   :  { %v3595_v14 = vor.u32 %v4015_v2, %v3592_v3  ;;  %v4056_v53 = vld [vmem:[%s6004_s13 + $0xf8] sm:$0xff]  ;;  %v3515_v42 = vor.u32 %v3995_v48, %v3512_v49  ;;  %v4038_v2 = vld [vmem:[%s6004_s13 + $0x68] sm:$0xff] }
 0x1a5   :  { %2102 = vmatpush.bf16.msra.mxu2 %v3391_v8  ;;  %2130 = vmatpush.bf16.msrb.mxu0 %v3519_v9  ;;  %v3969_v8 = vld [vmem:[%s6003_s11 + $0x44] sm:$0xf]  ;;  %v3408_v9 = vld [vmem:[%s6003_s11 + $0x48] sm:$0xf0] }
 0x1a6   :  { %v4054_v3 = vld [vmem:[%s6004_s13 + $0xe8] sm:$0xff] }
 0x1a7   :  { %2118 = vmatpush.bf16.msra.mxu3 %v3439_v43  ;;  %2146 = vmatpush.bf16.msrb.mxu1 %v3567_v15  ;;  %v4013_v43 = vld [vmem:[%s6003_s11 + $0x1a4] sm:$0xf]  ;;  %v3584_v15 = vld [vmem:[%s6003_s11 + $0x1a8] sm:$0xf0] }
 0x1a8   :  { %v3587_v1 = vor.u32 %v4013_v43, %v3584_v15  ;;  %v4046_v10 = vld [vmem:[%s6004_s13 + $0xa8] sm:$0xff]  ;;  %v4035_v43 = vld [vmem:[%s6004_s13 + $0x50] sm:$0xff] }
 0x1a9   :  { %2103 = vmatpush.bf16.msra.mxu2 %v3383_v22  ;;  %2131 = vmatpush.bf16.msrb.mxu0 %v3511_v23  ;;  %v3528_v22 = vld [vmem:[%s6003_s11 + $0x138] sm:$0xf0]  ;;  %v3459_v23 = vor.u32 %v3981_v13, %v3456_v6  ;;  %v4045_v6 = vld [vmem:[%s6004_s13 + $0xa0] sm:$0xff]  ;;  %v4051_v15 = vld [vmem:[%s6004_s13 + $0xd0] sm:$0xff] }
 0x1aa   :  { %2119 = vmatmul.bf16.vlgmr.msra.gmra.mxu3 %v4435_v58  ;;  %2147 = vmatmul.bf16.vlgmr.msrb.gmra.mxu1 %v4531_v40  ;;  %v4052_v13 = vld [vmem:[%s6004_s13 + $0xd8] sm:$0xff] }
 0x1ab   :  { %2167 = vmatpush.bf16.msrb.mxu3 %v3499_v16  ;;  %2195 = vmatpush.bf16.msra.mxu1 %v3627_v20  ;;  %v3411_v16 = vor.u32 %v3969_v8, %v3408_v9  ;;  %v3999_v20 = vld [vmem:[%s6003_s11 + $0x134] sm:$0xf]  ;;  %v4037_v8 = vld [vmem:[%s6004_s13 + $0x60] sm:$0xff] }
 0x1ac   :  { %v3531_v29 = vor.u32 %v3999_v20, %v3528_v22  ;;  %v4053_v9 = vld [vmem:[%s6004_s13 + $0xe0] sm:$0xff]  ;;  %v4027_v20 = vld [vmem:[%s6004_s13 + $0x10] sm:$0xff] }
 0x1ad   :  { %2104 = vmatpush.bf16.msra.mxu2 %v3375_v35  ;;  %2132 = vmatpush.bf16.msrb.mxu0 %v3503_v21  ;;  %v3977_v35 = vld [vmem:[%s6003_s11 + $0x84] sm:$0xf]  ;;  %v3579_v21 = vor.u32 %v4011_v26, %v3576_v27  ;;  %v4043_v22 = vld [vmem:[%s6004_s13 + $0x90] sm:$0xff] }
 0x1ae   :  { %v4025_v26 = vld [vmem:[%s6004_s13] sm:$0xff] }
 0x1af   :  { %2168 = vmatpush.bf16.msrb.mxu3 %v3491_v32  ;;  %2196 = vmatpush.bf16.msra.mxu1 %v3619_v34  ;;  %v3997_v32 = vld [vmem:[%s6003_s11 + $0x124] sm:$0xf]  ;;  %v3451_v34 = vor.u32 %v3979_v24, %v3448_v25  ;;  %v4042_v25 = vld [vmem:[%s6004_s13 + $0x88] sm:$0xff] }
 0x1b0   :  { %2105 = vmatmul.bf16.vlgmr.msra.gmra.mxu2 %v4427_v55  ;;  %2133 = vmatmul.bf16.vlgmr.msrb.gmra.mxu0 %v4520_v36  ;;  %v4049_v24 = vld [vmem:[%s6004_s13 + $0xc0] sm:$0xff] }
 0x1b1   :  { %2153 = vmatpush.bf16.msrb.mxu2 %v3435_v44  ;;  %2181 = vmatpush.bf16.msra.mxu0 %v3563_v41  ;;  %v3395_v44 = vor.u32 %v3965_v30, %v3392_v31  ;;  %v3523_v41 = vor.u32 %v3997_v32, %v3520_v33  ;;  %v4041_v27 = vld [vmem:[%s6004_s13 + $0x80] sm:$0xff] }
 0x1b3   :  { %2169 = vmatpush.bf16.msrb.mxu3 %v3483_v50  ;;  %2197 = vmatpush.bf16.msra.mxu1 %v3611_v51  ;;  %v3443_v50 = vor.u32 %v3977_v35, %v3440_v37  ;;  %v4040_v51 = vld [vmem:[%s6004_s13 + $0x78] sm:$0xff] }
 0x1b5   :  { %2154 = vmatpush.bf16.msrb.mxu2 %v3427_v56  ;;  %2182 = vmatpush.bf16.msra.mxu0 %v3555_v11  ;;  %v3961_v56 = vld [vmem:[%s6003_s11 + $0x4] sm:$0xf]  ;;  %v3376_v11 = vld [vmem:[%s6003_s11 + $0x8] sm:$0xf0] }
 0x1b7   :  { %2170 = vmatpush.bf16.msrb.mxu3 %v3475_v61  ;;  %2198 = vmatpush.bf16.msra.mxu1 %v3603_v63  ;;  %v3379_v61 = vor.u32 %v3961_v56, %v3376_v11  ;;  %v4032_v63 = vld [vmem:[%s6004_s13 + $0x38] sm:$0xff] }
 0x1b9   :  { %2155 = vmatpush.bf16.msrb.mxu2 %v3419_v4  ;;  %2183 = vmatpush.bf16.msra.mxu0 %v3547_v5  ;;  %v4031_v4 = vld [vmem:[%s6004_s13 + $0x30] sm:$0xff] }
 0x1ba   :  { %v4047_v5 = vld [vmem:[%s6004_s13 + $0xb0] sm:$0xff] }
 0x1bb   :  { %2171 = vmatpush.bf16.msrb.mxu3 %v3467_v12  ;;  %2199 = vmatpush.bf16.msra.mxu1 %v3595_v14  ;;  %v4036_v12 = vld [vmem:[%s6004_s13 + $0x58] sm:$0xff]  ;;  %v4029_v14 = vld [vmem:[%s6004_s13 + $0x20] sm:$0xff] }
 0x1bd   :  { %2156 = vmatpush.bf16.msrb.mxu2 %v3411_v16  ;;  %2184 = vmatpush.bf16.msra.mxu0 %v3539_v17  ;;  %v4028_v16 = vld [vmem:[%s6004_s13 + $0x18] sm:$0xff] }
 0x1be   :  { %v4044_v17 = vld [vmem:[%s6004_s13 + $0x98] sm:$0xff] }
 0x1bf   :  { %2172 = vmatpush.bf16.msrb.mxu3 %v3459_v23  ;;  %2200 = vmatpush.bf16.msra.mxu1 %v3587_v1  ;;  %v4033_v23 = vld [vmem:[%s6004_s13 + $0x40] sm:$0xff]  ;;  %v4026_v1 = vld [vmem:[%s6004_s13 + $0x8] sm:$0xff] }
 0x1c1   :  { %2157 = vmatpush.bf16.msrb.mxu2 %v3403_v28  ;;  %2185 = vmatpush.bf16.msra.mxu0 %v3531_v29  ;;  %v1257_v28 = vld [vmem:[%s6006_s10] sm:$0xf] }
 0x1c2   :  { %v1260_v31 = vperm.slane %v1257_v28, 1  ;;  %v1259_v33 = vperm.slane %v1257_v28, 0  ;;  %v1262_v49 = vperm.slane %v1257_v28, 3 }
 0x1c3   :  { %2173 = vmatpush.bf16.msrb.mxu3 %v3451_v34  ;;  %2201 = vmatpush.bf16.msra.mxu1 %v3579_v21 }
 0x1c5   :  { %2158 = vmatpush.bf16.msrb.mxu2 %v3395_v44  ;;  %2186 = vmatpush.bf16.msra.mxu0 %v3523_v41 }
 0x1c7   :  { %2174 = vmatpush.bf16.msrb.mxu3 %v3443_v50  ;;  %2202 = vmatpush.bf16.msra.mxu1 %v3571_v52  ;;  %v1261_v52 = vperm.slane %v1257_v28, 2 }
 0x1c9   :  { %2159 = vmatpush.bf16.msrb.mxu2 %v3387_v54  ;;  %2187 = vmatpush.bf16.msra.mxu0 %v3515_v42 }
 0x1ca   :  { %2175 = vmatmul.bf16.vlgmr.msrb.gmra.mxu3 %v4435_v58  ;;  %2203 = vmatmul.bf16.vlgmr.msra.gmra.mxu1 %v4531_v40 }
 0x1cb   :  { %2491 = vmatpush.bf16.msra.mxu3 %v4040_v51  ;;  %2519 = vmatpush.bf16.msrb.mxu1 %v4056_v53 }
 0x1cd   :  { %2160 = vmatpush.bf16.msrb.mxu2 %v3379_v61  ;;  %2188 = vmatpush.bf16.msra.mxu0 %v3507_v62 }
 0x1cf   :  { %2492 = vmatpush.bf16.msra.mxu3 %v4039_v59  ;;  %2520 = vmatpush.bf16.msrb.mxu1 %v4055_v60 }
 0x1d0   :  { %2161 = vmatmul.bf16.vlgmr.msrb.gmra.mxu2 %v4427_v55  ;;  %2189 = vmatmul.bf16.vlgmr.msra.gmra.mxu0 %v4520_v36 }
 0x1d1   :  { %2477 = vmatpush.bf16.msra.mxu2 %v4032_v63  ;;  %2505 = vmatpush.bf16.msrb.mxu0 %v4048_v0 }
 0x1d3   :  { %2493 = vmatpush.bf16.msra.mxu3 %v4038_v2  ;;  %2521 = vmatpush.bf16.msrb.mxu1 %v4054_v3 }
 0x1d5   :  { %2478 = vmatpush.bf16.msra.mxu2 %v4031_v4  ;;  %2506 = vmatpush.bf16.msrb.mxu0 %v4047_v5 }
 0x1d7   :  { %2494 = vmatpush.bf16.msra.mxu3 %v4037_v8  ;;  %2522 = vmatpush.bf16.msrb.mxu1 %v4053_v9 }
 0x1d9   :  { %2479 = vmatpush.bf16.msra.mxu2 %v4030_v7  ;;  %2507 = vmatpush.bf16.msrb.mxu0 %v4046_v10  ;;  %v1771_v10 = vld [vmem:[%s6008_s12] sm:$0x3] }
 0x1db   :  { %2495 = vmatpush.bf16.msra.mxu3 %v4036_v12  ;;  %2523 = vmatpush.bf16.msrb.mxu1 %v4052_v13  ;;  %v1773_v12 = vperm.slane %v1771_v10, 0 }
 0x1dd   :  { %2480 = vmatpush.bf16.msra.mxu2 %v4029_v14  ;;  %2508 = vmatpush.bf16.msrb.mxu0 %v4045_v6 }
 0x1df   :  { %2496 = vmatpush.bf16.msra.mxu3 %v4035_v43  ;;  %2524 = vmatpush.bf16.msrb.mxu1 %v4051_v15 }
 0x1e1   :  { %2481 = vmatpush.bf16.msra.mxu2 %v4028_v16  ;;  %2509 = vmatpush.bf16.msrb.mxu0 %v4044_v17  ;;  %v1774_v17 = vperm.slane %v1771_v10, 1 }
 0x1e3   :  { %2497 = vmatpush.bf16.msra.mxu3 %v4034_v18  ;;  %2525 = vmatpush.bf16.msrb.mxu1 %v4050_v19 }
 0x1e5   :  { %2482 = vmatpush.bf16.msra.mxu2 %v4027_v20  ;;  %2510 = vmatpush.bf16.msrb.mxu0 %v4043_v22 }
 0x1e7   :  { %2498 = vmatpush.bf16.msra.mxu3 %v4033_v23  ;;  %2526 = vmatpush.bf16.msrb.mxu1 %v4049_v24 }
 0x1e9   :  { %2483 = vmatpush.bf16.msra.mxu2 %v4026_v1  ;;  %2511 = vmatpush.bf16.msrb.mxu0 %v4042_v25 }
 0x1ea   :  { %2499 = vmatmul.bf16.vlgmr.msra.gmra.mxu3 %v4435_v58  ;;  %2527 = vmatmul.bf16.vlgmr.msrb.gmra.mxu1 %v4531_v40 }
 0x1ed   :  { %2484 = vmatpush.bf16.msra.mxu2 %v4025_v26  ;;  %2512 = vmatpush.bf16.msrb.mxu0 %v4041_v27 }
 0x1f0   :  { %2485 = vmatmul.bf16.vlgmr.msra.gmra.mxu2 %v4427_v55  ;;  %2513 = vmatmul.bf16.vlgmr.msrb.gmra.mxu0 %v4520_v36 }
 0x207   :  { %v1638_v30 = vpop.f32.mrf.mxu1 }
 0x20d   :  { %v1624_v29 = vpop.f32.mrf.mxu0  ;;  %v1610_v32 = vpop.f32.mrf.mxu3 }
 0x20e   :  { %v1625_v34 = vadd.f32 %v1624_v29, %v1260_v31 }
 0x20f   :  { %v1640_v38 = vpop.f32.mrf.mxu1 }
 0x210   :  { %v1639_v40 = vadd.f32 %v1638_v30, %v1625_v34 }
 0x213   :  { %v1596_v35 = vpop.f32.mrf.mxu2 }
 0x214   :  { %v1597_v58 = vadd.f32 %v1596_v35, %v1259_v33 }
 0x215   :  { %v1626_v21 = vpop.f32.mrf.mxu0  ;;  %v1612_v55 = vpop.f32.mrf.mxu3 }
 0x216   :  { %v1611_v37 = vadd.f32 %v1610_v32, %v1597_v58  ;;  %v1627_v36 = vadd.f32 %v1626_v21, %v1260_v31 }
 0x217   :  { %v1694_v51 = vpop.f32.mrf.mxu1 }
 0x218   :  { %v1699_v39 = vpack.c.bf16 %v1639_v40, %v1611_v37  ;;  %v1641_v47 = vadd.f32 %v1640_v38, %v1627_v36 }
 0x21a   :  { %1703 = vst [vmem:[%s6007_s15] sm:$0xff] %v1699_v39 }
 0x21b   :  { %v1598_v44 = vpop.f32.mrf.mxu2 }
 0x21c   :  { %v1599_v41 = vadd.f32 %v1598_v44, %v1259_v33 }
 0x21d   :  { %v1680_v46 = vpop.f32.mrf.mxu0  ;;  %v1666_v54 = vpop.f32.mrf.mxu3 }
 0x21e   :  { %v1613_v48 = vadd.f32 %v1612_v55, %v1599_v41  ;;  %v1681_v53 = vadd.f32 %v1680_v46, %v1262_v49  ;;  %v4057_v46 = vld [vmem:[%s6005_s14] ss:$0 sm:$0xff] }
 0x21f   :  { %v1696_v63 = vpop.f32.mrf.mxu1 }
 0x220   :  { %v1701_v50 = vpack.c.bf16 %v1641_v47, %v1613_v48  ;;  %v1695_v11 = vadd.f32 %v1694_v51, %v1681_v53 }
 0x222   :  { %1705 = vst [vmem:[%s6007_s15 + $0x10] sm:$0xff] %v1701_v50 }
 0x223   :  { %v1652_v42 = vpop.f32.mrf.mxu2 }
 0x224   :  { %v1653_v56 = vadd.f32 %v1652_v42, %v1261_v52 }
 0x225   :  { %v1682_v57 = vpop.f32.mrf.mxu0  ;;  %v1668_v0 = vpop.f32.mrf.mxu3 }
 0x226   :  { %v1667_v45 = vadd.f32 %v1666_v54, %v1653_v56  ;;  %v1683_v60 = vadd.f32 %v1682_v57, %v1262_v49 }
 0x227   :  { %v2148_v7 = vpop.f32.mrf.mxu1 }
 0x228   :  { %v1700_v59 = vpack.c.bf16 %v1695_v11, %v1667_v45  ;;  %v1697_v2 = vadd.f32 %v1696_v63, %v1683_v60 }
 0x22a   :  { %1704 = vst [vmem:[%s6007_s15 + $0x8] sm:$0xff] %v1700_v59 }
 0x22b   :  { %v1654_v61 = vpop.f32.mrf.mxu2 }
 0x22c   :  { %v1655_v62 = vadd.f32 %v1654_v61, %v1261_v52 }
 0x22d   :  { %v2120_v5 = vpop.f32.mrf.mxu3  ;;  %v2134_v9 = vpop.f32.mrf.mxu0 }
 0x22e   :  { %v1669_v3 = vadd.f32 %v1668_v0, %v1655_v62 }
 0x22f   :  { %v2150_v15 = vpop.f32.mrf.mxu1 }
 0x230   :  { %v1702_v4 = vpack.c.bf16 %v1697_v2, %v1669_v3 }
 0x232   :  { %1706 = vst [vmem:[%s6007_s15 + $0x18] sm:$0xff] %v1702_v4 }
 0x233   :  { %v2106_v8 = vpop.f32.mrf.mxu2 }
 0x234   :  { %v2107_v43 = vadd.f32 %v2106_v8, %v1773_v12 }
 0x235   :  { %v2122_v13 = vpop.f32.mrf.mxu3  ;;  %v2136_v6 = vpop.f32.mrf.mxu0 }
 0x236   :  { %v2121_v16 = vadd.f32 %v2120_v5, %v2107_v43 }
 0x238   :  { %v2135_v19 = vadd.f32 %v2134_v9, %v2121_v16 }
 0x23a   :  { %v2149_v26 = vadd.f32 %v2148_v7, %v2135_v19 }
 0x23b   :  { %v2108_v14 = vpop.f32.mrf.mxu2 }
 0x23c   :  { %v2109_v20 = vadd.f32 %v2108_v14, %v1773_v12  ;;  %4074 = vtanh.f32 %v2149_v26 }
 0x23e   :  { %v2123_v27 = vadd.f32 %v2122_v13, %v2109_v20 }
 0x240   :  { %v2137_v30 = vadd.f32 %v2136_v6, %v2123_v27 }
 0x242   :  { %v2151_v58 = vadd.f32 %v2150_v15, %v2137_v30  ;;  %v4075_v37 = vpop.eup %4074 }
 0x247   :  { %v2204_v1 = vpop.f32.mrf.mxu1 }
 0x24d   :  { %v2176_v18 = vpop.f32.mrf.mxu3  ;;  %v2190_v23 = vpop.f32.mrf.mxu0 }
 0x24f   :  { %v2206_v21 = vpop.f32.mrf.mxu1 }
 0x253   :  { %v2162_v22 = vpop.f32.mrf.mxu2 }
 0x254   :  { %v2163_v24 = vadd.f32 %v2162_v22, %v1774_v17 }
 0x255   :  { %v2178_v32 = vpop.f32.mrf.mxu3  ;;  %v2192_v34 = vpop.f32.mrf.mxu0 }
 0x256   :  { %v2177_v25 = vadd.f32 %v2176_v18, %v2163_v24 }
 0x258   :  { %v2191_v28 = vadd.f32 %v2190_v23, %v2177_v25 }
 0x25a   :  { %v2205_v29 = vadd.f32 %v2204_v1, %v2191_v28 }
 0x25b   :  { %v2164_v31 = vpop.f32.mrf.mxu2 }
 0x25c   :  { %4076 = vtanh.f32 %v2205_v29  ;;  %v2165_v33 = vadd.f32 %v2164_v31, %v1774_v17 }
 0x25d   :  { %4078 = vtanh.f32 %v2151_v58 }
 0x25e   :  { %v2179_v35 = vadd.f32 %v2178_v32, %v2165_v33 }
 0x260   :  { %v2193_v40 = vadd.f32 %v2192_v34, %v2179_v35 }
 0x262   :  { %v4077_v38 = vpop.eup %4076  ;;  %v2207_v39 = vadd.f32 %v2206_v21, %v2193_v40 }
 0x263   :  { %v2213_v55 = vpack.c.bf16 %v4077_v38, %v4075_v37  ;;  %v4079_v36 = vpop.eup %4078 }
 0x264   :  { %4080 = vtanh.f32 %v2207_v39 }
 0x265   :  { %2215 = vst [vmem:[%s6009_s16] sm:$0xff] %v2213_v55 }
 0x267   :  { %v2528_v51 = vpop.f32.mrf.mxu1 }
 0x26a   :  { %v4081_v44 = vpop.eup %4080 }
 0x26b   :  { %v2214_v41 = vpack.c.bf16 %v4081_v44, %v4079_v36 }
 0x26d   :  { %2216 = vst [vmem:[%s6009_s16 + $0x8] sm:$0xff] %v2214_v41  ;;  %v2500_v47 = vpop.f32.mrf.mxu3  ;;  %v2514_v50 = vpop.f32.mrf.mxu0 }
 0x26f   :  { %v2530_v60 = vpop.f32.mrf.mxu1 }
 0x273   :  { %v2486_v48 = vpop.f32.mrf.mxu2 }
 0x274   :  { %v2487_v49 = vadd.f32 %v4057_v46, %v2486_v48 }
 0x275   :  { %v2502_v11 = vpop.f32.mrf.mxu3  ;;  %v2516_v57 = vpop.f32.mrf.mxu0 }
 0x276   :  { %v2501_v52 = vadd.f32 %v2500_v47, %v2487_v49 }
 0x278   :  { %v2515_v53 = vadd.f32 %v2514_v50, %v2501_v52 }
 0x27a   :  { %v2529_v54 = vadd.f32 %v2528_v51, %v2515_v53 }
 0x27b   :  { %v2488_v42 = vpop.f32.mrf.mxu2 }
 0x27c   :  { %4082 = vtanh.f32 %v2529_v54  ;;  %v2489_v56 = vadd.f32 %v4057_v46, %v2488_v42 }
 0x27e   :  { %v2503_v45 = vadd.f32 %v2502_v11, %v2489_v56 }
 0x280   :  { %v2517_v59 = vadd.f32 %v2516_v57, %v2503_v45 }
 0x282   :  { %v4083_v61 = vpop.eup %4082  ;;  %v2531_v62 = vadd.f32 %v2530_v60, %v2517_v59 }
 0x283   :  { %2536 = vst.msk [vmem:[%s6010_s17] sm:$0xff] %vm2535_vm1, %v4083_v61 }
 0x284   :  { %4084 = vtanh.f32 %v2531_v62 }
 0x28a   :  { %v4085_v63 = vpop.eup %4084 }
 0x28b   :  { %2537 = vst.msk [vmem:[%s6010_s17 + $0x8] sm:$0xff] %vm2535_vm1, %v4085_v63 }

// kernel: _dkf_av_forward_impl.7
= control target key start
LH: loop header
LB: loop body
LE: loop exit
PB: predicated region body
PF: predicated region fallthrough
CT: control target
= control target key end

     0   :  { %s2189_s3 = smov 6   ;;  %s2190_s7 = smov 5   ;;  %vm154_vm0 = vcmask 130048   ;;  %vm578_vm1 = vcmask 261120   ;;  %vm635_vm9 = vcmask 523264   ;;  %s2623_s0 = inlined_call_operand.smem [shape: u32[37], index: -1, kind: input, shape index: {}] }
   0x1   :  { %s1503_s6 = sld [smem:[%s2623_s0 + %s2189_s3]]   ;;  %s2191_s11 = smov 2  }
   0x2   :  { %s1502_s10 = sld [smem:[%s2623_s0 + %s2190_s7]]   ;;  %s2192_s15 = smov 1  }
   0x3   :  { %s1499_s14 = sld [smem:[%s2623_s0 + %s2191_s11]]   ;;  %s2193_s19 = smov 7  }
   0x4   :  { %s1498_s18 = sld [smem:[%s2623_s0 + %s2192_s15]]   ;;  %s2194_s23 = smov 13  }
   0x5   :  { %s2245_s22 = sld [smem:[%s2623_s0 + %s2193_s19]]   ;;  %s2195_s27 = smov 12  }
   0x6   :  { %s2254_s26 = sld [smem:[%s2623_s0 + %s2194_s23]]   ;;  %s2196_s1 = smov 8  }
   0x7   :  { %v153_v0 = vld [vmem:[%s1503_s6 + $0x8] sm:$0xff]  ;;  %v152_v1 = vld [vmem:[%s1503_s6] sm:$0xff]  ;;  %s1509_s30 = sld [smem:[%s2623_s0 + %s2195_s27]]   ;;  %s2197_s5 = smov 20  }
   0x8   :  { %175 = vmatpush.msra.mxu0 %v153_v0  ;;  %v149_v2 = vld [vmem:[%s1502_s10 + $0x8] sm:$0xff]  ;;  %2080 = vmatpush.msra.mxu3 %v153_v0  ;;  %v148_v3 = vld [vmem:[%s1502_s10] sm:$0xff]  ;;  %s1505_s4 = sld [smem:[%s2623_s0 + %s2196_s1]]   ;;  %s2198_s9 = smov 16  }
   0x9   :  { %204 = vmatpush.msra.mxu1 %v149_v2  ;;  %v150_v4 = vld [vmem:[%s1499_s14] sm:$0xff]  ;;  %v151_v5 = vld [vmem:[%s1499_s14 + $0x8] sm:$0xff]  ;;  %s1517_s8 = sld [smem:[%s2623_s0 + %s2197_s5]]   ;;  %s2199_s13 = smov 9  }
   0xa   :  { %176 = vmatpush.msra.mxu0 %v152_v1  ;;  %v146_v6 = vld [vmem:[%s1498_s18] sm:$0xff]  ;;  %2081 = vmatpush.msra.mxu3 %v152_v1  ;;  %v147_v7 = vld [vmem:[%s1498_s18 + $0x8] sm:$0xff]  ;;  %s1513_s12 = sld [smem:[%s2623_s0 + %s2198_s9]]   ;;  %s2200_s20 = smov 21  }
   0xb   :  { %205 = vmatpush.msra.mxu1 %v148_v3  ;;  %1534 = vmatmul.msk.f32.vlgmr.msra.gmra.mxu0 %vm154_vm0, %v150_v4  ;;  %v2118_v16 = vld [vmem:[%s2245_s22] ss:$0 sm:$0xff]  ;;  %s2272_s16 = sld [smem:[%s2623_s0 + %s2199_s13]]   ;;  %s2201_s24 = smov 17  }
   0xc   :  { %1536 = vmatmul.msk.f32.vlgmr.msra.gmra.mxu1 %vm154_vm0, %v146_v6  ;;  %1535 = vmatmul.msk.f32.vlgmr.msra.gmra.mxu3 %vm154_vm0, %v151_v5  ;;  %s1_s19 = sld [smem:[%s2623_s0]]   ;;  %s2202_s29 = smov 15   ;;  %v2119_v34 = vld [vmem:[%s2254_s26] ss:$0 sm:$0xff] }
   0xd   :  { %v332_v8 = vld [vmem:[%s1509_s30 + $0x8] sm:$0xff]  ;;  %v331_v10 = vld [vmem:[%s1509_s30] sm:$0xff]  ;;  %s2282_s23 = sld [smem:[%s2623_s0 + %s2200_s20]]   ;;  %s2203_s3 = smov 14  }
   0xe   :  { %351 = vmatpush.msrb.mxu0 %v332_v8  ;;  %v222_v9 = vld [vmem:[%s1505_s4 + $0x8] sm:$0xff]  ;;  %v221_v11 = vld [vmem:[%s1505_s4] sm:$0xff]  ;;  %s2289_s28 = sld [smem:[%s2623_s0 + %s2201_s24]]   ;;  %s2204_s7 = smov 10  }
   0xf   :  { %247 = vmatpush.msra.mxu2 %v222_v9  ;;  %v1975_v12 = vld [vmem:[%s1517_s8] sm:$0xff]  ;;  %s2297_s2 = sld [smem:[%s2623_s0 + %s2202_s29]]   ;;  %s2205_s11 = smov 22  }
  0x10   :  { %352 = vmatpush.msrb.mxu0 %v331_v10  ;;  %v400_v13 = vld [vmem:[%s1513_s12 + $0x8] sm:$0xff]  ;;  %v399_v14 = vld [vmem:[%s1513_s12] sm:$0xff]  ;;  %s1511_s6 = sld [smem:[%s2623_s0 + %s2203_s3]]   ;;  %s2206_s15 = smov 11  }
  0x11   :  { %248 = vmatpush.msra.mxu2 %v221_v11  ;;  %s1507_s10 = sld [smem:[%s2623_s0 + %s2204_s7]]   ;;  %v2120_v39 = vld [vmem:[%s2272_s16] ss:$0 sm:$0xff]  ;;  %s2207_s26 = smov 23  }
  0x12   :  { %548 = vmatpush.bf16.msra.mxu0 %v1975_v12  ;;  %v523_v26 = vld [vmem:[%s1_s19] sm:$0xff]  ;;  %v524_v27 = vld [vmem:[%s1_s19 + $0x8] sm:$0xff]  ;;  %s1519_s14 = sld [smem:[%s2623_s0 + %s2205_s11]]   ;;  %s2208_s22 = smov 19  }
  0x13   :  { %419 = vmatpush.msrb.mxu2 %v400_v13  ;;  %v525_v28 = vpack.c.bf16 %v524_v27, %v523_v26  ;;  %s2314_s19 = sld [smem:[%s2623_s0 + %s2206_s15]]   ;;  %v2121_v50 = vld [vmem:[%s2282_s23] ss:$0 sm:$0xff]  ;;  %s2209_s27 = smov 18  }
  0x14   :  { %1537 = vmatmul.msk.f32.gmra.mxu1 %vm154_vm0, %v147_v7  ;;  %s2323_s21 = sld [smem:[%s2623_s0 + %s2207_s26]]   ;;  %s2210_s3 = smov 24   ;;  %v2122_v27 = vld [vmem:[%s2289_s28] ss:$0 sm:$0xff] }
  0x15   :  { %420 = vmatpush.msrb.mxu2 %v399_v14  ;;  %s2328_s25 = sld [smem:[%s2623_s0 + %s2208_s22]]   ;;  %v2123_v59 = vld [vmem:[%s2297_s2] ss:$0 sm:$0xff]  ;;  %s2211_s2 = smov 35  }
  0x16   :  { %v363_v29 = vld [vmem:[%s1511_s6 + $0x8] sm:$0xff]  ;;  %v362_v30 = vld [vmem:[%s1511_s6] sm:$0xff]  ;;  %s1515_s1 = sld [smem:[%s2623_s0 + %s2209_s27]]   ;;  %s2212_s28 = smov 25  }
  0x17   :  { %388 = vmatpush.msrb.mxu1 %v363_v29  ;;  %v259_v31 = vld [vmem:[%s1507_s10 + $0x8] sm:$0xff]  ;;  %v258_v32 = vld [vmem:[%s1507_s10] sm:$0xff]  ;;  %s1521_s6 = sld [smem:[%s2623_s0 + %s2210_s3]]   ;;  %s2213_s13 = smov 26  }
  0x18   :  { %284 = vmatpush.msrb.mxu3 %v259_v31  ;;  %v1977_v33 = vld [vmem:[%s1519_s14 + $0x8] sm:$0xff]  ;;  %v1976_v35 = vld [vmem:[%s1519_s14] sm:$0xff]  ;;  %s2351_s9 = sld [smem:[%s2623_s0 + %s2211_s2]]   ;;  %s2214_s18 = smov 29  }
  0x19   :  { %389 = vmatpush.msrb.mxu1 %v362_v30  ;;  %v2124_v3 = vld [vmem:[%s2314_s19] ss:$0 sm:$0xff]  ;;  %s2359_s12 = sld [smem:[%s2623_s0 + %s2212_s28]]   ;;  %s2215_s20 = smov 36  }
  0x1a   :  { %285 = vmatpush.msrb.mxu3 %v258_v32  ;;  %s2373_s17 = sld [smem:[%s2623_s0 + %s2213_s13]]   ;;  %s2216_s24 = smov 4  }
  0x1b   :  { %588 = vmatpush.bf16.msra.mxu1 %v1977_v33  ;;  %s2415_s16 = sld [smem:[%s2623_s0 + %s2214_s18]]   ;;  %s2217_s30 = smov 34  }
  0x1c   :  { %v437_v57 = vld [vmem:[%s1515_s1 + $0x8] sm:$0xff]  ;;  %v436_v58 = vld [vmem:[%s1515_s1] sm:$0xff]  ;;  %s2423_s23 = sld [smem:[%s2623_s0 + %s2215_s20]]   ;;  %s2218_s5 = smov 28  }
  0x1d   :  { %462 = vmatpush.msra.mxu3 %v437_v57  ;;  %v1981_v63 = vld [vmem:[%s1521_s6 + $0x18] sm:$0xff]  ;;  %v1980_v0 = vld [vmem:[%s1521_s6 + $0x10] sm:$0xff]  ;;  %v1979_v5 = vld [vmem:[%s1521_s6 + $0x8] sm:$0xff]  ;;  %s2436_s29 = sld [smem:[%s2623_s0 + %s2216_s24]]   ;;  %s2219_s8 = smov 3  }
  0x1e   :  { %v1978_v9 = vld [vmem:[%s1521_s6] sm:$0xff]  ;;  %s2467_s4 = sld [smem:[%s2623_s0 + %s2217_s30]]   ;;  %s2220_s11 = smov 27  }
  0x1f   :  { %589 = vmatpush.bf16.msra.mxu1 %v1976_v35  ;;  %463 = vmatpush.msra.mxu3 %v436_v58  ;;  %v2126_v58 = vld [vmem:[%s2328_s25] ss:$0 sm:$0xff]  ;;  %s2492_s7 = sld [smem:[%s2623_s0 + %s2218_s5]]   ;;  %s2221_s15 = smov 32  }
  0x20   :  { %s1500_s10 = sld [smem:[%s2623_s0 + %s2219_s8]]   ;;  %s2222_s26 = smov 31  }
  0x21   :  { %s1524_s14 = sld [smem:[%s2623_s0 + %s2220_s11]]   ;;  %s2223_s22 = smov 30  }
  0x22   :  { %s2593_s19 = sld [smem:[%s2623_s0 + %s2221_s15]]   ;;  %s2224_s27 = smov 33  }
  0x23   :  { %s1527_s25 = sld [smem:[%s2623_s0 + %s2223_s22]]  }
  0x24   :  { %s1530_s1 = sld [smem:[%s2623_s0 + %s2224_s27]]  }
  0x88   :  { %v178_v15 = vpop.f32.mrf.mxu0 }
  0x89   :  { %v207_v17 = vpop.f32.mrf.mxu1 }
  0x8a   :  { %v208_v18 = vadd.f32 %v207_v17, %v178_v15 }
  0x8c   :  { %v217_v19 = vadd.f32 %v2118_v16, %v208_v18 }
  0x8e   :  { %2129 = vtanh.f32 %v217_v19 }
  0x8f   :  { %v181_v20 = vpop.f32.mrf.mxu3 }
  0x91   :  { %v210_v21 = vpop.f32.mrf.mxu1 }
  0x92   :  { %v211_v22 = vadd.f32 %v210_v21, %v181_v20  ;;  %v2125_v20 = vld [vmem:[%s2323_s21] ss:$0 sm:$0xff]  ;;  %s2598_s21 = sld [smem:[%s2623_s0 + %s2222_s26]]  }
  0x94   :  { %v2130_v23 = vpop.eup %2129  ;;  %v218_v24 = vadd.f32 %v2118_v16, %v211_v22 }
  0x95   :  { %1538 = vmatmul.msk.f32.vlgmr.msra.gmra.mxu2 %vm154_vm0, %v2130_v23  ;;  %1544 = vmatmul.msk.f32.vlgmr.msrb.gmra.mxu0 %vm154_vm0, %v2130_v23 }
  0x96   :  { %2131 = vtanh.f32 %v218_v24  ;;  %643 = vmatpush.bf16.msra.mxu2 %v1981_v63  ;;  %v1996_v63 = vld [vmem:[%s2373_s17 + $0x74] sm:$0xf] }
  0x9a   :  { %644 = vmatpush.bf16.msra.mxu2 %v1980_v0 }
  0x9c   :  { %v2132_v25 = vpop.eup %2131 }
  0x9d   :  { %1539 = vmatmul.msk.f32.gmra.mxu2 %vm154_vm0, %v2132_v25  ;;  %1545 = vmatmul.msk.f32.gmra.mxu0 %vm154_vm0, %v2132_v25 }
  0x9e   :  { %645 = vmatpush.bf16.msra.mxu2 %v1979_v5  ;;  %v1633_v5 = vld [vmem:[%s2373_s17 + $0x60] sm:$0xf] }
  0xa2   :  { %646 = vmatpush.bf16.msra.mxu2 %v1978_v9  ;;  %v1635_v9 = vld [vmem:[%s2373_s17 + $0x68] sm:$0xf0] }
  0xa5   :  { %1548 = vmatmul.msk.f32.vlgmr.msrb.gmra.mxu2 %vm154_vm0, %v2130_v23  ;;  %1556 = vmatmul.msk.bf16.vlgmr.msra.gmra.mxu0 %vm154_vm0, %v525_v28 }
  0xad   :  { %1549 = vmatmul.msk.f32.gmra.mxu2 %vm154_vm0, %v2132_v25 }
 0x112   :  { %v354_v36 = vpop.f32.mrf.mxu0 }
 0x113   :  { %v355_v37 = vadd.f32 %v2119_v34, %v354_v36 }
 0x115   :  { %v360_v38 = vmax.f32 %v355_v37, 0.0 }
 0x117   :  { %1546 = vmatmul.msk.f32.vlgmr.msrb.gmra.mxu1 %vm154_vm0, %v360_v38 }
 0x118   :  { %v250_v40 = vpop.f32.mrf.mxu2 }
 0x119   :  { %v251_v41 = vadd.f32 %v2120_v39, %v250_v40 }
 0x11a   :  { %v357_v42 = vpop.f32.mrf.mxu0 }
 0x11b   :  { %v256_v43 = vmax.f32 %v251_v41, 0.0  ;;  %v358_v44 = vadd.f32 %v2119_v34, %v357_v42 }
 0x11d   :  { %v361_v45 = vmax.f32 %v358_v44, 0.0  ;;  %1540 = vmatmul.msk.f32.vlgmr.msrb.gmra.mxu3 %vm154_vm0, %v256_v43 }
 0x11f   :  { %1547 = vmatmul.msk.f32.gmra.mxu1 %vm154_vm0, %v361_v45 }
 0x120   :  { %v253_v46 = vpop.f32.mrf.mxu2 }
 0x121   :  { %v254_v47 = vadd.f32 %v2120_v39, %v253_v46 }
 0x122   :  { %v550_v48 = vpop.f32.mrf.mxu0 }
 0x123   :  { %v257_v49 = vmax.f32 %v254_v47, 0.0  ;;  %v551_v51 = vadd.f32 %v2121_v50, %v550_v48 }
 0x125   :  { %1541 = vmatmul.msk.f32.gmra.mxu3 %vm154_vm0, %v257_v49  ;;  %2133 = vtanh.f32 %v551_v51 }
 0x128   :  { %v422_v26 = vpop.f32.mrf.mxu2 }
 0x129   :  { %v423_v36 = vadd.f32 %v2122_v27, %v422_v26 }
 0x12a   :  { %v552_v52 = vpop.f32.mrf.mxu0 }
 0x12b   :  { %v553_v53 = vadd.f32 %v2121_v50, %v552_v52  ;;  %v2134_v54 = vpop.eup %2133 }
 0x12d   :  { %2135 = vtanh.f32 %v553_v53 }
 0x130   :  { %v425_v48 = vpop.f32.mrf.mxu2 }
 0x131   :  { %v426_v53 = vadd.f32 %v2122_v27, %v425_v48  ;;  %v1990_v27 = vld [vmem:[%s2373_s17 + $0x44] sm:$0xf] }
 0x133   :  { %v2136_v55 = vpop.eup %2135 }
 0x134   :  { %v557_v56 = vpack.c.bf16 %v2136_v55, %v2134_v54 }
 0x136   :  { %1565 = vmatmul.msk.bf16.vlgmr.msra.gmra.mxu1 %vm578_vm1, %v557_v56 }
 0x194   :  { %v391_v60 = vpop.f32.mrf.mxu1 }
 0x195   :  { %v2337_v61 = vadd.f32 %v2123_v59, %v391_v60 }
 0x197   :  { %v434_v62 = vmax.f32 %v2337_v61, 0.0 }
 0x199   :  { %1550 = vmatmul.msk.f32.vlgmr.msra.gmra.mxu3 %vm154_vm0, %v434_v62  ;;  %v1997_v62 = vld [vmem:[%s2373_s17 + $0x74] sm:$0xf0] }
 0x19c   :  { %v394_v1 = vpop.f32.mrf.mxu1 }
 0x19d   :  { %v2341_v2 = vadd.f32 %v2123_v59, %v394_v1  ;;  %v1643_v1 = vld [vmem:[%s2373_s17 + $0x78] sm:$0xf0] }
 0x19f   :  { %v435_v4 = vmax.f32 %v2341_v2, 0.0 }
 0x1a0   :  { %v287_v6 = vpop.f32.mrf.mxu3 }
 0x1a1   :  { %v288_v7 = vadd.f32 %v2124_v3, %v287_v6  ;;  %1551 = vmatmul.msk.f32.gmra.mxu3 %vm154_vm0, %v435_v4  ;;  %v1995_v6 = vld [vmem:[%s2373_s17 + $0x64] sm:$0xf0] }
 0x1a3   :  { %v1542_v8 = vmul.f32 -1.442695, %v288_v7  ;;  %v1634_v7 = vor.u32 %v1995_v6, %v1633_v5 }
 0x1a5   :  { %2137 = vpow2.f32 %v1542_v8  ;;  %v1994_v8 = vld [vmem:[%s2373_s17 + $0x64] sm:$0xf] }
 0x1a8   :  { %v290_v10 = vpop.f32.mrf.mxu3 }
 0x1a9   :  { %v291_v11 = vadd.f32 %v2124_v3, %v290_v10  ;;  %v1646_v3 = vor.u32 %v1996_v63, %v1643_v1  ;;  %v1638_v10 = vor.u32 %v1994_v8, %v1635_v9  ;;  %v1983_v1 = vld [vmem:[%s2373_s17 + $0x4] sm:$0xf0] }
 0x1ab   :  { %v2138_v12 = vpop.eup %2137  ;;  %v1543_v13 = vmul.f32 -1.442695, %v291_v11  ;;  %772 = vmatpush.bf16.msrb.mxu0 %v1646_v3 }
 0x1ac   :  { %v299_v14 = vadd.f32 1.0, %v2138_v12 }
 0x1ad   :  { %2139 = vpow2.f32 %v1543_v13  ;;  %v1625_v13 = vld [vmem:[%s2373_s17 + $0x50] sm:$0xf] }
 0x1ae   :  { %2141 = vrcp.f32 %v299_v14  ;;  %v312_v22 = vand.u32 2147483648, %v299_v14  ;;  %v310_v24 = vand.u32 2147483647, %v299_v14  ;;  %vm306_vm3 = vweird.f32 %v299_v14 }
 0x1af   :  { %773 = vmatpush.bf16.msrb.mxu0 %v1638_v10  ;;  %v1777_v10 = vld [vmem:[%s2415_s16 + $0xf0] sm:$0xf] }
 0x1b0   :  { %v313_v31 = vor.u32 1.1754944e-38, %v312_v22  ;;  %vm311_vm5 = vcmp.eq.f32.partialorder %v310_v24, 8.507059e+37  ;;  %v1617_v22 = vld [vmem:[%s2373_s17 + $0x40] sm:$0xf] }
 0x1b3   :  { %v2140_v15 = vpop.eup %2139  ;;  %v591_v16 = vpop.f32.mrf.mxu1 }
 0x1b4   :  { %v2142_v17 = vpop.eup %2141  ;;  %v300_v18 = vadd.f32 1.0, %v2140_v15  ;;  %v592_v25 = vadd.f32 %v2125_v20, %v591_v16  ;;  %v1992_v15 = vld [vmem:[%s2373_s17 + $0x54] sm:$0xf] }
 0x1b5   :  { %v302_v19 = vmul.f32 %v2142_v17, %v299_v14  ;;  %vm307_vm2 = vweird.f32 %v2142_v17  ;;  %v1993_v14 = vld [vmem:[%s2373_s17 + $0x54] sm:$0xf0] }
 0x1b6   :  { %2143 = vrcp.f32 %v300_v18  ;;  %vm308_vm4 = vmor %vm306_vm3, %vm307_vm2  ;;  %v325_v39 = vand.u32 2147483647, %v300_v18  ;;  %v327_v40 = vand.u32 2147483648, %v300_v18  ;;  %vm321_vm7 = vweird.f32 %v300_v18 }
 0x1b7   :  { %v303_v21 = vsub.f32 1.0, %v302_v19  ;;  %2145 = vtanh.f32 %v592_v25  ;;  %v1626_v16 = vor.u32 %v1993_v14, %v1625_v13  ;;  %v2062_v13 = vld [vmem:[%s2415_s16 + $0xf4] sm:$0xf] }
 0x1b8   :  { %v328_v49 = vor.u32 1.1754944e-38, %v327_v40  ;;  %vm326_vm10 = vcmp.eq.f32.partialorder %v325_v39, 8.507059e+37  ;;  %v1601_v39 = vld [vmem:[%s2373_s17 + $0x20] sm:$0xf]  ;;  %v1987_v40 = vld [vmem:[%s2373_s17 + $0x24] sm:$0xf0] }
 0x1b9   :  { %v304_v23 = vmul.f32 %v2142_v17, %v303_v21 }
 0x1bb   :  { %v305_v28 = vadd.f32 %v2142_v17, %v304_v23  ;;  %v593_v29 = vpop.f32.mrf.mxu1  ;;  %v1991_v23 = vld [vmem:[%s2373_s17 + $0x44] sm:$0xf0] }
 0x1bc   :  { %v2144_v30 = vpop.eup %2143  ;;  %v594_v32 = vadd.f32 %v2125_v20, %v593_v29  ;;  %v1618_v25 = vor.u32 %v1991_v23, %v1617_v22  ;;  %v1771_v23 = vld [vmem:[%s2415_s16 + $0xe8] sm:$0xf0] }
 0x1bd   :  { %v309_v33 = vsel %vm308_vm4, %v2142_v17, %v305_v28  ;;  %v317_v34 = vmul.f32 %v2144_v30, %v300_v18  ;;  %vm322_vm6 = vweird.f32 %v2144_v30  ;;  %v2146_v44 = vpop.eup %2145  ;;  %v1627_v17 = vld [vmem:[%s2373_s17 + $0x58] sm:$0xf0]  ;;  %v1619_v28 = vld [vmem:[%s2373_s17 + $0x48] sm:$0xf0] }
 0x1be   :  { %v314_v35 = vsel %vm311_vm5, %v313_v31, %v309_v33  ;;  %2147 = vtanh.f32 %v594_v32  ;;  %vm323_vm8 = vmor %vm321_vm7, %vm322_vm6  ;;  %v1630_v19 = vor.u32 %v1992_v15, %v1627_v17  ;;  %v1622_v29 = vor.u32 %v1990_v27, %v1619_v28  ;;  %v1989_v31 = vld [vmem:[%s2373_s17 + $0x34] sm:$0xf0]  ;;  %v1988_v32 = vld [vmem:[%s2373_s17 + $0x34] sm:$0xf] }
 0x1bf   :  { %v397_v37 = vsub.f32 1.0, %v314_v35  ;;  %v318_v38 = vsub.f32 1.0, %v317_v34  ;;  %v430_v42 = vmul.f32 %v2337_v61, %v314_v35  ;;  %v1641_v61 = vld [vmem:[%s2373_s17 + $0x70] sm:$0xf]  ;;  %v1611_v34 = vld [vmem:[%s2373_s17 + $0x38] sm:$0xf0] }
 0x1c0   :  { %v1642_v0 = vor.u32 %v1997_v62, %v1641_v61  ;;  %774 = vmatpush.bf16.msrb.mxu0 %v1630_v19  ;;  %v1779_v17 = vld [vmem:[%s2415_s16 + $0xf8] sm:$0xf0] }
 0x1c1   :  { %v428_v41 = vmul.f32 %v423_v36, %v397_v37  ;;  %v319_v43 = vmul.f32 %v2144_v30, %v318_v38  ;;  %v1614_v36 = vor.u32 %v1988_v32, %v1611_v34  ;;  %v1782_v19 = vor.u32 %v2062_v13, %v1779_v17  ;;  %v1761_v32 = vld [vmem:[%s2415_s16 + $0xd0] sm:$0xf]  ;;  %v2058_v34 = vld [vmem:[%s2415_s16 + $0xd4] sm:$0xf]  ;;  %v2053_v17 = vld [vmem:[%s2415_s16 + $0xa4] sm:$0xf0] }
 0x1c2   :  { %758 = vmatpush.bf16.msrb.mxu3 %v1642_v0  ;;  %v1585_v0 = vld [vmem:[%s2373_s17] sm:$0xf] }
 0x1c3   :  { %v320_v45 = vadd.f32 %v2144_v30, %v319_v43  ;;  %v2354_v46 = vadd.f32 %v430_v42, %v428_v41  ;;  %v1602_v43 = vor.u32 %v1987_v40, %v1601_v39  ;;  %v1586_v3 = vor.u32 %v1983_v1, %v1585_v0  ;;  %v2045_v39 = vld [vmem:[%s2415_s16 + $0x64] sm:$0xf0]  ;;  %v2044_v40 = vld [vmem:[%s2415_s16 + $0x64] sm:$0xf]  ;;  %v2054_v0 = vld [vmem:[%s2415_s16 + $0xb4] sm:$0xf] }
 0x1c4   :  { %v2148_v47 = vpop.eup %2147  ;;  %775 = vmatpush.bf16.msrb.mxu0 %v1622_v29  ;;  %v2046_v29 = vld [vmem:[%s2415_s16 + $0x74] sm:$0xf] }
 0x1c5   :  { %v324_v50 = vsel %vm323_vm8, %v2144_v30, %v320_v45  ;;  %v598_v51 = vpack.c.bf16 %v2148_v47, %v2146_v44  ;;  %519 = vst.msk [vmem:[%s2351_s9] sm:$0xff] %vm154_vm0, %v2354_v46  ;;  %v1609_v30 = vld [vmem:[%s2373_s17 + $0x30] sm:$0xf]  ;;  %v1986_v44 = vld [vmem:[%s2373_s17 + $0x24] sm:$0xf] }
 0x1c6   :  { %v329_v52 = vsel %vm326_vm10, %v328_v49, %v324_v50  ;;  %759 = vmatpush.bf16.msrb.mxu3 %v1634_v7  ;;  %v1610_v33 = vor.u32 %v1989_v31, %v1609_v30  ;;  %v1603_v49 = vld [vmem:[%s2373_s17 + $0x28] sm:$0xf0]  ;;  %v1715_v30 = vld [vmem:[%s2415_s16 + $0x78] sm:$0xf0] }
 0x1c7   :  { %v398_v54 = vsub.f32 1.0, %v329_v52  ;;  %1582 = vmatmul.msk.bf16.vlgmr.msra.gmra.mxu2 %vm635_vm9, %v598_v51  ;;  %v431_v56 = vmul.f32 %v2341_v2, %v329_v52  ;;  %v1606_v50 = vor.u32 %v1986_v44, %v1603_v49  ;;  %v1593_v52 = vld [vmem:[%s2373_s17 + $0x10] sm:$0xf]  ;;  %v1718_v31 = vor.u32 %v2046_v29, %v1715_v30  ;;  %v1673_v30 = vld [vmem:[%s2415_s16 + $0x20] sm:$0xf] }
 0x1c8   :  { %776 = vmatpush.bf16.msrb.mxu0 %v1614_v36  ;;  %v1763_v36 = vld [vmem:[%s2415_s16 + $0xd8] sm:$0xf0] }
 0x1c9   :  { %v429_v55 = vmul.f32 %v426_v53, %v398_v54  ;;  %v1985_v53 = vld [vmem:[%s2373_s17 + $0x14] sm:$0xf0]  ;;  %v1984_v54 = vld [vmem:[%s2373_s17 + $0x14] sm:$0xf] }
 0x1ca   :  { %760 = vmatpush.bf16.msrb.mxu3 %v1626_v16 }
 0x1cb   :  { %v2365_v57 = vadd.f32 %v431_v56, %v429_v55  ;;  %v1594_v56 = vor.u32 %v1985_v53, %v1593_v52  ;;  %v2043_v52 = vld [vmem:[%s2415_s16 + $0x54] sm:$0xf0]  ;;  %v505_v53 = vld [vmem:[%s2436_s29] sm:$0xff] }
 0x1cc   :  { %777 = vmatpush.bf16.msrb.mxu0 %v1606_v50  ;;  %v1755_v50 = vld [vmem:[%s2415_s16 + $0xc8] sm:$0xf0] }
 0x1cd   :  { %520 = vst.msk [vmem:[%s2351_s9 + $0x8] sm:$0xff] %vm154_vm0, %v2365_v57 }
 0x1ce   :  { %761 = vmatpush.bf16.msrb.mxu3 %v1618_v25  ;;  %v2047_v25 = vld [vmem:[%s2415_s16 + $0x74] sm:$0xf0] }
 0x1d2   :  { %762 = vmatpush.bf16.msrb.mxu3 %v1610_v33  ;;  %v2059_v33 = vld [vmem:[%s2415_s16 + $0xd4] sm:$0xf0] }
 0x1d6   :  { %763 = vmatpush.bf16.msrb.mxu3 %v1602_v43 }
 0x1da   :  { %764 = vmatpush.bf16.msrb.mxu3 %v1594_v56  ;;  %v2042_v56 = vld [vmem:[%s2415_s16 + $0x54] sm:$0xf] }
 0x1de   :  { %765 = vmatpush.bf16.msrb.mxu3 %v1586_v3  ;;  %v1747_v3 = vld [vmem:[%s2415_s16 + $0xb8] sm:$0xf0] }
 0x1e2   :  { %1056 = vmatpush.bf16.msra.mxu3 %v1718_v31  ;;  %v2037_v31 = vld [vmem:[%s2415_s16 + $0x24] sm:$0xf0] }
 0x21c   :  { %v465_v59 = vpop.f32.mrf.mxu3 }
 0x21d   :  { %v2376_v60 = vadd.f32 %v2126_v58, %v465_v59 }
 0x21f   :  { %v473_v2 = vmin.f32 %v2376_v60, 20.0  ;;  %vm471_vm11 = vcmp.gt.f32.partialorder %v2376_v60, 20.0 }
 0x221   :  { %v475_v4 = vmul.f32 1.442695, %v473_v2  ;;  %v1982_v2 = vld [vmem:[%s2373_s17 + $0x4] sm:$0xf] }
 0x223   :  { %2149 = vpow2.f32 %v475_v4  ;;  %v1587_v4 = vld [vmem:[%s2373_s17 + $0x8] sm:$0xf0] }
 0x224   :  { %v468_v11 = vpop.f32.mrf.mxu3  ;;  %v1590_v7 = vor.u32 %v1982_v2, %v1587_v4  ;;  %v1689_v4 = vld [vmem:[%s2415_s16 + $0x40] sm:$0xf] }
 0x225   :  { %v2387_v12 = vadd.f32 %v2126_v58, %v468_v11  ;;  %v1595_v58 = vld [vmem:[%s2373_s17 + $0x18] sm:$0xf0]  ;;  %v2063_v11 = vld [vmem:[%s2415_s16 + $0xf4] sm:$0xf0] }
 0x226   :  { %v1598_v62 = vor.u32 %v1984_v54, %v1595_v58  ;;  %v1778_v16 = vor.u32 %v2063_v11, %v1777_v10  ;;  %v1699_v58 = vld [vmem:[%s2415_s16 + $0x58] sm:$0xf0]  ;;  %v2127_v10 = vld [vmem:[%s2359_s12] ss:$0 sm:$0xff] }
 0x227   :  { %v474_v18 = vmin.f32 %v2387_v12, 20.0  ;;  %vm472_vm14 = vcmp.gt.f32.partialorder %v2387_v12, 20.0 }
 0x228   :  { %778 = vmatpush.bf16.msrb.mxu0 %v1598_v62  ;;  %1042 = vmatpush.bf16.msrb.mxu2 %v1778_v16  ;;  %v1745_v62 = vld [vmem:[%s2415_s16 + $0xb0] sm:$0xf]  ;;  %v1737_v16 = vld [vmem:[%s2415_s16 + $0xa0] sm:$0xf] }
 0x229   :  { %v2150_v20 = vpop.eup %2149  ;;  %v477_v21 = vmul.f32 1.442695, %v474_v18  ;;  %v1769_v18 = vld [vmem:[%s2415_s16 + $0xe0] sm:$0xf] }
 0x22a   :  { %v479_v24 = vadd.f32 1.0, %v2150_v20  ;;  %v482_v26 = vmul.f32 -0.5, %v2150_v20  ;;  %v485_v37 = vand.u32 2147483647, %v2150_v20 }
 0x22b   :  { %2151 = vpow2.f32 %v477_v21  ;;  %v2060_v21 = vld [vmem:[%s2415_s16 + $0xe4] sm:$0xf] }
 0x22c   :  { %2153 = vlog2.f32 %v479_v24  ;;  %v483_v35 = vadd.f32 1.0, %v482_v26  ;;  %vm486_vm12 = vcmp.lt.f32.partialorder %v485_v37, 0.0004427343  ;;  %779 = vmatpush.bf16.msrb.mxu0 %v1590_v7  ;;  %v1713_v24 = vld [vmem:[%s2415_s16 + $0x70] sm:$0xf]  ;;  %v1774_v27 = vor.u32 %v2060_v21, %v1771_v23 }
 0x22d   :  { %v1714_v28 = vor.u32 %v2047_v25, %v1713_v24  ;;  %v1705_v37 = vld [vmem:[%s2415_s16 + $0x60] sm:$0xf]  ;;  %v1691_v7 = vld [vmem:[%s2415_s16 + $0x48] sm:$0xf0]  ;;  %v1683_v21 = vld [vmem:[%s2415_s16 + $0x38] sm:$0xf0] }
 0x22e   :  { %v484_v47 = vmul.f32 %v2150_v20, %v483_v35  ;;  %v2061_v20 = vld [vmem:[%s2415_s16 + $0xe4] sm:$0xf0]  ;;  %v1706_v43 = vor.u32 %v2045_v39, %v1705_v37  ;;  %v2052_v23 = vld [vmem:[%s2415_s16 + $0xa4] sm:$0xf]  ;;  %v1739_v24 = vld [vmem:[%s2415_s16 + $0xa8] sm:$0xf0] }
 0x22f   :  { %v1770_v22 = vor.u32 %v2061_v20, %v1769_v18  ;;  %1028 = vmatpush.bf16.msrb.mxu1 %v1714_v28  ;;  %v1681_v18 = vld [vmem:[%s2415_s16 + $0x30] sm:$0xf]  ;;  %v2038_v20 = vld [vmem:[%s2415_s16 + $0x34] sm:$0xf]  ;;  %v1738_v28 = vor.u32 %v2053_v17, %v1737_v16  ;;  %v1731_v39 = vld [vmem:[%s2415_s16 + $0x98] sm:$0xf0] }
 0x230   :  { %1070 = vmatpush.bf16.msra.mxu0 %v1782_v19  ;;  %v2039_v19 = vld [vmem:[%s2415_s16 + $0x34] sm:$0xf0]  ;;  %v1686_v29 = vor.u32 %v2038_v20, %v1683_v21  ;;  %v2026_v17 = vld [vmem:[%s2492_s7 + $0xe4] sm:$0xf]  ;;  %v1833_v21 = vld [vmem:[%s2492_s7 + $0x60] sm:$0xf] }
 0x231   :  { %v2152_v38 = vpop.eup %2151  ;;  %1043 = vmatpush.bf16.msrb.mxu2 %v1770_v22 }
 0x232   :  { %v2154_v41 = vpop.eup %2153  ;;  %v488_v42 = vadd.f32 1.0, %v2152_v38  ;;  %v491_v48 = vmul.f32 -0.5, %v2152_v38  ;;  %v494_v63 = vand.u32 2147483647, %v2152_v38 }
 0x233   :  { %v481_v45 = vmul.f32 0.6931472, %v2154_v41  ;;  %v1707_v41 = vld [vmem:[%s2415_s16 + $0x68] sm:$0xf0]  ;;  %1029 = vmatpush.bf16.msrb.mxu1 %v1706_v43 }
 0x234   :  { %2155 = vlog2.f32 %v488_v42  ;;  %v492_v61 = vadd.f32 1.0, %v491_v48  ;;  %vm495_vm13 = vcmp.lt.f32.partialorder %v494_v63, 0.0004427343  ;;  %1071 = vmatpush.bf16.msra.mxu0 %v1774_v27  ;;  %v1766_v42 = vor.u32 %v2058_v34, %v1763_v36  ;;  %v2056_v48 = vld [vmem:[%s2415_s16 + $0xc4] sm:$0xf] }
 0x235   :  { %v487_v51 = vsel %vm486_vm12, %v484_v47, %v481_v45  ;;  %v1710_v44 = vor.u32 %v2044_v40, %v1707_v41  ;;  %v1753_v45 = vld [vmem:[%s2415_s16 + $0xc0] sm:$0xf]  ;;  %v2057_v47 = vld [vmem:[%s2415_s16 + $0xc4] sm:$0xf0]  ;;  %v2055_v63 = vld [vmem:[%s2415_s16 + $0xb4] sm:$0xf0]  ;;  %v1674_v41 = vor.u32 %v2037_v31, %v1673_v30 }
 0x236   :  { %v497_v55 = vsel %vm471_vm11, %v2376_v60, %v487_v51  ;;  %v493_v6 = vmul.f32 %v2152_v38, %v492_v61  ;;  %v1762_v38 = vor.u32 %v2059_v33, %v1761_v32  ;;  %v1697_v51 = vld [vmem:[%s2415_s16 + $0x50] sm:$0xf]  ;;  %v1702_v61 = vor.u32 %v2042_v56, %v1699_v58  ;;  %v2051_v34 = vld [vmem:[%s2415_s16 + $0x94] sm:$0xf0]  ;;  %v1675_v36 = vld [vmem:[%s2415_s16 + $0x28] sm:$0xf0] }
 0x237   :  { %v499_v59 = vmax.f32 %v497_v55, 1e-20  ;;  %v1698_v55 = vor.u32 %v2043_v52, %v1697_v51  ;;  %1057 = vmatpush.bf16.msra.mxu3 %v1710_v44  ;;  %v1729_v27 = vld [vmem:[%s2415_s16 + $0x90] sm:$0xf]  ;;  %v1742_v33 = vor.u32 %v2052_v23, %v1739_v24  ;;  %v2048_v51 = vld [vmem:[%s2415_s16 + $0x84] sm:$0xf] }
 0x238   :  { %1044 = vmatpush.bf16.msrb.mxu2 %v1762_v38  ;;  %1072 = vmatpush.bf16.msra.mxu0 %v1766_v42  ;;  %v2050_v38 = vld [vmem:[%s2415_s16 + $0x94] sm:$0xf]  ;;  %v1721_v42 = vld [vmem:[%s2415_s16 + $0x80] sm:$0xf]  ;;  %v1730_v44 = vor.u32 %v2051_v34, %v1729_v27  ;;  %v1905_v56 = vld [vmem:[%s2492_s7 + $0xf0] sm:$0xf] }
 0x239   :  { %2157 = vlog2.f32 %v499_v59  ;;  %v1754_v59 = vor.u32 %v2057_v47, %v1753_v45  ;;  %1030 = vmatpush.bf16.msrb.mxu1 %v1698_v55  ;;  %v2049_v47 = vld [vmem:[%s2415_s16 + $0x84] sm:$0xf0]  ;;  %v2034_v52 = vld [vmem:[%s2415_s16 + $0x14] sm:$0xf]  ;;  %v1723_v55 = vld [vmem:[%s2415_s16 + $0x88] sm:$0xf0] }
 0x23a   :  { %v2156_v60 = vpop.eup %2155  ;;  %v2029_v58 = vld [vmem:[%s2492_s7 + $0xf4] sm:$0xf0]  ;;  %v2010_v24 = vld [vmem:[%s2492_s7 + $0x64] sm:$0xf]  ;;  %v1889_v27 = vld [vmem:[%s2492_s7 + $0xd0] sm:$0xf] }
 0x23b   :  { %v490_v5 = vmul.f32 0.6931472, %v2156_v60  ;;  %v1758_v60 = vor.u32 %v2056_v48, %v1755_v50  ;;  %1058 = vmatpush.bf16.msra.mxu3 %v1702_v61  ;;  %v1665_v48 = vld [vmem:[%s2415_s16 + $0x10] sm:$0xf]  ;;  %v1734_v50 = vor.u32 %v2050_v38, %v1731_v39  ;;  %v1907_v61 = vld [vmem:[%s2492_s7 + $0xf8] sm:$0xf0] }
 0x23c   :  { %1045 = vmatpush.bf16.msrb.mxu2 %v1754_v59  ;;  %v2028_v59 = vld [vmem:[%s2492_s7 + $0xf4] sm:$0xf]  ;;  %v1881_v34 = vld [vmem:[%s2492_s7 + $0xc0] sm:$0xf]  ;;  %v1883_v38 = vld [vmem:[%s2492_s7 + $0xc8] sm:$0xf0] }
 0x23d   :  { %v496_v8 = vsel %vm495_vm13, %v493_v6, %v490_v5  ;;  %v2041_v5 = vld [vmem:[%s2415_s16 + $0x44] sm:$0xf0]  ;;  %v2040_v6 = vld [vmem:[%s2415_s16 + $0x44] sm:$0xf]  ;;  %1073 = vmatpush.bf16.msra.mxu0 %v1758_v60  ;;  %v1649_v39 = vld [vmem:[%s1500_s10] sm:$0xf] }
 0x23e   :  { %v498_v9 = vsel %vm472_vm14, %v2387_v12, %v496_v8  ;;  %v1690_v11 = vor.u32 %v2041_v5, %v1689_v4  ;;  %v1841_v4 = vld [vmem:[%s2492_s7 + $0x70] sm:$0xf]  ;;  %v2013_v5 = vld [vmem:[%s2492_s7 + $0x74] sm:$0xf0] }
 0x23f   :  { %v2158_v14 = vpop.eup %2157  ;;  %v500_v15 = vmax.f32 %v498_v9, 1e-20 }
 0x240   :  { %v502_v12 = vmul.f32 0.6931472, %v2158_v14  ;;  %v1746_v14 = vor.u32 %v2055_v63, %v1745_v62  ;;  %1031 = vmatpush.bf16.msrb.mxu1 %v1690_v11  ;;  %v1657_v63 = vld [vmem:[%s2415_s16] sm:$0xf] }
 0x241   :  { %2159 = vlog2.f32 %v500_v15  ;;  %v1694_v15 = vor.u32 %v2040_v6, %v1691_v7  ;;  %v1726_v7 = vor.u32 %v2048_v51, %v1723_v55  ;;  %v2020_v55 = vld [vmem:[%s2492_s7 + $0xb4] sm:$0xf] }
 0x242   :  { %v507_v26 = vmul.f32 0.5, %v502_v12  ;;  %521 = vst.msk [vmem:[%s2423_s23] sm:$0xff] %vm154_vm0, %v502_v12  ;;  %v1750_v12 = vor.u32 %v2054_v0, %v1747_v3  ;;  %1046 = vmatpush.bf16.msrb.mxu2 %v1746_v14  ;;  %v1722_v0 = vor.u32 %v2049_v47, %v1721_v42  ;;  %v1659_v3 = vld [vmem:[%s2415_s16 + $0x8] sm:$0xf0]  ;;  %v1897_v14 = vld [vmem:[%s2492_s7 + $0xe0] sm:$0xf] }
 0x243   :  { %1059 = vmatpush.bf16.msra.mxu3 %v1694_v15  ;;  %v2027_v15 = vld [vmem:[%s2492_s7 + $0xe4] sm:$0xf0] }
 0x244   :  { %v509_v35 = vmul.f32 1.442695, %v507_v26  ;;  %v1682_v26 = vor.u32 %v2039_v19, %v1681_v18  ;;  %1074 = vmatpush.bf16.msra.mxu0 %v1750_v12  ;;  %v1899_v18 = vld [vmem:[%s2492_s7 + $0xe8] sm:$0xf0]  ;;  %v1842_v19 = vor.u32 %v2013_v5, %v1841_v4  ;;  %v1898_v23 = vor.u32 %v2027_v15, %v1897_v14  ;;  %v1857_v14 = vld [vmem:[%s2492_s7 + $0x90] sm:$0xf] }
 0x245   :  { %v1867_v5 = vld [vmem:[%s2492_s7 + $0xa8] sm:$0xf0]  ;;  %v2017_v15 = vld [vmem:[%s2492_s7 + $0x94] sm:$0xf0] }
 0x246   :  { %2161 = vpow2.f32 %v509_v35  ;;  %v2036_v35 = vld [vmem:[%s2415_s16 + $0x24] sm:$0xf]  ;;  %1032 = vmatpush.bf16.msrb.mxu1 %v1682_v26  ;;  %1047 = vmatpush.bf16.msrb.mxu2 %v1738_v28  ;;  %v1902_v26 = vor.u32 %v2026_v17, %v1899_v18  ;;  %v2024_v28 = vld [vmem:[%s2492_s7 + $0xd4] sm:$0xf]  ;;  %v1858_v17 = vor.u32 %v2017_v15, %v1857_v14  ;;  %v1859_v18 = vld [vmem:[%s2492_s7 + $0x98] sm:$0xf0] }
 0x247   :  { %v2160_v49 = vpop.eup %2159  ;;  %1060 = vmatpush.bf16.msra.mxu3 %v1686_v29  ;;  %v1678_v45 = vor.u32 %v2036_v35, %v1675_v36  ;;  %v1891_v29 = vld [vmem:[%s2492_s7 + $0xd8] sm:$0xf0]  ;;  %v2023_v35 = vld [vmem:[%s2492_s7 + $0xc4] sm:$0xf0]  ;;  %v2022_v36 = vld [vmem:[%s2492_s7 + $0xc4] sm:$0xf] }
 0x248   :  { %v504_v54 = vmul.f32 0.6931472, %v2160_v49  ;;  %v2035_v49 = vld [vmem:[%s2415_s16 + $0x14] sm:$0xf0]  ;;  %1075 = vmatpush.bf16.msra.mxu0 %v1742_v33  ;;  %v1894_v33 = vor.u32 %v2024_v28, %v1891_v29  ;;  %v1851_v28 = vld [vmem:[%s2492_s7 + $0x88] sm:$0xf0] }
 0x249   :  { %v1666_v62 = vor.u32 %v2035_v49, %v1665_v48  ;;  %v1827_v48 = vld [vmem:[%s2492_s7 + $0x58] sm:$0xf0]  ;;  %v2030_v49 = vld [vmem:[%s1500_s10 + $0x4] sm:$0xf]  ;;  %v2073_v15 = vld [vmem:[%s2598_s21 + $0x48] sm:$0xff] }
 0x24a   :  { %v508_v1 = vmul.f32 0.5, %v504_v54  ;;  %522 = vst.msk [vmem:[%s2423_s23 + $0x8] sm:$0xff] %vm154_vm0, %v504_v54  ;;  %v648_v2 = vpop.f32.mrf.mxu2  ;;  %1033 = vmatpush.bf16.msrb.mxu1 %v1674_v41  ;;  %1048 = vmatpush.bf16.msrb.mxu2 %v1730_v44  ;;  %v1886_v41 = vor.u32 %v2022_v36, %v1883_v38  ;;  %v2009_v44 = vld [vmem:[%s2492_s7 + $0x54] sm:$0xf0]  ;;  %v1785_v36 = vld [vmem:[%s2492_s7] sm:$0xf] }
 0x24b   :  { %v649_v25 = vadd.f32 %v2127_v10, %v648_v2  ;;  %1061 = vmatpush.bf16.msra.mxu3 %v1678_v45  ;;  %v2032_v2 = vld [vmem:[%s2415_s16 + $0x4] sm:$0xf]  ;;  %v2008_v45 = vld [vmem:[%s2492_s7 + $0x54] sm:$0xf] }
 0x24c   :  { %v2162_v8 = vpop.eup %2161  ;;  %v511_v9 = vmul.f32 1.442695, %v508_v1  ;;  %1076 = vmatpush.bf16.msra.mxu0 %v1734_v50  ;;  %v1662_v12 = vor.u32 %v2032_v2, %v1659_v3  ;;  %v1651_v50 = vld [vmem:[%s1500_s10 + $0x8] sm:$0xf0]  ;;  %v1830_v51 = vor.u32 %v2008_v45, %v1827_v48  ;;  %v1865_v2 = vld [vmem:[%s2492_s7 + $0xa0] sm:$0xf] }
 0x24d   :  { %v513_v13 = vmul.f32 %v2162_v8, %v505_v53  ;;  %v1667_v53 = vld [vmem:[%s2415_s16 + $0x18] sm:$0xf0]  ;;  %v1906_v8 = vor.u32 %v2029_v58, %v1905_v56  ;;  %v2018_v3 = vld [vmem:[%s2492_s7 + $0xa4] sm:$0xf] }
 0x24e   :  { %2163 = vpow2.f32 %v511_v9  ;;  %v1670_v1 = vor.u32 %v2034_v52, %v1667_v53  ;;  %v2012_v9 = vld [vmem:[%s2492_s7 + $0x74] sm:$0xf]  ;;  %1034 = vmatpush.bf16.msrb.mxu1 %v1666_v62  ;;  %1049 = vmatpush.bf16.msrb.mxu2 %v1722_v0  ;;  %v1654_v52 = vor.u32 %v2030_v49, %v1651_v50  ;;  %v1873_v53 = vld [vmem:[%s2492_s7 + $0xb0] sm:$0xf]  ;;  %v1875_v58 = vld [vmem:[%s2492_s7 + $0xb8] sm:$0xf0] }
 0x24f   :  { %v515_v22 = vadd.f32 %v513_v13, %v2354_v46  ;;  %v506_v46 = vld [vmem:[%s2436_s29 + $0x8] sm:$0xff]  ;;  %2165 = vtanh.f32 %v649_v25  ;;  %v1910_v13 = vor.u32 %v2028_v59, %v1907_v61  ;;  %v1878_v59 = vor.u32 %v2020_v55, %v1875_v58  ;;  %v1817_v61 = vld [vmem:[%s2492_s7 + $0x40] sm:$0xf]  ;;  %v1998_v38 = vld [vmem:[%s2492_s7 + $0x4] sm:$0xf] }
 0x250   :  { %1062 = vmatpush.bf16.msra.mxu3 %v1670_v1  ;;  %1077 = vmatpush.bf16.msra.mxu0 %v1726_v7  ;;  %v1835_v25 = vld [vmem:[%s2492_s7 + $0x68] sm:$0xf0]  ;;  %v2007_v62 = vld [vmem:[%s2492_s7 + $0x44] sm:$0xf0]  ;;  %v1809_v7 = vld [vmem:[%s2492_s7 + $0x30] sm:$0xf] }
 0x251   :  { %517 = vst.msk [vmem:[%s2467_s4] sm:$0xff] %vm154_vm0, %v515_v22  ;;  %v2011_v22 = vld [vmem:[%s2492_s7 + $0x64] sm:$0xf0]  ;;  %v1838_v31 = vor.u32 %v2010_v24, %v1835_v25  ;;  %1050 = vmatmul.bf16.vlgmr.msrb.gmra.mxu2 %v1654_v52  ;;  %v1818_v0 = vor.u32 %v2007_v62, %v1817_v61  ;;  %v1819_v1 = vld [vmem:[%s2492_s7 + $0x48] sm:$0xf0]  ;;  %v2071_v62 = vld [vmem:[%s2598_s21 + $0x38] sm:$0xff] }
 0x252   :  { %v650_v32 = vpop.f32.mrf.mxu2  ;;  %1258 = vmatpush.bf16.msra.mxu2 %v1906_v8  ;;  %v1834_v30 = vor.u32 %v2011_v22, %v1833_v21  ;;  %v2005_v8 = vld [vmem:[%s2492_s7 + $0x34] sm:$0xf0]  ;;  %v2002_v21 = vld [vmem:[%s2492_s7 + $0x24] sm:$0xf]  ;;  %v1849_v25 = vld [vmem:[%s2492_s7 + $0x80] sm:$0xf] }
 0x253   :  { %v651_v37 = vadd.f32 %v2127_v10, %v650_v32  ;;  %v1843_v10 = vld [vmem:[%s2492_s7 + $0x78] sm:$0xf0]  ;;  %v2064_v14 = vld [vmem:[%s2598_s21] sm:$0xff] }
 0x254   :  { %v2164_v40 = vpop.eup %2163  ;;  %v1846_v20 = vor.u32 %v2012_v9, %v1843_v10  ;;  %1063 = vmatpush.bf16.msra.mxu3 %v1662_v12  ;;  %v2004_v9 = vld [vmem:[%s2492_s7 + $0x34] sm:$0xf]  ;;  %v1810_v10 = vor.u32 %v2005_v8, %v1809_v7  ;;  %v2075_v8 = vld [vmem:[%s2598_s21 + $0x58] sm:$0xff] }
 0x255   :  { %v514_v43 = vmul.f32 %v2164_v40, %v506_v46  ;;  %2167 = vtanh.f32 %v651_v37  ;;  %v2166_v60 = vpop.eup %2165  ;;  %v2025_v46 = vld [vmem:[%s2492_s7 + $0xd4] sm:$0xf0]  ;;  %v1882_v37 = vor.u32 %v2023_v35, %v1881_v34  ;;  %v2031_v40 = vld [vmem:[%s1500_s10 + $0x4] sm:$0xf0]  ;;  %v1795_v34 = vld [vmem:[%s2492_s7 + $0x18] sm:$0xf0] }
 0x256   :  { %1259 = vmatpush.bf16.msra.mxu2 %v1898_v23  ;;  %v1890_v32 = vor.u32 %v2025_v46, %v1889_v27  ;;  %v1650_v42 = vor.u32 %v2031_v40, %v1649_v39  ;;  %v1803_v23 = vld [vmem:[%s2492_s7 + $0x28] sm:$0xf0]  ;;  %v2014_v27 = vld [vmem:[%s2492_s7 + $0x84] sm:$0xf]  ;;  %v2066_v7 = vld [vmem:[%s2598_s21 + $0x10] sm:$0xff] }
 0x257   :  { %v516_v54 = vadd.f32 %v514_v43, %v2365_v57  ;;  %v2033_v57 = vld [vmem:[%s2415_s16 + $0x4] sm:$0xf0]  ;;  %v1825_v43 = vld [vmem:[%s2492_s7 + $0x50] sm:$0xf]  ;;  %v1806_v24 = vor.u32 %v2002_v21, %v1803_v23  ;;  %v1854_v29 = vor.u32 %v2014_v27, %v1851_v28  ;;  %v1787_v40 = vld [vmem:[%s2492_s7 + $0x8] sm:$0xf0] }
 0x258   :  { %v1658_v16 = vor.u32 %v2033_v57, %v1657_v63  ;;  %v1826_v47 = vor.u32 %v2009_v44, %v1825_v43  ;;  %v2006_v63 = vld [vmem:[%s2492_s7 + $0x44] sm:$0xf] }
 0x259   :  { %518 = vst.msk [vmem:[%s2467_s4 + $0x8] sm:$0xff] %vm154_vm0, %v516_v54  ;;  %v2021_v54 = vld [vmem:[%s2492_s7 + $0xb4] sm:$0xf0]  ;;  %v1822_v57 = vor.u32 %v2006_v63, %v1819_v1  ;;  %v2070_v63 = vld [vmem:[%s2598_s21 + $0x30] sm:$0xff]  ;;  %v2069_v1 = vld [vmem:[%s2598_s21 + $0x28] sm:$0xff] }
 0x25a   :  { %1035 = vmatpush.bf16.msrb.mxu1 %v1658_v16  ;;  %1260 = vmatpush.bf16.msra.mxu2 %v1890_v32  ;;  %v1874_v56 = vor.u32 %v2021_v54, %v1873_v53  ;;  %v2016_v16 = vld [vmem:[%s2492_s7 + $0x94] sm:$0xf] }
 0x25b   :  { %v2168_v6 = vpop.eup %2167  ;;  %v1862_v12 = vor.u32 %v2016_v16, %v1859_v18  ;;  %v2000_v32 = vld [vmem:[%s2492_s7 + $0x14] sm:$0xf]  ;;  %v2072_v18 = vld [vmem:[%s2598_s21 + $0x40] sm:$0xff] }
 0x25c   :  { %v655_v11 = vpack.c.bf16 %v2168_v6, %v2166_v60  ;;  %v2019_v60 = vld [vmem:[%s2492_s7 + $0xa4] sm:$0xf0]  ;;  %v1870_v6 = vor.u32 %v2018_v3, %v1867_v5  ;;  %v1798_v35 = vor.u32 %v2000_v32, %v1795_v34  ;;  %v2067_v3 = vld [vmem:[%s2598_s21 + $0x18] sm:$0xff] }
 0x25d   :  { %1036 = vmatmul.bf16.vlgmr.msrb.gmra.mxu1 %v1650_v42  ;;  %v1866_v4 = vor.u32 %v2019_v60, %v1865_v2  ;;  %v2068_v2 = vld [vmem:[%s2598_s21 + $0x20] sm:$0xff]  ;;  %v2077_v60 = vld [vmem:[%s2598_s21 + $0x68] sm:$0xff] }
 0x25e   :  { %766 = vmatmul.bf16.vlgmr.msrb.gmra.mxu3 %v655_v11  ;;  %780 = vmatmul.bf16.vlgmr.msrb.gmra.mxu0 %v655_v11  ;;  %v1811_v11 = vld [vmem:[%s2492_s7 + $0x38] sm:$0xf0] }
 0x25f   :  { %1286 = vmatpush.bf16.msrb.mxu0 %v1910_v13  ;;  %1244 = vmatpush.bf16.msra.mxu1 %v1842_v19  ;;  %v1814_v13 = vor.u32 %v2004_v9, %v1811_v11  ;;  %v1801_v19 = vld [vmem:[%s2492_s7 + $0x20] sm:$0xf]  ;;  %v2065_v9 = vld [vmem:[%s2598_s21 + $0x8] sm:$0xff]  ;;  %v2074_v11 = vld [vmem:[%s2598_s21 + $0x50] sm:$0xff] }
 0x260   :  { %1272 = vmatpush.bf16.msrb.mxu3 %v1846_v20  ;;  %1261 = vmatpush.bf16.msra.mxu2 %v1882_v37  ;;  %v2003_v20 = vld [vmem:[%s2492_s7 + $0x24] sm:$0xf0] }
 0x261   :  { %v1802_v22 = vor.u32 %v2003_v20, %v1801_v19  ;;  %v1999_v37 = vld [vmem:[%s2492_s7 + $0x4] sm:$0xf0] }
 0x262   :  { %v1786_v39 = vor.u32 %v1999_v37, %v1785_v36 }
 0x263   :  { %1287 = vmatpush.bf16.msrb.mxu0 %v1902_v26  ;;  %1245 = vmatpush.bf16.msra.mxu1 %v1834_v30  ;;  %v2015_v26 = vld [vmem:[%s2492_s7 + $0x84] sm:$0xf0]  ;;  %v1793_v30 = vld [vmem:[%s2492_s7 + $0x10] sm:$0xf] }
 0x264   :  { %1273 = vmatpush.bf16.msrb.mxu3 %v1838_v31  ;;  %1262 = vmatpush.bf16.msra.mxu2 %v1874_v56  ;;  %v1850_v46 = vor.u32 %v2015_v26, %v1849_v25  ;;  %v2001_v31 = vld [vmem:[%s2492_s7 + $0x14] sm:$0xf0] }
 0x267   :  { %1288 = vmatpush.bf16.msrb.mxu0 %v1894_v33  ;;  %1246 = vmatpush.bf16.msra.mxu1 %v1826_v47  ;;  %v1794_v33 = vor.u32 %v2001_v31, %v1793_v30 }
 0x268   :  { %1274 = vmatpush.bf16.msrb.mxu3 %v1830_v51  ;;  %1263 = vmatpush.bf16.msra.mxu2 %v1866_v4  ;;  %v2076_v4 = vld [vmem:[%s2598_s21 + $0x60] sm:$0xff] }
 0x26b   :  { %1289 = vmatpush.bf16.msrb.mxu0 %v1886_v41  ;;  %1247 = vmatpush.bf16.msra.mxu1 %v1818_v0  ;;  %v1790_v41 = vor.u32 %v1998_v38, %v1787_v40  ;;  %v2079_v0 = vld [vmem:[%s2598_s21 + $0x78] sm:$0xff] }
 0x26c   :  { %1275 = vmatpush.bf16.msrb.mxu3 %v1822_v57  ;;  %1264 = vmatpush.bf16.msra.mxu2 %v1858_v17  ;;  %v2078_v57 = vld [vmem:[%s2598_s21 + $0x70] sm:$0xff] }
 0x26e   :  { %1064 = vmatmul.bf16.vlgmr.msra.gmra.mxu3 %v1650_v42  ;;  %1078 = vmatmul.bf16.vlgmr.msra.gmra.mxu0 %v1654_v52  ;;  %v672_v42 = vld [vmem:[%s1524_s14] sm:$0x3] }
 0x26f   :  { %1290 = vmatpush.bf16.msrb.mxu0 %v1878_v59  ;;  %1248 = vmatpush.bf16.msra.mxu1 %v1810_v10  ;;  %v675_v44 = vperm.slane %v672_v42, 1  ;;  %v674_v48 = vperm.slane %v672_v42, 0 }
 0x270   :  { %1276 = vmatpush.bf16.msrb.mxu3 %v1814_v13  ;;  %1265 = vmatpush.bf16.msra.mxu2 %v1850_v46 }
 0x273   :  { %1291 = vmatpush.bf16.msrb.mxu0 %v1870_v6  ;;  %1249 = vmatpush.bf16.msra.mxu1 %v1802_v22 }
 0x274   :  { %1277 = vmatpush.bf16.msrb.mxu3 %v1806_v24  ;;  %1462 = vmatpush.bf16.msrb.mxu2 %v2079_v0  ;;  %v1300_v24 = vld [vmem:[%s1527_s25] sm:$0x3] }
 0x275   :  { %v1302_v46 = vperm.slane %v1300_v24, 0  ;;  %v1303_v37 = vperm.slane %v1300_v24, 1 }
 0x277   :  { %1292 = vmatpush.bf16.msrb.mxu0 %v1862_v12  ;;  %1250 = vmatpush.bf16.msra.mxu1 %v1794_v33 }
 0x278   :  { %1278 = vmatpush.bf16.msrb.mxu3 %v1798_v35  ;;  %1463 = vmatpush.bf16.msrb.mxu2 %v2078_v57 }
 0x27b   :  { %1293 = vmatpush.bf16.msrb.mxu0 %v1854_v29  ;;  %1251 = vmatpush.bf16.msra.mxu1 %v1786_v39 }
 0x27c   :  { %1279 = vmatpush.bf16.msrb.mxu3 %v1790_v41  ;;  %1464 = vmatpush.bf16.msrb.mxu2 %v2077_v60 }
 0x27f   :  { %1448 = vmatpush.bf16.msrb.mxu1 %v2071_v62 }
 0x280   :  { %1465 = vmatpush.bf16.msrb.mxu2 %v2076_v4 }
 0x283   :  { %1449 = vmatpush.bf16.msrb.mxu1 %v2070_v63 }
 0x284   :  { %1466 = vmatpush.bf16.msrb.mxu2 %v2075_v8 }
 0x287   :  { %1450 = vmatpush.bf16.msrb.mxu1 %v2069_v1 }
 0x288   :  { %1467 = vmatpush.bf16.msrb.mxu2 %v2074_v11 }
 0x28b   :  { %1451 = vmatpush.bf16.msrb.mxu1 %v2068_v2 }
 0x28c   :  { %1468 = vmatpush.bf16.msrb.mxu2 %v2073_v15 }
 0x28f   :  { %1452 = vmatpush.bf16.msrb.mxu1 %v2067_v3 }
 0x290   :  { %1469 = vmatpush.bf16.msrb.mxu2 %v2072_v18 }
 0x293   :  { %1453 = vmatpush.bf16.msrb.mxu1 %v2066_v7 }
 0x297   :  { %1454 = vmatpush.bf16.msrb.mxu1 %v2065_v9 }
 0x29b   :  { %1455 = vmatpush.bf16.msrb.mxu1 %v2064_v14 }
 0x2d4   :  { %v1051_v6 = vpop.f32.mrf.mxu2 }
 0x2da   :  { %v1037_v5 = vpop.f32.mrf.mxu1 }
 0x2db   :  { %v781_v43 = vpop.f32.mrf.mxu0  ;;  %v1052_v20 = vadd.f32 %v1051_v6, %v1037_v5 }
 0x2dc   :  { %v782_v45 = vadd.f32 %v781_v43, %v675_v44  ;;  %v1053_v17 = vpop.f32.mrf.mxu2 }
 0x2de   :  { %2169 = vtanh.f32 %v782_v45 }
 0x2e1   :  { %v767_v47 = vpop.f32.mrf.mxu3 }
 0x2e2   :  { %v768_v51 = vadd.f32 %v767_v47, %v674_v48  ;;  %v1039_v16 = vpop.f32.mrf.mxu1 }
 0x2e3   :  { %v783_v49 = vpop.f32.mrf.mxu0  ;;  %v1054_v29 = vadd.f32 %v1053_v17, %v1039_v16 }
 0x2e4   :  { %v784_v50 = vadd.f32 %v783_v49, %v675_v44  ;;  %v2170_v54 = vpop.eup %2169 }
 0x2e6   :  { %2171 = vtanh.f32 %v784_v50 }
 0x2e7   :  { %2173 = vtanh.f32 %v768_v51 }
 0x2e9   :  { %v769_v52 = vpop.f32.mrf.mxu3 }
 0x2ea   :  { %v770_v53 = vadd.f32 %v769_v52, %v674_v48 }
 0x2eb   :  { %v1079_v10 = vpop.f32.mrf.mxu0 }
 0x2ec   :  { %v2172_v55 = vpop.eup %2171  ;;  %2175 = vtanh.f32 %v770_v53 }
 0x2ed   :  { %v791_v56 = vpack.c.bf16 %v2172_v55, %v2170_v54  ;;  %v2174_v58 = vpop.eup %2173  ;;  %v2128_v54 = vld [vmem:[%s2593_s19] ss:$0 sm:$0xff] }
 0x2ef   :  { %1266 = vmatmul.bf16.vlgmr.msra.gmra.mxu2 %v791_v56  ;;  %1294 = vmatmul.bf16.vlgmr.msrb.gmra.mxu0 %v791_v56 }
 0x2f1   :  { %v1065_v13 = vpop.f32.mrf.mxu3 }
 0x2f2   :  { %v2176_v59 = vpop.eup %2175  ;;  %v1080_v25 = vadd.f32 %v1079_v10, %v1065_v13 }
 0x2f3   :  { %v790_v61 = vpack.c.bf16 %v2176_v59, %v2174_v58  ;;  %v1081_v12 = vpop.f32.mrf.mxu0 }
 0x2f5   :  { %1252 = vmatmul.bf16.vlgmr.msra.gmra.mxu1 %v790_v61  ;;  %1280 = vmatmul.bf16.vlgmr.msrb.gmra.mxu3 %v790_v61 }
 0x2f9   :  { %v1067_v19 = vpop.f32.mrf.mxu3 }
 0x2fa   :  { %v1082_v38 = vadd.f32 %v1081_v12, %v1067_v19 }
 0x36c   :  { %v1295_v26 = vpop.f32.mrf.mxu0 }
 0x372   :  { %v1253_v21 = vpop.f32.mrf.mxu1  ;;  %v1267_v22 = vpop.f32.mrf.mxu2 }
 0x373   :  { %v1254_v23 = vadd.f32 %v1253_v21, %v1052_v20 }
 0x374   :  { %v1297_v42 = vpop.f32.mrf.mxu0 }
 0x375   :  { %v1268_v27 = vadd.f32 %v1267_v22, %v1254_v23 }
 0x377   :  { %v1306_v33 = vadd.f32 %v1302_v46, %v1268_v27 }
 0x378   :  { %v1281_v28 = vpop.f32.mrf.mxu3 }
 0x379   :  { %v1282_v30 = vadd.f32 %v1281_v28, %v1080_v25  ;;  %2177 = vtanh.f32 %v1306_v33 }
 0x37a   :  { %v1255_v31 = vpop.f32.mrf.mxu1  ;;  %v1269_v34 = vpop.f32.mrf.mxu2 }
 0x37b   :  { %v1256_v32 = vadd.f32 %v1255_v31, %v1054_v29  ;;  %v1296_v36 = vadd.f32 %v1295_v26, %v1282_v30 }
 0x37d   :  { %v1270_v35 = vadd.f32 %v1269_v34, %v1256_v32  ;;  %v1307_v43 = vadd.f32 %v1303_v37, %v1296_v36 }
 0x37f   :  { %v1308_v39 = vadd.f32 %v1302_v46, %v1270_v35  ;;  %v2178_v47 = vpop.eup %2177 }
 0x380   :  { %v1283_v40 = vpop.f32.mrf.mxu3 }
 0x381   :  { %2179 = vtanh.f32 %v1308_v39  ;;  %v1284_v41 = vadd.f32 %v1283_v40, %v1082_v38 }
 0x382   :  { %2181 = vtanh.f32 %v1307_v43 }
 0x383   :  { %v1298_v44 = vadd.f32 %v1297_v42, %v1284_v41 }
 0x385   :  { %v1309_v45 = vadd.f32 %v1303_v37, %v1298_v44 }
 0x387   :  { %v2180_v48 = vpop.eup %2179  ;;  %2183 = vtanh.f32 %v1309_v45 }
 0x388   :  { %v1314_v49 = vpack.c.bf16 %v2180_v48, %v2178_v47  ;;  %v2182_v50 = vpop.eup %2181 }
 0x38a   :  { %1456 = vmatmul.bf16.vlgmr.msrb.gmra.mxu1 %v1314_v49 }
 0x38d   :  { %v2184_v51 = vpop.eup %2183 }
 0x38e   :  { %v1315_v52 = vpack.c.bf16 %v2184_v51, %v2182_v50 }
 0x390   :  { %1470 = vmatmul.bf16.vlgmr.msrb.gmra.mxu2 %v1315_v52 }
 0x407   :  { %v1457_v53 = vpop.f32.mrf.mxu1 }
 0x408   :  { %v1458_v55 = vadd.f32 %v2128_v54, %v1457_v53 }
 0x40f   :  { %v1459_v61 = vpop.f32.mrf.mxu1 }
 0x410   :  { %v1460_v62 = vadd.f32 %v2128_v54, %v1459_v61 }
 0x413   :  { %v1471_v56 = vpop.f32.mrf.mxu2 }
 0x414   :  { %v1472_v58 = vadd.f32 %v1471_v56, %v1458_v55 }
 0x416   :  { %v1476_v59 = vmul.f32 1.442695, %v1472_v58 }
 0x418   :  { %2185 = vpow2.f32 %v1476_v59 }
 0x41b   :  { %v1473_v63 = vpop.f32.mrf.mxu2 }
 0x41c   :  { %v1474_v0 = vadd.f32 %v1473_v63, %v1460_v62 }
 0x41e   :  { %v2186_v1 = vpop.eup %2185  ;;  %v1478_v57 = vmul.f32 1.442695, %v1474_v0 }
 0x41f   :  { %1480 = vst [vmem:[%s1530_s1] sm:$0xff] %v2186_v1 }
 0x420   :  { %2187 = vpow2.f32 %v1478_v57 }
 0x426   :  { %v2188_v2 = vpop.eup %2187 }
 0x427   :  { %1481 = vst [vmem:[%s1530_s1 + $0x8] sm:$0xff] %v2188_v2 }

// kernel: _dkf_av_forward_impl.6
= control target key start
LH: loop header
LB: loop body
LE: loop exit
PB: predicated region body
PF: predicated region fallthrough
CT: control target
= control target key end

     0   :  { %vm2024_vm0 = vcmask 123904   ;;  %v7472_v4 = vmov 0.0   ;;  %vm217_vm1 = vcmask 1041408   ;;  %vm219_vm2 = vcmask 1045508   ;;  %s7442_s2 = inlined_call_operand.vmem [shape: f32[128,512], index: 2, kind: input, shape index: {}]   ;;  %s7443_s19 = inlined_call_operand.vmem [shape: f32[8,2,16], index: 19, kind: output, shape index: {1}]   ;;  %s7444_s3 = inlined_call_operand.vmem [shape: f32[1,512], index: 3, kind: input, shape index: {}]   ;;  %s7445_s0 = inlined_call_operand.vmem [shape: bf16[8,2,512], index: 0, kind: input, shape index: {}]   ;;  %s7446_s4 = inlined_call_operand.vmem [shape: f32[16,32], index: 4, kind: input, shape index: {}]   ;;  %s7447_s5 = inlined_call_operand.vmem [shape: f32[1,32], index: 5, kind: input, shape index: {}]   ;;  %s7448_s7 = inlined_call_operand.vmem [shape: f32[1,64], index: 7, kind: input, shape index: {}]   ;;  %s7449_s6 = inlined_call_operand.vmem [shape: f32[32,64], index: 6, kind: input, shape index: {}]   ;;  %s7450_s8 = inlined_call_operand.vmem [shape: f32[64,128], index: 8, kind: input, shape index: {}]   ;;  %s7451_s9 = inlined_call_operand.vmem [shape: f32[1,128], index: 9, kind: input, shape index: {}]   ;;  %s7452_s10 = inlined_call_operand.vmem [shape: f32[128,64], index: 10, kind: input, shape index: {}]   ;;  %s7453_s11 = inlined_call_operand.vmem [shape: f32[1,64], index: 11, kind: input, shape index: {}]   ;;  %s7454_s12 = inlined_call_operand.vmem [shape: f32[64,32], index: 12, kind: input, shape index: {}]   ;;  %s7455_s13 = inlined_call_operand.vmem [shape: f32[1,32], index: 13, kind: input, shape index: {}]   ;;  %s7456_s15 = inlined_call_operand.vmem [shape: f32[1,16], index: 15, kind: input, shape index: {}]   ;;  %s7457_s14 = inlined_call_operand.vmem [shape: f32[32,16], index: 14, kind: input, shape index: {}]   ;;  %s7458_s16 = inlined_call_operand.vmem [shape: f32[32,16], index: 16, kind: input, shape index: {}]   ;;  %s7459_s17 = inlined_call_operand.vmem [shape: f32[1,16], index: 17, kind: input, shape index: {}]   ;;  %s7460_s20 = inlined_call_operand.vmem [shape: f32[8,2,16], index: 20, kind: output, shape index: {2}]   ;;  %s7461_s21 = inlined_call_operand.vmem [shape: f32[8,2,16], index: 21, kind: output, shape index: {3}]   ;;  %s7462_s1 = inlined_call_operand.vmem [shape: f32[8,2,16], index: 1, kind: input, shape index: {}]   ;;  %s7463_s18 = inlined_call_operand.vmem [shape: f32[8,2,16], index: 18, kind: output, shape index: {0}]  }
   0x1   :  { %7507 = sst [smem:[#allocation23_spill]] %s7442_s2  ;;  %vm221_vm3 = vcmask 1043456  }
   0x2   :  { %7508 = sst [smem:[#allocation24_spill]] %s7443_s19 }
   0x3   :  { %7509 = sst [smem:[#allocation25_spill]] %s7444_s3 }
   0x4   :  { %7510 = sst [smem:[#allocation26_spill]] %s7445_s0 }
   0x5   :  { %7511 = sst [smem:[#allocation27_spill]] %s7446_s4 }
   0x6   :  { %7512 = sst [smem:[#allocation28_spill]] %s7447_s5 }
   0x7   :  { %s7513_s26 = sld [smem:[#allocation23_spill]] }
   0x8   :  { %s7514_s22 = sld [smem:[#allocation24_spill]] }
   0x9   :  { %s7517_s27 = sld [smem:[#allocation25_spill]] }
   0xa   :  { %s7518_s29 = sld [smem:[#allocation26_spill]] }
   0xb   :  { %s7573_s2 = sld [smem:[#allocation27_spill]] }
   0xd   :  { %v4563_v0 = vld [vmem:[%s7513_s26 + $0x1f0] sm:$0xff]  ;;  %v4568_v1 = vld [vmem:[%s7513_s26 + $0x1f8] sm:$0xff]  ;;  %v4600_v7 = vld [vmem:[%s7513_s26 + $0x1e8] sm:$0xff] }
   0xe   :  { %v4573_v2 = vld [vmem:[%s7513_s26 + $0x1d0] sm:$0xff]  ;;  %170 = vmatpush.msra.mxu2 %v4563_v0  ;;  %190 = vmatpush.msra.mxu3 %v4568_v1  ;;  %v4580_v3 = vld [vmem:[%s7513_s26 + $0x1d8] sm:$0xff]  ;;  %2025 = vst.msk [vmem:[%s7514_s22] sm:$0x3] %vm2024_vm0, %v7472_v4  ;;  %v4607_v8 = vld [vmem:[%s7513_s26 + $0x1e0] sm:$0xff] }
   0xf   :  { %v4590_v5 = vld [vmem:[%s7513_s26 + $0x1b0] sm:$0xff]  ;;  %v4595_v6 = vld [vmem:[%s7513_s26 + $0x1b8] sm:$0xff]  ;;  %v4612_v9 = vld [vmem:[%s7513_s26 + $0x1c8] sm:$0xff]  ;;  %150 = vmatpush.msra.mxu1 %v4600_v7  ;;  %130 = vmatpush.msra.mxu0 %v4607_v8 }
  0x10   :  { %171 = vmatpush.msra.mxu2 %v4573_v2  ;;  %191 = vmatpush.msra.mxu3 %v4580_v3  ;;  %v4618_v10 = vld [vmem:[%s7513_s26 + $0x190] sm:$0xff]  ;;  %v4623_v11 = vld [vmem:[%s7513_s26 + $0x198] sm:$0xff]  ;;  %v4629_v12 = vld [vmem:[%s7513_s26 + $0x1c0] sm:$0xff] }
  0x11   :  { %v4636_v13 = vld [vmem:[%s7513_s26 + $0x1a8] sm:$0xff]  ;;  %v4641_v14 = vld [vmem:[%s7513_s26 + $0x1a0] sm:$0xff]  ;;  %151 = vmatpush.msra.mxu1 %v4612_v9  ;;  %v4647_v15 = vld [vmem:[%s7513_s26 + $0x170] sm:$0xff]  ;;  %131 = vmatpush.msra.mxu0 %v4629_v12 }
  0x12   :  { %172 = vmatpush.msra.mxu2 %v4590_v5  ;;  %192 = vmatpush.msra.mxu3 %v4595_v6  ;;  %v4652_v16 = vld [vmem:[%s7513_s26 + $0x178] sm:$0xff]  ;;  %v4660_v17 = vld [vmem:[%s7513_s26 + $0x188] sm:$0xff]  ;;  %v4665_v18 = vld [vmem:[%s7513_s26 + $0x180] sm:$0xff] }
  0x13   :  { %152 = vmatpush.msra.mxu1 %v4636_v13  ;;  %v4671_v19 = vld [vmem:[%s7513_s26 + $0x150] sm:$0xff]  ;;  %v4676_v20 = vld [vmem:[%s7513_s26 + $0x158] sm:$0xff]  ;;  %132 = vmatpush.msra.mxu0 %v4641_v14  ;;  %v4684_v21 = vld [vmem:[%s7513_s26 + $0x168] sm:$0xff] }
  0x14   :  { %173 = vmatpush.msra.mxu2 %v4618_v10  ;;  %193 = vmatpush.msra.mxu3 %v4623_v11  ;;  %v4689_v22 = vld [vmem:[%s7513_s26 + $0x160] sm:$0xff]  ;;  %v4695_v23 = vld [vmem:[%s7513_s26 + $0x130] sm:$0xff]  ;;  %v4700_v24 = vld [vmem:[%s7513_s26 + $0x138] sm:$0xff] }
  0x15   :  { %153 = vmatpush.msra.mxu1 %v4660_v17  ;;  %133 = vmatpush.msra.mxu0 %v4665_v18  ;;  %v4708_v25 = vld [vmem:[%s7513_s26 + $0x148] sm:$0xff]  ;;  %v4713_v26 = vld [vmem:[%s7513_s26 + $0x140] sm:$0xff]  ;;  %v4719_v27 = vld [vmem:[%s7513_s26 + $0x110] sm:$0xff] }
  0x16   :  { %174 = vmatpush.msra.mxu2 %v4647_v15  ;;  %194 = vmatpush.msra.mxu3 %v4652_v16  ;;  %v4724_v28 = vld [vmem:[%s7513_s26 + $0x118] sm:$0xff]  ;;  %v4732_v29 = vld [vmem:[%s7513_s26 + $0x128] sm:$0xff]  ;;  %v4737_v30 = vld [vmem:[%s7513_s26 + $0x120] sm:$0xff] }
  0x17   :  { %154 = vmatpush.msra.mxu1 %v4684_v21  ;;  %134 = vmatpush.msra.mxu0 %v4689_v22  ;;  %v4743_v31 = vld [vmem:[%s7513_s26 + $0xf0] sm:$0xff]  ;;  %v4748_v32 = vld [vmem:[%s7513_s26 + $0xf8] sm:$0xff]  ;;  %v4756_v33 = vld [vmem:[%s7513_s26 + $0x108] sm:$0xff] }
  0x18   :  { %175 = vmatpush.msra.mxu2 %v4671_v19  ;;  %195 = vmatpush.msra.mxu3 %v4676_v20  ;;  %v4761_v34 = vld [vmem:[%s7513_s26 + $0x100] sm:$0xff]  ;;  %v4767_v35 = vld [vmem:[%s7513_s26 + $0xd0] sm:$0xff]  ;;  %v4772_v36 = vld [vmem:[%s7513_s26 + $0xd8] sm:$0xff] }
  0x19   :  { %155 = vmatpush.msra.mxu1 %v4708_v25  ;;  %135 = vmatpush.msra.mxu0 %v4713_v26  ;;  %v4780_v37 = vld [vmem:[%s7513_s26 + $0xe8] sm:$0xff]  ;;  %v4785_v38 = vld [vmem:[%s7513_s26 + $0xe0] sm:$0xff]  ;;  %v4791_v39 = vld [vmem:[%s7513_s26 + $0xb0] sm:$0xff] }
  0x1a   :  { %176 = vmatpush.msra.mxu2 %v4695_v23  ;;  %196 = vmatpush.msra.mxu3 %v4700_v24  ;;  %v4796_v40 = vld [vmem:[%s7513_s26 + $0xb8] sm:$0xff]  ;;  %v4804_v41 = vld [vmem:[%s7513_s26 + $0xc8] sm:$0xff]  ;;  %v4809_v42 = vld [vmem:[%s7513_s26 + $0xc0] sm:$0xff] }
  0x1b   :  { %156 = vmatpush.msra.mxu1 %v4732_v29  ;;  %136 = vmatpush.msra.mxu0 %v4737_v30  ;;  %v4815_v43 = vld [vmem:[%s7513_s26 + $0x90] sm:$0xff]  ;;  %v4820_v44 = vld [vmem:[%s7513_s26 + $0x98] sm:$0xff]  ;;  %v4828_v45 = vld [vmem:[%s7513_s26 + $0xa8] sm:$0xff] }
  0x1c   :  { %177 = vmatpush.msra.mxu2 %v4719_v27  ;;  %197 = vmatpush.msra.mxu3 %v4724_v28  ;;  %v4833_v46 = vld [vmem:[%s7513_s26 + $0xa0] sm:$0xff]  ;;  %v4839_v47 = vld [vmem:[%s7513_s26 + $0x70] sm:$0xff]  ;;  %v4844_v48 = vld [vmem:[%s7513_s26 + $0x78] sm:$0xff] }
  0x1d   :  { %157 = vmatpush.msra.mxu1 %v4756_v33  ;;  %137 = vmatpush.msra.mxu0 %v4761_v34  ;;  %v4852_v49 = vld [vmem:[%s7513_s26 + $0x88] sm:$0xff]  ;;  %v4857_v50 = vld [vmem:[%s7513_s26 + $0x80] sm:$0xff]  ;;  %v4863_v51 = vld [vmem:[%s7513_s26 + $0x50] sm:$0xff] }
  0x1e   :  { %178 = vmatpush.msra.mxu2 %v4743_v31  ;;  %198 = vmatpush.msra.mxu3 %v4748_v32  ;;  %v4868_v52 = vld [vmem:[%s7513_s26 + $0x58] sm:$0xff]  ;;  %v4876_v53 = vld [vmem:[%s7513_s26 + $0x68] sm:$0xff]  ;;  %v4881_v54 = vld [vmem:[%s7513_s26 + $0x60] sm:$0xff] }
  0x1f   :  { %158 = vmatpush.msra.mxu1 %v4780_v37  ;;  %138 = vmatpush.msra.mxu0 %v4785_v38  ;;  %v4887_v55 = vld [vmem:[%s7513_s26 + $0x30] sm:$0xff]  ;;  %v4892_v56 = vld [vmem:[%s7513_s26 + $0x38] sm:$0xff]  ;;  %v4900_v57 = vld [vmem:[%s7513_s26 + $0x48] sm:$0xff] }
  0x20   :  { %179 = vmatpush.msra.mxu2 %v4767_v35  ;;  %199 = vmatpush.msra.mxu3 %v4772_v36  ;;  %7515 = vst [vmem:[#allocation3_spill] sm:$0xff] %v4892_v56  ;;  %v4905_v58 = vld [vmem:[%s7513_s26 + $0x40] sm:$0xff]  ;;  %v4911_v59 = vld [vmem:[%s7513_s26 + $0x10] sm:$0xff]  ;;  %v4916_v60 = vld [vmem:[%s7513_s26 + $0x18] sm:$0xff] }
  0x21   :  { %159 = vmatpush.msra.mxu1 %v4804_v41  ;;  %139 = vmatpush.msra.mxu0 %v4809_v42  ;;  %v4926_v61 = vld [vmem:[%s7513_s26 + $0x28] sm:$0xff]  ;;  %v4931_v62 = vld [vmem:[%s7513_s26 + $0x20] sm:$0xff] }
  0x22   :  { %180 = vmatpush.msra.mxu2 %v4791_v39  ;;  %200 = vmatpush.msra.mxu3 %v4796_v40  ;;  %v4940_v63 = vld [vmem:[%s7513_s26 + $0x8] sm:$0xff] }
  0x23   :  { %160 = vmatpush.msra.mxu1 %v4828_v45  ;;  %140 = vmatpush.msra.mxu0 %v4833_v46 }
  0x24   :  { %181 = vmatpush.msra.mxu2 %v4815_v43  ;;  %201 = vmatpush.msra.mxu3 %v4820_v44 }
  0x25   :  { %161 = vmatpush.msra.mxu1 %v4852_v49  ;;  %141 = vmatpush.msra.mxu0 %v4857_v50 }
  0x26   :  { %182 = vmatpush.msra.mxu2 %v4839_v47  ;;  %202 = vmatpush.msra.mxu3 %v4844_v48 }
  0x27   :  { %162 = vmatpush.msra.mxu1 %v4876_v53  ;;  %142 = vmatpush.msra.mxu0 %v4881_v54 }
  0x28   :  { %183 = vmatpush.msra.mxu2 %v4863_v51  ;;  %203 = vmatpush.msra.mxu3 %v4868_v52 }
  0x29   :  { %163 = vmatpush.msra.mxu1 %v4900_v57  ;;  %143 = vmatpush.msra.mxu0 %v4905_v58 }
  0x2a   :  { %184 = vmatpush.msra.mxu2 %v4887_v55  ;;  %204 = vmatpush.msra.mxu3 %v4892_v56  ;;  %v4945_v56 = vld [vmem:[%s7513_s26] sm:$0xff] }
  0x2b   :  { %164 = vmatpush.msra.mxu1 %v4926_v61  ;;  %144 = vmatpush.msra.mxu0 %v4931_v62 }
  0x2c   :  { %185 = vmatpush.msra.mxu2 %v4911_v59  ;;  %205 = vmatpush.msra.mxu3 %v4916_v60 }
  0x2d   :  { %186 = vmatmul.f32.vlgmr.msra.gmra.mxu2 %v7472_v4  ;;  %206 = vmatmul.f32.vlgmr.msra.gmra.mxu3 %v7472_v4 }
  0x2e   :  { %418 = vmatpush.msrb.mxu2 %v4563_v0  ;;  %438 = vmatpush.msrb.mxu3 %v4568_v1 }
  0x2f   :  { %165 = vmatpush.msra.mxu1 %v4940_v63  ;;  %145 = vmatpush.msra.mxu0 %v4945_v56 }
  0x30   :  { %166 = vmatmul.f32.vlgmr.msra.gmra.mxu1 %v7472_v4  ;;  %146 = vmatmul.f32.vlgmr.msra.gmra.mxu0 %v7472_v4  ;;  %v7516_v4 = vld [vmem:[#allocation3_spill] sm:$0xff] }
  0x31   :  { %378 = vmatpush.msrb.mxu0 %v4607_v8  ;;  %398 = vmatpush.msrb.mxu1 %v4600_v7 }
  0x32   :  { %419 = vmatpush.msrb.mxu2 %v4573_v2  ;;  %439 = vmatpush.msrb.mxu3 %v4580_v3 }
  0x33   :  { %379 = vmatpush.msrb.mxu0 %v4629_v12  ;;  %399 = vmatpush.msrb.mxu1 %v4612_v9 }
  0x34   :  { %420 = vmatpush.msrb.mxu2 %v4590_v5  ;;  %440 = vmatpush.msrb.mxu3 %v4595_v6 }
  0x35   :  { %380 = vmatpush.msrb.mxu0 %v4641_v14  ;;  %400 = vmatpush.msrb.mxu1 %v4636_v13 }
  0x36   :  { %421 = vmatpush.msrb.mxu2 %v4618_v10  ;;  %441 = vmatpush.msrb.mxu3 %v4623_v11 }
  0x37   :  { %381 = vmatpush.msrb.mxu0 %v4665_v18  ;;  %401 = vmatpush.msrb.mxu1 %v4660_v17 }
  0x38   :  { %422 = vmatpush.msrb.mxu2 %v4647_v15  ;;  %442 = vmatpush.msrb.mxu3 %v4652_v16 }
  0x39   :  { %382 = vmatpush.msrb.mxu0 %v4689_v22  ;;  %402 = vmatpush.msrb.mxu1 %v4684_v21 }
  0x3a   :  { %423 = vmatpush.msrb.mxu2 %v4671_v19  ;;  %443 = vmatpush.msrb.mxu3 %v4676_v20 }
  0x3b   :  { %383 = vmatpush.msrb.mxu0 %v4713_v26  ;;  %403 = vmatpush.msrb.mxu1 %v4708_v25 }
  0x3c   :  { %424 = vmatpush.msrb.mxu2 %v4695_v23  ;;  %444 = vmatpush.msrb.mxu3 %v4700_v24 }
  0x3d   :  { %384 = vmatpush.msrb.mxu0 %v4737_v30  ;;  %404 = vmatpush.msrb.mxu1 %v4732_v29 }
  0x3e   :  { %425 = vmatpush.msrb.mxu2 %v4719_v27  ;;  %445 = vmatpush.msrb.mxu3 %v4724_v28 }
  0x3f   :  { %385 = vmatpush.msrb.mxu0 %v4761_v34  ;;  %405 = vmatpush.msrb.mxu1 %v4756_v33 }
  0x40   :  { %426 = vmatpush.msrb.mxu2 %v4743_v31  ;;  %446 = vmatpush.msrb.mxu3 %v4748_v32 }
  0x41   :  { %386 = vmatpush.msrb.mxu0 %v4785_v38  ;;  %406 = vmatpush.msrb.mxu1 %v4780_v37 }
  0x42   :  { %427 = vmatpush.msrb.mxu2 %v4767_v35  ;;  %447 = vmatpush.msrb.mxu3 %v4772_v36 }
  0x43   :  { %387 = vmatpush.msrb.mxu0 %v4809_v42  ;;  %407 = vmatpush.msrb.mxu1 %v4804_v41 }
  0x44   :  { %428 = vmatpush.msrb.mxu2 %v4791_v39  ;;  %448 = vmatpush.msrb.mxu3 %v4796_v40 }
  0x45   :  { %388 = vmatpush.msrb.mxu0 %v4833_v46  ;;  %408 = vmatpush.msrb.mxu1 %v4828_v45 }
  0x46   :  { %429 = vmatpush.msrb.mxu2 %v4815_v43  ;;  %449 = vmatpush.msrb.mxu3 %v4820_v44 }
  0x47   :  { %389 = vmatpush.msrb.mxu0 %v4857_v50  ;;  %409 = vmatpush.msrb.mxu1 %v4852_v49 }
  0x48   :  { %430 = vmatpush.msrb.mxu2 %v4839_v47  ;;  %450 = vmatpush.msrb.mxu3 %v4844_v48 }
  0x49   :  { %390 = vmatpush.msrb.mxu0 %v4881_v54  ;;  %410 = vmatpush.msrb.mxu1 %v4876_v53 }
  0x4a   :  { %431 = vmatpush.msrb.mxu2 %v4863_v51  ;;  %451 = vmatpush.msrb.mxu3 %v4868_v52 }
  0x4b   :  { %391 = vmatpush.msrb.mxu0 %v4905_v58  ;;  %411 = vmatpush.msrb.mxu1 %v4900_v57 }
  0x4c   :  { %432 = vmatpush.msrb.mxu2 %v4887_v55  ;;  %452 = vmatpush.msrb.mxu3 %v7516_v4 }
  0x4d   :  { %392 = vmatpush.msrb.mxu0 %v4931_v62  ;;  %412 = vmatpush.msrb.mxu1 %v4926_v61 }
  0x4e   :  { %433 = vmatpush.msrb.mxu2 %v4911_v59  ;;  %453 = vmatpush.msrb.mxu3 %v4916_v60 }
  0x4f   :  { %393 = vmatpush.msrb.mxu0 %v4945_v56  ;;  %413 = vmatpush.msrb.mxu1 %v4940_v63 }
  0x50   :  { %663 = vmatpush.msra.mxu2 %v4563_v0  ;;  %683 = vmatpush.msra.mxu3 %v4568_v1  ;;  %v225_v0 = vld [vmem:[%s7517_s27] sm:$0xf] }
  0x51   :  { %623 = vmatpush.msra.mxu0 %v4607_v8  ;;  %643 = vmatpush.msra.mxu1 %v4600_v7  ;;  %v228_v1 = vperm.slane %v225_v0, 1 }
  0x52   :  { %664 = vmatpush.msra.mxu2 %v4573_v2  ;;  %684 = vmatpush.msra.mxu3 %v4580_v3  ;;  %v229_v2 = vperm.slane %v225_v0, 2  ;;  %v230_v3 = vperm.slane %v225_v0, 3 }
  0x53   :  { %624 = vmatpush.msra.mxu0 %v4629_v12  ;;  %644 = vmatpush.msra.mxu1 %v4612_v9 }
  0x54   :  { %665 = vmatpush.msra.mxu2 %v4590_v5  ;;  %685 = vmatpush.msra.mxu3 %v4595_v6  ;;  %v227_v5 = vperm.slane %v225_v0, 0  ;;  %v231_v6 = vrot.slane %v228_v1, 6  ;;  %v232_v7 = vrot.slane %v229_v2, 4  ;;  %v233_v8 = vrot.slane %v230_v3, 2 }
  0x55   :  { %625 = vmatpush.msra.mxu0 %v4641_v14  ;;  %645 = vmatpush.msra.mxu1 %v4636_v13 }
  0x56   :  { %666 = vmatpush.msra.mxu2 %v4618_v10  ;;  %686 = vmatpush.msra.mxu3 %v4623_v11 }
  0x57   :  { %626 = vmatpush.msra.mxu0 %v4665_v18  ;;  %646 = vmatpush.msra.mxu1 %v4660_v17 }
  0x58   :  { %667 = vmatpush.msra.mxu2 %v4647_v15  ;;  %687 = vmatpush.msra.mxu3 %v4652_v16  ;;  %v234_v15 = vsel %vm217_vm1, %v227_v5, %v231_v6 }
  0x59   :  { %627 = vmatpush.msra.mxu0 %v4689_v22  ;;  %647 = vmatpush.msra.mxu1 %v4684_v21 }
  0x5a   :  { %668 = vmatpush.msra.mxu2 %v4671_v19  ;;  %688 = vmatpush.msra.mxu3 %v4676_v20  ;;  %v235_v19 = vsel %vm219_vm2, %v232_v7, %v233_v8 }
  0x5b   :  { %628 = vmatpush.msra.mxu0 %v4713_v26  ;;  %648 = vmatpush.msra.mxu1 %v4708_v25  ;;  %v236_v22 = vsel %vm221_vm3, %v234_v15, %v235_v19 }
  0x5c   :  { %669 = vmatpush.msra.mxu2 %v4695_v23  ;;  %689 = vmatpush.msra.mxu3 %v4700_v24 }
  0x5d   :  { %629 = vmatpush.msra.mxu0 %v4737_v30  ;;  %649 = vmatpush.msra.mxu1 %v4732_v29 }
  0x5e   :  { %670 = vmatpush.msra.mxu2 %v4719_v27  ;;  %690 = vmatpush.msra.mxu3 %v4724_v28 }
  0x5f   :  { %630 = vmatpush.msra.mxu0 %v4761_v34  ;;  %650 = vmatpush.msra.mxu1 %v4756_v33 }
  0x60   :  { %671 = vmatpush.msra.mxu2 %v4743_v31  ;;  %691 = vmatpush.msra.mxu3 %v4748_v32 }
  0x61   :  { %631 = vmatpush.msra.mxu0 %v4785_v38  ;;  %651 = vmatpush.msra.mxu1 %v4780_v37 }
  0x62   :  { %672 = vmatpush.msra.mxu2 %v4767_v35  ;;  %692 = vmatpush.msra.mxu3 %v4772_v36 }
  0x63   :  { %632 = vmatpush.msra.mxu0 %v4809_v42  ;;  %652 = vmatpush.msra.mxu1 %v4804_v41 }
  0x64   :  { %673 = vmatpush.msra.mxu2 %v4791_v39  ;;  %693 = vmatpush.msra.mxu3 %v4796_v40 }
  0x65   :  { %633 = vmatpush.msra.mxu0 %v4833_v46  ;;  %653 = vmatpush.msra.mxu1 %v4828_v45 }
  0x66   :  { %674 = vmatpush.msra.mxu2 %v4815_v43  ;;  %694 = vmatpush.msra.mxu3 %v4820_v44 }
  0x67   :  { %634 = vmatpush.msra.mxu0 %v4857_v50  ;;  %654 = vmatpush.msra.mxu1 %v4852_v49 }
  0x68   :  { %675 = vmatpush.msra.mxu2 %v4839_v47  ;;  %695 = vmatpush.msra.mxu3 %v4844_v48 }
  0x69   :  { %635 = vmatpush.msra.mxu0 %v4881_v54  ;;  %655 = vmatpush.msra.mxu1 %v4876_v53 }
  0x6a   :  { %676 = vmatpush.msra.mxu2 %v4863_v51  ;;  %696 = vmatpush.msra.mxu3 %v4868_v52 }
  0x6b   :  { %636 = vmatpush.msra.mxu0 %v4905_v58  ;;  %656 = vmatpush.msra.mxu1 %v4900_v57 }
  0x6c   :  { %677 = vmatpush.msra.mxu2 %v4887_v55  ;;  %697 = vmatpush.msra.mxu3 %v7516_v4  ;;  %v5087_v4 = vld [vmem:[%s7518_s29 + $0x18] sm:$0xff]  }
  0x6d   :  { %637 = vmatpush.msra.mxu0 %v4931_v62  ;;  %657 = vmatpush.msra.mxu1 %v4926_v61  ;;  %v65_v14 = vunpack.c.h.bf16 %v5087_v4 }
  0x6e   :  { %678 = vmatpush.msra.mxu2 %v4911_v59  ;;  %698 = vmatpush.msra.mxu3 %v4916_v60 }
  0x6f   :  { %638 = vmatpush.msra.mxu0 %v4945_v56  ;;  %658 = vmatpush.msra.mxu1 %v4940_v63 }
  0xad   :  { %v167_v9 = vpop.f32.mrf.mxu1  ;;  %v147_v10 = vpop.f32.mrf.mxu0 }
  0xae   :  { %v214_v11 = vrot.slane %v167_v9, 6 }
  0xb0   :  { %v187_v12 = vpop.f32.mrf.mxu2  ;;  %v207_v13 = vpop.f32.mrf.mxu3  ;;  %v218_v18 = vsel %vm217_vm1, %v147_v10, %v214_v11  ;;  %v470_v10 = vld [vmem:[%s7517_s27] sm:$0xf] }
  0xb1   :  { %v215_v16 = vrot.slane %v187_v12, 4  ;;  %v216_v17 = vrot.slane %v207_v13, 2  ;;  %v473_v11 = vperm.slane %v470_v10, 1  ;;  %v474_v12 = vperm.slane %v470_v10, 2 }
  0xb2   :  { %v475_v13 = vperm.slane %v470_v10, 3  ;;  %v472_v15 = vperm.slane %v470_v10, 0 }
  0xb3   :  { %v220_v20 = vsel %vm219_vm2, %v215_v16, %v216_v17  ;;  %v476_v16 = vrot.slane %v473_v11, 6  ;;  %v477_v17 = vrot.slane %v474_v12, 4 }
  0xb4   :  { %v222_v21 = vsel %vm221_vm3, %v218_v18, %v220_v20  ;;  %v478_v18 = vrot.slane %v475_v13, 2 }
  0xb5   :  { %v224_v23 = vadd.f32 %v222_v21, %v65_v14  ;;  %v313_v21 = vunpack.c.l.bf16 %v5087_v4 }
  0xb7   :  { %v238_v24 = vadd.f32 %v236_v22, %v224_v23 }
  0xb9   :  { %v4056_v25 = vmul.f32 -1.442695, %v238_v24  ;;  %v259_v26 = vrot.slane %v238_v24, 2  ;;  %v283_v27 = vrot.slane %v238_v24, 6  ;;  %v280_v40 = vrot.slane %v238_v24, 4 }
  0xbb   :  { %4225 = vpow2.f32 %v4056_v25  ;;  %v4057_v28 = vmul.f32 -1.442695, %v259_v26  ;;  %v4058_v29 = vmul.f32 -1.442695, %v283_v27  ;;  %v479_v25 = vsel %vm217_vm1, %v472_v15, %v476_v16 }
  0xbc   :  { %v480_v26 = vsel %vm219_vm2, %v477_v17, %v478_v18 }
  0xbd   :  { %4227 = vpow2.f32 %v4057_v28 }
  0xbe   :  { %4229 = vpow2.f32 %v4058_v29 }
  0xc1   :  { %v4226_v30 = vpop.eup %4225 }
  0xc2   :  { %v242_v31 = vadd.f32 1.0, %v4226_v30 }
  0xc3   :  { %v4228_v32 = vpop.eup %4227 }
  0xc4   :  { %v4230_v33 = vpop.eup %4229  ;;  %4231 = vrcp.f32 %v242_v31  ;;  %v264_v34 = vadd.f32 1.0, %v4228_v32  ;;  %v254_v44 = vand.u32 2147483648, %v242_v31  ;;  %v252_v46 = vand.u32 2147483647, %v242_v31 }
  0xc5   :  { %v288_v35 = vadd.f32 1.0, %v4230_v33  ;;  %vm248_vm5 = vweird.f32 %v242_v31 }
  0xc6   :  { %4233 = vrcp.f32 %v264_v34  ;;  %v276_v49 = vand.u32 2147483648, %v264_v34  ;;  %v274_v51 = vand.u32 2147483647, %v264_v34  ;;  %v255_v53 = vor.u32 1.1754944e-38, %v254_v44 }
  0xc7   :  { %4235 = vrcp.f32 %v288_v35  ;;  %vm253_vm8 = vcmp.eq.f32.partialorder %v252_v46, 8.507059e+37  ;;  %vm270_vm9 = vweird.f32 %v264_v34  ;;  %v300_v2 = vand.u32 2147483648, %v288_v35 }
  0xc8   :  { %4237 = vtanh.f32 %v280_v40  ;;  %v277_v57 = vor.u32 1.1754944e-38, %v276_v49  ;;  %vm275_vm11 = vcmp.eq.f32.partialorder %v274_v51, 8.507059e+37  ;;  %vm294_vm13 = vweird.f32 %v288_v35 }
  0xc9   :  { %v298_v3 = vand.u32 2147483647, %v288_v35  ;;  %v301_v6 = vor.u32 1.1754944e-38, %v300_v2 }
  0xca   :  { %v4232_v36 = vpop.eup %4231 }
  0xcb   :  { %v244_v37 = vmul.f32 %v4232_v36, %v242_v31  ;;  %vm249_vm4 = vweird.f32 %v4232_v36  ;;  %vm299_vm15 = vcmp.eq.f32.partialorder %v298_v3, 8.507059e+37  ;;  %v481_v31 = vsel %vm221_vm3, %v479_v25, %v480_v26  ;;  %v5155_v25 = vld [vmem:[%s7513_s26 + $0x1d0] sm:$0xff]  ;;  %v5162_v26 = vld [vmem:[%s7513_s26 + $0x1d8] sm:$0xff] }
  0xcc   :  { %v4234_v38 = vpop.eup %4233  ;;  %vm250_vm6 = vmor %vm248_vm5, %vm249_vm4  ;;  %7521 = vst [vmem:[#allocation5_spill] sm:$0xff] %v5155_v25 }
  0xcd   :  { %v245_v39 = vsub.f32 1.0, %v244_v37  ;;  %v4236_v41 = vpop.eup %4235  ;;  %v266_v42 = vmul.f32 %v4234_v38, %v264_v34  ;;  %vm271_vm7 = vweird.f32 %v4234_v38  ;;  %7522 = vst [vmem:[#allocation6_spill] sm:$0xff] %v5162_v26 }
  0xce   :  { %v290_v45 = vmul.f32 %v4236_v41, %v288_v35  ;;  %vm272_vm10 = vmor %vm270_vm9, %vm271_vm7  ;;  %v4238_v59 = vpop.eup %4237  ;;  %vm295_vm12 = vweird.f32 %v4236_v41 }
  0xcf   :  { %v246_v43 = vmul.f32 %v4232_v36, %v245_v39  ;;  %v267_v47 = vsub.f32 1.0, %v266_v42  ;;  %vm296_vm14 = vmor %vm294_vm13, %vm295_vm12 }
  0xd0   :  { %v291_v54 = vsub.f32 1.0, %v290_v45 }
  0xd1   :  { %v247_v48 = vadd.f32 %v4232_v36, %v246_v43  ;;  %v268_v50 = vmul.f32 %v4234_v38, %v267_v47 }
  0xd2   :  { %v292_v61 = vmul.f32 %v4236_v41, %v291_v54 }
  0xd3   :  { %v251_v52 = vsel %vm250_vm6, %v4232_v36, %v247_v48  ;;  %v269_v55 = vadd.f32 %v4234_v38, %v268_v50 }
  0xd4   :  { %v256_v56 = vsel %vm253_vm8, %v255_v53, %v251_v52  ;;  %v293_v1 = vadd.f32 %v4236_v41, %v292_v61 }
  0xd5   :  { %v273_v58 = vsel %vm272_vm10, %v4234_v38, %v269_v55  ;;  %v305_v62 = vmul.f32 %v4238_v59, %v256_v56 }
  0xd6   :  { %v278_v60 = vsel %vm275_vm11, %v277_v57, %v273_v58  ;;  %v297_v5 = vsel %vm296_vm14, %v4236_v41, %v293_v1 }
  0xd7   :  { %v304_v63 = vmul.f32 0.0, %v278_v60  ;;  %v302_v8 = vsel %vm299_vm15, %v301_v6, %v297_v5 }
  0xd9   :  { %v5096_v0 = vadd.f32 %v305_v62, %v304_v63 }
  0xdb   :  { %4239 = vtanh.f32 %v5096_v0 }
  0xe1   :  { %v4240_v7 = vpop.eup %4239 }
  0xe2   :  { %v308_v9 = vmul.f32 %v4240_v7, %v302_v8 }
  0xe4   :  { %310 = vst [vmem:[#allocation2 + $0xe] sm:$0x3] %v308_v9  ;;  %394 = vmatmul.f32.vlgmr.msrb.gmra.mxu0 %v308_v9  ;;  %414 = vmatmul.f32.vlgmr.msrb.gmra.mxu1 %v308_v9 }
  0xe5   :  { %434 = vmatmul.f32.vlgmr.msrb.gmra.mxu2 %v308_v9  ;;  %454 = vmatmul.f32.vlgmr.msrb.gmra.mxu3 %v308_v9 }
 0x161   :  { %v415_v14 = vpop.f32.mrf.mxu1  ;;  %v395_v27 = vpop.f32.mrf.mxu0 }
 0x162   :  { %v462_v19 = vrot.slane %v415_v14, 6 }
 0x164   :  { %v465_v28 = vsel %vm217_vm1, %v395_v27, %v462_v19  ;;  %v5121_v19 = vld [vmem:[%s7513_s26 + $0x1e8] sm:$0xff] }
 0x165   :  { %888 = vmatpush.msrb.mxu1 %v5121_v19 }
 0x168   :  { %v435_v20 = vpop.f32.mrf.mxu2  ;;  %v455_v22 = vpop.f32.mrf.mxu3 }
 0x169   :  { %v463_v23 = vrot.slane %v435_v20, 4  ;;  %v464_v24 = vrot.slane %v455_v22, 2  ;;  %v5126_v20 = vld [vmem:[%s7513_s26 + $0x1f0] sm:$0xff]  ;;  %v5138_v22 = vld [vmem:[%s7513_s26 + $0x1f8] sm:$0xff] }
 0x16a   :  { %7519 = vst [vmem:[#allocation3_spill] sm:$0xff] %v5138_v22  ;;  %908 = vmatpush.msrb.mxu2 %v5126_v20  ;;  %928 = vmatpush.msrb.mxu3 %v5138_v22 }
 0x16b   :  { %v466_v29 = vsel %vm219_vm2, %v463_v23, %v464_v24  ;;  %v5145_v23 = vld [vmem:[%s7513_s26 + $0x1c0] sm:$0xff]  ;;  %v5150_v24 = vld [vmem:[%s7513_s26 + $0x1c8] sm:$0xff] }
 0x16c   :  { %v467_v30 = vsel %vm221_vm3, %v465_v28, %v466_v29  ;;  %7520 = vst [vmem:[#allocation4_spill] sm:$0xff] %v5145_v23  ;;  %889 = vmatpush.msrb.mxu1 %v5150_v24  ;;  %909 = vmatpush.msrb.mxu2 %v5155_v25 }
 0x16d   :  { %v469_v32 = vadd.f32 %v467_v30, %v313_v21  ;;  %v5131_v21 = vld [vmem:[%s7517_s27] sm:$0xf]  ;;  %929 = vmatpush.msrb.mxu3 %v5162_v26 }
 0x16e   :  { %v718_v27 = vperm.slane %v5131_v21, 1  ;;  %v719_v28 = vperm.slane %v5131_v21, 2  ;;  %v720_v29 = vperm.slane %v5131_v21, 3  ;;  %v5172_v30 = vld [vmem:[%s7513_s26 + $0x1a0] sm:$0xff] }
 0x16f   :  { %v483_v33 = vadd.f32 %v481_v31, %v469_v32  ;;  %7523 = vst [vmem:[#allocation7_spill] sm:$0xff] %v5172_v30  ;;  %v5177_v31 = vld [vmem:[%s7513_s26 + $0x1a8] sm:$0xff]  ;;  %v5182_v32 = vld [vmem:[%s7513_s26 + $0x1b0] sm:$0xff] }
 0x170   :  { %7524 = vst [vmem:[#allocation8_spill] sm:$0xff] %v5182_v32  ;;  %890 = vmatpush.msrb.mxu1 %v5177_v31  ;;  %910 = vmatpush.msrb.mxu2 %v5182_v32 }
 0x171   :  { %v4060_v34 = vmul.f32 -1.442695, %v483_v33  ;;  %v504_v4 = vrot.slane %v483_v33, 2  ;;  %v528_v35 = vrot.slane %v483_v33, 6  ;;  %v525_v47 = vrot.slane %v483_v33, 4  ;;  %v5189_v33 = vld [vmem:[%s7513_s26 + $0x1b8] sm:$0xff] }
 0x172   :  { %7525 = vst [vmem:[#allocation9_spill] sm:$0xff] %v5189_v33  ;;  %930 = vmatpush.msrb.mxu3 %v5189_v33 }
 0x173   :  { %4241 = vpow2.f32 %v4060_v34  ;;  %v4061_v36 = vmul.f32 -1.442695, %v504_v4  ;;  %v4062_v37 = vmul.f32 -1.442695, %v528_v35  ;;  %v5196_v34 = vld [vmem:[%s7513_s26 + $0x180] sm:$0xff]  ;;  %v5201_v4 = vld [vmem:[%s7513_s26 + $0x188] sm:$0xff] }
 0x174   :  { %7526 = vst [vmem:[#allocation10_spill] sm:$0xff] %v5201_v4  ;;  %v5206_v35 = vld [vmem:[%s7513_s26 + $0x190] sm:$0xff]  ;;  %891 = vmatpush.msrb.mxu1 %v5201_v4 }
 0x175   :  { %4243 = vpow2.f32 %v4061_v36  ;;  %911 = vmatpush.msrb.mxu2 %v5206_v35 }
 0x176   :  { %4245 = vpow2.f32 %v4062_v37  ;;  %v5211_v37 = vld [vmem:[%s7518_s29 + $0x10] sm:$0xff]  }
 0x177   :  { %7527 = vst [vmem:[#allocation11_spill] sm:$0xff] %v5211_v37 }
 0x179   :  { %v4242_v38 = vpop.eup %4241 }
 0x17a   :  { %v487_v39 = vadd.f32 1.0, %v4242_v38  ;;  %v717_v38 = vperm.slane %v5131_v21, 0  ;;  %v5366_v21 = vld [vmem:[%s7513_s26 + $0xd8] sm:$0xff] }
 0x17b   :  { %v4244_v40 = vpop.eup %4243 }
 0x17c   :  { %v4246_v41 = vpop.eup %4245  ;;  %4247 = vrcp.f32 %v487_v39  ;;  %v509_v42 = vadd.f32 1.0, %v4244_v40  ;;  %v499_v51 = vand.u32 2147483648, %v487_v39  ;;  %v497_v55 = vand.u32 2147483647, %v487_v39 }
 0x17d   :  { %v533_v43 = vadd.f32 1.0, %v4246_v41  ;;  %vm493_vm5 = vweird.f32 %v487_v39  ;;  %v721_v40 = vrot.slane %v718_v27, 6  ;;  %v722_v41 = vrot.slane %v719_v28, 4  ;;  %v5375_v28 = vld [vmem:[%s7513_s26 + $0xa0] sm:$0xff] }
 0x17e   :  { %4249 = vrcp.f32 %v509_v42  ;;  %v521_v56 = vand.u32 2147483648, %v509_v42  ;;  %v519_v59 = vand.u32 2147483647, %v509_v42  ;;  %v500_v60 = vor.u32 1.1754944e-38, %v499_v51 }
 0x17f   :  { %4251 = vrcp.f32 %v533_v43  ;;  %vm498_vm8 = vcmp.eq.f32.partialorder %v497_v55, 8.507059e+37  ;;  %vm515_vm9 = vweird.f32 %v509_v42  ;;  %v545_v12 = vand.u32 2147483648, %v533_v43  ;;  %v5273_v55 = vld [vmem:[%s7513_s26 + $0x120] sm:$0xff] }
 0x180   :  { %4253 = vtanh.f32 %v525_v47  ;;  %v522_v2 = vor.u32 1.1754944e-38, %v521_v56  ;;  %vm520_vm11 = vcmp.eq.f32.partialorder %v519_v59, 8.507059e+37  ;;  %vm539_vm13 = vweird.f32 %v533_v43  ;;  %v5278_v56 = vld [vmem:[%s7513_s26 + $0x128] sm:$0xff] }
 0x181   :  { %v543_v13 = vand.u32 2147483647, %v533_v43  ;;  %v546_v15 = vor.u32 1.1754944e-38, %v545_v12  ;;  %v724_v59 = vsel %vm217_vm1, %v717_v38, %v721_v40  ;;  %v5392_v38 = vld [vmem:[%s7513_s26 + $0xb8] sm:$0xff] }
 0x182   :  { %v4248_v44 = vpop.eup %4247 }
 0x183   :  { %v489_v45 = vmul.f32 %v4248_v44, %v487_v39  ;;  %vm494_vm4 = vweird.f32 %v4248_v44  ;;  %vm544_vm15 = vcmp.eq.f32.partialorder %v543_v13, 8.507059e+37  ;;  %v5219_v39 = vld [vmem:[%s7513_s26 + $0x198] sm:$0xff]  ;;  %v5337_v13 = vld [vmem:[%s7513_s26 + $0xf0] sm:$0xff] }
 0x184   :  { %v4250_v46 = vpop.eup %4249  ;;  %vm495_vm7 = vmor %vm493_vm5, %vm494_vm4  ;;  %7528 = vst [vmem:[#allocation12_spill] sm:$0xff] %v5219_v39  ;;  %931 = vmatpush.msrb.mxu3 %v5219_v39 }
 0x185   :  { %v4252_v48 = vpop.eup %4251  ;;  %v490_v49 = vsub.f32 1.0, %v489_v45  ;;  %v511_v50 = vmul.f32 %v4250_v46, %v509_v42  ;;  %vm516_vm6 = vweird.f32 %v4250_v46  ;;  %v723_v42 = vrot.slane %v720_v29, 2  ;;  %v5236_v45 = vld [vmem:[%s7513_s26 + $0x170] sm:$0xff]  ;;  %v5380_v29 = vld [vmem:[%s7513_s26 + $0xa8] sm:$0xff] }
 0x186   :  { %v535_v52 = vmul.f32 %v4252_v48, %v533_v43  ;;  %vm517_vm10 = vmor %vm515_vm9, %vm516_vm6  ;;  %v4254_v5 = vpop.eup %4253  ;;  %vm540_vm12 = vweird.f32 %v4252_v48  ;;  %v5226_v43 = vld [vmem:[%s7513_s26 + $0x160] sm:$0xff]  ;;  %912 = vmatpush.msrb.mxu2 %v5236_v45 }
 0x187   :  { %v512_v53 = vsub.f32 1.0, %v511_v50  ;;  %v491_v54 = vmul.f32 %v4248_v44, %v490_v49  ;;  %vm541_vm14 = vmor %vm539_vm13, %vm540_vm12  ;;  %7529 = vst [vmem:[#allocation13_spill] sm:$0xff] %v5226_v43  ;;  %v5255_v49 = vld [vmem:[%s7513_s26 + $0x148] sm:$0xff]  ;;  %v5260_v50 = vld [vmem:[%s7513_s26 + $0x150] sm:$0xff] }
 0x188   :  { %v536_v61 = vsub.f32 1.0, %v535_v52  ;;  %7531 = vst [vmem:[#allocation15_spill] sm:$0xff] %v5255_v49  ;;  %v558_v52 = vunpack.c.h.bf16 %v5211_v37  ;;  %913 = vmatpush.msrb.mxu2 %v5260_v50  ;;  %v5498_v37 = vld [vmem:[%s7513_s26] sm:$0xff] }
 0x189   :  { %v492_v57 = vadd.f32 %v4248_v44, %v491_v54  ;;  %v513_v58 = vmul.f32 %v4250_v46, %v512_v53  ;;  %v5268_v54 = vld [vmem:[%s7513_s26 + $0x158] sm:$0xff] }
 0x18a   :  { %v537_v7 = vmul.f32 %v4252_v48, %v536_v61  ;;  %v5287_v61 = vld [vmem:[%s7513_s26 + $0x130] sm:$0xff] }
 0x18b   :  { %v496_v62 = vsel %vm495_vm7, %v4248_v44, %v492_v57  ;;  %v514_v63 = vadd.f32 %v4250_v46, %v513_v58  ;;  %v5231_v44 = vld [vmem:[%s7513_s26 + $0x168] sm:$0xff]  ;;  %914 = vmatpush.msrb.mxu2 %v5287_v61 }
 0x18c   :  { %v501_v1 = vsel %vm498_vm8, %v500_v60, %v496_v62  ;;  %v538_v11 = vadd.f32 %v4252_v48, %v537_v7  ;;  %7530 = vst [vmem:[#allocation14_spill] sm:$0xff] %v5231_v44  ;;  %892 = vmatpush.msrb.mxu1 %v5231_v44  ;;  %v725_v60 = vsel %vm219_vm2, %v722_v41, %v723_v42  ;;  %v5292_v62 = vld [vmem:[%s7513_s26 + $0x138] sm:$0xff] }
 0x18d   :  { %v518_v3 = vsel %vm517_vm10, %v4250_v46, %v514_v63  ;;  %v550_v9 = vmul.f32 %v4254_v5, %v501_v1  ;;  %v5243_v46 = vld [vmem:[%s7513_s26 + $0x178] sm:$0xff]  ;;  %v5297_v63 = vld [vmem:[%s7513_s26 + $0x100] sm:$0xff]  ;;  %v726_v12 = vsel %vm221_vm3, %v724_v59, %v725_v60  ;;  %v5431_v60 = vld [vmem:[%s7513_s26 + $0x68] sm:$0xff] }
 0x18e   :  { %v523_v6 = vsel %vm520_vm11, %v522_v2, %v518_v3  ;;  %v542_v14 = vsel %vm541_vm14, %v4252_v48, %v538_v11  ;;  %932 = vmatpush.msrb.mxu3 %v5243_v46  ;;  %v5250_v48 = vld [vmem:[%s7513_s26 + $0x140] sm:$0xff]  ;;  %893 = vmatpush.msrb.mxu1 %v5255_v49  ;;  %v5304_v2 = vld [vmem:[%s7513_s26 + $0x108] sm:$0xff]  ;;  %v5309_v3 = vld [vmem:[%s7513_s26 + $0x110] sm:$0xff] }
 0x18f   :  { %v549_v8 = vmul.f32 %v523_v6, %v5096_v0  ;;  %v547_v17 = vsel %vm544_vm15, %v546_v15, %v542_v14  ;;  %v5116_v0 = vld [vmem:[%s7513_s26 + $0x1e0] sm:$0xff]  ;;  %v5314_v5 = vld [vmem:[%s7513_s26 + $0x118] sm:$0xff]  ;;  %915 = vmatpush.msrb.mxu2 %v5309_v3 }
 0x190   :  { %868 = vmatpush.msrb.mxu0 %v5116_v0  ;;  %933 = vmatpush.msrb.mxu3 %v5268_v54  ;;  %v5342_v14 = vld [vmem:[%s7513_s26 + $0xf8] sm:$0xff]  ;;  %v5426_v59 = vld [vmem:[%s7513_s26 + $0x60] sm:$0xff] }
 0x191   :  { %v5110_v10 = vadd.f32 %v550_v9, %v549_v8  ;;  %894 = vmatpush.msrb.mxu1 %v5278_v56  ;;  %v5323_v8 = vld [vmem:[%s7513_s26 + $0xe0] sm:$0xff]  ;;  %v5328_v9 = vld [vmem:[%s7513_s26 + $0xe8] sm:$0xff]  ;;  %916 = vmatpush.msrb.mxu2 %v5337_v13 }
 0x192   :  { %869 = vmatpush.msrb.mxu0 %v5145_v23  ;;  %934 = vmatpush.msrb.mxu3 %v5292_v62 }
 0x193   :  { %4255 = vtanh.f32 %v5110_v10  ;;  %895 = vmatpush.msrb.mxu1 %v5304_v2 }
 0x194   :  { %870 = vmatpush.msrb.mxu0 %v5172_v30  ;;  %935 = vmatpush.msrb.mxu3 %v5314_v5 }
 0x195   :  { %896 = vmatpush.msrb.mxu1 %v5328_v9 }
 0x196   :  { %871 = vmatpush.msrb.mxu0 %v5196_v34  ;;  %936 = vmatpush.msrb.mxu3 %v5342_v14 }
 0x198   :  { %872 = vmatpush.msrb.mxu0 %v5226_v43  ;;  %937 = vmatpush.msrb.mxu3 %v5366_v21 }
 0x199   :  { %v4256_v16 = vpop.eup %4255 }
 0x19a   :  { %v553_v18 = vmul.f32 %v4256_v16, %v547_v17  ;;  %873 = vmatpush.msrb.mxu0 %v5250_v48  ;;  %v5349_v16 = vld [vmem:[%s7513_s26 + $0xc0] sm:$0xff]  ;;  %v5354_v17 = vld [vmem:[%s7513_s26 + $0xc8] sm:$0xff]  ;;  %938 = vmatpush.msrb.mxu3 %v5392_v38 }
 0x19b   :  { %897 = vmatpush.msrb.mxu1 %v5354_v17 }
 0x19c   :  { %555 = vst [vmem:[#allocation2 + $0xc] sm:$0x3] %v553_v18  ;;  %639 = vmatmul.f32.vlgmr.msra.gmra.mxu0 %v553_v18  ;;  %659 = vmatmul.f32.vlgmr.msra.gmra.mxu1 %v553_v18 }
 0x19d   :  { %679 = vmatmul.f32.vlgmr.msra.gmra.mxu2 %v553_v18  ;;  %699 = vmatmul.f32.vlgmr.msra.gmra.mxu3 %v553_v18  ;;  %v5361_v18 = vld [vmem:[%s7513_s26 + $0xd0] sm:$0xff] }
 0x19e   :  { %874 = vmatpush.msrb.mxu0 %v5273_v55  ;;  %917 = vmatpush.msrb.mxu2 %v5361_v18 }
 0x19f   :  { %898 = vmatpush.msrb.mxu1 %v5380_v29 }
 0x1a0   :  { %875 = vmatpush.msrb.mxu0 %v5297_v63 }
 0x1a2   :  { %876 = vmatpush.msrb.mxu0 %v5323_v8 }
 0x1a4   :  { %877 = vmatpush.msrb.mxu0 %v5349_v16 }
 0x1a6   :  { %878 = vmatpush.msrb.mxu0 %v5375_v28 }
 0x219   :  { %v660_v36 = vpop.f32.mrf.mxu1  ;;  %v640_v1 = vpop.f32.mrf.mxu0 }
 0x21a   :  { %v707_v47 = vrot.slane %v660_v36, 6  ;;  %v5387_v36 = vld [vmem:[%s7513_s26 + $0xb0] sm:$0xff] }
 0x21b   :  { %918 = vmatpush.msrb.mxu2 %v5387_v36 }
 0x21c   :  { %v710_v6 = vsel %vm217_vm1, %v640_v1, %v707_v47  ;;  %v5402_v47 = vld [vmem:[%s7513_s26 + $0x80] sm:$0xff]  ;;  %v5438_v1 = vld [vmem:[%s7513_s26 + $0x70] sm:$0xff] }
 0x21d   :  { %879 = vmatpush.msrb.mxu0 %v5402_v47 }
 0x21f   :  { %880 = vmatpush.msrb.mxu0 %v5426_v59 }
 0x220   :  { %v680_v51 = vpop.f32.mrf.mxu2  ;;  %v700_v53 = vpop.f32.mrf.mxu3 }
 0x221   :  { %v708_v57 = vrot.slane %v680_v51, 4  ;;  %v709_v58 = vrot.slane %v700_v53, 2  ;;  %v5407_v51 = vld [vmem:[%s7513_s26 + $0x88] sm:$0xff]  ;;  %v5419_v53 = vld [vmem:[%s7513_s26 + $0x98] sm:$0xff] }
 0x222   :  { %899 = vmatpush.msrb.mxu1 %v5407_v51  ;;  %939 = vmatpush.msrb.mxu3 %v5419_v53 }
 0x223   :  { %v711_v7 = vsel %vm219_vm2, %v708_v57, %v709_v58 }
 0x224   :  { %v712_v11 = vsel %vm221_vm3, %v710_v6, %v711_v7  ;;  %v5443_v6 = vld [vmem:[%s7513_s26 + $0x78] sm:$0xff]  ;;  %v5450_v7 = vld [vmem:[%s7513_s26 + $0x40] sm:$0xff]  ;;  %900 = vmatpush.msrb.mxu1 %v5431_v60 }
 0x225   :  { %v714_v15 = vadd.f32 %v712_v11, %v558_v52  ;;  %v5414_v52 = vld [vmem:[%s7513_s26 + $0x90] sm:$0xff]  ;;  %7532 = vst [vmem:[#allocation16_spill] sm:$0xff] %v5443_v6  ;;  %v5455_v11 = vld [vmem:[%s7513_s26 + $0x48] sm:$0xff]  ;;  %940 = vmatpush.msrb.mxu3 %v5443_v6  ;;  %881 = vmatpush.msrb.mxu0 %v5450_v7 }
 0x226   :  { %919 = vmatpush.msrb.mxu2 %v5414_v52  ;;  %7533 = vst [vmem:[#allocation17_spill] sm:$0xff] %v5450_v7  ;;  %901 = vmatpush.msrb.mxu1 %v5455_v11 }
 0x227   :  { %v5368_v27 = vadd.f32 %v726_v12, %v714_v15  ;;  %7534 = vst [vmem:[#allocation18_spill] sm:$0xff] %v5455_v11  ;;  %v5462_v12 = vld [vmem:[%s7513_s26 + $0x50] sm:$0xff]  ;;  %v5467_v15 = vld [vmem:[%s7513_s26 + $0x58] sm:$0xff]  ;;  %v5503_v11 = vld [vmem:[%s7513_s26 + $0x8] sm:$0xff] }
 0x228   :  { %7535 = vst [vmem:[#allocation19_spill] sm:$0xff] %v5462_v12  ;;  %920 = vmatpush.msrb.mxu2 %v5438_v1  ;;  %941 = vmatpush.msrb.mxu3 %v5467_v15 }
 0x229   :  { %v4064_v40 = vmul.f32 -1.442695, %v5368_v27  ;;  %v749_v41 = vrot.slane %v5368_v27, 2  ;;  %v773_v42 = vrot.slane %v5368_v27, 6  ;;  %7536 = vst [vmem:[#allocation20_spill] sm:$0xff] %v5467_v15  ;;  %v5512_v15 = vld [vmem:[%s7513_s26 + $0x10] sm:$0xff] }
 0x22a   :  { %921 = vmatpush.msrb.mxu2 %v5462_v12  ;;  %v5517_v12 = vld [vmem:[%s7513_s26 + $0x18] sm:$0xff] }
 0x22b   :  { %4257 = vpow2.f32 %v4064_v40  ;;  %v4065_v57 = vmul.f32 -1.442695, %v749_v41  ;;  %v4066_v58 = vmul.f32 -1.442695, %v773_v42  ;;  %v5474_v40 = vld [vmem:[%s7513_s26 + $0x20] sm:$0xff]  ;;  %v5479_v41 = vld [vmem:[%s7513_s26 + $0x28] sm:$0xff] }
 0x22c   :  { %7537 = vst [vmem:[#allocation21_spill] sm:$0xff] %v5474_v40  ;;  %v5486_v42 = vld [vmem:[%s7513_s26 + $0x30] sm:$0xff]  ;;  %882 = vmatpush.msrb.mxu0 %v5474_v40  ;;  %902 = vmatpush.msrb.mxu1 %v5479_v41 }
 0x22d   :  { %4259 = vpow2.f32 %v4065_v57  ;;  %7538 = vst [vmem:[#allocation22_spill] sm:$0xff] %v5479_v41  ;;  %v5491_v57 = vld [vmem:[%s7513_s26 + $0x38] sm:$0xff]  ;;  %922 = vmatpush.msrb.mxu2 %v5486_v42 }
 0x22e   :  { %4261 = vpow2.f32 %v4066_v58  ;;  %942 = vmatpush.msrb.mxu3 %v5491_v57  ;;  %883 = vmatpush.msrb.mxu0 %v5498_v37 }
 0x22f   :  { %903 = vmatpush.msrb.mxu1 %v5503_v11  ;;  %923 = vmatpush.msrb.mxu2 %v5512_v15 }
 0x230   :  { %943 = vmatpush.msrb.mxu3 %v5517_v12  ;;  %1113 = vmatpush.msra.mxu0 %v5116_v0 }
 0x231   :  { %v4258_v58 = vpop.eup %4257  ;;  %1133 = vmatpush.msra.mxu1 %v5121_v19  ;;  %1153 = vmatpush.msra.mxu2 %v5126_v20 }
 0x232   :  { %v5505_v7 = vadd.f32 1.0, %v4258_v58  ;;  %1173 = vmatpush.msra.mxu3 %v5138_v22  ;;  %1114 = vmatpush.msra.mxu0 %v5145_v23  ;;  %v770_v23 = vrot.slane %v5368_v27, 4 }
 0x233   :  { %v4260_v6 = vpop.eup %4259  ;;  %1134 = vmatpush.msra.mxu1 %v5150_v24  ;;  %1154 = vmatpush.msra.mxu2 %v5155_v25 }
 0x234   :  { %v4262_v58 = vpop.eup %4261  ;;  %4263 = vrcp.f32 %v5505_v7  ;;  %v5522_v40 = vadd.f32 1.0, %v4260_v6  ;;  %1174 = vmatpush.msra.mxu3 %v5162_v26  ;;  %1115 = vmatpush.msra.mxu0 %v5172_v30  ;;  %vm738_vm5 = vweird.f32 %v5505_v7 }
 0x235   :  { %v5526_v41 = vadd.f32 1.0, %v4262_v58  ;;  %1135 = vmatpush.msra.mxu1 %v5177_v31  ;;  %1155 = vmatpush.msra.mxu2 %v5182_v32  ;;  %v744_v32 = vand.u32 2147483648, %v5505_v7 }
 0x236   :  { %4265 = vrcp.f32 %v5522_v40  ;;  %1175 = vmatpush.msra.mxu3 %v5189_v33  ;;  %1116 = vmatpush.msra.mxu0 %v5196_v34  ;;  %vm760_vm9 = vweird.f32 %v5522_v40 }
 0x237   :  { %4267 = vrcp.f32 %v5526_v41  ;;  %1136 = vmatpush.msra.mxu1 %v5201_v4  ;;  %1156 = vmatpush.msra.mxu2 %v5206_v35  ;;  %vm784_vm13 = vweird.f32 %v5526_v41 }
 0x238   :  { %1176 = vmatpush.msra.mxu3 %v5219_v39  ;;  %1117 = vmatpush.msra.mxu0 %v5226_v43  ;;  %4269 = vtanh.f32 %v770_v23  ;;  %v766_v39 = vand.u32 2147483648, %v5522_v40  ;;  %v745_v23 = vor.u32 1.1754944e-38, %v744_v32 }
 0x239   :  { %1137 = vmatpush.msra.mxu1 %v5231_v44  ;;  %1157 = vmatpush.msra.mxu2 %v5236_v45 }
 0x23a   :  { %v4264_v6 = vpop.eup %4263  ;;  %1177 = vmatpush.msra.mxu3 %v5243_v46  ;;  %1118 = vmatpush.msra.mxu0 %v5250_v48 }
 0x23b   :  { %v734_v58 = vmul.f32 %v4264_v6, %v5505_v7  ;;  %vm739_vm4 = vweird.f32 %v4264_v6  ;;  %1138 = vmatpush.msra.mxu1 %v5255_v49  ;;  %1158 = vmatpush.msra.mxu2 %v5260_v50 }
 0x23c   :  { %v4266_v22 = vpop.eup %4265  ;;  %1178 = vmatpush.msra.mxu3 %v5268_v54  ;;  %vm740_vm7 = vmor %vm738_vm5, %vm739_vm4  ;;  %1119 = vmatpush.msra.mxu0 %v5273_v55 }
 0x23d   :  { %v5548_v25 = vpop.eup %4267  ;;  %v735_v26 = vsub.f32 1.0, %v734_v58  ;;  %v756_v30 = vmul.f32 %v4266_v22, %v5522_v40  ;;  %v742_v58 = vand.u32 2147483647, %v5505_v7  ;;  %vm761_vm6 = vweird.f32 %v4266_v22  ;;  %1139 = vmatpush.msra.mxu1 %v5278_v56  ;;  %1159 = vmatpush.msra.mxu2 %v5287_v61 }
 0x23e   :  { %v780_v33 = vmul.f32 %v5548_v25, %v5526_v41  ;;  %1179 = vmatpush.msra.mxu3 %v5292_v62  ;;  %vm762_vm10 = vmor %vm760_vm9, %vm761_vm6  ;;  %1120 = vmatpush.msra.mxu0 %v5297_v63  ;;  %vm785_vm12 = vweird.f32 %v5548_v25 }
 0x23f   :  { %v757_v27 = vsub.f32 1.0, %v756_v30  ;;  %v736_v4 = vmul.f32 %v4264_v6, %v735_v26  ;;  %v764_v26 = vand.u32 2147483647, %v5522_v40  ;;  %vm743_vm8 = vcmp.eq.f32.partialorder %v742_v58, 8.507059e+37  ;;  %1140 = vmatpush.msra.mxu1 %v5304_v2  ;;  %1160 = vmatpush.msra.mxu2 %v5309_v3  ;;  %vm786_vm14 = vmor %vm784_vm13, %vm785_vm12 }
 0x240   :  { %v781_v30 = vsub.f32 1.0, %v780_v33  ;;  %1180 = vmatpush.msra.mxu3 %v5314_v5  ;;  %v4270_v33 = vpop.eup %4269  ;;  %1121 = vmatpush.msra.mxu0 %v5323_v8 }
 0x241   :  { %v737_v43 = vadd.f32 %v4264_v6, %v736_v4  ;;  %v758_v44 = vmul.f32 %v4266_v22, %v757_v27  ;;  %v767_v27 = vor.u32 1.1754944e-38, %v766_v39  ;;  %vm765_vm11 = vcmp.eq.f32.partialorder %v764_v26, 8.507059e+37  ;;  %1141 = vmatpush.msra.mxu1 %v5328_v9  ;;  %1161 = vmatpush.msra.mxu2 %v5337_v13 }
 0x242   :  { %1181 = vmatpush.msra.mxu3 %v5342_v14  ;;  %1122 = vmatpush.msra.mxu0 %v5349_v16 }
 0x243   :  { %v741_v7 = vsel %vm740_vm7, %v4264_v6, %v737_v43  ;;  %v759_v49 = vadd.f32 %v4266_v22, %v758_v44  ;;  %v782_v44 = vmul.f32 %v5548_v25, %v781_v30  ;;  %1142 = vmatpush.msra.mxu1 %v5354_v17  ;;  %1162 = vmatpush.msra.mxu2 %v5361_v18  ;;  %v788_v6 = vand.u32 2147483647, %v5526_v41  ;;  %v7541_v30 = vld [vmem:[#allocation18_spill] sm:$0xff] }
 0x244   :  { %v746_v4 = vsel %vm743_vm8, %v745_v23, %v741_v7  ;;  %1182 = vmatpush.msra.mxu3 %v5366_v21  ;;  %1123 = vmatpush.msra.mxu0 %v5375_v28  ;;  %v7539_v23 = vld [vmem:[#allocation16_spill] sm:$0xff] }
 0x245   :  { %v763_v32 = vsel %vm762_vm10, %v4266_v22, %v759_v49  ;;  %v795_v40 = vmul.f32 %v4270_v33, %v746_v4  ;;  %v783_v49 = vadd.f32 %v5548_v25, %v782_v44  ;;  %1143 = vmatpush.msra.mxu1 %v5380_v29  ;;  %1163 = vmatpush.msra.mxu2 %v5387_v36  ;;  %vm789_vm15 = vcmp.eq.f32.partialorder %v788_v6, 8.507059e+37  ;;  %v7544_v33 = vld [vmem:[#allocation21_spill] sm:$0xff]  ;;  %v7546_v44 = vld [vmem:[#allocation3_spill] sm:$0xff]  ;;  %v7551_v6 = vld [vmem:[#allocation8_spill] sm:$0xff] }
 0x246   :  { %v768_v43 = vsel %vm765_vm11, %v767_v27, %v763_v32  ;;  %1183 = vmatpush.msra.mxu3 %v5392_v38  ;;  %1124 = vmatpush.msra.mxu0 %v5402_v47  ;;  %v7542_v27 = vld [vmem:[#allocation19_spill] sm:$0xff]  ;;  %v7543_v32 = vld [vmem:[#allocation20_spill] sm:$0xff] }
 0x247   :  { %v794_v39 = vmul.f32 %v768_v43, %v5110_v10  ;;  %v790_v10 = vand.u32 2147483648, %v5526_v41  ;;  %1144 = vmatpush.msra.mxu1 %v5407_v51  ;;  %1164 = vmatpush.msra.mxu2 %v5414_v52  ;;  %v787_v58 = vsel %vm786_vm14, %v5548_v25, %v783_v49  ;;  %v7540_v41 = vld [vmem:[#allocation17_spill] sm:$0xff]  ;;  %v7545_v43 = vld [vmem:[#allocation22_spill] sm:$0xff] }
 0x248   :  { %1184 = vmatpush.msra.mxu3 %v5419_v53  ;;  %1125 = vmatpush.msra.mxu0 %v5426_v59  ;;  %v7549_v49 = vld [vmem:[#allocation6_spill] sm:$0xff] }
 0x249   :  { %v5587_v22 = vadd.f32 %v795_v40, %v794_v39  ;;  %1145 = vmatpush.msra.mxu1 %v5431_v60  ;;  %v791_v26 = vor.u32 1.1754944e-38, %v790_v10  ;;  %1165 = vmatpush.msra.mxu2 %v5438_v1  ;;  %v7547_v39 = vld [vmem:[#allocation4_spill] sm:$0xff]  ;;  %v7548_v40 = vld [vmem:[#allocation5_spill] sm:$0xff]  ;;  %v7550_v10 = vld [vmem:[#allocation7_spill] sm:$0xff] }
 0x24a   :  { %1185 = vmatpush.msra.mxu3 %v7539_v23  ;;  %1126 = vmatpush.msra.mxu0 %v7540_v41 }
 0x24b   :  { %4271 = vtanh.f32 %v5587_v22  ;;  %1146 = vmatpush.msra.mxu1 %v7541_v30  ;;  %v792_v4 = vsel %vm789_vm15, %v791_v26, %v787_v58  ;;  %1166 = vmatpush.msra.mxu2 %v7542_v27  ;;  %v7556_v58 = vld [vmem:[#allocation14_spill] sm:$0xff] }
 0x24c   :  { %1186 = vmatpush.msra.mxu3 %v7543_v32  ;;  %1127 = vmatpush.msra.mxu0 %v7544_v33 }
 0x24d   :  { %1147 = vmatpush.msra.mxu1 %v7545_v43  ;;  %1167 = vmatpush.msra.mxu2 %v5486_v42 }
 0x24e   :  { %1187 = vmatpush.msra.mxu3 %v5491_v57  ;;  %1128 = vmatpush.msra.mxu0 %v5498_v37 }
 0x24f   :  { %1148 = vmatpush.msra.mxu1 %v5503_v11  ;;  %1168 = vmatpush.msra.mxu2 %v5512_v15 }
 0x250   :  { %1188 = vmatpush.msra.mxu3 %v5517_v12 }
 0x251   :  { %v4272_v7 = vpop.eup %4271 }
 0x252   :  { %v798_v25 = vmul.f32 %v4272_v7, %v792_v4 }
 0x254   :  { %800 = vst [vmem:[#allocation2 + $0xa] sm:$0x3] %v798_v25  ;;  %884 = vmatmul.f32.vlgmr.msrb.gmra.mxu0 %v798_v25  ;;  %904 = vmatmul.f32.vlgmr.msrb.gmra.mxu1 %v798_v25 }
 0x255   :  { %924 = vmatmul.f32.vlgmr.msrb.gmra.mxu2 %v798_v25  ;;  %944 = vmatmul.f32.vlgmr.msrb.gmra.mxu3 %v798_v25 }
 0x256   :  { %1358 = vmatpush.msrb.mxu0 %v5116_v0  ;;  %1378 = vmatpush.msrb.mxu1 %v5121_v19  ;;  %v7552_v0 = vld [vmem:[#allocation9_spill] sm:$0xff]  ;;  %v7553_v19 = vld [vmem:[#allocation10_spill] sm:$0xff] }
 0x257   :  { %1398 = vmatpush.msrb.mxu2 %v5126_v20  ;;  %1418 = vmatpush.msrb.mxu3 %v7546_v44  ;;  %v7554_v20 = vld [vmem:[#allocation12_spill] sm:$0xff] }
 0x258   :  { %1359 = vmatpush.msrb.mxu0 %v7547_v39  ;;  %1379 = vmatpush.msrb.mxu1 %v5150_v24  ;;  %v7555_v24 = vld [vmem:[#allocation13_spill] sm:$0xff] }
 0x259   :  { %1399 = vmatpush.msrb.mxu2 %v7548_v40  ;;  %1419 = vmatpush.msrb.mxu3 %v7549_v49 }
 0x25a   :  { %1360 = vmatpush.msrb.mxu0 %v7550_v10  ;;  %1380 = vmatpush.msrb.mxu1 %v5177_v31  ;;  %v7557_v31 = vld [vmem:[#allocation15_spill] sm:$0xff] }
 0x25b   :  { %1400 = vmatpush.msrb.mxu2 %v7551_v6  ;;  %1420 = vmatpush.msrb.mxu3 %v7552_v0 }
 0x25c   :  { %1361 = vmatpush.msrb.mxu0 %v5196_v34  ;;  %1381 = vmatpush.msrb.mxu1 %v7553_v19  ;;  %v960_v34 = vld [vmem:[%s7517_s27] sm:$0xf] }
 0x25d   :  { %1401 = vmatpush.msrb.mxu2 %v5206_v35  ;;  %1421 = vmatpush.msrb.mxu3 %v7554_v20  ;;  %v963_v35 = vperm.slane %v960_v34, 1 }
 0x25e   :  { %1362 = vmatpush.msrb.mxu0 %v7555_v24  ;;  %1382 = vmatpush.msrb.mxu1 %v7556_v58 }
 0x25f   :  { %1402 = vmatpush.msrb.mxu2 %v5236_v45  ;;  %1422 = vmatpush.msrb.mxu3 %v5243_v46  ;;  %v964_v45 = vperm.slane %v960_v34, 2  ;;  %v965_v46 = vperm.slane %v960_v34, 3 }
 0x260   :  { %1363 = vmatpush.msrb.mxu0 %v5250_v48  ;;  %1383 = vmatpush.msrb.mxu1 %v7557_v31 }
 0x261   :  { %1403 = vmatpush.msrb.mxu2 %v5260_v50  ;;  %1423 = vmatpush.msrb.mxu3 %v5268_v54  ;;  %v962_v50 = vperm.slane %v960_v34, 0  ;;  %v966_v54 = vrot.slane %v963_v35, 6 }
 0x262   :  { %1364 = vmatpush.msrb.mxu0 %v5273_v55  ;;  %1384 = vmatpush.msrb.mxu1 %v5278_v56  ;;  %v967_v55 = vrot.slane %v964_v45, 4  ;;  %v968_v56 = vrot.slane %v965_v46, 2 }
 0x263   :  { %1404 = vmatpush.msrb.mxu2 %v5287_v61  ;;  %1424 = vmatpush.msrb.mxu3 %v5292_v62  ;;  %v7558_v62 = vld [vmem:[#allocation11_spill] sm:$0xff] }
 0x264   :  { %1365 = vmatpush.msrb.mxu0 %v5297_v63  ;;  %1385 = vmatpush.msrb.mxu1 %v5304_v2  ;;  %v803_v63 = vunpack.c.l.bf16 %v7558_v62 }
 0x265   :  { %1405 = vmatpush.msrb.mxu2 %v5309_v3  ;;  %1425 = vmatpush.msrb.mxu3 %v5314_v5 }
 0x266   :  { %1366 = vmatpush.msrb.mxu0 %v5323_v8  ;;  %1386 = vmatpush.msrb.mxu1 %v5328_v9  ;;  %v969_v8 = vsel %vm217_vm1, %v962_v50, %v966_v54  ;;  %v970_v9 = vsel %vm219_vm2, %v967_v55, %v968_v56 }
 0x267   :  { %1406 = vmatpush.msrb.mxu2 %v5337_v13  ;;  %1426 = vmatpush.msrb.mxu3 %v5342_v14 }
 0x268   :  { %1367 = vmatpush.msrb.mxu0 %v5349_v16  ;;  %1387 = vmatpush.msrb.mxu1 %v5354_v17 }
 0x269   :  { %1407 = vmatpush.msrb.mxu2 %v5361_v18  ;;  %1427 = vmatpush.msrb.mxu3 %v5366_v21  ;;  %v971_v18 = vsel %vm221_vm3, %v969_v8, %v970_v9 }
 0x26a   :  { %1368 = vmatpush.msrb.mxu0 %v5375_v28  ;;  %1388 = vmatpush.msrb.mxu1 %v5380_v29 }
 0x26b   :  { %1408 = vmatpush.msrb.mxu2 %v5387_v36  ;;  %1428 = vmatpush.msrb.mxu3 %v5392_v38 }
 0x26c   :  { %1369 = vmatpush.msrb.mxu0 %v5402_v47  ;;  %1389 = vmatpush.msrb.mxu1 %v5407_v51 }
 0x26d   :  { %1409 = vmatpush.msrb.mxu2 %v5414_v52  ;;  %1429 = vmatpush.msrb.mxu3 %v5419_v53 }
 0x26e   :  { %1370 = vmatpush.msrb.mxu0 %v5426_v59  ;;  %1390 = vmatpush.msrb.mxu1 %v5431_v60 }
 0x26f   :  { %1410 = vmatpush.msrb.mxu2 %v5438_v1  ;;  %1430 = vmatpush.msrb.mxu3 %v7539_v23 }
 0x270   :  { %1371 = vmatpush.msrb.mxu0 %v7540_v41  ;;  %1391 = vmatpush.msrb.mxu1 %v7541_v30 }
 0x271   :  { %1411 = vmatpush.msrb.mxu2 %v7542_v27  ;;  %1431 = vmatpush.msrb.mxu3 %v7543_v32 }
 0x272   :  { %1372 = vmatpush.msrb.mxu0 %v7544_v33  ;;  %1392 = vmatpush.msrb.mxu1 %v7545_v43 }
 0x273   :  { %1412 = vmatpush.msrb.mxu2 %v5486_v42  ;;  %1432 = vmatpush.msrb.mxu3 %v5491_v57 }
 0x274   :  { %1373 = vmatpush.msrb.mxu0 %v5498_v37  ;;  %1393 = vmatpush.msrb.mxu1 %v5503_v11 }
 0x275   :  { %1413 = vmatpush.msrb.mxu2 %v5512_v15  ;;  %1433 = vmatpush.msrb.mxu3 %v5517_v12 }
 0x2d1   :  { %v905_v48 = vpop.f32.mrf.mxu1  ;;  %v885_v13 = vpop.f32.mrf.mxu0 }
 0x2d2   :  { %v952_v61 = vrot.slane %v905_v48, 6 }
 0x2d4   :  { %v955_v14 = vsel %vm217_vm1, %v885_v13, %v952_v61 }
 0x2d8   :  { %v925_v37 = vpop.f32.mrf.mxu2  ;;  %v945_v2 = vpop.f32.mrf.mxu3 }
 0x2d9   :  { %v953_v3 = vrot.slane %v925_v37, 4  ;;  %v954_v5 = vrot.slane %v945_v2, 2 }
 0x2db   :  { %v956_v16 = vsel %vm219_vm2, %v953_v3, %v954_v5  ;;  %v5706_v3 = vld [vmem:[%s7518_s29 + $0x8] sm:$0xff]  }
 0x2dc   :  { %v957_v17 = vsel %vm221_vm3, %v955_v14, %v956_v16 }
 0x2dd   :  { %v959_v21 = vadd.f32 %v957_v17, %v803_v63  ;;  %v1048_v17 = vunpack.c.h.bf16 %v5706_v3 }
 0x2df   :  { %v973_v28 = vadd.f32 %v971_v18, %v959_v21 }
 0x2e1   :  { %v4068_v29 = vmul.f32 -1.442695, %v973_v28  ;;  %v994_v36 = vrot.slane %v973_v28, 2  ;;  %v1018_v38 = vrot.slane %v973_v28, 6  ;;  %v1015_v57 = vrot.slane %v973_v28, 4 }
 0x2e3   :  { %4273 = vpow2.f32 %v4068_v29  ;;  %v4069_v47 = vmul.f32 -1.442695, %v994_v36  ;;  %v4070_v51 = vmul.f32 -1.442695, %v1018_v38 }
 0x2e5   :  { %4275 = vpow2.f32 %v4069_v47 }
 0x2e6   :  { %4277 = vpow2.f32 %v4070_v51 }
 0x2e9   :  { %v4274_v52 = vpop.eup %4273 }
 0x2ea   :  { %v977_v53 = vadd.f32 1.0, %v4274_v52 }
 0x2eb   :  { %v4276_v59 = vpop.eup %4275 }
 0x2ec   :  { %v4278_v60 = vpop.eup %4277  ;;  %4279 = vrcp.f32 %v977_v53  ;;  %v999_v1 = vadd.f32 1.0, %v4276_v59  ;;  %v989_v30 = vand.u32 2147483648, %v977_v53  ;;  %v987_v32 = vand.u32 2147483647, %v977_v53 }
 0x2ed   :  { %v1023_v11 = vadd.f32 1.0, %v4278_v60  ;;  %vm983_vm5 = vweird.f32 %v977_v53 }
 0x2ee   :  { %4281 = vrcp.f32 %v999_v1  ;;  %v1011_v25 = vand.u32 2147483648, %v999_v1  ;;  %v1009_v44 = vand.u32 2147483647, %v999_v1  ;;  %v990_v39 = vor.u32 1.1754944e-38, %v989_v30 }
 0x2ef   :  { %4283 = vrcp.f32 %v1023_v11  ;;  %vm988_vm8 = vcmp.eq.f32.partialorder %v987_v32, 8.507059e+37  ;;  %vm1005_vm9 = vweird.f32 %v999_v1  ;;  %v1035_v46 = vand.u32 2147483648, %v1023_v11 }
 0x2f0   :  { %4285 = vtanh.f32 %v1015_v57  ;;  %v1012_v0 = vor.u32 1.1754944e-38, %v1011_v25  ;;  %vm1010_vm11 = vcmp.eq.f32.partialorder %v1009_v44, 8.507059e+37  ;;  %vm1029_vm13 = vweird.f32 %v1023_v11 }
 0x2f1   :  { %v1033_v48 = vand.u32 2147483647, %v1023_v11  ;;  %v1036_v54 = vor.u32 1.1754944e-38, %v1035_v46 }
 0x2f2   :  { %v4280_v12 = vpop.eup %4279 }
 0x2f3   :  { %v979_v15 = vmul.f32 %v4280_v12, %v977_v53  ;;  %vm984_vm4 = vweird.f32 %v4280_v12  ;;  %vm1034_vm15 = vcmp.eq.f32.partialorder %v1033_v48, 8.507059e+37 }
 0x2f4   :  { %v4282_v42 = vpop.eup %4281  ;;  %vm985_vm7 = vmor %vm983_vm5, %vm984_vm4 }
 0x2f5   :  { %v4284_v26 = vpop.eup %4283  ;;  %v980_v23 = vsub.f32 1.0, %v979_v15  ;;  %v1001_v41 = vmul.f32 %v4282_v42, %v999_v1  ;;  %vm1006_vm6 = vweird.f32 %v4282_v42 }
 0x2f6   :  { %v1025_v7 = vmul.f32 %v4284_v26, %v1023_v11  ;;  %vm1007_vm10 = vmor %vm1005_vm9, %vm1006_vm6  ;;  %v4286_v20 = vpop.eup %4285  ;;  %vm1030_vm12 = vweird.f32 %v4284_v26 }
 0x2f7   :  { %v1002_v4 = vsub.f32 1.0, %v1001_v41  ;;  %v981_v27 = vmul.f32 %v4280_v12, %v980_v23  ;;  %vm1031_vm14 = vmor %vm1029_vm13, %vm1030_vm12 }
 0x2f8   :  { %v1026_v40 = vsub.f32 1.0, %v1025_v7 }
 0x2f9   :  { %v982_v33 = vadd.f32 %v4280_v12, %v981_v27  ;;  %v1003_v43 = vmul.f32 %v4282_v42, %v1002_v4 }
 0x2fa   :  { %v1027_v58 = vmul.f32 %v4284_v26, %v1026_v40 }
 0x2fb   :  { %v986_v49 = vsel %vm985_vm7, %v4280_v12, %v982_v33  ;;  %v1004_v10 = vadd.f32 %v4282_v42, %v1003_v43 }
 0x2fc   :  { %v991_v6 = vsel %vm988_vm8, %v990_v39, %v986_v49  ;;  %v1028_v45 = vadd.f32 %v4284_v26, %v1027_v58 }
 0x2fd   :  { %v1008_v19 = vsel %vm1007_vm10, %v4282_v42, %v1004_v10  ;;  %v1040_v34 = vmul.f32 %v4286_v20, %v991_v6 }
 0x2fe   :  { %v1013_v24 = vsel %vm1010_vm11, %v1012_v0, %v1008_v19  ;;  %v1032_v50 = vsel %vm1031_vm14, %v4284_v26, %v1028_v45 }
 0x2ff   :  { %v1039_v31 = vmul.f32 %v1013_v24, %v5587_v22  ;;  %v1037_v56 = vsel %vm1034_vm15, %v1036_v54, %v1032_v50  ;;  %v1205_v22 = vld [vmem:[%s7517_s27] sm:$0xf] }
 0x300   :  { %v1208_v37 = vperm.slane %v1205_v22, 1  ;;  %v1209_v62 = vperm.slane %v1205_v22, 2  ;;  %v1210_v63 = vperm.slane %v1205_v22, 3  ;;  %v1207_v5 = vperm.slane %v1205_v22, 0 }
 0x301   :  { %v5697_v35 = vadd.f32 %v1040_v34, %v1039_v31 }
 0x302   :  { %v1211_v8 = vrot.slane %v1208_v37, 6  ;;  %v1212_v9 = vrot.slane %v1209_v62, 4  ;;  %v1213_v13 = vrot.slane %v1210_v63, 2 }
 0x303   :  { %4287 = vtanh.f32 %v5697_v35 }
 0x304   :  { %v1214_v29 = vsel %vm217_vm1, %v1207_v5, %v1211_v8  ;;  %v1215_v36 = vsel %vm219_vm2, %v1212_v9, %v1213_v13 }
 0x305   :  { %v1216_v53 = vsel %vm221_vm3, %v1214_v29, %v1215_v36  ;;  %v5754_v29 = vld [vmem:[%s7513_s26 + $0x1c8] sm:$0xff]  ;;  %v5759_v36 = vld [vmem:[%s7513_s26 + $0x1d0] sm:$0xff] }
 0x309   :  { %v4288_v55 = vpop.eup %4287 }
 0x30a   :  { %v1043_v61 = vmul.f32 %v4288_v55, %v1037_v56 }
 0x30c   :  { %1045 = vst [vmem:[#allocation2 + $0x8] sm:$0x3] %v1043_v61  ;;  %1129 = vmatmul.f32.vlgmr.msra.gmra.mxu0 %v1043_v61  ;;  %1149 = vmatmul.f32.vlgmr.msra.gmra.mxu1 %v1043_v61 }
 0x30d   :  { %1169 = vmatmul.f32.vlgmr.msra.gmra.mxu2 %v1043_v61  ;;  %1189 = vmatmul.f32.vlgmr.msra.gmra.mxu3 %v1043_v61 }
 0x389   :  { %v1150_v2 = vpop.f32.mrf.mxu1  ;;  %v1130_v38 = vpop.f32.mrf.mxu0 }
 0x38a   :  { %v1197_v14 = vrot.slane %v1150_v2, 6 }
 0x38c   :  { %v1200_v47 = vsel %vm217_vm1, %v1130_v38, %v1197_v14  ;;  %v5766_v38 = vld [vmem:[%s7513_s26 + $0x1d8] sm:$0xff] }
 0x390   :  { %v1170_v16 = vpop.f32.mrf.mxu2  ;;  %v1190_v18 = vpop.f32.mrf.mxu3 }
 0x391   :  { %v1198_v21 = vrot.slane %v1170_v16, 4  ;;  %v1199_v28 = vrot.slane %v1190_v18, 2  ;;  %v5727_v16 = vld [vmem:[%s7513_s26 + $0x1e8] sm:$0xff]  ;;  %v1450_v18 = vld [vmem:[%s7517_s27] sm:$0xf] }
 0x392   :  { %1623 = vmatpush.msra.mxu1 %v5727_v16 }
 0x393   :  { %v1201_v51 = vsel %vm219_vm2, %v1198_v21, %v1199_v28  ;;  %v5742_v21 = vld [vmem:[%s7513_s26 + $0x1f8] sm:$0xff]  ;;  %v5749_v28 = vld [vmem:[%s7513_s26 + $0x1c0] sm:$0xff] }
 0x394   :  { %v1202_v52 = vsel %vm221_vm3, %v1200_v47, %v1201_v51  ;;  %1663 = vmatpush.msra.mxu3 %v5742_v21  ;;  %1624 = vmatpush.msra.mxu1 %v5754_v29  ;;  %v1453_v47 = vperm.slane %v1450_v18, 1  ;;  %v1454_v51 = vperm.slane %v1450_v18, 2 }
 0x395   :  { %v1204_v59 = vadd.f32 %v1202_v52, %v1048_v17  ;;  %v5732_v17 = vld [vmem:[%s7513_s26 + $0x1f0] sm:$0xff]  ;;  %v1455_v52 = vperm.slane %v1450_v18, 3 }
 0x396   :  { %1643 = vmatpush.msra.mxu2 %v5732_v17  ;;  %1664 = vmatpush.msra.mxu3 %v5766_v38 }
 0x397   :  { %v1218_v60 = vadd.f32 %v1216_v53, %v1204_v59  ;;  %v5773_v53 = vld [vmem:[%s7513_s26 + $0x1a0] sm:$0xff]  ;;  %v5778_v59 = vld [vmem:[%s7513_s26 + $0x1a8] sm:$0xff] }
 0x398   :  { %1644 = vmatpush.msra.mxu2 %v5759_v36  ;;  %1625 = vmatpush.msra.mxu1 %v5778_v59 }
 0x399   :  { %v4072_v1 = vmul.f32 -1.442695, %v1218_v60  ;;  %v1239_v11 = vrot.slane %v1218_v60, 2  ;;  %v1263_v12 = vrot.slane %v1218_v60, 6  ;;  %v1260_v25 = vrot.slane %v1218_v60, 4  ;;  %v5783_v60 = vld [vmem:[%s7513_s26 + $0x1b0] sm:$0xff] }
 0x39a   :  { %1645 = vmatpush.msra.mxu2 %v5783_v60 }
 0x39b   :  { %4289 = vpow2.f32 %v4072_v1  ;;  %v4073_v15 = vmul.f32 -1.442695, %v1239_v11  ;;  %v4074_v42 = vmul.f32 -1.442695, %v1263_v12  ;;  %v5790_v1 = vld [vmem:[%s7513_s26 + $0x1b8] sm:$0xff]  ;;  %v5797_v11 = vld [vmem:[%s7513_s26 + $0x180] sm:$0xff] }
 0x39c   :  { %1665 = vmatpush.msra.mxu3 %v5790_v1  ;;  %v5802_v12 = vld [vmem:[%s7513_s26 + $0x188] sm:$0xff] }
 0x39d   :  { %4291 = vpow2.f32 %v4073_v15  ;;  %v5807_v15 = vld [vmem:[%s7513_s26 + $0x190] sm:$0xff]  ;;  %1626 = vmatpush.msra.mxu1 %v5802_v12 }
 0x39e   :  { %4293 = vpow2.f32 %v4074_v42  ;;  %1646 = vmatpush.msra.mxu2 %v5807_v15 }
 0x3a1   :  { %v4290_v57 = vpop.eup %4289 }
 0x3a2   :  { %v1222_v26 = vadd.f32 1.0, %v4290_v57  ;;  %v1452_v57 = vperm.slane %v1450_v18, 0 }
 0x3a3   :  { %v4292_v23 = vpop.eup %4291 }
 0x3a4   :  { %v4294_v41 = vpop.eup %4293  ;;  %4295 = vrcp.f32 %v1222_v26  ;;  %v1244_v30 = vadd.f32 1.0, %v4292_v23  ;;  %v1234_v39 = vand.u32 2147483648, %v1222_v26  ;;  %v1232_v6 = vand.u32 2147483647, %v1222_v26 }
 0x3a5   :  { %v1268_v7 = vadd.f32 1.0, %v4294_v41  ;;  %vm1228_vm5 = vweird.f32 %v1222_v26  ;;  %v1456_v23 = vrot.slane %v1453_v47, 6  ;;  %v1457_v41 = vrot.slane %v1454_v51, 4  ;;  %v5970_v47 = vld [vmem:[%s7513_s26 + $0xa0] sm:$0xff]  ;;  %v5975_v51 = vld [vmem:[%s7513_s26 + $0xa8] sm:$0xff] }
 0x3a6   :  { %4297 = vrcp.f32 %v1244_v30  ;;  %v1256_v0 = vand.u32 2147483648, %v1244_v30  ;;  %v1254_v24 = vand.u32 2147483647, %v1244_v30  ;;  %v1235_v58 = vor.u32 1.1754944e-38, %v1234_v39 }
 0x3a7   :  { %4299 = vrcp.f32 %v1268_v7  ;;  %vm1233_vm8 = vcmp.eq.f32.partialorder %v1232_v6, 8.507059e+37  ;;  %vm1250_vm9 = vweird.f32 %v1244_v30  ;;  %v1280_v63 = vand.u32 2147483648, %v1268_v7  ;;  %v5868_v6 = vld [vmem:[%s7513_s26 + $0x120] sm:$0xff] }
 0x3a8   :  { %4301 = vtanh.f32 %v1260_v25  ;;  %v1257_v48 = vor.u32 1.1754944e-38, %v1256_v0  ;;  %vm1255_vm11 = vcmp.eq.f32.partialorder %v1254_v24, 8.507059e+37  ;;  %vm1274_vm13 = vweird.f32 %v1268_v7  ;;  %v5873_v0 = vld [vmem:[%s7513_s26 + $0x128] sm:$0xff] }
 0x3a9   :  { %v1278_v2 = vand.u32 2147483647, %v1268_v7  ;;  %v1281_v8 = vor.u32 1.1754944e-38, %v1280_v63  ;;  %v5932_v63 = vld [vmem:[%s7513_s26 + $0xf0] sm:$0xff] }
 0x3aa   :  { %v4296_v4 = vpop.eup %4295 }
 0x3ab   :  { %v1224_v27 = vmul.f32 %v4296_v4, %v1222_v26  ;;  %vm1229_vm4 = vweird.f32 %v4296_v4  ;;  %vm1279_vm15 = vcmp.eq.f32.partialorder %v1278_v2, 8.507059e+37  ;;  %v5814_v26 = vld [vmem:[%s7513_s26 + $0x198] sm:$0xff] }
 0x3ac   :  { %v4298_v32 = vpop.eup %4297  ;;  %vm1230_vm7 = vmor %vm1228_vm5, %vm1229_vm4  ;;  %1666 = vmatpush.msra.mxu3 %v5814_v26  ;;  %v5937_v2 = vld [vmem:[%s7513_s26 + $0xf8] sm:$0xff] }
 0x3ad   :  { %v4300_v33 = vpop.eup %4299  ;;  %v1225_v43 = vsub.f32 1.0, %v1224_v27  ;;  %v1246_v44 = vmul.f32 %v4298_v32, %v1244_v30  ;;  %vm1251_vm6 = vweird.f32 %v4298_v32  ;;  %v1458_v30 = vrot.slane %v1455_v52, 2  ;;  %v5831_v27 = vld [vmem:[%s7513_s26 + $0x170] sm:$0xff] }
 0x3ae   :  { %v1270_v40 = vmul.f32 %v4300_v33, %v1268_v7  ;;  %vm1252_vm10 = vmor %vm1250_vm9, %vm1251_vm6  ;;  %v4302_v54 = vpop.eup %4301  ;;  %vm1275_vm12 = vweird.f32 %v4300_v33  ;;  %v5821_v7 = vld [vmem:[%s7513_s26 + $0x160] sm:$0xff]  ;;  %1647 = vmatpush.msra.mxu2 %v5831_v27  ;;  %v5982_v52 = vld [vmem:[%s7513_s26 + $0xb0] sm:$0xff] }
 0x3af   :  { %v1247_v49 = vsub.f32 1.0, %v1246_v44  ;;  %v1226_v10 = vmul.f32 %v4296_v4, %v1225_v43  ;;  %vm1276_vm14 = vmor %vm1274_vm13, %vm1275_vm12  ;;  %v5850_v43 = vld [vmem:[%s7513_s26 + $0x148] sm:$0xff]  ;;  %v5855_v44 = vld [vmem:[%s7513_s26 + $0x150] sm:$0xff]  ;;  %v1460_v24 = vsel %vm219_vm2, %v1457_v41, %v1458_v30 }
 0x3b0   :  { %v1271_v31 = vsub.f32 1.0, %v1270_v40  ;;  %v1293_v40 = vunpack.c.l.bf16 %v5706_v3  ;;  %1648 = vmatpush.msra.mxu2 %v5855_v44  ;;  %v5997_v30 = vld [vmem:[%s7513_s26 + $0x80] sm:$0xff] }
 0x3b1   :  { %v1227_v19 = vadd.f32 %v4296_v4, %v1226_v10  ;;  %v1248_v20 = vmul.f32 %v4298_v32, %v1247_v49  ;;  %v5863_v10 = vld [vmem:[%s7513_s26 + $0x158] sm:$0xff] }
 0x3b2   :  { %v1272_v56 = vmul.f32 %v4300_v33, %v1271_v31  ;;  %v5887_v31 = vld [vmem:[%s7513_s26 + $0x138] sm:$0xff] }
 0x3b3   :  { %v1231_v34 = vsel %vm1230_vm7, %v4296_v4, %v1227_v19  ;;  %v1249_v45 = vadd.f32 %v4298_v32, %v1248_v20  ;;  %v5826_v4 = vld [vmem:[%s7513_s26 + $0x168] sm:$0xff]  ;;  %v1459_v20 = vsel %vm217_vm1, %v1452_v57, %v1456_v23 }
 0x3b4   :  { %v1236_v46 = vsel %vm1233_vm8, %v1235_v58, %v1231_v34  ;;  %v1273_v62 = vadd.f32 %v4300_v33, %v1272_v56  ;;  %1627 = vmatpush.msra.mxu1 %v5826_v4  ;;  %v5882_v58 = vld [vmem:[%s7513_s26 + $0x130] sm:$0xff]  ;;  %v5892_v34 = vld [vmem:[%s7513_s26 + $0x100] sm:$0xff] }
 0x3b5   :  { %v1253_v50 = vsel %vm1252_vm10, %v4298_v32, %v1249_v45  ;;  %v1285_v22 = vmul.f32 %v4302_v54, %v1236_v46  ;;  %v5838_v32 = vld [vmem:[%s7513_s26 + $0x178] sm:$0xff]  ;;  %v5899_v46 = vld [vmem:[%s7513_s26 + $0x108] sm:$0xff]  ;;  %1649 = vmatpush.msra.mxu2 %v5882_v58  ;;  %v5918_v56 = vld [vmem:[%s7513_s26 + $0xe0] sm:$0xff] }
 0x3b6   :  { %v1258_v55 = vsel %vm1255_vm11, %v1257_v48, %v1253_v50  ;;  %v1277_v5 = vsel %vm1276_vm14, %v4300_v33, %v1273_v62  ;;  %1667 = vmatpush.msra.mxu3 %v5838_v32  ;;  %v5845_v33 = vld [vmem:[%s7513_s26 + $0x140] sm:$0xff]  ;;  %1628 = vmatpush.msra.mxu1 %v5850_v43  ;;  %v5904_v48 = vld [vmem:[%s7513_s26 + $0x110] sm:$0xff]  ;;  %v5909_v50 = vld [vmem:[%s7513_s26 + $0x118] sm:$0xff]  ;;  %v1461_v62 = vsel %vm221_vm3, %v1459_v20, %v1460_v24 }
 0x3b7   :  { %v1284_v61 = vmul.f32 %v1258_v55, %v5697_v35  ;;  %v1282_v13 = vsel %vm1279_vm15, %v1281_v8, %v1277_v5  ;;  %v5722_v35 = vld [vmem:[%s7513_s26 + $0x1e0] sm:$0xff]  ;;  %1650 = vmatpush.msra.mxu2 %v5904_v48  ;;  %v6026_v20 = vld [vmem:[%s7513_s26 + $0x68] sm:$0xff]  ;;  %v6033_v24 = vld [vmem:[%s7513_s26 + $0x70] sm:$0xff] }
 0x3b8   :  { %1603 = vmatpush.msra.mxu0 %v5722_v35  ;;  %1668 = vmatpush.msra.mxu3 %v5863_v10  ;;  %v5944_v8 = vld [vmem:[%s7513_s26 + $0xc0] sm:$0xff] }
 0x3b9   :  { %v5716_v37 = vadd.f32 %v1285_v22, %v1284_v61  ;;  %1629 = vmatpush.msra.mxu1 %v5873_v0  ;;  %v5923_v61 = vld [vmem:[%s7513_s26 + $0xe8] sm:$0xff]  ;;  %1651 = vmatpush.msra.mxu2 %v5932_v63 }
 0x3ba   :  { %1604 = vmatpush.msra.mxu0 %v5749_v28  ;;  %1669 = vmatpush.msra.mxu3 %v5887_v31 }
 0x3bb   :  { %4303 = vtanh.f32 %v5716_v37  ;;  %1630 = vmatpush.msra.mxu1 %v5899_v46 }
 0x3bc   :  { %1605 = vmatpush.msra.mxu0 %v5773_v53  ;;  %1670 = vmatpush.msra.mxu3 %v5909_v50 }
 0x3bd   :  { %1631 = vmatpush.msra.mxu1 %v5923_v61 }
 0x3be   :  { %1606 = vmatpush.msra.mxu0 %v5797_v11  ;;  %1671 = vmatpush.msra.mxu3 %v5937_v2 }
 0x3c0   :  { %1607 = vmatpush.msra.mxu0 %v5821_v7 }
 0x3c1   :  { %v4304_v9 = vpop.eup %4303 }
 0x3c2   :  { %v1288_v14 = vmul.f32 %v4304_v9, %v1282_v13  ;;  %1608 = vmatpush.msra.mxu0 %v5845_v33  ;;  %v5949_v9 = vld [vmem:[%s7513_s26 + $0xc8] sm:$0xff]  ;;  %v5956_v13 = vld [vmem:[%s7513_s26 + $0xd0] sm:$0xff] }
 0x3c3   :  { %1632 = vmatpush.msra.mxu1 %v5949_v9  ;;  %1652 = vmatpush.msra.mxu2 %v5956_v13 }
 0x3c4   :  { %1290 = vst [vmem:[#allocation2 + $0x6] sm:$0x3] %v1288_v14  ;;  %1374 = vmatmul.f32.vlgmr.msrb.gmra.mxu0 %v1288_v14  ;;  %1394 = vmatmul.f32.vlgmr.msrb.gmra.mxu1 %v1288_v14 }
 0x3c5   :  { %1414 = vmatmul.f32.vlgmr.msrb.gmra.mxu2 %v1288_v14  ;;  %1434 = vmatmul.f32.vlgmr.msrb.gmra.mxu3 %v1288_v14  ;;  %v5961_v14 = vld [vmem:[%s7513_s26 + $0xd8] sm:$0xff] }
 0x3c6   :  { %1609 = vmatpush.msra.mxu0 %v5868_v6  ;;  %1672 = vmatpush.msra.mxu3 %v5961_v14 }
 0x3c7   :  { %1633 = vmatpush.msra.mxu1 %v5975_v51  ;;  %1653 = vmatpush.msra.mxu2 %v5982_v52 }
 0x3c8   :  { %1610 = vmatpush.msra.mxu0 %v5892_v34 }
 0x3ca   :  { %1611 = vmatpush.msra.mxu0 %v5918_v56 }
 0x3cc   :  { %1612 = vmatpush.msra.mxu0 %v5944_v8 }
 0x3ce   :  { %1613 = vmatpush.msra.mxu0 %v5970_v47 }
 0x3d0   :  { %1614 = vmatpush.msra.mxu0 %v5997_v30 }
 0x441   :  { %v1395_v42 = vpop.f32.mrf.mxu1  ;;  %v1375_v45 = vpop.f32.mrf.mxu0 }
 0x442   :  { %v1442_v25 = vrot.slane %v1395_v42, 6  ;;  %v5987_v42 = vld [vmem:[%s7513_s26 + $0xb8] sm:$0xff] }
 0x443   :  { %1673 = vmatpush.msra.mxu3 %v5987_v42 }
 0x444   :  { %v1445_v54 = vsel %vm217_vm1, %v1375_v45, %v1442_v25  ;;  %v6002_v25 = vld [vmem:[%s7513_s26 + $0x88] sm:$0xff]  ;;  %v6038_v45 = vld [vmem:[%s7513_s26 + $0x78] sm:$0xff] }
 0x445   :  { %1634 = vmatpush.msra.mxu1 %v6002_v25  ;;  %7559 = vst [vmem:[#allocation16_spill] sm:$0xff] %v6038_v45 }
 0x447   :  { %1635 = vmatpush.msra.mxu1 %v6026_v20 }
 0x448   :  { %v1415_v39 = vpop.f32.mrf.mxu2  ;;  %v1435_v49 = vpop.f32.mrf.mxu3 }
 0x449   :  { %v1443_v3 = vrot.slane %v1415_v39, 4  ;;  %v1444_v19 = vrot.slane %v1435_v49, 2  ;;  %v6009_v39 = vld [vmem:[%s7513_s26 + $0x90] sm:$0xff] }
 0x44a   :  { %1654 = vmatpush.msra.mxu2 %v6009_v39 }
 0x44b   :  { %v1446_v55 = vsel %vm219_vm2, %v1443_v3, %v1444_v19  ;;  %v6021_v19 = vld [vmem:[%s7513_s26 + $0x60] sm:$0xff] }
 0x44c   :  { %v1447_v22 = vsel %vm221_vm3, %v1445_v54, %v1446_v55  ;;  %v6045_v54 = vld [vmem:[%s7513_s26 + $0x40] sm:$0xff]  ;;  %v6050_v55 = vld [vmem:[%s7513_s26 + $0x48] sm:$0xff]  ;;  %1615 = vmatpush.msra.mxu0 %v6021_v19  ;;  %1655 = vmatpush.msra.mxu2 %v6033_v24 }
 0x44d   :  { %v1449_v5 = vadd.f32 %v1447_v22, %v1293_v40  ;;  %v6014_v40 = vld [vmem:[%s7513_s26 + $0x98] sm:$0xff]  ;;  %7560 = vst [vmem:[#allocation17_spill] sm:$0xff] %v6045_v54  ;;  %v6057_v22 = vld [vmem:[%s7513_s26 + $0x50] sm:$0xff]  ;;  %1636 = vmatpush.msra.mxu1 %v6050_v55 }
 0x44e   :  { %1674 = vmatpush.msra.mxu3 %v6014_v40  ;;  %7561 = vst [vmem:[#allocation18_spill] sm:$0xff] %v6050_v55  ;;  %1616 = vmatpush.msra.mxu0 %v6045_v54  ;;  %v6098_v55 = vld [vmem:[%s7513_s26 + $0x8] sm:$0xff] }
 0x44f   :  { %v5963_v18 = vadd.f32 %v1461_v62, %v1449_v5  ;;  %7562 = vst [vmem:[#allocation19_spill] sm:$0xff] %v6057_v22  ;;  %v6062_v62 = vld [vmem:[%s7513_s26 + $0x58] sm:$0xff]  ;;  %v6069_v5 = vld [vmem:[%s7513_s26 + $0x20] sm:$0xff]  ;;  %1656 = vmatpush.msra.mxu2 %v6057_v22 }
 0x450   :  { %7563 = vst [vmem:[#allocation20_spill] sm:$0xff] %v6062_v62  ;;  %1675 = vmatpush.msra.mxu3 %v6038_v45  ;;  %1617 = vmatpush.msra.mxu0 %v6069_v5  ;;  %v6112_v22 = vld [vmem:[%s7513_s26 + $0x18] sm:$0xff] }
 0x451   :  { %v4076_v57 = vmul.f32 -1.442695, %v5963_v18  ;;  %v1484_v23 = vrot.slane %v5963_v18, 2  ;;  %v1508_v41 = vrot.slane %v5963_v18, 6  ;;  %7564 = vst [vmem:[#allocation21_spill] sm:$0xff] %v6069_v5 }
 0x452   :  { %1676 = vmatpush.msra.mxu3 %v6062_v62  ;;  %v6107_v62 = vld [vmem:[%s7513_s26 + $0x10] sm:$0xff] }
 0x453   :  { %4305 = vpow2.f32 %v4076_v57  ;;  %v4077_v49 = vmul.f32 -1.442695, %v1484_v23  ;;  %v4078_v3 = vmul.f32 -1.442695, %v1508_v41  ;;  %v6074_v57 = vld [vmem:[%s7513_s26 + $0x28] sm:$0xff]  ;;  %v6081_v23 = vld [vmem:[%s7513_s26 + $0x30] sm:$0xff] }
 0x454   :  { %7565 = vst [vmem:[#allocation22_spill] sm:$0xff] %v6074_v57  ;;  %v6086_v41 = vld [vmem:[%s7513_s26 + $0x38] sm:$0xff]  ;;  %1637 = vmatpush.msra.mxu1 %v6074_v57  ;;  %1657 = vmatpush.msra.mxu2 %v6081_v23 }
 0x455   :  { %4307 = vpow2.f32 %v4077_v49  ;;  %1677 = vmatpush.msra.mxu3 %v6086_v41 }
 0x456   :  { %4309 = vpow2.f32 %v4078_v3  ;;  %v6093_v3 = vld [vmem:[%s7513_s26] sm:$0xff]  ;;  %1638 = vmatpush.msra.mxu1 %v6098_v55  ;;  %1658 = vmatpush.msra.mxu2 %v6107_v62  ;;  %s7575_s26 = sld [smem:[#allocation28_spill]] }
 0x457   :  { %1618 = vmatpush.msra.mxu0 %v6093_v3  ;;  %1678 = vmatpush.msra.mxu3 %v6112_v22 }
 0x458   :  { %1867 = vmatpush.msrb.mxu1 %v5727_v16  ;;  %1887 = vmatpush.msrb.mxu2 %v5732_v17  ;;  %v1505_v17 = vrot.slane %v5963_v18, 4  ;;  %v7571_v18 = vld [vmem:[#allocation21_spill] sm:$0xff] }
 0x459   :  { %v4306_v49 = vpop.eup %4305  ;;  %1847 = vmatpush.msrb.mxu0 %v5722_v35  ;;  %1907 = vmatpush.msrb.mxu3 %v5742_v21 }
 0x45a   :  { %v6100_v54 = vadd.f32 1.0, %v4306_v49  ;;  %1868 = vmatpush.msrb.mxu1 %v5754_v29  ;;  %1888 = vmatpush.msrb.mxu2 %v5759_v36 }
 0x45b   :  { %v4308_v45 = vpop.eup %4307  ;;  %1848 = vmatpush.msrb.mxu0 %v5749_v28  ;;  %1908 = vmatpush.msrb.mxu3 %v5766_v38 }
 0x45c   :  { %v4310_v49 = vpop.eup %4309  ;;  %4311 = vrcp.f32 %v6100_v54  ;;  %v6117_v5 = vadd.f32 1.0, %v4308_v45  ;;  %1869 = vmatpush.msrb.mxu1 %v5778_v59  ;;  %1889 = vmatpush.msrb.mxu2 %v5783_v60  ;;  %v1479_v36 = vand.u32 2147483648, %v6100_v54  ;;  %v1477_v60 = vand.u32 2147483647, %v6100_v54 }
 0x45d   :  { %v6121_v57 = vadd.f32 1.0, %v4310_v49  ;;  %1849 = vmatpush.msrb.mxu0 %v5773_v53  ;;  %1909 = vmatpush.msrb.mxu3 %v5790_v1  ;;  %vm1473_vm5 = vweird.f32 %v6100_v54 }
 0x45e   :  { %4313 = vrcp.f32 %v6117_v5  ;;  %1870 = vmatpush.msrb.mxu1 %v5802_v12  ;;  %1890 = vmatpush.msrb.mxu2 %v5807_v15  ;;  %v1501_v1 = vand.u32 2147483648, %v6117_v5  ;;  %v1499_v15 = vand.u32 2147483647, %v6117_v5  ;;  %vm1478_vm8 = vcmp.eq.f32.partialorder %v1477_v60, 8.507059e+37 }
 0x45f   :  { %4315 = vrcp.f32 %v6121_v57  ;;  %1850 = vmatpush.msrb.mxu0 %v5797_v11  ;;  %1910 = vmatpush.msrb.mxu3 %v5814_v26  ;;  %v1480_v26 = vor.u32 1.1754944e-38, %v1479_v36  ;;  %vm1495_vm9 = vweird.f32 %v6117_v5  ;;  %vm1519_vm13 = vweird.f32 %v6121_v57 }
 0x460   :  { %1871 = vmatpush.msrb.mxu1 %v5826_v4  ;;  %1891 = vmatpush.msrb.mxu2 %v5831_v27  ;;  %4317 = vtanh.f32 %v1505_v17  ;;  %vm1500_vm11 = vcmp.eq.f32.partialorder %v1499_v15, 8.507059e+37 }
 0x461   :  { %1851 = vmatpush.msrb.mxu0 %v5821_v7  ;;  %1911 = vmatpush.msrb.mxu3 %v5838_v32 }
 0x462   :  { %v4312_v45 = vpop.eup %4311  ;;  %1872 = vmatpush.msrb.mxu1 %v5850_v43  ;;  %1892 = vmatpush.msrb.mxu2 %v5855_v44 }
 0x463   :  { %v1469_v35 = vmul.f32 %v4312_v45, %v6100_v54  ;;  %vm1474_vm4 = vweird.f32 %v4312_v45  ;;  %1852 = vmatpush.msrb.mxu0 %v5845_v33  ;;  %1912 = vmatpush.msrb.mxu3 %v5863_v10  ;;  %v1502_v33 = vor.u32 1.1754944e-38, %v1501_v1 }
 0x464   :  { %v4314_v16 = vpop.eup %4313  ;;  %vm1475_vm7 = vmor %vm1473_vm5, %vm1474_vm4  ;;  %1873 = vmatpush.msrb.mxu1 %v5873_v0  ;;  %1893 = vmatpush.msrb.mxu2 %v5882_v58 }
 0x465   :  { %v6143_v21 = vpop.eup %4315  ;;  %v1470_v28 = vsub.f32 1.0, %v1469_v35  ;;  %v1491_v29 = vmul.f32 %v4314_v16, %v6117_v5  ;;  %vm1496_vm6 = vweird.f32 %v4314_v16  ;;  %1853 = vmatpush.msrb.mxu0 %v5868_v6  ;;  %1913 = vmatpush.msrb.mxu3 %v5887_v31 }
 0x466   :  { %v1515_v38 = vmul.f32 %v6143_v21, %v6121_v57  ;;  %vm1497_vm10 = vmor %vm1495_vm9, %vm1496_vm6  ;;  %1874 = vmatpush.msrb.mxu1 %v5899_v46  ;;  %1894 = vmatpush.msrb.mxu2 %v5904_v48  ;;  %v4318_v44 = vpop.eup %4317  ;;  %vm1520_vm12 = vweird.f32 %v6143_v21  ;;  %v1523_v46 = vand.u32 2147483647, %v6121_v57 }
 0x467   :  { %v1492_v53 = vsub.f32 1.0, %v1491_v29  ;;  %v1471_v59 = vmul.f32 %v4312_v45, %v1470_v28  ;;  %1854 = vmatpush.msrb.mxu0 %v5892_v34  ;;  %1914 = vmatpush.msrb.mxu3 %v5909_v50  ;;  %vm1521_vm14 = vmor %vm1519_vm13, %vm1520_vm12 }
 0x468   :  { %v1516_v7 = vsub.f32 1.0, %v1515_v38  ;;  %1875 = vmatpush.msrb.mxu1 %v5923_v61  ;;  %1895 = vmatpush.msrb.mxu2 %v5932_v63  ;;  %vm1524_vm15 = vcmp.eq.f32.partialorder %v1523_v46, 8.507059e+37  ;;  %v7567_v61 = vld [vmem:[#allocation17_spill] sm:$0xff]  ;;  %v7568_v63 = vld [vmem:[#allocation18_spill] sm:$0xff] }
 0x469   :  { %v1472_v11 = vadd.f32 %v4312_v45, %v1471_v59  ;;  %v1493_v12 = vmul.f32 %v4314_v16, %v1492_v53  ;;  %1855 = vmatpush.msrb.mxu0 %v5918_v56  ;;  %1915 = vmatpush.msrb.mxu3 %v5937_v2  ;;  %v7566_v56 = vld [vmem:[#allocation16_spill] sm:$0xff] }
 0x46a   :  { %v1517_v6 = vmul.f32 %v6143_v21, %v1516_v7  ;;  %1876 = vmatpush.msrb.mxu1 %v5949_v9  ;;  %1896 = vmatpush.msrb.mxu2 %v5956_v13  ;;  %v7569_v9 = vld [vmem:[#allocation19_spill] sm:$0xff]  ;;  %v7570_v13 = vld [vmem:[#allocation20_spill] sm:$0xff]  ;;  %v6237_v7 = vld [vmem:[%s7573_s2] sm:$0xff] }
 0x46b   :  { %v1476_v4 = vsel %vm1475_vm7, %v4312_v45, %v1472_v11  ;;  %v1494_v27 = vadd.f32 %v4314_v16, %v1493_v12  ;;  %1856 = vmatpush.msrb.mxu0 %v5944_v8  ;;  %1916 = vmatpush.msrb.mxu3 %v5961_v14 }
 0x46c   :  { %v1481_v32 = vsel %vm1478_vm8, %v1480_v26, %v1476_v4  ;;  %v1518_v34 = vadd.f32 %v6143_v21, %v1517_v6  ;;  %1877 = vmatpush.msrb.mxu1 %v5975_v51  ;;  %1897 = vmatpush.msrb.mxu2 %v5982_v52  ;;  %v1695_v51 = vld [vmem:[%s7517_s27] sm:$0xf]  ;;  %v6232_v26 = vld [vmem:[%s7573_s2 + $0x8] sm:$0xff] }
 0x46d   :  { %v1498_v43 = vsel %vm1497_vm10, %v4314_v16, %v1494_v27  ;;  %v1530_v58 = vmul.f32 %v4318_v44, %v1481_v32  ;;  %1857 = vmatpush.msrb.mxu0 %v5970_v47  ;;  %1917 = vmatpush.msrb.mxu3 %v5987_v42  ;;  %v7572_v47 = vld [vmem:[#allocation22_spill] sm:$0xff]  ;;  %v1698_v52 = vperm.slane %v1695_v51, 1  ;;  %v1699_v42 = vperm.slane %v1695_v51, 2 }
 0x46e   :  { %v1503_v10 = vsel %vm1500_vm11, %v1502_v33, %v1498_v43  ;;  %1878 = vmatpush.msrb.mxu1 %v6002_v25  ;;  %1898 = vmatpush.msrb.mxu2 %v6009_v39  ;;  %v1522_v48 = vsel %vm1521_vm14, %v6143_v21, %v1518_v34  ;;  %v4079_v39 = vld [vmem:[%s7518_s29 + $0x4] sm:$0xf] }
 0x46f   :  { %v1529_v0 = vmul.f32 %v1503_v10, %v5716_v37  ;;  %v1525_v37 = vand.u32 2147483648, %v6121_v57  ;;  %1858 = vmatpush.msrb.mxu0 %v5997_v30  ;;  %1918 = vmatpush.msrb.mxu3 %v6014_v40  ;;  %v1700_v30 = vperm.slane %v1695_v51, 3  ;;  %v1697_v40 = vperm.slane %v1695_v51, 0 }
 0x470   :  { %1879 = vmatpush.msrb.mxu1 %v6026_v20  ;;  %1899 = vmatpush.msrb.mxu2 %v6033_v24  ;;  %v1702_v20 = vrot.slane %v1699_v42, 4 }
 0x471   :  { %v6182_v31 = vadd.f32 %v1530_v58, %v1529_v0  ;;  %1859 = vmatpush.msrb.mxu0 %v6021_v19  ;;  %v1526_v50 = vor.u32 1.1754944e-38, %v1525_v37  ;;  %1919 = vmatpush.msrb.mxu3 %v7566_v56  ;;  %v1701_v19 = vrot.slane %v1698_v52, 6  ;;  %v1703_v24 = vrot.slane %v1700_v30, 2 }
 0x472   :  { %1880 = vmatpush.msrb.mxu1 %v7568_v63  ;;  %1900 = vmatpush.msrb.mxu2 %v7569_v9 }
 0x473   :  { %4319 = vtanh.f32 %v6182_v31  ;;  %1860 = vmatpush.msrb.mxu0 %v7567_v61  ;;  %v1527_v8 = vsel %vm1524_vm15, %v1526_v50, %v1522_v48  ;;  %1920 = vmatpush.msrb.mxu3 %v7570_v13 }
 0x474   :  { %1881 = vmatpush.msrb.mxu1 %v7572_v47  ;;  %1901 = vmatpush.msrb.mxu2 %v6081_v23  ;;  %v1704_v23 = vsel %vm217_vm1, %v1697_v40, %v1701_v19 }
 0x475   :  { %1861 = vmatpush.msrb.mxu0 %v7571_v18  ;;  %1921 = vmatpush.msrb.mxu3 %v6086_v41  ;;  %v1705_v41 = vsel %vm219_vm2, %v1702_v20, %v1703_v24 }
 0x476   :  { %1882 = vmatpush.msrb.mxu1 %v6098_v55  ;;  %1902 = vmatpush.msrb.mxu2 %v6107_v62  ;;  %v1538_v62 = vunpack.c.l.bf16 %v4079_v39  ;;  %v1706_v16 = vsel %vm221_vm3, %v1704_v23, %v1705_v41  ;;  %v1939_v23 = vld [vmem:[%s7517_s27] sm:$0xf] }
 0x477   :  { %1862 = vmatpush.msrb.mxu0 %v6093_v3  ;;  %1922 = vmatpush.msrb.mxu3 %v6112_v22 }
 0x479   :  { %v4320_v2 = vpop.eup %4319 }
 0x47a   :  { %v1533_v14 = vmul.f32 %v4320_v2, %v1527_v8 }
 0x47c   :  { %1535 = vst [vmem:[#allocation2 + $0x4] sm:$0x3] %v1533_v14  ;;  %1619 = vmatmul.f32.vlgmr.msra.gmra.mxu0 %v1533_v14  ;;  %1639 = vmatmul.f32.vlgmr.msra.gmra.mxu1 %v1533_v14 }
 0x47d   :  { %1659 = vmatmul.f32.vlgmr.msra.gmra.mxu2 %v1533_v14  ;;  %1679 = vmatmul.f32.vlgmr.msra.gmra.mxu3 %v1533_v14 }
 0x47e   :  { %2050 = vmatpush.msra.mxu0 %v6232_v26 }
 0x480   :  { %2051 = vmatpush.msra.mxu0 %v6237_v7 }
 0x4f9   :  { %v1640_v25 = vpop.f32.mrf.mxu1  ;;  %v1620_v3 = vpop.f32.mrf.mxu0 }
 0x4fa   :  { %v1687_v54 = vrot.slane %v1640_v25, 6 }
 0x4fc   :  { %v1690_v49 = vsel %vm217_vm1, %v1620_v3, %v1687_v54  ;;  %v1942_v3 = vperm.slane %v1939_v23, 1 }
 0x500   :  { %v1660_v55 = vpop.f32.mrf.mxu2  ;;  %v1680_v22 = vpop.f32.mrf.mxu3 }
 0x501   :  { %v1688_v5 = vrot.slane %v1660_v55, 4  ;;  %v1689_v57 = vrot.slane %v1680_v22, 2  ;;  %v6255_v22 = vld [vmem:[%s7449_s6 + $0x10] sm:$0xff] }
 0x503   :  { %v1691_v45 = vsel %vm219_vm2, %v1688_v5, %v1689_v57  ;;  %v6261_v5 = vld [vmem:[%s7449_s6 + $0x8] sm:$0xff]  ;;  %v6267_v57 = vld [vmem:[%s7449_s6] sm:$0xff] }
 0x504   :  { %v1692_v35 = vsel %vm221_vm3, %v1690_v49, %v1691_v45  ;;  %v1943_v49 = vperm.slane %v1939_v23, 2  ;;  %v1944_v45 = vperm.slane %v1939_v23, 3 }
 0x505   :  { %v1694_v17 = vadd.f32 %v1692_v35, %v1538_v62  ;;  %v6249_v62 = vld [vmem:[%s7449_s6 + $0x18] sm:$0xff] }
 0x506   :  { %2081 = vmatpush.msra.mxu1 %v6249_v62 }
 0x507   :  { %v1708_v21 = vadd.f32 %v1706_v16, %v1694_v17  ;;  %v1781_v16 = vld [vmem:[%s7518_s29] sm:$0xf]  ;;  %v1941_v17 = vperm.slane %v1939_v23, 0 }
 0x508   :  { %2082 = vmatpush.msra.mxu1 %v6255_v22 }
 0x509   :  { %v4080_v28 = vmul.f32 -1.442695, %v1708_v21  ;;  %v1729_v29 = vrot.slane %v1708_v21, 2  ;;  %v1753_v36 = vrot.slane %v1708_v21, 6  ;;  %v1750_v33 = vrot.slane %v1708_v21, 4 }
 0x50a   :  { %2083 = vmatpush.msra.mxu1 %v6261_v5  ;;  %v1945_v21 = vrot.slane %v1942_v3, 6 }
 0x50b   :  { %4321 = vpow2.f32 %v4080_v28  ;;  %v4081_v38 = vmul.f32 -1.442695, %v1729_v29  ;;  %v4082_v53 = vmul.f32 -1.442695, %v1753_v36  ;;  %v1946_v28 = vrot.slane %v1943_v49, 4 }
 0x50c   :  { %2084 = vmatpush.msra.mxu1 %v6267_v57  ;;  %v1947_v29 = vrot.slane %v1944_v45, 2  ;;  %v4169_v36 = vld [vmem:[%s7575_s26] ss:$0 sm:$0xff] }
 0x50d   :  { %4323 = vpow2.f32 %v4081_v38 }
 0x50e   :  { %4325 = vpow2.f32 %v4082_v53 }
 0x511   :  { %v4322_v59 = vpop.eup %4321 }
 0x512   :  { %v1712_v60 = vadd.f32 1.0, %v4322_v59  ;;  %v1782_v59 = vunpack.c.l.bf16 %v1781_v16 }
 0x513   :  { %v4324_v1 = vpop.eup %4323 }
 0x514   :  { %v4326_v11 = vpop.eup %4325  ;;  %4327 = vrcp.f32 %v1712_v60  ;;  %v1734_v12 = vadd.f32 1.0, %v4324_v1  ;;  %v1724_v6 = vand.u32 2147483648, %v1712_v60  ;;  %v1722_v37 = vand.u32 2147483647, %v1712_v60 }
 0x515   :  { %v1758_v15 = vadd.f32 1.0, %v4326_v11  ;;  %vm1718_vm5 = vweird.f32 %v1712_v60 }
 0x516   :  { %4329 = vrcp.f32 %v1734_v12  ;;  %v1746_v46 = vand.u32 2147483648, %v1734_v12  ;;  %v1744_v56 = vand.u32 2147483647, %v1734_v12  ;;  %v1725_v61 = vor.u32 1.1754944e-38, %v1724_v6 }
 0x517   :  { %4331 = vrcp.f32 %v1758_v15  ;;  %vm1723_vm8 = vcmp.eq.f32.partialorder %v1722_v37, 8.507059e+37  ;;  %vm1740_vm9 = vweird.f32 %v1734_v12  ;;  %v1770_v39 = vand.u32 2147483648, %v1758_v15 }
 0x518   :  { %4333 = vtanh.f32 %v1750_v33  ;;  %v1747_v13 = vor.u32 1.1754944e-38, %v1746_v46  ;;  %vm1745_vm11 = vcmp.eq.f32.partialorder %v1744_v56, 8.507059e+37  ;;  %vm1764_vm13 = vweird.f32 %v1758_v15 }
 0x519   :  { %v1768_v40 = vand.u32 2147483647, %v1758_v15  ;;  %v1771_v20 = vor.u32 1.1754944e-38, %v1770_v39 }
 0x51a   :  { %v4328_v4 = vpop.eup %4327 }
 0x51b   :  { %v1714_v27 = vmul.f32 %v4328_v4, %v1712_v60  ;;  %vm1719_vm4 = vweird.f32 %v4328_v4  ;;  %vm1769_vm15 = vcmp.eq.f32.partialorder %v1768_v40, 8.507059e+37 }
 0x51c   :  { %v4330_v32 = vpop.eup %4329  ;;  %vm1720_vm7 = vmor %vm1718_vm5, %vm1719_vm4  ;;  %vm2065_vm4 = vcmask 261120  }
 0x51d   :  { %v4332_v43 = vpop.eup %4331  ;;  %v1715_v44 = vsub.f32 1.0, %v1714_v27  ;;  %v1736_v10 = vmul.f32 %v4330_v32, %v1734_v12  ;;  %vm1741_vm6 = vweird.f32 %v4330_v32  ;;  %v1948_v12 = vsel %vm217_vm1, %v1941_v17, %v1945_v21 }
 0x51e   :  { %v1760_v0 = vmul.f32 %v4332_v43, %v1758_v15  ;;  %vm1742_vm10 = vmor %vm1740_vm9, %vm1741_vm6  ;;  %v4334_v18 = vpop.eup %4333  ;;  %vm1765_vm12 = vweird.f32 %v4332_v43  ;;  %v1949_v15 = vsel %vm219_vm2, %v1946_v28, %v1947_v29 }
 0x51f   :  { %v1737_v58 = vsub.f32 1.0, %v1736_v10  ;;  %v1716_v34 = vmul.f32 %v4328_v4, %v1715_v44  ;;  %vm1766_vm14 = vmor %vm1764_vm13, %vm1765_vm12  ;;  %v1950_v44 = vsel %vm221_vm3, %v1948_v12, %v1949_v15 }
 0x520   :  { %v1761_v63 = vsub.f32 1.0, %v1760_v0 }
 0x521   :  { %v1717_v48 = vadd.f32 %v4328_v4, %v1716_v34  ;;  %v1738_v50 = vmul.f32 %v4330_v32, %v1737_v58 }
 0x522   :  { %v1762_v51 = vmul.f32 %v4332_v43, %v1761_v63 }
 0x523   :  { %v1721_v2 = vsel %vm1720_vm7, %v4328_v4, %v1717_v48  ;;  %v1739_v8 = vadd.f32 %v4330_v32, %v1738_v50 }
 0x524   :  { %v1726_v9 = vsel %vm1723_vm8, %v1725_v61, %v1721_v2  ;;  %v1763_v25 = vadd.f32 %v4332_v43, %v1762_v51 }
 0x525   :  { %v1743_v14 = vsel %vm1742_vm10, %v4330_v32, %v1739_v8  ;;  %v1775_v42 = vmul.f32 %v4334_v18, %v1726_v9  ;;  %v6289_v9 = vld [vmem:[%s7450_s8 + $0x38] sm:$0xff] }
 0x526   :  { %v1748_v47 = vsel %vm1745_vm11, %v1747_v13, %v1743_v14  ;;  %v1767_v19 = vsel %vm1766_vm14, %v4332_v43, %v1763_v25  ;;  %v6294_v13 = vld [vmem:[%s7450_s8 + $0x30] sm:$0xff]  ;;  %2114 = vmatpush.msra.mxu2 %v6289_v9  ;;  %v6300_v14 = vld [vmem:[%s7450_s8 + $0x28] sm:$0xff]  ;;  %vm2102_vm14 = vcmask 523264  }
 0x527   :  { %v1774_v52 = vmul.f32 %v1748_v47, %v6182_v31  ;;  %v1772_v54 = vsel %vm1769_vm15, %v1771_v20, %v1767_v19  ;;  %v7574_v31 = vmov 0.0   ;;  %vm2032_vm15 = vcmask 130048  }
 0x528   :  { %2115 = vmatpush.msra.mxu2 %v6294_v13 }
 0x529   :  { %v6242_v30 = vadd.f32 %v1775_v42, %v1774_v52 }
 0x52a   :  { %2116 = vmatpush.msra.mxu2 %v6300_v14 }
 0x52b   :  { %4335 = vtanh.f32 %v6242_v30 }
 0x531   :  { %v4336_v24 = vpop.eup %4335 }
 0x532   :  { %v1778_v55 = vmul.f32 %v4336_v24, %v1772_v54 }
 0x534   :  { %1780 = vst [vmem:[#allocation2 + $0x2] sm:$0x3] %v1778_v55  ;;  %1863 = vmatmul.f32.vlgmr.msrb.gmra.mxu0 %v1778_v55  ;;  %1883 = vmatmul.f32.vlgmr.msrb.gmra.mxu1 %v1778_v55 }
 0x535   :  { %1903 = vmatmul.f32.vlgmr.msrb.gmra.mxu2 %v1778_v55  ;;  %1923 = vmatmul.f32.vlgmr.msrb.gmra.mxu3 %v1778_v55 }
 0x53c   :  { %2052 = vmatmul.f32.vlgmr.msra.gmra.mxu0 %v7574_v31 }
 0x5b1   :  { %v1864_v41 = vpop.f32.mrf.mxu0  ;;  %v1884_v35 = vpop.f32.mrf.mxu1 }
 0x5b2   :  { %v1931_v38 = vrot.slane %v1884_v35, 6 }
 0x5b4   :  { %v1934_v32 = vsel %vm217_vm1, %v1864_v41, %v1931_v38 }
 0x5b8   :  { %v1904_v53 = vpop.f32.mrf.mxu2  ;;  %v1924_v60 = vpop.f32.mrf.mxu3 }
 0x5b9   :  { %v1932_v1 = vrot.slane %v1904_v53, 4  ;;  %v1933_v11 = vrot.slane %v1924_v60, 2  ;;  %v2053_v4 = vpop.f32.mrf.mxu0 }
 0x5ba   :  { %v2054_v27 = vadd.f32 %v4169_v36, %v2053_v4 }
 0x5bb   :  { %v1935_v33 = vsel %vm219_vm2, %v1932_v1, %v1933_v11 }
 0x5bc   :  { %v1936_v43 = vsel %vm221_vm3, %v1934_v32, %v1935_v33  ;;  %4337 = vtanh.f32 %v2054_v27  ;;  %v6313_v33 = vld [vmem:[%s7450_s8 + $0x18] sm:$0xff] }
 0x5bd   :  { %v1938_v10 = vadd.f32 %v1936_v43, %v1782_v59  ;;  %v6319_v43 = vld [vmem:[%s7450_s8 + $0x10] sm:$0xff] }
 0x5bf   :  { %v1952_v6 = vadd.f32 %v1950_v44, %v1938_v10  ;;  %v6325_v44 = vld [vmem:[%s7450_s8 + $0x8] sm:$0xff]  ;;  %v6331_v10 = vld [vmem:[%s7450_s8] sm:$0xff] }
 0x5c1   :  { %v4083_v0 = vmul.f32 -1.442695, %v1952_v6  ;;  %v1973_v58 = vrot.slane %v1952_v6, 2  ;;  %v1997_v34 = vrot.slane %v1952_v6, 6  ;;  %v1994_v42 = vrot.slane %v1952_v6, 4  ;;  %v6337_v6 = vld [vmem:[%s7452_s10 + $0x78] sm:$0xff] }
 0x5c2   :  { %v4338_v37 = vpop.eup %4337  ;;  %2150 = vmatpush.msra.mxu3 %v6337_v6 }
 0x5c3   :  { %4339 = vpow2.f32 %v4083_v0  ;;  %v4084_v46 = vmul.f32 -1.442695, %v1973_v58  ;;  %v4085_v48 = vmul.f32 -1.442695, %v1997_v34  ;;  %4086 = vmatmul.msk.f32.vlgmr.msra.gmra.mxu1 %vm2065_vm4, %v4338_v37  ;;  %v6342_v0 = vld [vmem:[%s7452_s10 + $0x70] sm:$0xff]  ;;  %v6349_v58 = vld [vmem:[%s7452_s10 + $0x68] sm:$0xff] }
 0x5c4   :  { %2151 = vmatpush.msra.mxu3 %v6342_v0  ;;  %v6356_v34 = vld [vmem:[%s7452_s10 + $0x60] sm:$0xff]  ;;  %v6363_v37 = vld [vmem:[%s7452_s10 + $0x58] sm:$0xff] }
 0x5c5   :  { %4341 = vpow2.f32 %v4084_v46  ;;  %v6370_v46 = vld [vmem:[%s7452_s10 + $0x50] sm:$0xff] }
 0x5c6   :  { %4343 = vpow2.f32 %v4085_v48  ;;  %2152 = vmatpush.msra.mxu3 %v6349_v58  ;;  %v6377_v48 = vld [vmem:[%s7452_s10 + $0x48] sm:$0xff] }
 0x5c8   :  { %2153 = vmatpush.msra.mxu3 %v6356_v34 }
 0x5c9   :  { %v4340_v50 = vpop.eup %4339 }
 0x5ca   :  { %v1956_v56 = vadd.f32 1.0, %v4340_v50  ;;  %2154 = vmatpush.msra.mxu3 %v6363_v37  ;;  %v6384_v50 = vld [vmem:[%s7452_s10 + $0x40] sm:$0xff] }
 0x5cb   :  { %v4342_v61 = vpop.eup %4341 }
 0x5cc   :  { %v4344_v63 = vpop.eup %4343  ;;  %4345 = vrcp.f32 %v1956_v56  ;;  %v1978_v2 = vadd.f32 1.0, %v4342_v61  ;;  %v1968_v19 = vand.u32 2147483648, %v1956_v56  ;;  %v1966_v24 = vand.u32 2147483647, %v1956_v56  ;;  %2155 = vmatpush.msra.mxu3 %v6370_v46  ;;  %v4170_v61 = vld [vmem:[%s7448_s7] ss:$0 sm:$0xff] }
 0x5cd   :  { %v2002_v8 = vadd.f32 1.0, %v4344_v63  ;;  %vm1962_vm2 = vweird.f32 %v1956_v56 }
 0x5ce   :  { %4347 = vrcp.f32 %v1978_v2  ;;  %v1990_v31 = vand.u32 2147483648, %v1978_v2  ;;  %v1988_v41 = vand.u32 2147483647, %v1978_v2  ;;  %v1969_v49 = vor.u32 1.1754944e-38, %v1968_v19  ;;  %2156 = vmatpush.msra.mxu3 %v6377_v48  ;;  %v6456_v19 = vld [vmem:[%s7454_s12 + $0x30] sm:$0xff] }
 0x5cf   :  { %4349 = vrcp.f32 %v2002_v8  ;;  %vm1967_vm6 = vcmp.eq.f32.partialorder %v1966_v24, 8.507059e+37  ;;  %vm1984_vm7 = vweird.f32 %v1978_v2  ;;  %v2014_v1 = vand.u32 2147483648, %v2002_v8  ;;  %v4171_v24 = vld [vmem:[%s7451_s9] ss:$0 sm:$0xff] }
 0x5d0   :  { %4351 = vtanh.f32 %v1994_v42  ;;  %v1991_v17 = vor.u32 1.1754944e-38, %v1990_v31  ;;  %vm1989_vm9 = vcmp.eq.f32.partialorder %v1988_v41, 8.507059e+37  ;;  %vm2008_vm11 = vweird.f32 %v2002_v8  ;;  %2157 = vmatpush.msra.mxu3 %v6384_v50  ;;  %v6431_v42 = vld [vmem:[%s7452_s10 + $0x10] sm:$0xff] }
 0x5d1   :  { %v2012_v11 = vand.u32 2147483647, %v2002_v8  ;;  %v2015_v15 = vor.u32 1.1754944e-38, %v2014_v1  ;;  %v6553_v1 = vld [vmem:[%s7458_s16 + $0x18] sm:$0xff] }
 0x5d2   :  { %v4346_v18 = vpop.eup %4345 }
 0x5d3   :  { %v1958_v47 = vmul.f32 %v4346_v18, %v1956_v56  ;;  %vm1963_vm1 = vweird.f32 %v4346_v18  ;;  %vm2013_vm13 = vcmp.eq.f32.partialorder %v2012_v11, 8.507059e+37  ;;  %v6391_v56 = vld [vmem:[%s7452_s10 + $0x38] sm:$0xff]  ;;  %v6558_v11 = vld [vmem:[%s7458_s16 + $0x10] sm:$0xff] }
 0x5d4   :  { %v4348_v51 = vpop.eup %4347  ;;  %vm1964_vm3 = vmor %vm1962_vm2, %vm1963_vm1  ;;  %2158 = vmatpush.msra.mxu3 %v6391_v56 }
 0x5d5   :  { %v1959_v52 = vsub.f32 1.0, %v1958_v47  ;;  %v4350_v25 = vpop.eup %4349  ;;  %v1980_v39 = vmul.f32 %v4348_v51, %v1978_v2  ;;  %vm1985_vm5 = vweird.f32 %v4348_v51  ;;  %v6410_v47 = vld [vmem:[%s7452_s10 + $0x28] sm:$0xff] }
 0x5d6   :  { %v2004_v20 = vmul.f32 %v4350_v25, %v2002_v8  ;;  %vm1986_vm8 = vmor %vm1984_vm7, %vm1985_vm5  ;;  %v4352_v28 = vpop.eup %4351  ;;  %vm2009_vm10 = vweird.f32 %v4350_v25 }
 0x5d7   :  { %v1960_v40 = vmul.f32 %v4346_v18, %v1959_v52  ;;  %v1981_v54 = vsub.f32 1.0, %v1980_v39  ;;  %vm2010_vm12 = vmor %vm2008_vm11, %vm2009_vm10  ;;  %v6424_v52 = vld [vmem:[%s7452_s10 + $0x18] sm:$0xff]  ;;  %v6445_v39 = vld [vmem:[%s7452_s10] sm:$0xff] }
 0x5d8   :  { %v2005_v45 = vsub.f32 1.0, %v2004_v20  ;;  %v6464_v20 = vld [vmem:[%s7454_s12 + $0x28] sm:$0xff] }
 0x5d9   :  { %v1961_v55 = vadd.f32 %v4346_v18, %v1960_v40  ;;  %v1982_v23 = vmul.f32 %v4348_v51, %v1981_v54  ;;  %v6451_v40 = vld [vmem:[%s7454_s12 + $0x38] sm:$0xff] }
 0x5da   :  { %v2006_v36 = vmul.f32 %v4350_v25, %v2005_v45  ;;  %2194 = vmatpush.msrb.mxu0 %v6451_v40  ;;  %v6482_v45 = vld [vmem:[%s7454_s12 + $0x18] sm:$0xff] }
 0x5db   :  { %v1965_v3 = vsel %vm1964_vm3, %v4346_v18, %v1961_v55  ;;  %v1983_v35 = vadd.f32 %v4348_v51, %v1982_v23  ;;  %v6405_v18 = vld [vmem:[%s7452_s10 + $0x30] sm:$0xff] }
 0x5dc   :  { %v1970_v16 = vsel %vm1967_vm6, %v1969_v49, %v1965_v3  ;;  %v2007_v60 = vadd.f32 %v4350_v25, %v2006_v36  ;;  %2159 = vmatpush.msra.mxu3 %v6405_v18  ;;  %2195 = vmatpush.msrb.mxu0 %v6456_v19  ;;  %v6477_v49 = vld [vmem:[%s7454_s12 + $0x20] sm:$0xff] }
 0x5dd   :  { %v1987_v21 = vsel %vm1986_vm8, %v4348_v51, %v1983_v35  ;;  %v2019_v53 = vmul.f32 %v4352_v28, %v1970_v16  ;;  %v6417_v51 = vld [vmem:[%s7452_s10 + $0x20] sm:$0xff]  ;;  %v6488_v35 = vld [vmem:[%s7454_s12 + $0x10] sm:$0xff]  ;;  %v6494_v16 = vld [vmem:[%s7454_s12 + $0x8] sm:$0xff] }
 0x5de   :  { %v1992_v29 = vsel %vm1989_vm9, %v1991_v17, %v1987_v21  ;;  %v2011_v12 = vsel %vm2010_vm12, %v4350_v25, %v2007_v60  ;;  %2160 = vmatpush.msra.mxu3 %v6410_v47  ;;  %v6438_v25 = vld [vmem:[%s7452_s10 + $0x8] sm:$0xff]  ;;  %2196 = vmatpush.msrb.mxu0 %v6464_v20  ;;  %v6500_v17 = vld [vmem:[%s7454_s12] sm:$0xff] }
 0x5df   :  { %v2018_v38 = vmul.f32 %v1992_v29, %v6242_v30  ;;  %v2016_v27 = vsel %vm2013_vm13, %v2015_v15, %v2011_v12  ;;  %v6308_v30 = vld [vmem:[%s7450_s8 + $0x20] sm:$0xff]  ;;  %v6566_v12 = vld [vmem:[%s7458_s16 + $0x8] sm:$0xff] }
 0x5e0   :  { %2117 = vmatpush.msra.mxu2 %v6308_v30  ;;  %2161 = vmatpush.msra.mxu3 %v6417_v51  ;;  %v4172_v21 = vld [vmem:[%s7453_s11] ss:$0 sm:$0xff] }
 0x5e1   :  { %v2020_v59 = vadd.f32 %v2019_v53, %v2018_v38  ;;  %2197 = vmatpush.msrb.mxu0 %v6477_v49  ;;  %v6523_v38 = vld [vmem:[%s7457_s14 + $0x18] sm:$0xff]  ;;  %v6528_v53 = vld [vmem:[%s7457_s14 + $0x10] sm:$0xff]  ;;  %v6543_v60 = vld [vmem:[%s7457_s14] sm:$0xff] }
 0x5e2   :  { %2118 = vmatpush.msra.mxu2 %v6313_v33  ;;  %2162 = vmatpush.msra.mxu3 %v6424_v52  ;;  %v6572_v15 = vld [vmem:[%s7458_s16] sm:$0xff] }
 0x5e3   :  { %4353 = vtanh.f32 %v2020_v59  ;;  %2198 = vmatpush.msrb.mxu0 %v6482_v45  ;;  %2230 = vmatpush.msrb.mxu1 %v6523_v38  ;;  %v6535_v59 = vld [vmem:[%s7457_s14 + $0x8] sm:$0xff] }
 0x5e4   :  { %2119 = vmatpush.msra.mxu2 %v6319_v43  ;;  %2163 = vmatpush.msra.mxu3 %v6431_v42 }
 0x5e5   :  { %2199 = vmatpush.msrb.mxu0 %v6488_v35  ;;  %2231 = vmatpush.msrb.mxu1 %v6528_v53 }
 0x5e6   :  { %2120 = vmatpush.msra.mxu2 %v6325_v44  ;;  %2164 = vmatpush.msra.mxu3 %v6438_v25 }
 0x5e7   :  { %2200 = vmatpush.msrb.mxu0 %v6494_v16  ;;  %2232 = vmatpush.msrb.mxu1 %v6535_v59 }
 0x5e8   :  { %2121 = vmatpush.msra.mxu2 %v6331_v10  ;;  %2165 = vmatpush.msra.mxu3 %v6445_v39 }
 0x5e9   :  { %v4354_v4 = vpop.eup %4353  ;;  %2201 = vmatpush.msrb.mxu0 %v6500_v17  ;;  %2233 = vmatpush.msrb.mxu1 %v6543_v60 }
 0x5ea   :  { %v2022_v32 = vmul.f32 %v4354_v4, %v2016_v27  ;;  %2398 = vmatpush.msrb.mxu2 %v6337_v6  ;;  %2300 = vmatpush.msrb.mxu3 %v6232_v26  ;;  %v4173_v4 = vld [vmem:[%s7455_s13] ss:$0 sm:$0xff] }
 0x5eb   :  { %2330 = vmatpush.msra.mxu0 %v6249_v62  ;;  %2258 = vmatpush.msra.mxu1 %v6553_v1 }
 0x5ec   :  { %2023 = vst [vmem:[#allocation2] sm:$0x3] %v2022_v32  ;;  %2399 = vmatpush.msrb.mxu2 %v6342_v0  ;;  %2301 = vmatpush.msrb.mxu3 %v6237_v7 }
 0x5ed   :  { %2331 = vmatpush.msra.mxu0 %v6255_v22  ;;  %2259 = vmatpush.msra.mxu1 %v6558_v11 }
 0x5ee   :  { %2400 = vmatpush.msrb.mxu2 %v6349_v58 }
 0x5ef   :  { %2332 = vmatpush.msra.mxu0 %v6261_v5  ;;  %2260 = vmatpush.msra.mxu1 %v6566_v12 }
 0x5f0   :  { %2401 = vmatpush.msrb.mxu2 %v6356_v34 }
 0x5f1   :  { %2333 = vmatpush.msra.mxu0 %v6267_v57  ;;  %2261 = vmatpush.msra.mxu1 %v6572_v15 }
 0x5f2   :  { %2402 = vmatpush.msrb.mxu2 %v6363_v37 }
 0x5f3   :  { %v2127_v23 = vld [vmem:[#allocation2] sm:$0x3] }
 0x5f4   :  { %2403 = vmatpush.msrb.mxu2 %v6370_v46 }
 0x5f6   :  { %2404 = vmatpush.msrb.mxu2 %v6377_v48 }
 0x5f8   :  { %2405 = vmatpush.msrb.mxu2 %v6384_v50 }
 0x5fa   :  { %2406 = vmatpush.msrb.mxu2 %v6391_v56 }
 0x5fc   :  { %2407 = vmatpush.msrb.mxu2 %v6405_v18 }
 0x5fe   :  { %2408 = vmatpush.msrb.mxu2 %v6410_v47 }
 0x600   :  { %2409 = vmatpush.msrb.mxu2 %v6417_v51 }
 0x602   :  { %2410 = vmatpush.msrb.mxu2 %v6424_v52 }
 0x604   :  { %2411 = vmatpush.msrb.mxu2 %v6431_v42 }
 0x606   :  { %2412 = vmatpush.msrb.mxu2 %v6438_v25 }
 0x608   :  { %2413 = vmatpush.msrb.mxu2 %v6445_v39 }
 0x640   :  { %v2086_v63 = vpop.f32.mrf.mxu1 }
 0x641   :  { %v2087_v2 = vadd.f32 %v4170_v61, %v2086_v63  ;;  %v4174_v63 = vld [vmem:[%s7456_s15] ss:$0 sm:$0xff] }
 0x643   :  { %4355 = vtanh.f32 %v2087_v2 }
 0x649   :  { %v4356_v8 = vpop.eup %4355 }
 0x64a   :  { %4087 = vmatmul.msk.f32.vlgmr.msra.gmra.mxu2 %vm2102_vm14, %v4356_v8 }
 0x64b   :  { %2730 = vmatpush.msra.mxu2 %v6523_v38 }
 0x64d   :  { %2731 = vmatpush.msra.mxu2 %v6528_v53 }
 0x64f   :  { %2732 = vmatpush.msra.mxu2 %v6535_v59 }
 0x651   :  { %2733 = vmatpush.msra.mxu2 %v6543_v60 }
 0x6cd   :  { %v2123_v54 = vpop.f32.mrf.mxu2 }
 0x6ce   :  { %v2124_v55 = vadd.f32 %v4171_v24, %v2123_v54  ;;  %v4175_v24 = vld [vmem:[%s7459_s17] ss:$0 sm:$0xff] }
 0x6d0   :  { %4357 = vtanh.f32 %v2124_v55 }
 0x6d6   :  { %v4358_v31 = vpop.eup %4357 }
 0x6d7   :  { %v2128_v41 = vadd.f32 %v4358_v31, %v2127_v23 }
 0x6d9   :  { %v2129_v3 = vmul.f32 0.5, %v2128_v41  ;;  %v2266_v41 = vld [vmem:[%s7462_s1] sm:$0x3] }
 0x6db   :  { %2166 = vmatmul.f32.vlgmr.msra.gmra.mxu3 %v2129_v3 }
 0x6dc   :  { %2478 = vmatpush.msra.mxu3 %v6523_v38 }
 0x6de   :  { %2479 = vmatpush.msra.mxu3 %v6528_v53 }
 0x6e0   :  { %2480 = vmatpush.msra.mxu3 %v6535_v59 }
 0x6e2   :  { %2481 = vmatpush.msra.mxu3 %v6543_v60 }
 0x75e   :  { %v2167_v28 = vpop.f32.mrf.mxu3 }
 0x75f   :  { %v2168_v29 = vadd.f32 %v4172_v21, %v2167_v28 }
 0x761   :  { %4359 = vtanh.f32 %v2168_v29  ;;  %v4176_v29 = vld [vmem:[%s7575_s26] ss:$0 sm:$0xff] }
 0x767   :  { %v4360_v36 = vpop.eup %4359 }
 0x768   :  { %4088 = vmatmul.msk.f32.vlgmr.msrb.gmra.mxu0 %vm2102_vm14, %v4360_v36 }
 0x769   :  { %2442 = vmatpush.msrb.mxu0 %v6451_v40 }
 0x76b   :  { %2443 = vmatpush.msrb.mxu0 %v6456_v19 }
 0x76d   :  { %2444 = vmatpush.msrb.mxu0 %v6464_v20 }
 0x76f   :  { %2445 = vmatpush.msrb.mxu0 %v6477_v49 }
 0x771   :  { %2446 = vmatpush.msrb.mxu0 %v6482_v45 }
 0x773   :  { %2447 = vmatpush.msrb.mxu0 %v6488_v35 }
 0x775   :  { %2448 = vmatpush.msrb.mxu0 %v6494_v16 }
 0x777   :  { %2449 = vmatpush.msrb.mxu0 %v6500_v17 }
 0x7e5   :  { %v2203_v27 = vpop.f32.mrf.mxu0 }
 0x7e6   :  { %v2204_v32 = vadd.f32 %v4173_v4, %v2203_v27 }
 0x7e8   :  { %4361 = vtanh.f32 %v2204_v32 }
 0x7ee   :  { %v4362_v61 = vpop.eup %4361 }
 0x7ef   :  { %4089 = vmatmul.msk.f32.vlgmr.msrb.gmra.mxu1 %vm2065_vm4, %v4362_v61 }
 0x7f0   :  { %2362 = vmatpush.msrb.mxu1 %v6289_v9 }
 0x7f2   :  { %2363 = vmatpush.msrb.mxu1 %v6294_v13 }
 0x7f4   :  { %2364 = vmatpush.msrb.mxu1 %v6300_v14 }
 0x7f6   :  { %2365 = vmatpush.msrb.mxu1 %v6308_v30 }
 0x7f7   :  { %4090 = vmatmul.msk.f32.vlgmr.msra.gmra.mxu1 %vm2065_vm4, %v4362_v61 }
 0x7f8   :  { %2366 = vmatpush.msrb.mxu1 %v6313_v33 }
 0x7fa   :  { %2367 = vmatpush.msrb.mxu1 %v6319_v43 }
 0x7fc   :  { %2368 = vmatpush.msrb.mxu1 %v6325_v44 }
 0x7fe   :  { %2369 = vmatpush.msrb.mxu1 %v6331_v10 }
 0x800   :  { %2506 = vmatpush.msra.mxu1 %v6553_v1 }
 0x802   :  { %2507 = vmatpush.msra.mxu1 %v6558_v11 }
 0x804   :  { %2508 = vmatpush.msra.mxu1 %v6566_v12 }
 0x806   :  { %2509 = vmatpush.msra.mxu1 %v6572_v15 }
 0x86c   :  { %v2235_v2 = vpop.f32.mrf.mxu1 }
 0x86d   :  { %v2236_v8 = vadd.f32 %v4174_v63, %v2235_v2  ;;  %v4178_v63 = vld [vmem:[%s7451_s9] ss:$0 sm:$0xff] }
 0x86f   :  { %2272 = vst.msk [vmem:[%s7460_s20] sm:$0x3] %vm2024_vm0, %v2236_v8 }
 0x874   :  { %v2263_v54 = vpop.f32.mrf.mxu1 }
 0x875   :  { %v2264_v55 = vadd.f32 %v4175_v24, %v2263_v54  ;;  %v2375_v54 = vld [vmem:[#allocation2 + $0x2] sm:$0x3] }
 0x877   :  { %v2267_v31 = vmul.f32 0.5, %v2264_v55  ;;  %2273 = vst.msk [vmem:[%s7461_s21] sm:$0x3] %vm2024_vm0, %v2264_v55 }
 0x879   :  { %v2268_v23 = vmul.f32 1.442695, %v2267_v31 }
 0x87b   :  { %4363 = vpow2.f32 %v2268_v23  ;;  %v4179_v23 = vld [vmem:[%s7453_s11] ss:$0 sm:$0xff] }
 0x881   :  { %v4364_v3 = vpop.eup %4363 }
 0x882   :  { %v2270_v21 = vmul.f32 %v4364_v3, %v2266_v41 }
 0x884   :  { %v2271_v28 = vadd.f32 %v2270_v21, %v2236_v8 }
 0x886   :  { %2274 = vst.msk [vmem:[%s7463_s18] sm:$0x3] %vm2024_vm0, %v2271_v28  ;;  %4092 = vmatmul.msk.f32.vlgmr.msrb.gmra.mxu3 %vm2032_vm15, %v2271_v28 }
 0x887   :  { %4091 = vst.msk [vmem:[%s7514_s22 + $0x2] sm:$0x3] %vm2024_vm0, %v2271_v28  ;;  %2552 = vmatpush.msrb.mxu3 %v6232_v26  ;;  %v4177_v26 = vld [vmem:[%s7448_s7] ss:$0 sm:$0xff] }
 0x888   :  { %v4180_v28 = vld [vmem:[%s7455_s13] ss:$0 sm:$0xff] }
 0x889   :  { %2553 = vmatpush.msrb.mxu3 %v6237_v7 }
 0x909   :  { %v2303_v36 = vpop.f32.mrf.mxu3 }
 0x90a   :  { %v2304_v4 = vadd.f32 %v4176_v29, %v2303_v36 }
 0x90c   :  { %4365 = vtanh.f32 %v2304_v4 }
 0x912   :  { %v4366_v27 = vpop.eup %4365 }
 0x913   :  { %4093 = vmatmul.msk.f32.vlgmr.msra.gmra.mxu0 %vm2065_vm4, %v4366_v27  ;;  %v4181_v27 = vld [vmem:[%s7459_s17] ss:$0 sm:$0xff] }
 0x914   :  { %2582 = vmatpush.msra.mxu0 %v6249_v62 }
 0x916   :  { %2583 = vmatpush.msra.mxu0 %v6255_v22 }
 0x918   :  { %2584 = vmatpush.msra.mxu0 %v6261_v5 }
 0x91a   :  { %2585 = vmatpush.msra.mxu0 %v6267_v57 }
 0x990   :  { %v2335_v7 = vpop.f32.mrf.mxu0 }
 0x991   :  { %v2336_v32 = vadd.f32 %v4177_v26, %v2335_v7 }
 0x993   :  { %4367 = vtanh.f32 %v2336_v32 }
 0x999   :  { %v4368_v61 = vpop.eup %4367 }
 0x99a   :  { %4094 = vmatmul.msk.f32.vlgmr.msrb.gmra.mxu1 %vm2102_vm14, %v4368_v61  ;;  %v4182_v61 = vld [vmem:[%s7456_s15] ss:$0 sm:$0xff] }
 0x99b   :  { %2614 = vmatpush.msrb.mxu1 %v6289_v9 }
 0x99d   :  { %2615 = vmatpush.msrb.mxu1 %v6294_v13 }
 0x99f   :  { %2616 = vmatpush.msrb.mxu1 %v6300_v14 }
 0x9a1   :  { %2617 = vmatpush.msrb.mxu1 %v6308_v30 }
 0x9a3   :  { %2618 = vmatpush.msrb.mxu1 %v6313_v33 }
 0x9a5   :  { %2619 = vmatpush.msrb.mxu1 %v6319_v43 }
 0x9a7   :  { %2620 = vmatpush.msrb.mxu1 %v6325_v44 }
 0x9a9   :  { %2621 = vmatpush.msrb.mxu1 %v6331_v10 }
 0xa17   :  { %v2371_v2 = vpop.f32.mrf.mxu1 }
 0xa18   :  { %v2372_v8 = vadd.f32 %v4178_v63, %v2371_v2 }
 0xa1a   :  { %4369 = vtanh.f32 %v2372_v8 }
 0xa20   :  { %v4370_v24 = vpop.eup %4369 }
 0xa21   :  { %v2376_v55 = vadd.f32 %v4370_v24, %v2375_v54  ;;  %v4098_v24 = vld [vmem:[%s7462_s1 + $0x2] sm:$0x3] }
 0xa23   :  { %v2377_v31 = vmul.f32 0.5, %v2376_v55 }
 0xa25   :  { %2414 = vmatmul.f32.vlgmr.msrb.gmra.mxu2 %v2377_v31 }
 0xaa8   :  { %v2415_v41 = vpop.f32.mrf.mxu2 }
 0xaa9   :  { %v2416_v3 = vadd.f32 %v4179_v23, %v2415_v41  ;;  %v4183_v23 = vld [vmem:[%s7575_s26] ss:$0 sm:$0xff] }
 0xaab   :  { %4371 = vtanh.f32 %v2416_v3 }
 0xab1   :  { %v4372_v21 = vpop.eup %4371 }
 0xab2   :  { %4095 = vmatmul.msk.f32.vlgmr.msrb.gmra.mxu0 %vm2102_vm14, %v4372_v21 }
 0xab3   :  { %2694 = vmatpush.msrb.mxu0 %v6451_v40 }
 0xab5   :  { %2695 = vmatpush.msrb.mxu0 %v6456_v19 }
 0xab7   :  { %2696 = vmatpush.msrb.mxu0 %v6464_v20 }
 0xab9   :  { %2697 = vmatpush.msrb.mxu0 %v6477_v49 }
 0xabb   :  { %2698 = vmatpush.msrb.mxu0 %v6482_v45 }
 0xabd   :  { %2699 = vmatpush.msrb.mxu0 %v6488_v35 }
 0xabf   :  { %2700 = vmatpush.msrb.mxu0 %v6494_v16 }
 0xac1   :  { %2701 = vmatpush.msrb.mxu0 %v6500_v17 }
 0xb2f   :  { %v2451_v29 = vpop.f32.mrf.mxu0 }
 0xb30   :  { %v2452_v36 = vadd.f32 %v4180_v28, %v2451_v29  ;;  %v2879_v29 = vld [vmem:[#allocation2 + $0x6] sm:$0x3] }
 0xb32   :  { %4373 = vtanh.f32 %v2452_v36 }
 0xb38   :  { %v4374_v4 = vpop.eup %4373 }
 0xb39   :  { %4096 = vmatmul.msk.f32.vlgmr.msra.gmra.mxu3 %vm2065_vm4, %v4374_v4  ;;  %4097 = vmatmul.msk.f32.vlgmr.msra.gmra.mxu1 %vm2065_vm4, %v4374_v4 }
 0xb3a   :  { %2650 = vmatpush.msra.mxu3 %v6337_v6  ;;  %2758 = vmatpush.msra.mxu1 %v6553_v1 }
 0xb3c   :  { %2651 = vmatpush.msra.mxu3 %v6342_v0  ;;  %2759 = vmatpush.msra.mxu1 %v6558_v11 }
 0xb3e   :  { %2652 = vmatpush.msra.mxu3 %v6349_v58  ;;  %2760 = vmatpush.msra.mxu1 %v6566_v12 }
 0xb40   :  { %2653 = vmatpush.msra.mxu3 %v6356_v34  ;;  %2761 = vmatpush.msra.mxu1 %v6572_v15 }
 0xb42   :  { %2654 = vmatpush.msra.mxu3 %v6363_v37 }
 0xb44   :  { %2655 = vmatpush.msra.mxu3 %v6370_v46 }
 0xb46   :  { %2656 = vmatpush.msra.mxu3 %v6377_v48 }
 0xb48   :  { %2657 = vmatpush.msra.mxu3 %v6384_v50 }
 0xb4a   :  { %2658 = vmatpush.msra.mxu3 %v6391_v56 }
 0xb4c   :  { %2659 = vmatpush.msra.mxu3 %v6405_v18 }
 0xb4e   :  { %2660 = vmatpush.msra.mxu3 %v6410_v47 }
 0xb50   :  { %2661 = vmatpush.msra.mxu3 %v6417_v51 }
 0xb52   :  { %2662 = vmatpush.msra.mxu3 %v6424_v52 }
 0xb54   :  { %2663 = vmatpush.msra.mxu3 %v6431_v42 }
 0xb56   :  { %2664 = vmatpush.msra.mxu3 %v6438_v25 }
 0xb58   :  { %2665 = vmatpush.msra.mxu3 %v6445_v39 }
 0xbb6   :  { %v2511_v26 = vpop.f32.mrf.mxu1 }
 0xbb7   :  { %v2512_v7 = vadd.f32 %v4181_v27, %v2511_v26  ;;  %v4193_v27 = vld [vmem:[%s7453_s11] ss:$0 sm:$0xff] }
 0xbb9   :  { %v2516_v32 = vmul.f32 0.5, %v2512_v7  ;;  %4100 = vst.msk [vmem:[%s7461_s21 + $0x2] sm:$0x3] %vm2024_vm0, %v2512_v7 }
 0xbbb   :  { %v2517_v63 = vmul.f32 1.442695, %v2516_v32 }
 0xbbc   :  { %v2483_v2 = vpop.f32.mrf.mxu3 }
 0xbbd   :  { %4375 = vpow2.f32 %v2517_v63  ;;  %v2484_v8 = vadd.f32 %v4182_v61, %v2483_v2  ;;  %v4194_v61 = vld [vmem:[%s7455_s13] ss:$0 sm:$0xff] }
 0xbbf   :  { %4099 = vst.msk [vmem:[%s7460_s20 + $0x2] sm:$0x3] %vm2024_vm0, %v2484_v8 }
 0xbc3   :  { %v4376_v54 = vpop.eup %4375 }
 0xbc4   :  { %v2519_v55 = vmul.f32 %v4376_v54, %v4098_v24  ;;  %v4195_v24 = vld [vmem:[%s7459_s17] ss:$0 sm:$0xff] }
 0xbc6   :  { %v2520_v31 = vadd.f32 %v2519_v55, %v2484_v8 }
 0xbc8   :  { %4101 = vst.msk [vmem:[%s7463_s18 + $0x2] sm:$0x3] %vm2024_vm0, %v2520_v31  ;;  %4103 = vmatmul.msk.f32.vlgmr.msrb.gmra.mxu3 %vm2032_vm15, %v2520_v31 }
 0xbc9   :  { %4102 = vst.msk [vmem:[%s7514_s22 + $0x4] sm:$0x3] %vm2024_vm0, %v2520_v31  ;;  %2982 = vmatpush.msrb.mxu3 %v6523_v38  ;;  %v4184_v38 = vld [vmem:[%s7448_s7] ss:$0 sm:$0xff] }
 0xbcb   :  { %2983 = vmatpush.msrb.mxu3 %v6528_v53 }
 0xbcd   :  { %2984 = vmatpush.msrb.mxu3 %v6535_v59 }
 0xbcf   :  { %2985 = vmatpush.msrb.mxu3 %v6543_v60 }
 0xc4b   :  { %v2555_v41 = vpop.f32.mrf.mxu3 }
 0xc4c   :  { %v2556_v3 = vadd.f32 %v4183_v23, %v2555_v41  ;;  %v4196_v23 = vld [vmem:[%s7456_s15] ss:$0 sm:$0xff] }
 0xc4e   :  { %4377 = vtanh.f32 %v2556_v3 }
 0xc54   :  { %v4378_v21 = vpop.eup %4377 }
 0xc55   :  { %4104 = vmatmul.msk.f32.vlgmr.msra.gmra.mxu0 %vm2065_vm4, %v4378_v21 }
 0xc56   :  { %2834 = vmatpush.msra.mxu0 %v6249_v62  ;;  %v4185_v62 = vld [vmem:[%s7451_s9] ss:$0 sm:$0xff] }
 0xc58   :  { %2835 = vmatpush.msra.mxu0 %v6255_v22 }
 0xc5a   :  { %2836 = vmatpush.msra.mxu0 %v6261_v5 }
 0xc5c   :  { %2837 = vmatpush.msra.mxu0 %v6267_v57 }
 0xcd2   :  { %v2587_v53 = vpop.f32.mrf.mxu0 }
 0xcd3   :  { %v2588_v59 = vadd.f32 %v4184_v38, %v2587_v53  ;;  %v4120_v38 = vld [vmem:[%s7462_s1 + $0x6] sm:$0x3] }
 0xcd5   :  { %4379 = vtanh.f32 %v2588_v59 }
 0xcdb   :  { %v4380_v60 = vpop.eup %4379 }
 0xcdc   :  { %4105 = vmatmul.msk.f32.vlgmr.msrb.gmra.mxu1 %vm2102_vm14, %v4380_v60 }
 0xcdd   :  { %2866 = vmatpush.msrb.mxu1 %v6289_v9  ;;  %v2627_v9 = vld [vmem:[#allocation2 + $0x4] sm:$0x3] }
 0xcdf   :  { %2867 = vmatpush.msrb.mxu1 %v6294_v13 }
 0xce1   :  { %2868 = vmatpush.msrb.mxu1 %v6300_v14 }
 0xce3   :  { %2869 = vmatpush.msrb.mxu1 %v6308_v30  ;;  %v4186_v30 = vld [vmem:[%s7453_s11] ss:$0 sm:$0xff] }
 0xce5   :  { %2870 = vmatpush.msrb.mxu1 %v6313_v33 }
 0xce7   :  { %2871 = vmatpush.msrb.mxu1 %v6319_v43 }
 0xce9   :  { %2872 = vmatpush.msrb.mxu1 %v6325_v44 }
 0xceb   :  { %2873 = vmatpush.msrb.mxu1 %v6331_v10  ;;  %v4187_v10 = vld [vmem:[%s7455_s13] ss:$0 sm:$0xff] }
 0xd59   :  { %v2623_v22 = vpop.f32.mrf.mxu1 }
 0xd5a   :  { %v2624_v5 = vadd.f32 %v4185_v62, %v2623_v22  ;;  %v6860_v62 = vld [vmem:[%s7449_s6 + $0x18] sm:$0xff]  ;;  %v6865_v22 = vld [vmem:[%s7449_s6 + $0x10] sm:$0xff] }
 0xd5c   :  { %4381 = vtanh.f32 %v2624_v5  ;;  %v6871_v5 = vld [vmem:[%s7449_s6 + $0x8] sm:$0xff] }
 0xd62   :  { %v4382_v57 = vpop.eup %4381 }
 0xd63   :  { %v2628_v13 = vadd.f32 %v4382_v57, %v2627_v9  ;;  %v6877_v57 = vld [vmem:[%s7449_s6] sm:$0xff]  ;;  %v6884_v9 = vld [vmem:[%s7450_s8 + $0x38] sm:$0xff] }
 0xd65   :  { %v2629_v14 = vmul.f32 0.5, %v2628_v13  ;;  %v6889_v13 = vld [vmem:[%s7450_s8 + $0x30] sm:$0xff] }
 0xd67   :  { %2666 = vmatmul.f32.vlgmr.msra.gmra.mxu3 %v2629_v14  ;;  %v6895_v14 = vld [vmem:[%s7450_s8 + $0x28] sm:$0xff] }
 0xdea   :  { %v2667_v33 = vpop.f32.mrf.mxu3 }
 0xdeb   :  { %v2668_v43 = vadd.f32 %v4186_v30, %v2667_v33  ;;  %v4197_v30 = vld [vmem:[%s7575_s26] ss:$0 sm:$0xff] }
 0xded   :  { %4383 = vtanh.f32 %v2668_v43 }
 0xdf3   :  { %v4384_v44 = vpop.eup %4383 }
 0xdf4   :  { %4106 = vmatmul.msk.f32.vlgmr.msrb.gmra.mxu0 %vm2102_vm14, %v4384_v44 }
 0xdf5   :  { %2946 = vmatpush.msrb.mxu0 %v6451_v40 }
 0xdf7   :  { %2947 = vmatpush.msrb.mxu0 %v6456_v19 }
 0xdf9   :  { %2948 = vmatpush.msrb.mxu0 %v6464_v20  ;;  %v6758_v20 = vld [vmem:[%s7573_s2 + $0x8] sm:$0xff] }
 0xdfa   :  { %2804 = vmatpush.msrb.mxu2 %v6758_v20  ;;  %3056 = vmatpush.msra.mxu3 %v6758_v20 }
 0xdfb   :  { %2949 = vmatpush.msrb.mxu0 %v6477_v49  ;;  %v6765_v49 = vld [vmem:[%s7573_s2] sm:$0xff] }
 0xdfc   :  { %2805 = vmatpush.msrb.mxu2 %v6765_v49  ;;  %3057 = vmatpush.msra.mxu3 %v6765_v49 }
 0xdfd   :  { %2950 = vmatpush.msrb.mxu0 %v6482_v45  ;;  %v4188_v45 = vld [vmem:[%s7459_s17] ss:$0 sm:$0xff] }
 0xdff   :  { %2951 = vmatpush.msrb.mxu0 %v6488_v35 }
 0xe01   :  { %2952 = vmatpush.msrb.mxu0 %v6494_v16 }
 0xe03   :  { %2953 = vmatpush.msrb.mxu0 %v6500_v17 }
 0xe71   :  { %v2703_v28 = vpop.f32.mrf.mxu0 }
 0xe72   :  { %v2704_v40 = vadd.f32 %v4187_v10, %v2703_v28  ;;  %v6906_v10 = vld [vmem:[%s7450_s8 + $0x20] sm:$0xff]  ;;  %v6911_v28 = vld [vmem:[%s7450_s8 + $0x18] sm:$0xff] }
 0xe74   :  { %4385 = vtanh.f32 %v2704_v40  ;;  %v6917_v40 = vld [vmem:[%s7450_s8 + $0x10] sm:$0xff] }
 0xe7a   :  { %v4386_v19 = vpop.eup %4385 }
 0xe7b   :  { %4107 = vmatmul.msk.f32.vlgmr.msra.gmra.mxu2 %vm2065_vm4, %v4386_v19  ;;  %4108 = vmatmul.msk.f32.vlgmr.msra.gmra.mxu1 %vm2065_vm4, %v4386_v19  ;;  %v6923_v19 = vld [vmem:[%s7450_s8 + $0x8] sm:$0xff] }
 0xe7c   :  { %3010 = vmatpush.msra.mxu1 %v6553_v1  ;;  %2902 = vmatpush.msra.mxu2 %v6337_v6  ;;  %v4189_v6 = vld [vmem:[%s7456_s15] ss:$0 sm:$0xff] }
 0xe7e   :  { %3011 = vmatpush.msra.mxu1 %v6558_v11  ;;  %2903 = vmatpush.msra.mxu2 %v6342_v0 }
 0xe80   :  { %3012 = vmatpush.msra.mxu1 %v6566_v12  ;;  %2904 = vmatpush.msra.mxu2 %v6349_v58 }
 0xe82   :  { %3013 = vmatpush.msra.mxu1 %v6572_v15  ;;  %2905 = vmatpush.msra.mxu2 %v6356_v34 }
 0xe84   :  { %2906 = vmatpush.msra.mxu2 %v6363_v37  ;;  %v4109_v37 = vld [vmem:[%s7462_s1 + $0x4] sm:$0x3] }
 0xe86   :  { %2907 = vmatpush.msra.mxu2 %v6370_v46 }
 0xe88   :  { %2908 = vmatpush.msra.mxu2 %v6377_v48 }
 0xe8a   :  { %2909 = vmatpush.msra.mxu2 %v6384_v50 }
 0xe8c   :  { %2910 = vmatpush.msra.mxu2 %v6391_v56  ;;  %v4190_v56 = vld [vmem:[%s7575_s26] ss:$0 sm:$0xff] }
 0xe8e   :  { %2911 = vmatpush.msra.mxu2 %v6405_v18 }
 0xe90   :  { %2912 = vmatpush.msra.mxu2 %v6410_v47 }
 0xe92   :  { %2913 = vmatpush.msra.mxu2 %v6417_v51 }
 0xe94   :  { %2914 = vmatpush.msra.mxu2 %v6424_v52  ;;  %v4191_v52 = vld [vmem:[%s7448_s7] ss:$0 sm:$0xff] }
 0xe96   :  { %2915 = vmatpush.msra.mxu2 %v6431_v42 }
 0xe98   :  { %2916 = vmatpush.msra.mxu2 %v6438_v25 }
 0xe9a   :  { %2917 = vmatpush.msra.mxu2 %v6445_v39  ;;  %v4192_v39 = vld [vmem:[%s7451_s9] ss:$0 sm:$0xff] }
 0xef8   :  { %v2763_v35 = vpop.f32.mrf.mxu1 }
 0xef9   :  { %v2764_v16 = vadd.f32 %v4188_v45, %v2763_v35  ;;  %v6929_v45 = vld [vmem:[%s7450_s8] sm:$0xff]  ;;  %v6935_v35 = vld [vmem:[%s7452_s10 + $0x78] sm:$0xff] }
 0xefb   :  { %v2768_v17 = vmul.f32 0.5, %v2764_v16  ;;  %4111 = vst.msk [vmem:[%s7461_s21 + $0x4] sm:$0x3] %vm2024_vm0, %v2764_v16  ;;  %v6940_v16 = vld [vmem:[%s7452_s10 + $0x70] sm:$0xff] }
 0xefd   :  { %v2769_v0 = vmul.f32 1.442695, %v2768_v17  ;;  %v6947_v17 = vld [vmem:[%s7452_s10 + $0x68] sm:$0xff] }
 0xefe   :  { %v2735_v58 = vpop.f32.mrf.mxu2 }
 0xeff   :  { %4387 = vpow2.f32 %v2769_v0  ;;  %v2736_v34 = vadd.f32 %v4189_v6, %v2735_v58  ;;  %v6953_v6 = vld [vmem:[%s7452_s10 + $0x60] sm:$0xff]  ;;  %v6959_v0 = vld [vmem:[%s7452_s10 + $0x58] sm:$0xff]  ;;  %v6965_v58 = vld [vmem:[%s7452_s10 + $0x50] sm:$0xff] }
 0xf01   :  { %4110 = vst.msk [vmem:[%s7460_s20 + $0x4] sm:$0x3] %vm2024_vm0, %v2736_v34 }
 0xf05   :  { %v4388_v46 = vpop.eup %4387 }
 0xf06   :  { %v2771_v48 = vmul.f32 %v4388_v46, %v4109_v37  ;;  %v6977_v37 = vld [vmem:[%s7452_s10 + $0x40] sm:$0xff]  ;;  %v6983_v46 = vld [vmem:[%s7452_s10 + $0x38] sm:$0xff] }
 0xf08   :  { %v2772_v50 = vadd.f32 %v2771_v48, %v2736_v34  ;;  %v6971_v34 = vld [vmem:[%s7452_s10 + $0x48] sm:$0xff]  ;;  %v4198_v48 = vld [vmem:[%s7448_s7] ss:$0 sm:$0xff] }
 0xf0a   :  { %4112 = vst.msk [vmem:[%s7463_s18 + $0x4] sm:$0x3] %vm2024_vm0, %v2772_v50  ;;  %4114 = vmatmul.msk.f32.vlgmr.msrb.gmra.mxu2 %vm2032_vm15, %v2772_v50 }
 0xf0b   :  { %4113 = vst.msk [vmem:[%s7514_s22 + $0x6] sm:$0x3] %vm2024_vm0, %v2772_v50 }
 0xf8d   :  { %v2807_v18 = vpop.f32.mrf.mxu2 }
 0xf8e   :  { %v2808_v47 = vadd.f32 %v4190_v56, %v2807_v18 }
 0xf90   :  { %4389 = vtanh.f32 %v2808_v47  ;;  %v6994_v47 = vld [vmem:[%s7452_s10 + $0x30] sm:$0xff] }
 0xf96   :  { %v4390_v51 = vpop.eup %4389 }
 0xf97   :  { %4115 = vmatmul.msk.f32.vlgmr.msra.gmra.mxu0 %vm2065_vm4, %v4390_v51  ;;  %v6999_v51 = vld [vmem:[%s7452_s10 + $0x28] sm:$0xff] }
 0xf98   :  { %3086 = vmatpush.msra.mxu0 %v6860_v62 }
 0xf9a   :  { %3087 = vmatpush.msra.mxu0 %v6865_v22 }
 0xf9c   :  { %3088 = vmatpush.msra.mxu0 %v6871_v5 }
 0xf9e   :  { %3089 = vmatpush.msra.mxu0 %v6877_v57 }
0x1014   :  { %v2839_v42 = vpop.f32.mrf.mxu0 }
0x1015   :  { %v2840_v25 = vadd.f32 %v4191_v52, %v2839_v42  ;;  %v7005_v52 = vld [vmem:[%s7452_s10 + $0x20] sm:$0xff]  ;;  %v7011_v42 = vld [vmem:[%s7452_s10 + $0x18] sm:$0xff] }
0x1017   :  { %4391 = vtanh.f32 %v2840_v25  ;;  %v7017_v25 = vld [vmem:[%s7452_s10 + $0x10] sm:$0xff] }
0x101d   :  { %v4392_v1 = vpop.eup %4391 }
0x101e   :  { %4116 = vmatmul.msk.f32.vlgmr.msrb.gmra.mxu1 %vm2102_vm14, %v4392_v1  ;;  %v7023_v1 = vld [vmem:[%s7452_s10 + $0x8] sm:$0xff] }
0x101f   :  { %3118 = vmatpush.msrb.mxu1 %v6884_v9 }
0x1021   :  { %3119 = vmatpush.msrb.mxu1 %v6889_v13 }
0x1023   :  { %3120 = vmatpush.msrb.mxu1 %v6895_v14 }
0x1025   :  { %3121 = vmatpush.msrb.mxu1 %v6906_v10 }
0x1027   :  { %3122 = vmatpush.msrb.mxu1 %v6911_v28 }
0x1029   :  { %3123 = vmatpush.msrb.mxu1 %v6917_v40 }
0x102b   :  { %3124 = vmatpush.msrb.mxu1 %v6923_v19 }
0x102d   :  { %3125 = vmatpush.msrb.mxu1 %v6929_v45 }
0x109b   :  { %v2875_v11 = vpop.f32.mrf.mxu1 }
0x109c   :  { %v2876_v12 = vadd.f32 %v4192_v39, %v2875_v11  ;;  %v7029_v39 = vld [vmem:[%s7452_s10] sm:$0xff]  ;;  %v7035_v11 = vld [vmem:[%s7454_s12 + $0x38] sm:$0xff] }
0x109e   :  { %4393 = vtanh.f32 %v2876_v12  ;;  %v7040_v12 = vld [vmem:[%s7454_s12 + $0x30] sm:$0xff] }
0x10a4   :  { %v4394_v15 = vpop.eup %4393 }
0x10a5   :  { %v2880_v36 = vadd.f32 %v4394_v15, %v2879_v29  ;;  %v7047_v15 = vld [vmem:[%s7454_s12 + $0x28] sm:$0xff]  ;;  %v4199_v29 = vld [vmem:[%s7451_s9] ss:$0 sm:$0xff] }
0x10a7   :  { %v2881_v4 = vmul.f32 0.5, %v2880_v36 }
0x10a9   :  { %2918 = vmatmul.f32.vlgmr.msra.gmra.mxu2 %v2881_v4 }
0x112c   :  { %v2919_v26 = vpop.f32.mrf.mxu2 }
0x112d   :  { %v2920_v7 = vadd.f32 %v4193_v27, %v2919_v26  ;;  %v3131_v26 = vld [vmem:[#allocation2 + $0x8] sm:$0x3] }
0x112f   :  { %4395 = vtanh.f32 %v2920_v7 }
0x1135   :  { %v4396_v32 = vpop.eup %4395 }
0x1136   :  { %4117 = vmatmul.msk.f32.vlgmr.msrb.gmra.mxu0 %vm2102_vm14, %v4396_v32 }
0x1137   :  { %3198 = vmatpush.msrb.mxu0 %v7035_v11 }
0x1139   :  { %3199 = vmatpush.msrb.mxu0 %v7040_v12 }
0x113b   :  { %3200 = vmatpush.msrb.mxu0 %v7047_v15 }
0x11b3   :  { %v2955_v63 = vpop.f32.mrf.mxu0 }
0x11b4   :  { %v2956_v2 = vadd.f32 %v4194_v61, %v2955_v63  ;;  %v7057_v61 = vld [vmem:[%s7454_s12 + $0x20] sm:$0xff]  ;;  %v7062_v63 = vld [vmem:[%s7454_s12 + $0x18] sm:$0xff] }
0x11b5   :  { %3201 = vmatpush.msrb.mxu0 %v7057_v61 }
0x11b6   :  { %4397 = vtanh.f32 %v2956_v2  ;;  %v7068_v2 = vld [vmem:[%s7454_s12 + $0x10] sm:$0xff] }
0x11b7   :  { %3202 = vmatpush.msrb.mxu0 %v7062_v63 }
0x11b9   :  { %3203 = vmatpush.msrb.mxu0 %v7068_v2 }
0x11bc   :  { %v4398_v8 = vpop.eup %4397 }
0x11bd   :  { %4118 = vmatmul.msk.f32.vlgmr.msrb.gmra.mxu3 %vm2065_vm4, %v4398_v8  ;;  %4119 = vmatmul.msk.f32.vlgmr.msra.gmra.mxu1 %vm2065_vm4, %v4398_v8  ;;  %v7074_v8 = vld [vmem:[%s7454_s12 + $0x8] sm:$0xff] }
0x11be   :  { %3154 = vmatpush.msrb.mxu3 %v6935_v35  ;;  %3204 = vmatpush.msrb.mxu0 %v7074_v8 }
0x11c0   :  { %3155 = vmatpush.msrb.mxu3 %v6940_v16 }
0x11c2   :  { %3156 = vmatpush.msrb.mxu3 %v6947_v17 }
0x11c4   :  { %3157 = vmatpush.msrb.mxu3 %v6953_v6 }
0x11c6   :  { %3158 = vmatpush.msrb.mxu3 %v6959_v0 }
0x11c8   :  { %3159 = vmatpush.msrb.mxu3 %v6965_v58 }
0x11ca   :  { %3160 = vmatpush.msrb.mxu3 %v6971_v34 }
0x11cc   :  { %3161 = vmatpush.msrb.mxu3 %v6977_v37 }
0x11ce   :  { %3162 = vmatpush.msrb.mxu3 %v6983_v46 }
0x11d0   :  { %3163 = vmatpush.msrb.mxu3 %v6994_v47 }
0x11d2   :  { %3164 = vmatpush.msrb.mxu3 %v6999_v51 }
0x11d4   :  { %3165 = vmatpush.msrb.mxu3 %v7005_v52 }
0x11d6   :  { %3166 = vmatpush.msrb.mxu3 %v7011_v42 }
0x11d8   :  { %3167 = vmatpush.msrb.mxu3 %v7017_v25 }
0x11da   :  { %3168 = vmatpush.msrb.mxu3 %v7023_v1 }
0x11dc   :  { %3169 = vmatpush.msrb.mxu3 %v7029_v39 }
0x123a   :  { %v3015_v54 = vpop.f32.mrf.mxu1 }
0x123b   :  { %v3016_v55 = vadd.f32 %v4195_v24, %v3015_v54  ;;  %v7080_v24 = vld [vmem:[%s7454_s12] sm:$0xff] }
0x123c   :  { %3205 = vmatpush.msrb.mxu0 %v7080_v24  ;;  %v4200_v54 = vld [vmem:[%s7453_s11] ss:$0 sm:$0xff] }
0x123d   :  { %v3020_v31 = vmul.f32 0.5, %v3016_v55  ;;  %4122 = vst.msk [vmem:[%s7461_s21 + $0x6] sm:$0x3] %vm2024_vm0, %v3016_v55 }
0x123f   :  { %v3021_v41 = vmul.f32 1.442695, %v3020_v31 }
0x1240   :  { %v2987_v3 = vpop.f32.mrf.mxu3 }
0x1241   :  { %4399 = vpow2.f32 %v3021_v41  ;;  %v2988_v21 = vadd.f32 %v4196_v23, %v2987_v3  ;;  %v7103_v41 = vld [vmem:[%s7458_s16 + $0x18] sm:$0xff] }
0x1242   :  { %v7108_v3 = vld [vmem:[%s7457_s14 + $0x18] sm:$0xff]  ;;  %3262 = vmatpush.msra.mxu1 %v7103_v41 }
0x1243   :  { %4121 = vst.msk [vmem:[%s7460_s20 + $0x6] sm:$0x3] %vm2024_vm0, %v2988_v21  ;;  %3234 = vmatpush.msrb.mxu2 %v7108_v3 }
0x1247   :  { %v4400_v53 = vpop.eup %4399 }
0x1248   :  { %v3023_v59 = vmul.f32 %v4400_v53, %v4120_v38  ;;  %v7120_v38 = vld [vmem:[%s7457_s14 + $0x10] sm:$0xff]  ;;  %v7125_v53 = vld [vmem:[%s7458_s16 + $0x8] sm:$0xff] }
0x1249   :  { %3235 = vmatpush.msrb.mxu2 %v7120_v38 }
0x124a   :  { %v3024_v60 = vadd.f32 %v3023_v59, %v2988_v21  ;;  %v7113_v21 = vld [vmem:[%s7458_s16 + $0x10] sm:$0xff]  ;;  %v7130_v59 = vld [vmem:[%s7457_s14 + $0x8] sm:$0xff] }
0x124b   :  { %3263 = vmatpush.msra.mxu1 %v7113_v21  ;;  %3236 = vmatpush.msrb.mxu2 %v7130_v59 }
0x124c   :  { %4123 = vst.msk [vmem:[%s7463_s18 + $0x6] sm:$0x3] %vm2024_vm0, %v3024_v60  ;;  %4125 = vmatmul.msk.f32.vlgmr.msra.gmra.mxu3 %vm2032_vm15, %v3024_v60 }
0x124d   :  { %4124 = vst.msk [vmem:[%s7514_s22 + $0x8] sm:$0x3] %vm2024_vm0, %v3024_v60  ;;  %3486 = vmatpush.msra.mxu3 %v7108_v3  ;;  %v7138_v60 = vld [vmem:[%s7458_s16] sm:$0xff]  ;;  %3264 = vmatpush.msra.mxu1 %v7125_v53 }
0x124f   :  { %3487 = vmatpush.msra.mxu3 %v7120_v38  ;;  %3265 = vmatpush.msra.mxu1 %v7138_v60 }
0x1251   :  { %3488 = vmatpush.msra.mxu3 %v7130_v59 }
0x12cf   :  { %v3059_v33 = vpop.f32.mrf.mxu3 }
0x12d0   :  { %v3060_v43 = vadd.f32 %v4197_v30, %v3059_v33  ;;  %v7143_v30 = vld [vmem:[%s7457_s14] sm:$0xff] }
0x12d1   :  { %3237 = vmatpush.msrb.mxu2 %v7143_v30  ;;  %3489 = vmatpush.msra.mxu3 %v7143_v30  ;;  %v4201_v33 = vld [vmem:[%s7455_s13] ss:$0 sm:$0xff] }
0x12d2   :  { %4401 = vtanh.f32 %v3060_v43 }
0x12d3   :  { %3308 = vmatpush.msra.mxu2 %v6758_v20 }
0x12d5   :  { %3309 = vmatpush.msra.mxu2 %v6765_v49 }
0x12d8   :  { %v4402_v44 = vpop.eup %4401 }
0x12d9   :  { %4126 = vmatmul.msk.f32.vlgmr.msra.gmra.mxu0 %vm2065_vm4, %v4402_v44 }
0x12da   :  { %3338 = vmatpush.msra.mxu0 %v6860_v62 }
0x12dc   :  { %3339 = vmatpush.msra.mxu0 %v6865_v22 }
0x12de   :  { %3340 = vmatpush.msra.mxu0 %v6871_v5 }
0x12e0   :  { %3341 = vmatpush.msra.mxu0 %v6877_v57 }
0x1356   :  { %v3091_v50 = vpop.f32.mrf.mxu0 }
0x1357   :  { %v3092_v56 = vadd.f32 %v4198_v48, %v3091_v50 }
0x1359   :  { %4403 = vtanh.f32 %v3092_v56 }
0x135f   :  { %v4404_v18 = vpop.eup %4403 }
0x1360   :  { %4127 = vmatmul.msk.f32.vlgmr.msrb.gmra.mxu1 %vm2102_vm14, %v4404_v18  ;;  %v4203_v18 = vld [vmem:[%s7456_s15] ss:$0 sm:$0xff] }
0x1361   :  { %3370 = vmatpush.msrb.mxu1 %v6884_v9 }
0x1363   :  { %3371 = vmatpush.msrb.mxu1 %v6889_v13 }
0x1365   :  { %3372 = vmatpush.msrb.mxu1 %v6895_v14 }
0x1367   :  { %3373 = vmatpush.msrb.mxu1 %v6906_v10 }
0x1369   :  { %3374 = vmatpush.msrb.mxu1 %v6911_v28 }
0x136b   :  { %3375 = vmatpush.msrb.mxu1 %v6917_v40 }
0x136d   :  { %3376 = vmatpush.msrb.mxu1 %v6923_v19 }
0x136f   :  { %3377 = vmatpush.msrb.mxu1 %v6929_v45 }
0x13dd   :  { %v3127_v36 = vpop.f32.mrf.mxu1 }
0x13de   :  { %v3128_v4 = vadd.f32 %v4199_v29, %v3127_v36 }
0x13e0   :  { %4405 = vtanh.f32 %v3128_v4 }
0x13e6   :  { %v4406_v27 = vpop.eup %4405 }
0x13e7   :  { %v3132_v7 = vadd.f32 %v4406_v27, %v3131_v26  ;;  %v4131_v27 = vld [vmem:[%s7462_s1 + $0x8] sm:$0x3] }
0x13e9   :  { %v3133_v32 = vmul.f32 0.5, %v3132_v7 }
0x13eb   :  { %3170 = vmatmul.f32.vlgmr.msrb.gmra.mxu3 %v3133_v32 }
0x13ec   :  { %3560 = vmatpush.msrb.mxu3 %v6758_v20 }
0x13ee   :  { %3561 = vmatpush.msrb.mxu3 %v6765_v49  ;;  %v4202_v49 = vld [vmem:[%s7459_s17] ss:$0 sm:$0xff] }
0x146e   :  { %v3171_v55 = vpop.f32.mrf.mxu3 }
0x146f   :  { %v3172_v31 = vadd.f32 %v4200_v54, %v3171_v55  ;;  %v4204_v54 = vld [vmem:[%s7575_s26] ss:$0 sm:$0xff] }
0x1471   :  { %4407 = vtanh.f32 %v3172_v31 }
0x1477   :  { %v4408_v23 = vpop.eup %4407 }
0x1478   :  { %4128 = vmatmul.msk.f32.vlgmr.msrb.gmra.mxu0 %vm2102_vm14, %v4408_v23 }
0x1479   :  { %3450 = vmatpush.msrb.mxu0 %v7035_v11 }
0x147b   :  { %3451 = vmatpush.msrb.mxu0 %v7040_v12 }
0x147d   :  { %3452 = vmatpush.msrb.mxu0 %v7047_v15 }
0x147f   :  { %3453 = vmatpush.msrb.mxu0 %v7057_v61 }
0x1481   :  { %3454 = vmatpush.msrb.mxu0 %v7062_v63 }
0x1483   :  { %3455 = vmatpush.msrb.mxu0 %v7068_v2 }
0x1485   :  { %3456 = vmatpush.msrb.mxu0 %v7074_v8 }
0x1487   :  { %3457 = vmatpush.msrb.mxu0 %v7080_v24 }
0x14f5   :  { %v3207_v43 = vpop.f32.mrf.mxu0 }
0x14f6   :  { %v3208_v20 = vadd.f32 %v4201_v33, %v3207_v43  ;;  %v4205_v33 = vld [vmem:[%s7448_s7] ss:$0 sm:$0xff] }
0x14f8   :  { %4409 = vtanh.f32 %v3208_v20 }
0x14fe   :  { %v4410_v44 = vpop.eup %4409 }
0x14ff   :  { %4129 = vmatmul.msk.f32.vlgmr.msrb.gmra.mxu2 %vm2065_vm4, %v4410_v44  ;;  %4130 = vmatmul.msk.f32.vlgmr.msra.gmra.mxu1 %vm2065_vm4, %v4410_v44 }
0x1500   :  { %3406 = vmatpush.msrb.mxu2 %v6935_v35  ;;  %3514 = vmatpush.msra.mxu1 %v7103_v41 }
0x1502   :  { %3407 = vmatpush.msrb.mxu2 %v6940_v16  ;;  %3515 = vmatpush.msra.mxu1 %v7113_v21 }
0x1504   :  { %3408 = vmatpush.msrb.mxu2 %v6947_v17  ;;  %3516 = vmatpush.msra.mxu1 %v7125_v53 }
0x1506   :  { %3409 = vmatpush.msrb.mxu2 %v6953_v6  ;;  %3517 = vmatpush.msra.mxu1 %v7138_v60 }
0x1508   :  { %3410 = vmatpush.msrb.mxu2 %v6959_v0 }
0x150a   :  { %3411 = vmatpush.msrb.mxu2 %v6965_v58 }
0x150c   :  { %3412 = vmatpush.msrb.mxu2 %v6971_v34 }
0x150e   :  { %3413 = vmatpush.msrb.mxu2 %v6977_v37 }
0x1510   :  { %3414 = vmatpush.msrb.mxu2 %v6983_v46 }
0x1512   :  { %3415 = vmatpush.msrb.mxu2 %v6994_v47 }
0x1514   :  { %3416 = vmatpush.msrb.mxu2 %v6999_v51 }
0x1516   :  { %3417 = vmatpush.msrb.mxu2 %v7005_v52 }
0x1518   :  { %3418 = vmatpush.msrb.mxu2 %v7011_v42 }
0x151a   :  { %3419 = vmatpush.msrb.mxu2 %v7017_v25 }
0x151c   :  { %3420 = vmatpush.msrb.mxu2 %v7023_v1 }
0x151e   :  { %3421 = vmatpush.msrb.mxu2 %v7029_v39 }
0x157c   :  { %v3267_v48 = vpop.f32.mrf.mxu1 }
0x157d   :  { %v3268_v50 = vadd.f32 %v4202_v49, %v3267_v48  ;;  %v4206_v49 = vld [vmem:[%s7451_s9] ss:$0 sm:$0xff] }
0x157f   :  { %v3272_v56 = vmul.f32 0.5, %v3268_v50  ;;  %4133 = vst.msk [vmem:[%s7461_s21 + $0x8] sm:$0x3] %vm2024_vm0, %v3268_v50 }
0x1581   :  { %v3273_v29 = vmul.f32 1.442695, %v3272_v56 }
0x1582   :  { %v3239_v36 = vpop.f32.mrf.mxu2 }
0x1583   :  { %4411 = vpow2.f32 %v3273_v29  ;;  %v3240_v4 = vadd.f32 %v4203_v18, %v3239_v36  ;;  %v3383_v18 = vld [vmem:[#allocation2 + $0xa] sm:$0x3] }
0x1585   :  { %4132 = vst.msk [vmem:[%s7460_s20 + $0x8] sm:$0x3] %vm2024_vm0, %v3240_v4 }
0x1589   :  { %v4412_v26 = vpop.eup %4411 }
0x158a   :  { %v3275_v7 = vmul.f32 %v4412_v26, %v4131_v27 }
0x158c   :  { %v3276_v32 = vadd.f32 %v3275_v7, %v3240_v4  ;;  %v4207_v4 = vld [vmem:[%s7453_s11] ss:$0 sm:$0xff] }
0x158e   :  { %4134 = vst.msk [vmem:[%s7463_s18 + $0x8] sm:$0x3] %vm2024_vm0, %v3276_v32  ;;  %4136 = vmatmul.msk.f32.vlgmr.msra.gmra.mxu2 %vm2032_vm15, %v3276_v32 }
0x158f   :  { %4135 = vst.msk [vmem:[%s7514_s22 + $0xa] sm:$0x3] %vm2024_vm0, %v3276_v32  ;;  %3738 = vmatpush.msra.mxu2 %v7108_v3  ;;  %v4208_v32 = vld [vmem:[%s7455_s13] ss:$0 sm:$0xff] }
0x1591   :  { %3739 = vmatpush.msra.mxu2 %v7120_v38 }
0x1593   :  { %3740 = vmatpush.msra.mxu2 %v7130_v59 }
0x1595   :  { %3741 = vmatpush.msra.mxu2 %v7143_v30 }
0x1611   :  { %v3311_v55 = vpop.f32.mrf.mxu2 }
0x1612   :  { %v3312_v31 = vadd.f32 %v4204_v54, %v3311_v55 }
0x1614   :  { %4413 = vtanh.f32 %v3312_v31 }
0x161a   :  { %v4414_v23 = vpop.eup %4413 }
0x161b   :  { %4137 = vmatmul.msk.f32.vlgmr.msra.gmra.mxu0 %vm2065_vm4, %v4414_v23  ;;  %v4209_v23 = vld [vmem:[%s7459_s17] ss:$0 sm:$0xff] }
0x161c   :  { %3590 = vmatpush.msra.mxu0 %v6860_v62 }
0x161e   :  { %3591 = vmatpush.msra.mxu0 %v6865_v22 }
0x1620   :  { %3592 = vmatpush.msra.mxu0 %v6871_v5 }
0x1622   :  { %3593 = vmatpush.msra.mxu0 %v6877_v57 }
0x1698   :  { %v3343_v43 = vpop.f32.mrf.mxu0 }
0x1699   :  { %v3344_v20 = vadd.f32 %v4205_v33, %v3343_v43 }
0x169b   :  { %4415 = vtanh.f32 %v3344_v20 }
0x16a1   :  { %v4416_v44 = vpop.eup %4415 }
0x16a2   :  { %4138 = vmatmul.msk.f32.vlgmr.msrb.gmra.mxu1 %vm2102_vm14, %v4416_v44  ;;  %v4210_v44 = vld [vmem:[%s7456_s15] ss:$0 sm:$0xff] }
0x16a3   :  { %3622 = vmatpush.msrb.mxu1 %v6884_v9 }
0x16a5   :  { %3623 = vmatpush.msrb.mxu1 %v6889_v13 }
0x16a7   :  { %3624 = vmatpush.msrb.mxu1 %v6895_v14 }
0x16a9   :  { %3625 = vmatpush.msrb.mxu1 %v6906_v10 }
0x16ab   :  { %3626 = vmatpush.msrb.mxu1 %v6911_v28 }
0x16ad   :  { %3627 = vmatpush.msrb.mxu1 %v6917_v40 }
0x16af   :  { %3628 = vmatpush.msrb.mxu1 %v6923_v19 }
0x16b1   :  { %3629 = vmatpush.msrb.mxu1 %v6929_v45 }
0x171f   :  { %v3379_v48 = vpop.f32.mrf.mxu1 }
0x1720   :  { %v3380_v50 = vadd.f32 %v4206_v49, %v3379_v48 }
0x1722   :  { %4417 = vtanh.f32 %v3380_v50 }
0x1728   :  { %v4418_v56 = vpop.eup %4417 }
0x1729   :  { %v3384_v29 = vadd.f32 %v4418_v56, %v3383_v18  ;;  %v4142_v56 = vld [vmem:[%s7462_s1 + $0xa] sm:$0x3] }
0x172b   :  { %v3385_v36 = vmul.f32 0.5, %v3384_v29 }
0x172d   :  { %3422 = vmatmul.f32.vlgmr.msrb.gmra.mxu2 %v3385_v36 }
0x17b0   :  { %v3423_v27 = vpop.f32.mrf.mxu2 }
0x17b1   :  { %v3424_v26 = vadd.f32 %v4207_v4, %v3423_v27  ;;  %v4211_v4 = vld [vmem:[%s7575_s26] ss:$0 sm:$0xff] }
0x17b3   :  { %4419 = vtanh.f32 %v3424_v26 }
0x17b9   :  { %v4420_v7 = vpop.eup %4419 }
0x17ba   :  { %4139 = vmatmul.msk.f32.vlgmr.msrb.gmra.mxu0 %vm2102_vm14, %v4420_v7 }
0x17bb   :  { %3702 = vmatpush.msrb.mxu0 %v7035_v11 }
0x17bd   :  { %3703 = vmatpush.msrb.mxu0 %v7040_v12 }
0x17bf   :  { %3704 = vmatpush.msrb.mxu0 %v7047_v15 }
0x17c1   :  { %3705 = vmatpush.msrb.mxu0 %v7057_v61 }
0x17c3   :  { %3706 = vmatpush.msrb.mxu0 %v7062_v63 }
0x17c5   :  { %3707 = vmatpush.msrb.mxu0 %v7068_v2 }
0x17c7   :  { %3708 = vmatpush.msrb.mxu0 %v7074_v8 }
0x17c9   :  { %3709 = vmatpush.msrb.mxu0 %v7080_v24 }
0x1837   :  { %v3459_v54 = vpop.f32.mrf.mxu0 }
0x1838   :  { %v3460_v55 = vadd.f32 %v4208_v32, %v3459_v54  ;;  %v3887_v54 = vld [vmem:[#allocation2 + $0xe] sm:$0x3] }
0x183a   :  { %4421 = vtanh.f32 %v3460_v55 }
0x1840   :  { %v4422_v31 = vpop.eup %4421 }
0x1841   :  { %4140 = vmatmul.msk.f32.vlgmr.msra.gmra.mxu3 %vm2065_vm4, %v4422_v31  ;;  %4141 = vmatmul.msk.f32.vlgmr.msra.gmra.mxu1 %vm2065_vm4, %v4422_v31 }
0x1842   :  { %3658 = vmatpush.msra.mxu3 %v6935_v35  ;;  %3766 = vmatpush.msra.mxu1 %v7103_v41 }
0x1844   :  { %3659 = vmatpush.msra.mxu3 %v6940_v16  ;;  %3767 = vmatpush.msra.mxu1 %v7113_v21 }
0x1846   :  { %3660 = vmatpush.msra.mxu3 %v6947_v17  ;;  %3768 = vmatpush.msra.mxu1 %v7125_v53 }
0x1848   :  { %3661 = vmatpush.msra.mxu3 %v6953_v6  ;;  %3769 = vmatpush.msra.mxu1 %v7138_v60 }
0x184a   :  { %3662 = vmatpush.msra.mxu3 %v6959_v0 }
0x184c   :  { %3663 = vmatpush.msra.mxu3 %v6965_v58 }
0x184e   :  { %3664 = vmatpush.msra.mxu3 %v6971_v34 }
0x1850   :  { %3665 = vmatpush.msra.mxu3 %v6977_v37 }
0x1852   :  { %3666 = vmatpush.msra.mxu3 %v6983_v46 }
0x1854   :  { %3667 = vmatpush.msra.mxu3 %v6994_v47 }
0x1856   :  { %3668 = vmatpush.msra.mxu3 %v6999_v51 }
0x1858   :  { %3669 = vmatpush.msra.mxu3 %v7005_v52 }
0x185a   :  { %3670 = vmatpush.msra.mxu3 %v7011_v42 }
0x185c   :  { %3671 = vmatpush.msra.mxu3 %v7017_v25 }
0x185e   :  { %3672 = vmatpush.msra.mxu3 %v7023_v1 }
0x1860   :  { %3673 = vmatpush.msra.mxu3 %v7029_v39 }
0x18be   :  { %v3519_v33 = vpop.f32.mrf.mxu1 }
0x18bf   :  { %v3520_v43 = vadd.f32 %v4209_v23, %v3519_v33  ;;  %v4221_v23 = vld [vmem:[%s7453_s11] ss:$0 sm:$0xff] }
0x18c1   :  { %v3524_v20 = vmul.f32 0.5, %v3520_v43  ;;  %4144 = vst.msk [vmem:[%s7461_s21 + $0xa] sm:$0x3] %vm2024_vm0, %v3520_v43 }
0x18c3   :  { %v3525_v49 = vmul.f32 1.442695, %v3524_v20 }
0x18c4   :  { %v3491_v48 = vpop.f32.mrf.mxu3 }
0x18c5   :  { %4423 = vpow2.f32 %v3525_v49  ;;  %v3492_v50 = vadd.f32 %v4210_v44, %v3491_v48  ;;  %v4222_v44 = vld [vmem:[%s7455_s13] ss:$0 sm:$0xff] }
0x18c7   :  { %4143 = vst.msk [vmem:[%s7460_s20 + $0xa] sm:$0x3] %vm2024_vm0, %v3492_v50 }
0x18cb   :  { %v4424_v18 = vpop.eup %4423 }
0x18cc   :  { %v3527_v29 = vmul.f32 %v4424_v18, %v4142_v56  ;;  %v4223_v56 = vld [vmem:[%s7459_s17] ss:$0 sm:$0xff] }
0x18ce   :  { %v3528_v36 = vadd.f32 %v3527_v29, %v3492_v50 }
0x18d0   :  { %4145 = vst.msk [vmem:[%s7463_s18 + $0xa] sm:$0x3] %vm2024_vm0, %v3528_v36  ;;  %4147 = vmatmul.msk.f32.vlgmr.msrb.gmra.mxu3 %vm2032_vm15, %v3528_v36 }
0x18d1   :  { %4146 = vst.msk [vmem:[%s7514_s22 + $0xc] sm:$0x3] %vm2024_vm0, %v3528_v36  ;;  %3990 = vmatpush.msrb.mxu3 %v7108_v3  ;;  %v4212_v3 = vld [vmem:[%s7448_s7] ss:$0 sm:$0xff] }
0x18d3   :  { %3991 = vmatpush.msrb.mxu3 %v7120_v38 }
0x18d5   :  { %3992 = vmatpush.msrb.mxu3 %v7130_v59 }
0x18d7   :  { %3993 = vmatpush.msrb.mxu3 %v7143_v30 }
0x1953   :  { %v3563_v27 = vpop.f32.mrf.mxu3 }
0x1954   :  { %v3564_v26 = vadd.f32 %v4211_v4, %v3563_v27  ;;  %v4224_v4 = vld [vmem:[%s7456_s15] ss:$0 sm:$0xff] }
0x1956   :  { %4425 = vtanh.f32 %v3564_v26 }
0x195c   :  { %v4426_v7 = vpop.eup %4425 }
0x195d   :  { %4148 = vmatmul.msk.f32.vlgmr.msra.gmra.mxu0 %vm2065_vm4, %v4426_v7 }
0x195e   :  { %3842 = vmatpush.msra.mxu0 %v6860_v62  ;;  %v4213_v62 = vld [vmem:[%s7451_s9] ss:$0 sm:$0xff] }
0x1960   :  { %3843 = vmatpush.msra.mxu0 %v6865_v22 }
0x1962   :  { %3844 = vmatpush.msra.mxu0 %v6871_v5 }
0x1964   :  { %3845 = vmatpush.msra.mxu0 %v6877_v57 }
0x19da   :  { %v3595_v38 = vpop.f32.mrf.mxu0 }
0x19db   :  { %v3596_v59 = vadd.f32 %v4212_v3, %v3595_v38  ;;  %v4164_v3 = vld [vmem:[%s7462_s1 + $0xe] sm:$0x3] }
0x19dd   :  { %4427 = vtanh.f32 %v3596_v59 }
0x19e3   :  { %v4428_v30 = vpop.eup %4427 }
0x19e4   :  { %4149 = vmatmul.msk.f32.vlgmr.msrb.gmra.mxu1 %vm2102_vm14, %v4428_v30 }
0x19e5   :  { %3874 = vmatpush.msrb.mxu1 %v6884_v9  ;;  %v3635_v9 = vld [vmem:[#allocation2 + $0xc] sm:$0x3] }
0x19e7   :  { %3875 = vmatpush.msrb.mxu1 %v6889_v13 }
0x19e9   :  { %3876 = vmatpush.msrb.mxu1 %v6895_v14 }
0x19eb   :  { %3877 = vmatpush.msrb.mxu1 %v6906_v10  ;;  %v4214_v10 = vld [vmem:[%s7453_s11] ss:$0 sm:$0xff] }
0x19ed   :  { %3878 = vmatpush.msrb.mxu1 %v6911_v28 }
0x19ef   :  { %3879 = vmatpush.msrb.mxu1 %v6917_v40 }
0x19f1   :  { %3880 = vmatpush.msrb.mxu1 %v6923_v19 }
0x19f3   :  { %3881 = vmatpush.msrb.mxu1 %v6929_v45  ;;  %v4215_v45 = vld [vmem:[%s7455_s13] ss:$0 sm:$0xff] }
0x1a61   :  { %v3631_v22 = vpop.f32.mrf.mxu1 }
0x1a62   :  { %v3632_v5 = vadd.f32 %v4213_v62, %v3631_v22 }
0x1a64   :  { %4429 = vtanh.f32 %v3632_v5 }
0x1a6a   :  { %v4430_v57 = vpop.eup %4429 }
0x1a6b   :  { %v3636_v13 = vadd.f32 %v4430_v57, %v3635_v9 }
0x1a6d   :  { %v3637_v14 = vmul.f32 0.5, %v3636_v13 }
0x1a6f   :  { %3674 = vmatmul.f32.vlgmr.msra.gmra.mxu3 %v3637_v14 }
0x1af2   :  { %v3675_v28 = vpop.f32.mrf.mxu3 }
0x1af3   :  { %v3676_v40 = vadd.f32 %v4214_v10, %v3675_v28 }
0x1af5   :  { %4431 = vtanh.f32 %v3676_v40 }
0x1afb   :  { %v4432_v19 = vpop.eup %4431 }
0x1afc   :  { %4150 = vmatmul.msk.f32.vlgmr.msrb.gmra.mxu0 %vm2102_vm14, %v4432_v19 }
0x1afd   :  { %3954 = vmatpush.msrb.mxu0 %v7035_v11 }
0x1aff   :  { %3955 = vmatpush.msrb.mxu0 %v7040_v12 }
0x1b01   :  { %3956 = vmatpush.msrb.mxu0 %v7047_v15  ;;  %v3790_v15 = vld [vmem:[%s7573_s2 + $0x8] sm:$0xff] }
0x1b02   :  { %3812 = vmatpush.msrb.mxu2 %v3790_v15 }
0x1b03   :  { %3957 = vmatpush.msrb.mxu0 %v7057_v61  ;;  %v3789_v61 = vld [vmem:[%s7573_s2] sm:$0xff] }
0x1b04   :  { %3813 = vmatpush.msrb.mxu2 %v3789_v61 }
0x1b05   :  { %3958 = vmatpush.msrb.mxu0 %v7062_v63  ;;  %v4216_v63 = vld [vmem:[%s7459_s17] ss:$0 sm:$0xff] }
0x1b07   :  { %3959 = vmatpush.msrb.mxu0 %v7068_v2 }
0x1b09   :  { %3960 = vmatpush.msrb.mxu0 %v7074_v8 }
0x1b0b   :  { %3961 = vmatpush.msrb.mxu0 %v7080_v24 }
0x1b79   :  { %v3711_v32 = vpop.f32.mrf.mxu0 }
0x1b7a   :  { %v3712_v11 = vadd.f32 %v4215_v45, %v3711_v32 }
0x1b7c   :  { %4433 = vtanh.f32 %v3712_v11 }
0x1b82   :  { %v4434_v12 = vpop.eup %4433 }
0x1b83   :  { %4151 = vmatmul.msk.f32.vlgmr.msra.gmra.mxu2 %vm2065_vm4, %v4434_v12  ;;  %4152 = vmatmul.msk.f32.vlgmr.msra.gmra.mxu1 %vm2065_vm4, %v4434_v12 }
0x1b84   :  { %4018 = vmatpush.msra.mxu1 %v7103_v41  ;;  %3910 = vmatpush.msra.mxu2 %v6935_v35  ;;  %v4217_v35 = vld [vmem:[%s7456_s15] ss:$0 sm:$0xff] }
0x1b86   :  { %4019 = vmatpush.msra.mxu1 %v7113_v21  ;;  %3911 = vmatpush.msra.mxu2 %v6940_v16 }
0x1b88   :  { %4020 = vmatpush.msra.mxu1 %v7125_v53  ;;  %3912 = vmatpush.msra.mxu2 %v6947_v17 }
0x1b8a   :  { %4021 = vmatpush.msra.mxu1 %v7138_v60  ;;  %3913 = vmatpush.msra.mxu2 %v6953_v6 }
0x1b8c   :  { %3914 = vmatpush.msra.mxu2 %v6959_v0  ;;  %v4153_v0 = vld [vmem:[%s7462_s1 + $0xc] sm:$0x3] }
0x1b8e   :  { %3915 = vmatpush.msra.mxu2 %v6965_v58 }
0x1b90   :  { %3916 = vmatpush.msra.mxu2 %v6971_v34 }
0x1b92   :  { %3917 = vmatpush.msra.mxu2 %v6977_v37 }
0x1b94   :  { %3918 = vmatpush.msra.mxu2 %v6983_v46  ;;  %v4218_v46 = vld [vmem:[%s7575_s26] ss:$0 sm:$0xff] }
0x1b96   :  { %3919 = vmatpush.msra.mxu2 %v6994_v47 }
0x1b98   :  { %3920 = vmatpush.msra.mxu2 %v6999_v51 }
0x1b9a   :  { %3921 = vmatpush.msra.mxu2 %v7005_v52 }
0x1b9c   :  { %3922 = vmatpush.msra.mxu2 %v7011_v42  ;;  %v4219_v42 = vld [vmem:[%s7448_s7] ss:$0 sm:$0xff] }
0x1b9e   :  { %3923 = vmatpush.msra.mxu2 %v7017_v25 }
0x1ba0   :  { %3924 = vmatpush.msra.mxu2 %v7023_v1 }
0x1ba2   :  { %3925 = vmatpush.msra.mxu2 %v7029_v39  ;;  %v4220_v39 = vld [vmem:[%s7451_s9] ss:$0 sm:$0xff] }
0x1c00   :  { %v3771_v2 = vpop.f32.mrf.mxu1 }
0x1c01   :  { %v3772_v8 = vadd.f32 %v4216_v63, %v3771_v2 }
0x1c03   :  { %v3776_v24 = vmul.f32 0.5, %v3772_v8  ;;  %4155 = vst.msk [vmem:[%s7461_s21 + $0xc] sm:$0x3] %vm2024_vm0, %v3772_v8 }
0x1c05   :  { %v3777_v16 = vmul.f32 1.442695, %v3776_v24 }
0x1c06   :  { %v3743_v17 = vpop.f32.mrf.mxu2 }
0x1c07   :  { %4435 = vpow2.f32 %v3777_v16  ;;  %v3744_v6 = vadd.f32 %v4217_v35, %v3743_v17 }
0x1c09   :  { %4154 = vst.msk [vmem:[%s7460_s20 + $0xc] sm:$0x3] %vm2024_vm0, %v3744_v6 }
0x1c0d   :  { %v4436_v58 = vpop.eup %4435 }
0x1c0e   :  { %v3779_v34 = vmul.f32 %v4436_v58, %v4153_v0 }
0x1c10   :  { %v3780_v37 = vadd.f32 %v3779_v34, %v3744_v6 }
0x1c12   :  { %4156 = vst.msk [vmem:[%s7463_s18 + $0xc] sm:$0x3] %vm2024_vm0, %v3780_v37  ;;  %4158 = vmatmul.msk.f32.vlgmr.msrb.gmra.mxu2 %vm2032_vm15, %v3780_v37 }
0x1c13   :  { %4157 = vst.msk [vmem:[%s7514_s22 + $0xe] sm:$0x3] %vm2024_vm0, %v3780_v37 }
0x1c95   :  { %v3815_v47 = vpop.f32.mrf.mxu2 }
0x1c96   :  { %v3816_v51 = vadd.f32 %v4218_v46, %v3815_v47 }
0x1c98   :  { %4437 = vtanh.f32 %v3816_v51 }
0x1c9e   :  { %v4438_v52 = vpop.eup %4437 }
0x1c9f   :  { %4159 = vmatmul.msk.f32.vlgmr.msra.gmra.mxu0 %vm2065_vm4, %v4438_v52 }
0x1d1c   :  { %v3847_v25 = vpop.f32.mrf.mxu0 }
0x1d1d   :  { %v3848_v1 = vadd.f32 %v4219_v42, %v3847_v25 }
0x1d1f   :  { %4439 = vtanh.f32 %v3848_v1 }
0x1d25   :  { %v4440_v41 = vpop.eup %4439 }
0x1d26   :  { %4160 = vmatmul.msk.f32.vlgmr.msrb.gmra.mxu1 %vm2102_vm14, %v4440_v41 }
0x1da3   :  { %v3883_v21 = vpop.f32.mrf.mxu1 }
0x1da4   :  { %v3884_v53 = vadd.f32 %v4220_v39, %v3883_v21 }
0x1da6   :  { %4441 = vtanh.f32 %v3884_v53 }
0x1dac   :  { %v4442_v60 = vpop.eup %4441 }
0x1dad   :  { %v3888_v55 = vadd.f32 %v4442_v60, %v3887_v54 }
0x1daf   :  { %v3889_v31 = vmul.f32 0.5, %v3888_v55 }
0x1db1   :  { %3926 = vmatmul.f32.vlgmr.msra.gmra.mxu2 %v3889_v31 }
0x1e34   :  { %v3927_v33 = vpop.f32.mrf.mxu2 }
0x1e35   :  { %v3928_v43 = vadd.f32 %v4221_v23, %v3927_v33 }
0x1e37   :  { %4443 = vtanh.f32 %v3928_v43 }
0x1e3d   :  { %v4444_v20 = vpop.eup %4443 }
0x1e3e   :  { %4161 = vmatmul.msk.f32.vlgmr.msrb.gmra.mxu0 %vm2102_vm14, %v4444_v20 }
0x1ebb   :  { %v3963_v49 = vpop.f32.mrf.mxu0 }
0x1ebc   :  { %v3964_v48 = vadd.f32 %v4222_v44, %v3963_v49 }
0x1ebe   :  { %4445 = vtanh.f32 %v3964_v48 }
0x1ec4   :  { %v4446_v50 = vpop.eup %4445 }
0x1ec5   :  { %4162 = vmatmul.msk.f32.vlgmr.msrb.gmra.mxu3 %vm2065_vm4, %v4446_v50  ;;  %4163 = vmatmul.msk.f32.vlgmr.msra.gmra.mxu1 %vm2065_vm4, %v4446_v50 }
0x1f42   :  { %v4023_v18 = vpop.f32.mrf.mxu1 }
0x1f43   :  { %v4024_v29 = vadd.f32 %v4223_v56, %v4023_v18 }
0x1f45   :  { %v4028_v36 = vmul.f32 0.5, %v4024_v29  ;;  %4166 = vst.msk [vmem:[%s7461_s21 + $0xe] sm:$0x3] %vm2024_vm0, %v4024_v29 }
0x1f47   :  { %v4029_v27 = vmul.f32 1.442695, %v4028_v36 }
0x1f48   :  { %v3995_v26 = vpop.f32.mrf.mxu3 }
0x1f49   :  { %4447 = vpow2.f32 %v4029_v27  ;;  %v3996_v7 = vadd.f32 %v4224_v4, %v3995_v26 }
0x1f4b   :  { %4165 = vst.msk [vmem:[%s7460_s20 + $0xe] sm:$0x3] %vm2024_vm0, %v3996_v7 }
0x1f4f   :  { %v4448_v38 = vpop.eup %4447 }
0x1f50   :  { %v4031_v59 = vmul.f32 %v4448_v38, %v4164_v3 }
0x1f52   :  { %v4032_v30 = vadd.f32 %v4031_v59, %v3996_v7 }
0x1f54   :  { %4167 = vst.msk [vmem:[%s7463_s18 + $0xe] sm:$0x3] %vm2024_vm0, %v4032_v30 }

</bundles_post_ra>
